<compile_context>
chip_gen: v6e
topology: v6e:2x2x1
jax: 0.10.0
libtpu: 0.0.40
codegen_flags: <defaults>
</compile_context>

<pallas_src>
import functools

import jax
import jax.numpy as jnp
from jax.experimental import pallas as pl
from jax.experimental.pallas import tpu as pltpu


# --------------------------------------------------------------------------
# Interpolation weight matrices (match PyTorch F.interpolate semantics).
# --------------------------------------------------------------------------
def _nearest_matrix(n_in, n_out):
    # PyTorch 'nearest': src = min(floor(dst * n_in / n_out), n_in - 1)
    scale = n_in / n_out
    idx = jnp.floor(jnp.arange(n_out, dtype=jnp.float32) * scale).astype(jnp.int32)
    idx = jnp.minimum(idx, n_in - 1)
    return jax.nn.one_hot(idx, n_in, dtype=jnp.float32)          # (n_out, n_in)


def _bilinear_matrix(n_in, n_out):
    # PyTorch 'bilinear', align_corners=False:
    #   src = max(0, (dst + 0.5) * n_in / n_out - 0.5)
    scale = n_in / n_out
    s = jnp.maximum((jnp.arange(n_out, dtype=jnp.float32) + 0.5) * scale - 0.5, 0.0)
    i0 = jnp.minimum(jnp.floor(s).astype(jnp.int32), n_in - 1)
    i1 = jnp.minimum(i0 + 1, n_in - 1)
    w1 = s - i0.astype(jnp.float32)
    w0 = 1.0 - w1
    m = (jax.nn.one_hot(i0, n_in, dtype=jnp.float32) * w0[:, None]
         + jax.nn.one_hot(i1, n_in, dtype=jnp.float32) * w1[:, None])
    return m                                                      # (n_out, n_in)


def _interp_matrix(n_in, n_out, mode):
    if mode == "nearest":
        return _nearest_matrix(n_in, n_out)
    if mode in ("bilinear", "linear"):
        return _bilinear_matrix(n_in, n_out)
    # TODO(synk): modes other than 'nearest'/'bilinear' (e.g. 'bicubic', 'area')
    # are not implemented.
    raise NotImplementedError(f"mode={mode!r}")


# --------------------------------------------------------------------------
# Pallas kernel: one lane-dense matmul per tile of images.
# --------------------------------------------------------------------------
def _interpolate_kernel(x_ref, k_ref, o_ref):
    x = x_ref[...].astype(jnp.float32)        # (TN, Hi*Wi)
    k = k_ref[...]                            # (Hi*Wi, Ho*Wo)
    o_ref[...] = jnp.dot(
        x, k,
        preferred_element_type=jnp.float32,
        precision=jax.lax.Precision.HIGHEST,
    ).astype(o_ref.dtype)


def interpolate(x, *, size, mode):
    """Pallas implementation of F.interpolate(x, size=size, mode=mode) for NCHW x."""
    B, C, Hi, Wi = x.shape
    if isinstance(size, int):
        size = (size, size)
    Ho, Wo = size

    # Separable interpolation matrices; combined into one Kronecker matrix so
    # the kernel body is a single MXU matmul.
    wh = _interp_matrix(Hi, Ho, mode)                  # (Ho, Hi)
    ww = _interp_matrix(Wi, Wo, mode)                  # (Wo, Wi)
    k = jnp.kron(wh.T, ww.T)                           # (Hi*Wi, Ho*Wo)

    N = B * C
    Fi = Hi * Wi
    Fo = Ho * Wo
    x2 = x.reshape(N, Fi)

    # Tile the image axis: keep double-buffered (in + out) blocks ~< 4 MiB so
    # the pipeline fits v7x's smaller VMEM; sublane-aligned (multiple of 8).
    if N <= 8:
        tn = N
    else:
        bytes_per_row = 4 * (Fi + Fo)
        cap = max(8, (4 * 1024 * 1024) // (2 * bytes_per_row))
        tn = min(N, 512, cap)
        tn = max(8, (tn // 8) * 8)
    grid = (pl.cdiv(N, tn),)

    out2 = pl.pallas_call(
        _interpolate_kernel,
        grid=grid,
        in_specs=[
            pl.BlockSpec((tn, Fi), lambda i: (i, 0)),
            pl.BlockSpec((Fi, Fo), lambda i: (0, 0)),
        ],
        out_specs=pl.BlockSpec((tn, Fo), lambda i: (i, 0)),
        out_shape=jax.ShapeDtypeStruct((N, Fo), x.dtype),
        compiler_params=pltpu.CompilerParams(
            dimension_semantics=("parallel",)),
    )(x2, k)

    return out2.reshape(B, C, Ho, Wo)


# --------------------------------------------------------------------------
# Pure-JAX reference (gather/lerp path, independent of the matmul kernel).
# --------------------------------------------------------------------------
def _ref_interpolate(x, size, mode):
    B, C, Hi, Wi = x.shape
    if isinstance(size, int):
        size = (size, size)
    Ho, Wo = size

    if mode == "nearest":
        hs = jnp.minimum(
            jnp.floor(jnp.arange(Ho) * (Hi / Ho)).astype(jnp.int32), Hi - 1)
        ws = jnp.minimum(
            jnp.floor(jnp.arange(Wo) * (Wi / Wo)).astype(jnp.int32), Wi - 1)
        return x[:, :, hs, :][:, :, :, ws]

    # bilinear, align_corners=False
    def coords(n_in, n_out):
        s = jnp.maximum(
            (jnp.arange(n_out, dtype=jnp.float32) + 0.5) * (n_in / n_out) - 0.5, 0.0)
        i0 = jnp.minimum(jnp.floor(s).astype(jnp.int32), n_in - 1)
        i1 = jnp.minimum(i0 + 1, n_in - 1)
        lam = s - i0.astype(jnp.float32)
        return i0, i1, lam

    h0, h1, lh = coords(Hi, Ho)
    w0, w1, lw = coords(Wi, Wo)
    lh = lh[None, None, :, None]
    lw = lw[None, None, None, :]

    x00 = x[:, :, h0, :][:, :, :, w0]
    x01 = x[:, :, h0, :][:, :, :, w1]
    x10 = x[:, :, h1, :][:, :, :, w0]
    x11 = x[:, :, h1, :][:, :, :, w1]

    top = x00 * (1.0 - lw) + x01 * lw
    bot = x10 * (1.0 - lw) + x11 * lw
    return top * (1.0 - lh) + bot * lh


if __name__ == "__main__":
    key = jax.random.PRNGKey(0)
    B, C, H, W = 2, 4, 16, 16
    x = jax.random.uniform(key, (B, C, H, W), jnp.float32)

    ok = True
    for size, mode in (((32, 32), "bilinear"), ((8, 8), "nearest")):
        y = interpolate(x, size=size, mode=mode)
        jax.block_until_ready(y)
        y_ref = _ref_interpolate(x, size, mode)
        ok &= bool(y.shape == y_ref.shape)
        ok &= bool(jnp.allclose(y, y_ref, rtol=1e-3, atol=1e-3))

    print("KERNEL_OK" if ok else "KERNEL_MISMATCH")
</pallas_src>

<mosaic_0001>
module attributes {stable_mosaic.version = 11 : i64} {
  func.func @_interpolate_kernel(%arg0: i32, %arg1: memref<8x256xf32, #tpu.memory_space<vmem>>, %arg2: memref<256x1024xf32, #tpu.memory_space<vmem>>, %arg3: memref<8x1024xf32, #tpu.memory_space<vmem>>) attributes {dimension_semantics = [#tpu.dimension_semantics<parallel>], iteration_bounds = array<i64: 1>, scalar_prefetch = 0 : i64, scratch_operands = 0 : i64, tpu.core_type = #tpu.core_type<tc>, window_params = [{transform_indices = @transform_0, window_bounds = array<i64: 8, 256>}, {pipeline_mode = #tpu.pipeline_mode<synchronous>, transform_indices = @transform_1, window_bounds = array<i64: 256, 1024>}, {transform_indices = @transform_2, window_bounds = array<i64: 8, 1024>}]} {
    %c0 = arith.constant 0 : index
    %c0_0 = arith.constant 0 : index
    %0 = vector.load %arg1[%c0, %c0_0] : memref<8x256xf32, #tpu.memory_space<vmem>>, vector<8x256xf32>
    %c0_1 = arith.constant 0 : index
    %c0_2 = arith.constant 0 : index
    %1 = vector.load %arg2[%c0_1, %c0_2] : memref<256x1024xf32, #tpu.memory_space<vmem>>, vector<256x1024xf32>
    %cst = arith.constant dense<0.000000e+00> : vector<8x1024xf32>
    %2 = tpu.matmul %0, %1, %cst {dimension_numbers = #tpu.dot_dimension_numbers<[1], [0], [0], [1], [0, 0, 1, 1], [], []>, precision = #tpu.contract_precision<fp32>} : vector<8x256xf32>, vector<256x1024xf32>, vector<8x1024xf32> -> vector<8x1024xf32>
    %c0_3 = arith.constant 0 : index
    %c0_4 = arith.constant 0 : index
    %3 = vector.load %arg3[%c0_3, %c0_4] : memref<8x1024xf32, #tpu.memory_space<vmem>>, vector<8x1024xf32>
    tpu.vector_store %arg3[%c0_3, %c0_4], %2 {strides = array<i32>} : memref<8x1024xf32, #tpu.memory_space<vmem>>, vector<8x1024xf32>,
    return
  }
  func.func @transform_0(%arg0: i32) -> (i32, i32) {
    %c0_i32 = arith.constant 0 : i32
    %c0_i32_0 = arith.constant 0 : i32
    return %arg0, %c0_i32 : i32, i32
  }
  func.func @transform_1(%arg0: i32) -> (i32, i32) {
    %c0_i32 = arith.constant 0 : i32
    %c0_i32_0 = arith.constant 0 : i32
    %c0_i32_1 = arith.constant 0 : i32
    return %c0_i32, %c0_i32_0 : i32, i32
  }
  func.func @transform_2(%arg0: i32) -> (i32, i32) {
    %c0_i32 = arith.constant 0 : i32
    %c0_i32_0 = arith.constant 0 : i32
    return %arg0, %c0_i32 : i32, i32
  }
}

</mosaic_0001>

<bundles_post_ra>
// kernel: tpu_custom_call.1
= control target key start
LH: loop header
LB: loop body
LE: loop exit
PB: predicated region body
PF: predicated region fallthrough
CT: control target
= control target key end

     0   :  { %7 = vsyncpa [#allocation3], 0  ;;  %s10320_s0 = inlined_call_operand.hbm [shape: f32[8,256], index: 0, kind: input, shape index: {}]   ;;  %s10321_s1 = inlined_call_operand.hbm [shape: f32[256,1024], index: 1, kind: input, shape index: {}]   ;;  %s10322_s2 = inlined_call_operand.hbm [shape: f32[8,1024], index: 2, kind: output, shape index: {}]  }
   0x1   :  { %8 = vsyncpa [#allocation6], 0 }
   0x2   :  { %9 = vsyncpa [#allocation4], 0  ;;  %s5527_s9 = smov [#allocation2]   ;;  %s5528_s11 = smov [#allocation5]  }
   0x3   :  { %s16_s10 = sshll.u32 %s5527_s9, 4  ;;  %s25_s12 = sshll.u32 %s5528_s11, 4  ;;  %s17_s10 = int_to_ptr.vmem [resolvable:$true] %s16_s10  ;;  %s26_s12 = int_to_ptr.vmem [resolvable:$true] %s25_s12 }
   0x4   :  { %s5469_s13 = scalar_lea.vmem %s17_s10, 256  ;;  %p5474_p1 = scmp.lt.s32.totalorder %s17_s10, %s17_s10 }
   0x5   :  { %p5470_p0 = scmp.ne.s32.totalorder %s17_s10, %s5469_s13  ;;  %p5475_p2 = scmp.lt.s32.totalorder %s5469_s13, %s5469_s13 }
   0x7   :  { %p5476_p3 = por %p5475_p2, %p5474_p1 }
   0x9   :  { %p5477_p4 = pnand %p5476_p3, %p5470_p0 }
   0xb   :  { %5480 = shalt.err (!%p5477_p4)
}
   0xc   :  { %19 = dma.hbm_to_vmem [thread:$0]  %s10320_s0, 256, %s17_s10, [#allocation3]  }
   0xd   :  { %s5489_s16 = scalar_lea.vmem %s26_s12, 32768  ;;  %p5494_p6 = scmp.lt.s32.totalorder %s26_s12, %s26_s12 }
   0xe   :  { %p5490_p5 = scmp.ne.s32.totalorder %s26_s12, %s5489_s16  ;;  %p5495_p7 = scmp.lt.s32.totalorder %s5489_s16, %s5489_s16 }
  0x10   :  { %p5496_p8 = por %p5495_p7, %p5494_p6 }
  0x12   :  { %p5497_p9 = pnand %p5496_p8, %p5490_p5 }
  0x14   :  { %5500 = shalt.err (!%p5497_p9)
}
  0x15   :  { %s5529_s17 = smov 1024   ;;  %s5530_s18 = smov 64  }
  0x16   :  { %31 = dma.hbm_to_vmem [thread:$0]  %s10321_s1, 32768, %s26_s12, [#allocation6], %s5529_s17, %s5529_s17, %s5530_s18  }
  0x17   :  { %5521 = dma.done.wait [#allocation3], 256  }
  0x18   :  { %5522 = vsyncadd [#allocation3], 4294967040 }
  0x19   :  { %5523 = dma.done.wait [#allocation6], 32768  }
  0x1a   :  { %5524 = vsyncadd [#allocation6], 4294934528  ;;  %v161_v0 = vld [vmem:[#allocation5 + $0x3c8] sm:$0xff]  ;;  %v160_v1 = vld [vmem:[#allocation5 + $0x3c0] sm:$0xff]  ;;  %s5531_s0 = smov [#allocation7]  }
  0x1b   :  { %v153_v2 = vld [vmem:[#allocation5 + $0x388] sm:$0xff]  ;;  %v5553_v3 = vand.u32 4294901760, %v161_v0  ;;  %v5555_v4 = vand.u32 4294901760, %v160_v1  ;;  %v152_v6 = vld [vmem:[#allocation5 + $0x380] sm:$0xff]  ;;  %s5446_s1 = sshll.u32 %s5531_s0, 4  ;;  %s5447_s1 = int_to_ptr.vmem [resolvable:$true] %s5446_s1 }
  0x1c   :  { %v5557_v5 = vand.u32 4294901760, %v153_v2  ;;  %v145_v7 = vld [vmem:[#allocation5 + $0x348] sm:$0xff]  ;;  %v144_v8 = vld [vmem:[#allocation5 + $0x340] sm:$0xff]  ;;  %v5559_v9 = vand.u32 4294901760, %v152_v6  ;;  %s5501_s21 = scalar_lea.vmem %s5447_s1, 1024  ;;  %p5506_p11 = scmp.lt.s32.totalorder %s5447_s1, %s5447_s1 }
  0x1d   :  { %v5561_v10 = vand.u32 4294901760, %v145_v7  ;;  %v5563_v11 = vand.u32 4294901760, %v144_v8  ;;  %v137_v12 = vld [vmem:[#allocation5 + $0x308] sm:$0xff]  ;;  %v136_v13 = vld [vmem:[#allocation5 + $0x300] sm:$0xff]  ;;  %297 = vmatprep.subr.mxu0 %v5553_v3  ;;  %v5573_v18 = vsub.f32 %v161_v0, %v5553_v3  ;;  %v5586_v23 = vsub.f32 %v160_v1, %v5555_v4  ;;  %p5502_p10 = scmp.ne.s32.totalorder %s5447_s1, %s5501_s21  ;;  %p5507_p12 = scmp.lt.s32.totalorder %s5501_s21, %s5501_s21 }
  0x1e   :  { %v129_v14 = vld [vmem:[#allocation5 + $0x2c8] sm:$0xff]  ;;  %v5566_v15 = vand.u32 4294901760, %v137_v12  ;;  %v5568_v16 = vand.u32 4294901760, %v136_v13  ;;  %v5575_v19 = vld [vmem:[#allocation5 + $0x2c0] sm:$0xff]  ;;  %299 = vmatpush1.msra.mxu0 %v5555_v4  ;;  %v5592_v25 = vsub.f32 %v153_v2, %v5557_v5  ;;  %v5606_v31 = vsub.f32 %v152_v6, %v5559_v9 }
  0x1f   :  { %v5570_v17 = vand.u32 4294901760, %v129_v14  ;;  %v5577_v20 = vld [vmem:[#allocation5 + $0x288] sm:$0xff]  ;;  %v5579_v21 = vld [vmem:[#allocation5 + $0x280] sm:$0xff]  ;;  %v5583_v22 = vand.u32 4294901760, %v5575_v19  ;;  %301 = vmatprep.subr.mxu0 %v5557_v5  ;;  %v10336_v29 = vand.u32 4294901760, %v5573_v18  ;;  %v10334_v33 = vand.u32 4294901760, %v5586_v23  ;;  %p5508_p13 = por %p5507_p12, %p5506_p11 }
  0x20   :  { %v5589_v24 = vand.u32 4294901760, %v5577_v20  ;;  %v5594_v26 = vld [vmem:[#allocation5 + $0x248] sm:$0xff]  ;;  %v5596_v27 = vld [vmem:[#allocation5 + $0x240] sm:$0xff]  ;;  %v5603_v30 = vand.u32 4294901760, %v5579_v21  ;;  %303 = vmatpush1.msra.mxu0 %v5559_v9  ;;  %v10333_v34 = vand.u32 4294901760, %v5592_v25  ;;  %v5615_v35 = vsub.f32 %v145_v7, %v5561_v10 }
  0x21   :  { %v5598_v28 = vld [vmem:[#allocation5 + $0x208] sm:$0xff]  ;;  %v5609_v32 = vand.u32 4294901760, %v5594_v26  ;;  %v5618_v36 = vand.u32 4294901760, %v5596_v27  ;;  %v5620_v37 = vld [vmem:[#allocation5 + $0x200] sm:$0xff]  ;;  %305 = vmatprep.subr.mxu0 %v5561_v10  ;;  %v444_v38 = vsub.f32 %v5573_v18, %v10336_v29  ;;  %v10331_v39 = vand.u32 4294901760, %v5606_v31  ;;  %p5509_p0 = pnand %p5508_p13, %p5502_p10 }
  0x22   :  { %11150 = vst [vmem:[#allocation11_spill] sm:$0xff] %v5589_v24  ;;  %11151 = vst [vmem:[#allocation12_spill] sm:$0xff] %v5603_v30  ;;  %v5628_v40 = vsub.f32 %v144_v8, %v5563_v11  ;;  %v5631_v41 = vand.u32 4294901760, %v5598_v28  ;;  %307 = vmatpush1.msra.mxu0 %v5563_v11  ;;  %v450_v42 = vsub.f32 %v5586_v23, %v10334_v33  ;;  %v10329_v44 = vand.u32 4294901760, %v5615_v35  ;;  %v5644_v46 = vld [vmem:[#allocation5 + $0x1c8] sm:$0xff]  ;;  %v5654_v51 = vld [vmem:[#allocation5 + $0x1c0] sm:$0xff] }
  0x23   :  { %11152 = vst [vmem:[#allocation13_spill] sm:$0xff] %v5609_v32  ;;  %11153 = vst [vmem:[#allocation14_spill] sm:$0xff] %v5618_v36  ;;  %v456_v43 = vsub.f32 %v5592_v25, %v10333_v34  ;;  %v5642_v45 = vsub.f32 %v137_v12, %v5566_v15  ;;  %309 = vmatprep.subr.mxu0 %v5566_v15  ;;  %v445_v47 = vand.u32 4294901760, %v444_v38  ;;  %v5652_v50 = vand.u32 4294901760, %v5620_v37  ;;  %v5661_v56 = vld [vmem:[#allocation5 + $0x188] sm:$0xff]  ;;  %v5673_v61 = vld [vmem:[#allocation5 + $0x180] sm:$0xff] }
  0x24   :  { %11154 = vst [vmem:[#allocation15_spill] sm:$0xff] %v5631_v41  ;;  %v462_v48 = vsub.f32 %v5606_v31, %v10331_v39  ;;  %v10328_v49 = vand.u32 4294901760, %v5628_v40  ;;  %311 = vmatpush1.msra.mxu0 %v5568_v16  ;;  %v451_v52 = vand.u32 4294901760, %v450_v42  ;;  %v468_v54 = vsub.f32 %v5615_v35, %v10329_v44  ;;  %v5685_v2 = vld [vmem:[#allocation5 + $0x148] sm:$0xff]  ;;  %v5786_v34 = vld [vmem:[#allocation5 + $0x80] sm:$0xff] }
  0x25   :  { %11155 = vst [vmem:[#allocation16_spill] sm:$0xff] %v5652_v50  ;;  %v457_v53 = vand.u32 4294901760, %v456_v43  ;;  %v10326_v55 = vand.u32 4294901760, %v5642_v45  ;;  %313 = vmatprep.subr.mxu0 %v5570_v17  ;;  %446 = vmatprep.subr.mxu1 %v445_v47  ;;  %v5668_v59 = vsub.f32 %v136_v13, %v5568_v16  ;;  %v5671_v60 = vand.u32 4294901760, %v5644_v46  ;;  %v5696_v13 = vld [vmem:[#allocation5 + $0x140] sm:$0xff]  ;;  %v5776_v39 = vld [vmem:[#allocation5 + $0x88] sm:$0xff] }
  0x26   :  { %v463_v57 = vand.u32 4294901760, %v462_v48  ;;  %v474_v58 = vsub.f32 %v5628_v40, %v10328_v49  ;;  %315 = vmatpush1.msra.mxu0 %v5583_v22  ;;  %452 = vmatpush1.msra.mxu1 %v451_v52  ;;  %v469_v62 = vand.u32 4294901760, %v468_v54  ;;  %v5680_v0 = vsub.f32 %v129_v14, %v5570_v17  ;;  %v5763_v49 = vld [vmem:[#allocation5 + $0xc0] sm:$0xff] }
  0x27   :  { %11156 = vst [vmem:[#allocation17_spill] sm:$0xff] %v5671_v60  ;;  %v480_v63 = vsub.f32 %v5642_v45, %v10326_v55  ;;  %v5683_v1 = vand.u32 4294901760, %v5654_v51  ;;  %317 = vmatprep.subr.mxu0 %v5589_v24  ;;  %458 = vmatprep.subr.mxu1 %v457_v53  ;;  %v10324_v7 = vand.u32 4294901760, %v5668_v59  ;;  %v5691_v8 = vsub.f32 %v5575_v19, %v5583_v22 }
  0x28   :  { %v475_v6 = vand.u32 4294901760, %v474_v58  ;;  %v5694_v12 = vand.u32 4294901760, %v5661_v56  ;;  %319 = vmatpush1.msra.mxu0 %v5603_v30  ;;  %464 = vmatpush1.msra.mxu1 %v463_v57  ;;  %v10323_v38 = vand.u32 4294901760, %v5680_v0  ;;  %v5702_v42 = vsub.f32 %v5577_v20, %v5589_v24  ;;  %v5719_v20 = vld [vmem:[#allocation5 + $0x108] sm:$0xff] }
  0x29   :  { %11157 = vst [vmem:[#allocation18_spill] sm:$0xff] %v5683_v1  ;;  %v481_v14 = vand.u32 4294901760, %v480_v63  ;;  %v5705_v43 = vand.u32 4294901760, %v5673_v61  ;;  %321 = vmatprep.subr.mxu0 %v5609_v32  ;;  %470 = vmatprep.subr.mxu1 %v469_v62  ;;  %v486_v19 = vsub.f32 %v5668_v59, %v10324_v7  ;;  %v10325_v47 = vand.u32 4294901760, %v5691_v8 }
  0x2a   :  { %11158 = vst [vmem:[#allocation19_spill] sm:$0xff] %v5694_v12  ;;  %v5714_v48 = vsub.f32 %v5579_v21, %v5603_v30  ;;  %v5717_v52 = vand.u32 4294901760, %v5685_v2  ;;  %323 = vmatpush1.msra.mxu0 %v5618_v36  ;;  %476 = vmatpush1.msra.mxu1 %v475_v6  ;;  %v492_v53 = vsub.f32 %v5680_v0, %v10323_v38  ;;  %v10327_v54 = vand.u32 4294901760, %v5702_v42  ;;  %v5742_v38 = vld [vmem:[#allocation5 + $0x100] sm:$0xff] }
  0x2b   :  { %11159 = vst [vmem:[#allocation20_spill] sm:$0xff] %v5705_v43  ;;  %v5728_v57 = vsub.f32 %v5594_v26, %v5609_v32  ;;  %v5731_v21 = vand.u32 4294901760, %v5696_v13  ;;  %325 = vmatprep.subr.mxu0 %v5631_v41  ;;  %482 = vmatprep.subr.mxu1 %v481_v14  ;;  %v487_v58 = vand.u32 4294901760, %v486_v19  ;;  %v498_v62 = vsub.f32 %v5691_v8, %v10325_v47  ;;  %v5752_v47 = vld [vmem:[#allocation5 + $0xc8] sm:$0xff] }
  0x2c   :  { %11160 = vst [vmem:[#allocation21_spill] sm:$0xff] %v5717_v52  ;;  %v10330_v63 = vand.u32 4294901760, %v5714_v48  ;;  %v5740_v6 = vsub.f32 %v5596_v27, %v5618_v36  ;;  %327 = vmatpush1.msra.mxu0 %v5652_v50  ;;  %v493_v26 = vand.u32 4294901760, %v492_v53  ;;  %v504_v14 = vsub.f32 %v5702_v42, %v10327_v54  ;;  %v5866_v36 = vld [vmem:[#allocation5 + $0x7c8] sm:$0xff] }
  0x2d   :  { %11161 = vst [vmem:[#allocation22_spill] sm:$0xff] %v5731_v21  ;;  %v10332_v19 = vand.u32 4294901760, %v5728_v57  ;;  %v5750_v7 = vand.u32 4294901760, %v5719_v20  ;;  %488 = vmatpush1.msra.mxu1 %v487_v58  ;;  %329 = vmatprep.subr.mxu0 %v5671_v60  ;;  %v499_v27 = vand.u32 4294901760, %v498_v62  ;;  %v5761_v54 = vsub.f32 %v5598_v28, %v5631_v41 }
  0x2e   :  { %v510_v55 = vsub.f32 %v5714_v48, %v10330_v63  ;;  %v10335_v53 = vand.u32 4294901760, %v5740_v6  ;;  %494 = vmatprep.subr.mxu1 %v493_v26  ;;  %331 = vmatpush1.msra.mxu0 %v5683_v1  ;;  %v505_v44 = vand.u32 4294901760, %v504_v14  ;;  %v5770_v62 = vand.u32 4294901760, %v5742_v38 }
  0x2f   :  { %11162 = vst [vmem:[#allocation23_spill] sm:$0xff] %v5750_v7  ;;  %v516_v58 = vsub.f32 %v5728_v57, %v10332_v19  ;;  %v5774_v63 = vsub.f32 %v5620_v37, %v5652_v50  ;;  %500 = vmatpush1.msra.mxu1 %v499_v27  ;;  %333 = vmatprep.subr.mxu0 %v5694_v12  ;;  %v10339_v14 = vand.u32 4294901760, %v5761_v54  ;;  %v5784_v19 = vand.u32 4294901760, %v5752_v47 }
  0x30   :  { %11163 = vst [vmem:[#allocation24_spill] sm:$0xff] %v5770_v62  ;;  %v511_v28 = vand.u32 4294901760, %v510_v55  ;;  %v522_v26 = vsub.f32 %v5740_v6, %v10335_v53  ;;  %506 = vmatprep.subr.mxu1 %v505_v44  ;;  %335 = vmatpush1.msra.mxu0 %v5705_v43  ;;  %v5792_v55 = vsub.f32 %v5644_v46, %v5671_v60  ;;  %v5795_v33 = vand.u32 4294901760, %v5763_v49  ;;  %v5797_v53 = vld [vmem:[#allocation5 + $0x48] sm:$0xff] }
  0x31   :  { %11164 = vst [vmem:[#allocation25_spill] sm:$0xff] %v5784_v19  ;;  %v517_v37 = vand.u32 4294901760, %v516_v58  ;;  %v10342_v27 = vand.u32 4294901760, %v5774_v63  ;;  %337 = vmatprep.subr.mxu0 %v5717_v52  ;;  %v528_v44 = vsub.f32 %v5761_v54, %v10339_v14  ;;  %v5805_v58 = vsub.f32 %v5654_v51, %v5683_v1  ;;  %v5822_v51 = vld [vmem:[#allocation5 + $0x40] sm:$0xff] }
  0x32   :  { %11165 = vst [vmem:[#allocation26_spill] sm:$0xff] %v5795_v33  ;;  %512 = vmatpush1.msra.mxu1 %v511_v28  ;;  %v523_v29 = vand.u32 4294901760, %v522_v26  ;;  %v5808_v46 = vand.u32 4294901760, %v5776_v39  ;;  %339 = vmatpush1.msra.mxu0 %v5731_v21  ;;  %v5817_v60 = vsub.f32 %v5661_v56, %v5694_v12  ;;  %v5820_v14 = vand.u32 4294901760, %v5786_v34  ;;  %v5833_v56 = vld [vmem:[#allocation5 + $0x8] sm:$0xff] }
  0x33   :  { %518 = vmatprep.subr.mxu1 %v517_v37  ;;  %v534_v28 = vsub.f32 %v5774_v63, %v10342_v27  ;;  %341 = vmatprep.subr.mxu0 %v5750_v7  ;;  %v529_v37 = vand.u32 4294901760, %v528_v44  ;;  %v5828_v27 = vsub.f32 %v5673_v61, %v5705_v43  ;;  %v5831_v26 = vand.u32 4294901760, %v5797_v53  ;;  %v5856_v44 = vld [vmem:[#allocation5] sm:$0xff] }
  0x34   :  { %11166 = vst [vmem:[#allocation27_spill] sm:$0xff] %v5808_v46  ;;  %11167 = vst [vmem:[#allocation28_spill] sm:$0xff] %v5820_v14  ;;  %524 = vmatpush1.msra.mxu1 %v523_v29  ;;  %343 = vmatpush1.msra.mxu0 %v5770_v62  ;;  %v11170_v50 = vand.u32 4294901760, %v5792_v55  ;;  %v5842_v1 = vsub.f32 %v5685_v2, %v5717_v52  ;;  %v11172_v61 = vand.u32 4294901760, %v5805_v58  ;;  %v5864_v41 = vand.u32 4294901760, %v5833_v56 }
  0x35   :  { %11168 = vst [vmem:[#allocation29_spill] sm:$0xff] %v5828_v27  ;;  %11169 = vst [vmem:[#allocation30_spill] sm:$0xff] %v5831_v26  ;;  %v535_v12 = vand.u32 4294901760, %v534_v28  ;;  %530 = vmatprep.subr.mxu1 %v529_v37  ;;  %345 = vmatprep.subr.mxu0 %v5784_v19  ;;  %v5850_v28 = vand.u32 4294901760, %v5822_v51  ;;  %v11175_v37 = vand.u32 4294901760, %v5817_v60  ;;  %v5884_v24 = vand.u32 4294901760, %v5856_v44 }
  0x36   :  { %v540_v29 = vsub.f32 %v5792_v55, %v11170_v50  ;;  %11171 = vst [vmem:[#allocation31_spill] sm:$0xff] %v5842_v1  ;;  %v546_v43 = vsub.f32 %v5805_v58, %v11172_v61  ;;  %v5854_v50 = vsub.f32 %v5696_v13, %v5731_v21  ;;  %347 = vmatpush1.msra.mxu0 %v5795_v33  ;;  %11176 = vst [vmem:[#allocation34_spill] sm:$0xff] %v5864_v41 }
  0x37   :  { %11173 = vst [vmem:[#allocation32_spill] sm:$0xff] %v5850_v28  ;;  %536 = vmatpush1.msra.mxu1 %v535_v12  ;;  %v552_v52 = vsub.f32 %v5817_v60, %v11175_v37  ;;  %349 = vmatprep.subr.mxu0 %v5808_v46  ;;  %v11177_v13 = vand.u32 4294901760, %v5828_v27  ;;  %v5875_v21 = vsub.f32 %v5719_v20, %v5750_v7  ;;  %v5877_v37 = vld [vmem:[#allocation5 + $0x7c0] sm:$0xff]  ;;  %11180 = vst [vmem:[#allocation36_spill] sm:$0xff] %v5884_v24 }
  0x38   :  { %11174 = vst [vmem:[#allocation33_spill] sm:$0xff] %v5854_v50  ;;  %v541_v2 = vand.u32 4294901760, %v540_v29  ;;  %v547_v32 = vand.u32 4294901760, %v546_v43  ;;  %351 = vmatpush1.msra.mxu0 %v5820_v14  ;;  %v11179_v43 = vand.u32 4294901760, %v5842_v1  ;;  %v5890_v29 = vld [vmem:[#allocation5 + $0x788] sm:$0xff] }
  0x39   :  { %v558_v12 = vsub.f32 %v5828_v27, %v11177_v13  ;;  %11178 = vst [vmem:[#allocation35_spill] sm:$0xff] %v5875_v21  ;;  %v553_v61 = vand.u32 4294901760, %v552_v52  ;;  %v5888_v13 = vsub.f32 %v5742_v38, %v5770_v62  ;;  %353 = vmatprep.subr.mxu0 %v5831_v26  ;;  %v11182_v52 = vand.u32 4294901760, %v5854_v50 }
  0x3a   :  { %542 = vmatprep.subr.mxu1 %v541_v2  ;;  %v564_v30 = vsub.f32 %v5842_v1, %v11179_v43  ;;  %v5898_v43 = vand.u32 4294901760, %v5866_v36  ;;  %v5900_v1 = vld [vmem:[#allocation5 + $0x780] sm:$0xff]  ;;  %355 = vmatpush1.msra.mxu0 %v5850_v28  ;;  %v5909_v62 = vand.u32 4294901760, %v5877_v37 }
  0x3b   :  { %11181 = vst [vmem:[#allocation37_spill] sm:$0xff] %v5888_v13  ;;  %548 = vmatpush1.msra.mxu1 %v547_v32  ;;  %v559_v20 = vand.u32 4294901760, %v558_v12  ;;  %v570_v2 = vsub.f32 %v5854_v50, %v11182_v52  ;;  %v5906_v12 = vsub.f32 %v5752_v47, %v5784_v19  ;;  %v5911_v52 = vld [vmem:[#allocation5 + $0x748] sm:$0xff]  ;;  %357 = vmatprep.subr.mxu0 %v5864_v41  ;;  %v5922_v47 = vand.u32 4294901760, %v5890_v29 }
  0x3c   :  { %11183 = vst [vmem:[#allocation38_spill] sm:$0xff] %v5898_v43  ;;  %554 = vmatprep.subr.mxu1 %v553_v61  ;;  %v565_v38 = vand.u32 4294901760, %v564_v30  ;;  %11185 = vst [vmem:[#allocation40_spill] sm:$0xff] %v5909_v62  ;;  %v11186_v61 = vand.u32 4294901760, %v5875_v21  ;;  %v5919_v32 = vsub.f32 %v5763_v49, %v5795_v33  ;;  %359 = vmatpush1.msra.mxu0 %v5884_v24  ;;  %v11189_v19 = vand.u32 4294901760, %v5888_v13  ;;  %v5936_v49 = vld [vmem:[#allocation5 + $0x740] sm:$0xff] }
  0x3d   :  { %11184 = vst [vmem:[#allocation39_spill] sm:$0xff] %v5906_v12  ;;  %560 = vmatpush1.msra.mxu1 %v559_v20  ;;  %v571_v7 = vand.u32 4294901760, %v570_v2  ;;  %11188 = vst [vmem:[#allocation42_spill] sm:$0xff] %v5922_v47  ;;  %v5931_v50 = vsub.f32 %v5776_v39, %v5808_v46  ;;  %361 = vmatprep.subr.mxu0 %v5898_v43  ;;  %v5945_v2 = vand.u32 4294901760, %v5911_v52  ;;  %v5947_v39 = vld [vmem:[#allocation5 + $0x708] sm:$0xff] }
  0x3e   :  { %v576_v30 = vsub.f32 %v5875_v21, %v11186_v61  ;;  %11187 = vst [vmem:[#allocation41_spill] sm:$0xff] %v5919_v32  ;;  %566 = vmatprep.subr.mxu1 %v565_v38  ;;  %v582_v20 = vsub.f32 %v5888_v13, %v11189_v19  ;;  %v5934_v61 = vand.u32 4294901760, %v5900_v1  ;;  %v10385_v38 = vand.u32 4294901760, %v5919_v32  ;;  %363 = vmatpush2.msra.mxu0 %v5909_v62 }
  0x3f   :  { %11190 = vst [vmem:[#allocation43_spill] sm:$0xff] %v5931_v50  ;;  %572 = vmatpush1.msra.mxu1 %v571_v7  ;;  %v5942_v19 = vsub.f32 %v5786_v34, %v5820_v14  ;;  %11193 = vst [vmem:[#allocation46_spill] sm:$0xff] %v5945_v2  ;;  %v11194_v13 = vand.u32 4294901760, %v5906_v12  ;;  %365 = vmatprep.subr.mxu0 %v5922_v47  ;;  %v5964_v14 = vand.u32 4294901760, %v5936_v49  ;;  %v5970_v7 = vld [vmem:[#allocation5 + $0x700] sm:$0xff] }
  0x40   :  { %11191 = vst [vmem:[#allocation44_spill] sm:$0xff] %v5934_v61  ;;  %v577_v33 = vand.u32 4294901760, %v576_v30  ;;  %v583_v46 = vand.u32 4294901760, %v582_v20  ;;  %v5956_v30 = vsub.f32 %v5797_v53, %v5831_v26  ;;  %v594_v34 = vsub.f32 %v5919_v32, %v10385_v38  ;;  %367 = vmatpush2.msra.mxu0 %v5934_v61  ;;  %v5980_v32 = vld [vmem:[#allocation5 + $0x6c8] sm:$0xff] }
  0x41   :  { %11192 = vst [vmem:[#allocation45_spill] sm:$0xff] %v5942_v19  ;;  %v588_v21 = vsub.f32 %v5906_v12, %v11194_v13  ;;  %11196 = vst [vmem:[#allocation48_spill] sm:$0xff] %v5964_v14  ;;  %v5968_v13 = vsub.f32 %v5822_v51, %v5850_v28  ;;  %v5978_v20 = vand.u32 4294901760, %v5947_v39  ;;  %v11200_v51 = vand.u32 4294901760, %v5942_v19  ;;  %369 = vmatprep.subr.mxu0 %v5945_v2 }
  0x42   :  { %11195 = vst [vmem:[#allocation47_spill] sm:$0xff] %v5956_v30  ;;  %578 = vmatprep.subr.mxu1 %v577_v33  ;;  %v11198_v33 = vand.u32 4294901760, %v5931_v50  ;;  %v595_v12 = vand.u32 4294901760, %v594_v34  ;;  %371 = vmatpush2.msra.mxu0 %v5964_v14 }
  0x43   :  { %11197 = vst [vmem:[#allocation49_spill] sm:$0xff] %v5968_v13  ;;  %584 = vmatpush1.msra.mxu1 %v583_v46  ;;  %v589_v53 = vand.u32 4294901760, %v588_v21  ;;  %11199 = vst [vmem:[#allocation50_spill] sm:$0xff] %v5978_v20  ;;  %v606_v28 = vsub.f32 %v5942_v19, %v11200_v51  ;;  %v5989_v46 = vsub.f32 %v5833_v56, %v5864_v41  ;;  %v5998_v51 = vand.u32 4294901760, %v5970_v7  ;;  %v6004_v19 = vld [vmem:[#allocation5 + $0x688] sm:$0xff] }
  0x44   :  { %v600_v26 = vsub.f32 %v5931_v50, %v11198_v33  ;;  %v5991_v33 = vld [vmem:[#allocation5 + $0x6c0] sm:$0xff]  ;;  %v11202_v50 = vand.u32 4294901760, %v5956_v30  ;;  %v6002_v21 = vsub.f32 %v5856_v44, %v5884_v24  ;;  %373 = vmatprep.subr.mxu0 %v5978_v20  ;;  %v6012_v41 = vand.u32 4294901760, %v5980_v32  ;;  %v6025_v24 = vld [vmem:[#allocation5 + $0x648] sm:$0xff] }
  0x45   :  { %11201 = vst [vmem:[#allocation51_spill] sm:$0xff] %v5989_v46  ;;  %590 = vmatprep.subr.mxu1 %v589_v53  ;;  %11203 = vst [vmem:[#allocation52_spill] sm:$0xff] %v5998_v51  ;;  %v607_v56 = vand.u32 4294901760, %v606_v28  ;;  %v11205_v53 = vand.u32 4294901760, %v5968_v13  ;;  %375 = vmatpush2.msra.mxu0 %v5998_v51  ;;  %v6020_v28 = vsub.f32 %v5866_v36, %v5898_v43  ;;  %v6036_v36 = vand.u32 4294901760, %v6004_v19 }
  0x46   :  { %v601_v38 = vand.u32 4294901760, %v600_v26  ;;  %v612_v34 = vsub.f32 %v5956_v30, %v11202_v50  ;;  %11204 = vst [vmem:[#allocation53_spill] sm:$0xff] %v6002_v21  ;;  %596 = vmatpush1.msra.mxu1 %v595_v12  ;;  %11206 = vst [vmem:[#allocation54_spill] sm:$0xff] %v6012_v41  ;;  %v6014_v30 = vld [vmem:[#allocation5 + $0x680] sm:$0xff]  ;;  %v10408_v12 = vand.u32 4294901760, %v6002_v21  ;;  %377 = vmatprep.subr.mxu0 %v6012_v41 }
  0x47   :  { %v618_v26 = vsub.f32 %v5968_v13, %v11205_v53  ;;  %11207 = vst [vmem:[#allocation55_spill] sm:$0xff] %v6020_v28  ;;  %v6023_v53 = vand.u32 4294901760, %v5991_v33  ;;  %v11209_v13 = vand.u32 4294901760, %v5989_v46  ;;  %11211 = vst [vmem:[#allocation58_spill] sm:$0xff] %v6036_v36 }
  0x48   :  { %602 = vmatprep.subr.mxu1 %v601_v38  ;;  %v613_v44 = vand.u32 4294901760, %v612_v34  ;;  %v6033_v34 = vsub.f32 %v5877_v37, %v5909_v62  ;;  %v630_v43 = vsub.f32 %v6002_v21, %v10408_v12  ;;  %v6050_v37 = vld [vmem:[#allocation5 + $0x640] sm:$0xff]  ;;  %v6056_v12 = vsub.f32 %v5900_v1, %v5934_v61 }
  0x49   :  { %11208 = vst [vmem:[#allocation56_spill] sm:$0xff] %v6023_v53  ;;  %608 = vmatpush1.msra.mxu1 %v607_v56  ;;  %v619_v50 = vand.u32 4294901760, %v618_v26  ;;  %v624_v38 = vsub.f32 %v5989_v46, %v11209_v13  ;;  %379 = vmatpush2.msra.mxu0 %v6023_v53  ;;  %v6045_v13 = vsub.f32 %v5890_v29, %v5922_v47  ;;  %v6048_v26 = vand.u32 4294901760, %v6014_v30  ;;  %v6061_v29 = vld [vmem:[#allocation5 + $0x608] sm:$0xff] }
  0x4a   :  { %11210 = vst [vmem:[#allocation57_spill] sm:$0xff] %v6033_v34  ;;  %614 = vmatprep.subr.mxu1 %v613_v44  ;;  %v10419_v44 = vand.u32 4294901760, %v6033_v34  ;;  %381 = vmatprep.subr.mxu0 %v6036_v36  ;;  %11214 = vst [vmem:[#allocation61_spill] sm:$0xff] %v6056_v12  ;;  %v6059_v56 = vand.u32 4294901760, %v6025_v24  ;;  %v631_v47 = vand.u32 4294901760, %v630_v43  ;;  %v11216_v21 = vand.u32 4294901760, %v6020_v28 }
  0x4b   :  { %11212 = vst [vmem:[#allocation59_spill] sm:$0xff] %v6045_v13  ;;  %11213 = vst [vmem:[#allocation60_spill] sm:$0xff] %v6048_v26  ;;  %620 = vmatpush1.msra.mxu1 %v619_v50  ;;  %v625_v62 = vand.u32 4294901760, %v624_v38  ;;  %383 = vmatpush2.msra.mxu0 %v6048_v26  ;;  %v6070_v38 = vsub.f32 %v5911_v52, %v5945_v2  ;;  %v6078_v43 = vand.u32 4294901760, %v6050_v37  ;;  %v6084_v50 = vld [vmem:[#allocation5 + $0x600] sm:$0xff]  ;;  %v6091_v61 = vand.u32 4294901760, %v6061_v29 }
  0x4c   :  { %11215 = vst [vmem:[#allocation62_spill] sm:$0xff] %v6059_v56  ;;  %v636_v46 = vsub.f32 %v6020_v28, %v11216_v21  ;;  %v642_v1 = vsub.f32 %v6033_v34, %v10419_v44  ;;  %385 = vmatprep.subr.mxu0 %v6059_v56  ;;  %v6082_v21 = vsub.f32 %v5936_v49, %v5964_v14  ;;  %v6093_v34 = vld [vmem:[#allocation5 + $0x5c8] sm:$0xff]  ;;  %v11222_v27 = vand.u32 4294901760, %v6056_v12 }
  0x4d   :  { %11217 = vst [vmem:[#allocation63_spill] sm:$0xff] %v6070_v38  ;;  %626 = vmatprep.subr.mxu1 %v625_v62  ;;  %11218 = vst [vmem:[#allocation64_spill] sm:$0xff] %v6078_v43  ;;  %v11220_v62 = vand.u32 4294901760, %v6045_v13  ;;  %387 = vmatpush2.msra.mxu0 %v6078_v43  ;;  %v11224_v14 = vand.u32 4294901760, %v6070_v38 }
  0x4e   :  { %11219 = vst [vmem:[#allocation65_spill] sm:$0xff] %v6082_v21  ;;  %632 = vmatpush1.msra.mxu1 %v631_v47  ;;  %v637_v52 = vand.u32 4294901760, %v636_v46  ;;  %11221 = vst [vmem:[#allocation66_spill] sm:$0xff] %v6091_v61  ;;  %v643_v28 = vand.u32 4294901760, %v642_v1  ;;  %v654_v49 = vsub.f32 %v6056_v12, %v11222_v27  ;;  %v6102_v46 = vsub.f32 %v5947_v39, %v5978_v20  ;;  %v6117_v12 = vld [vmem:[#allocation5 + $0x588] sm:$0xff] }
  0x4f   :  { %v648_v2 = vsub.f32 %v6045_v13, %v11220_v62  ;;  %v6104_v62 = vld [vmem:[#allocation5 + $0x5c0] sm:$0xff]  ;;  %v660_v1 = vsub.f32 %v6070_v38, %v11224_v14  ;;  %389 = vmatprep.subr.mxu0 %v6091_v61  ;;  %v6111_v27 = vand.u32 4294901760, %v6084_v50  ;;  %v6115_v47 = vsub.f32 %v5970_v7, %v5998_v51 }
  0x50   :  { %11223 = vst [vmem:[#allocation67_spill] sm:$0xff] %v6102_v46  ;;  %638 = vmatprep.subr.mxu1 %v637_v52  ;;  %v655_v39 = vand.u32 4294901760, %v654_v49  ;;  %v11227_v52 = vand.u32 4294901760, %v6082_v21  ;;  %v6124_v14 = vand.u32 4294901760, %v6093_v34  ;;  %v6126_v38 = vld [vmem:[#allocation5 + $0x580] sm:$0xff]  ;;  %v6135_v49 = vand.u32 4294901760, %v6104_v62 }
  0x51   :  { %v649_v44 = vand.u32 4294901760, %v648_v2  ;;  %11225 = vst [vmem:[#allocation68_spill] sm:$0xff] %v6111_v27  ;;  %11226 = vst [vmem:[#allocation69_spill] sm:$0xff] %v6115_v47  ;;  %644 = vmatpush2.msra.mxu1 %v643_v28  ;;  %v661_v13 = vand.u32 4294901760, %v660_v1  ;;  %391 = vmatpush2.msra.mxu0 %v6111_v27  ;;  %v10442_v7 = vand.u32 4294901760, %v6115_v47  ;;  %v6132_v28 = vsub.f32 %v5980_v32, %v6012_v41 }
  0x52   :  { %v666_v2 = vsub.f32 %v6082_v21, %v11227_v52  ;;  %11228 = vst [vmem:[#allocation70_spill] sm:$0xff] %v6124_v14  ;;  %11230 = vst [vmem:[#allocation72_spill] sm:$0xff] %v6135_v49  ;;  %v6137_v52 = vld [vmem:[#allocation5 + $0x548] sm:$0xff]  ;;  %v11231_v51 = vand.u32 4294901760, %v6102_v46  ;;  %393 = vmatprep.subr.mxu0 %v6124_v14  ;;  %v6145_v1 = vsub.f32 %v5991_v33, %v6023_v53  ;;  %v6148_v32 = vand.u32 4294901760, %v6117_v12  ;;  %v6162_v33 = vld [vmem:[#allocation5 + $0x540] sm:$0xff] }
  0x53   :  { %650 = vmatprep.subr.mxu1 %v649_v44  ;;  %11229 = vst [vmem:[#allocation71_spill] sm:$0xff] %v6132_v28  ;;  %v678_v41 = vsub.f32 %v6115_v47, %v10442_v7  ;;  %395 = vmatpush2.msra.mxu0 %v6135_v49  ;;  %v6168_v7 = vsub.f32 %v6014_v30, %v6048_v26  ;;  %v11238_v47 = vand.u32 4294901760, %v6132_v28 }
  0x54   :  { %656 = vmatpush2.msra.mxu1 %v655_v39  ;;  %v667_v20 = vand.u32 4294901760, %v666_v2  ;;  %v672_v44 = vsub.f32 %v6102_v46, %v11231_v51  ;;  %11232 = vst [vmem:[#allocation73_spill] sm:$0xff] %v6145_v1  ;;  %11233 = vst [vmem:[#allocation74_spill] sm:$0xff] %v6148_v32  ;;  %v6157_v51 = vsub.f32 %v6004_v19, %v6036_v36  ;;  %v6160_v2 = vand.u32 4294901760, %v6126_v38  ;;  %v6173_v19 = vld [vmem:[#allocation5 + $0x508] sm:$0xff] }
  0x55   :  { %662 = vmatprep.subr.mxu1 %v661_v13  ;;  %v10453_v13 = vand.u32 4294901760, %v6145_v1  ;;  %397 = vmatprep.subr.mxu0 %v6148_v32  ;;  %11236 = vst [vmem:[#allocation77_spill] sm:$0xff] %v6168_v7  ;;  %v6171_v39 = vand.u32 4294901760, %v6137_v52  ;;  %v679_v36 = vand.u32 4294901760, %v678_v41  ;;  %v684_v46 = vsub.f32 %v6132_v28, %v11238_v47 }
  0x56   :  { %11234 = vst [vmem:[#allocation75_spill] sm:$0xff] %v6157_v51  ;;  %11235 = vst [vmem:[#allocation76_spill] sm:$0xff] %v6160_v2  ;;  %668 = vmatpush2.msra.mxu1 %v667_v20  ;;  %v673_v53 = vand.u32 4294901760, %v672_v44  ;;  %399 = vmatpush2.msra.mxu0 %v6160_v2  ;;  %v6182_v44 = vsub.f32 %v6025_v24, %v6059_v56  ;;  %v6190_v41 = vand.u32 4294901760, %v6162_v33  ;;  %v6196_v20 = vld [vmem:[#allocation5 + $0x500] sm:$0xff]  ;;  %v6203_v26 = vand.u32 4294901760, %v6173_v19 }
  0x57   :  { %11237 = vst [vmem:[#allocation78_spill] sm:$0xff] %v6171_v39  ;;  %v690_v30 = vsub.f32 %v6145_v1, %v10453_v13  ;;  %401 = vmatprep.subr.mxu0 %v6171_v39  ;;  %v6194_v47 = vsub.f32 %v6050_v37, %v6078_v43  ;;  %v685_v24 = vand.u32 4294901760, %v684_v46  ;;  %v6205_v1 = vld [vmem:[#allocation5 + $0x4c8] sm:$0xff]  ;;  %v11244_v21 = vand.u32 4294901760, %v6168_v7 }
  0x58   :  { %11239 = vst [vmem:[#allocation79_spill] sm:$0xff] %v6182_v44  ;;  %674 = vmatprep.subr.mxu1 %v673_v53  ;;  %11240 = vst [vmem:[#allocation80_spill] sm:$0xff] %v6190_v41  ;;  %v11242_v53 = vand.u32 4294901760, %v6157_v51  ;;  %403 = vmatpush2.msra.mxu0 %v6190_v41  ;;  %v6214_v46 = vsub.f32 %v6061_v29, %v6091_v61  ;;  %v11246_v43 = vand.u32 4294901760, %v6182_v44 }
  0x59   :  { %11241 = vst [vmem:[#allocation81_spill] sm:$0xff] %v6194_v47  ;;  %680 = vmatpush2.msra.mxu1 %v679_v36  ;;  %11243 = vst [vmem:[#allocation82_spill] sm:$0xff] %v6203_v26  ;;  %v691_v28 = vand.u32 4294901760, %v690_v30  ;;  %v702_v37 = vsub.f32 %v6168_v7, %v11244_v21  ;;  %405 = vmatprep.subr.mxu0 %v6203_v26  ;;  %v6223_v21 = vand.u32 4294901760, %v6196_v20  ;;  %v6229_v7 = vld [vmem:[#allocation5 + $0x488] sm:$0xff] }
  0x5a   :  { %v696_v56 = vsub.f32 %v6157_v51, %v11242_v53  ;;  %11245 = vst [vmem:[#allocation83_spill] sm:$0xff] %v6214_v46  ;;  %v6216_v53 = vld [vmem:[#allocation5 + $0x4c0] sm:$0xff]  ;;  %686 = vmatprep.subr.mxu1 %v685_v24  ;;  %v708_v30 = vsub.f32 %v6182_v44, %v11246_v43  ;;  %v6227_v36 = vsub.f32 %v6084_v50, %v6111_v27  ;;  %v11249_v24 = vand.u32 4294901760, %v6194_v47 }
  0x5b   :  { %11247 = vst [vmem:[#allocation84_spill] sm:$0xff] %v6223_v21  ;;  %692 = vmatpush2.msra.mxu1 %v691_v28  ;;  %v703_v29 = vand.u32 4294901760, %v702_v37  ;;  %v6236_v43 = vand.u32 4294901760, %v6205_v1  ;;  %v6238_v44 = vld [vmem:[#allocation5 + $0x480] sm:$0xff]  ;;  %407 = vmatpush2.msra.mxu0 %v6223_v21  ;;  %v6244_v28 = vsub.f32 %v6093_v34, %v6124_v14  ;;  %v6247_v37 = vand.u32 4294901760, %v6216_v53 }
  0x5c   :  { %v697_v13 = vand.u32 4294901760, %v696_v56  ;;  %11248 = vst [vmem:[#allocation85_spill] sm:$0xff] %v6227_v36  ;;  %v714_v56 = vsub.f32 %v6194_v47, %v11249_v24  ;;  %v709_v51 = vand.u32 4294901760, %v708_v30  ;;  %v10476_v50 = vand.u32 4294901760, %v6227_v36  ;;  %v6249_v24 = vld [vmem:[#allocation5 + $0x448] sm:$0xff] }
  0x5d   :  { %11250 = vst [vmem:[#allocation86_spill] sm:$0xff] %v6244_v28  ;;  %v11251_v27 = vand.u32 4294901760, %v6214_v46  ;;  %409 = vmatprep.subr.mxu0 %v6236_v43  ;;  %v6257_v30 = vsub.f32 %v6104_v62, %v6135_v49  ;;  %v6260_v34 = vand.u32 4294901760, %v6229_v7  ;;  %v6274_v62 = vld [vmem:[#allocation5 + $0x440] sm:$0xff] }
  0x5e   :  { %698 = vmatprep.subr.mxu1 %v697_v13  ;;  %v715_v61 = vand.u32 4294901760, %v714_v56  ;;  %v726_v14 = vsub.f32 %v6227_v36, %v10476_v50  ;;  %411 = vmatpush2.msra.mxu0 %v6247_v37  ;;  %v6272_v56 = vand.u32 4294901760, %v6238_v44  ;;  %v6280_v50 = vsub.f32 %v6126_v38, %v6160_v2 }
  0x5f   :  { %704 = vmatpush2.msra.mxu1 %v703_v29  ;;  %v720_v13 = vsub.f32 %v6214_v46, %v11251_v27  ;;  %11252 = vst [vmem:[#allocation87_spill] sm:$0xff] %v6257_v30  ;;  %11253 = vst [vmem:[#allocation88_spill] sm:$0xff] %v6260_v34  ;;  %v6269_v27 = vsub.f32 %v6117_v12, %v6148_v32  ;;  %413 = vmatprep.subr.mxu0 %v6260_v34  ;;  %v6283_v29 = vand.u32 4294901760, %v6249_v24  ;;  %v6285_v12 = vld [vmem:[#allocation5 + $0x408] sm:$0xff] }
  0x60   :  { %710 = vmatprep.subr.mxu1 %v709_v51  ;;  %11255 = vst [vmem:[#allocation90_spill] sm:$0xff] %v6272_v56  ;;  %v10487_v51 = vand.u32 4294901760, %v6257_v30  ;;  %11256 = vst [vmem:[#allocation91_spill] sm:$0xff] %v6280_v50  ;;  %v727_v32 = vand.u32 4294901760, %v726_v14  ;;  %v11258_v36 = vand.u32 4294901760, %v6244_v28  ;;  %415 = vmatpush2.msra.mxu0 %v6272_v56  ;;  %v6302_v14 = vand.u32 4294901760, %v6274_v62 }
  0x61   :  { %11254 = vst [vmem:[#allocation89_spill] sm:$0xff] %v6269_v27  ;;  %716 = vmatpush2.msra.mxu1 %v715_v61  ;;  %v721_v49 = vand.u32 4294901760, %v720_v13  ;;  %11257 = vst [vmem:[#allocation92_spill] sm:$0xff] %v6283_v29  ;;  %v6294_v13 = vsub.f32 %v6137_v52, %v6171_v39  ;;  %417 = vmatprep.subr.mxu0 %v6283_v29  ;;  %v6308_v61 = vld [vmem:[#allocation5 + $0x400] sm:$0xff]  ;;  %v6315_v2 = vand.u32 4294901760, %v6285_v12  ;;  %v11262_v47 = vand.u32 4294901760, %v6280_v50 }
  0x62   :  { %v732_v46 = vsub.f32 %v6244_v28, %v11258_v36  ;;  %v738_v38 = vsub.f32 %v6257_v30, %v10487_v51  ;;  %v6306_v36 = vsub.f32 %v6162_v33, %v6190_v41  ;;  %v39_v30 = vld [vmem:[#allocation2 + $0x8] sm:$0xff]  ;;  %419 = vmatpush2.msra.mxu0 %v6302_v14 }
  0x63   :  { %11259 = vst [vmem:[#allocation93_spill] sm:$0xff] %v6294_v13  ;;  %722 = vmatprep.subr.mxu1 %v721_v49  ;;  %v11261_v49 = vand.u32 4294901760, %v6269_v27  ;;  %v750_v33 = vsub.f32 %v6280_v50, %v11262_v47  ;;  %v11264_v41 = vand.u32 4294901760, %v6294_v13  ;;  %421 = vmatprep.subr.mxu0 %v6315_v2  ;;  %v6335_v47 = vsub.f32 %v6196_v20, %v6223_v21 }
  0x64   :  { %11260 = vst [vmem:[#allocation94_spill] sm:$0xff] %v6306_v36  ;;  %728 = vmatpush2.msra.mxu1 %v727_v32  ;;  %v733_v52 = vand.u32 4294901760, %v732_v46  ;;  %v739_v28 = vand.u32 4294901760, %v738_v38  ;;  %v6324_v46 = vsub.f32 %v6173_v19, %v6203_v26  ;;  %v6331_v38 = vand.u32 4294901760, %v6308_v61 }
  0x65   :  { %v744_v39 = vsub.f32 %v6269_v27, %v11261_v49  ;;  %v38_v49 = vld [vmem:[#allocation2] sm:$0xff]  ;;  %v756_v27 = vsub.f32 %v6294_v13, %v11264_v41  ;;  %11265 = vst [vmem:[#allocation96_spill] sm:$0xff] %v6335_v47  ;;  %v751_v32 = vand.u32 4294901760, %v750_v33  ;;  %v11266_v19 = vand.u32 4294901760, %v6306_v36 }
  0x66   :  { %11263 = vst [vmem:[#allocation95_spill] sm:$0xff] %v6324_v46  ;;  %734 = vmatprep.subr.mxu1 %v733_v52  ;;  %v6341_v26 = vand.u32 4294901760, %v39_v30  ;;  %423 = vmatpush2.msra.mxu0 %v6331_v38  ;;  %v10504_v13 = vand.u32 4294901760, %v6335_v47  ;;  %v6347_v20 = vsub.f32 %v6205_v1, %v6236_v43 }
  0x67   :  { %v745_v51 = vand.u32 4294901760, %v744_v39  ;;  %740 = vmatpush2.msra.mxu1 %v739_v28  ;;  %v762_v52 = vsub.f32 %v6306_v36, %v11266_v19  ;;  %v10505_v39 = vand.u32 4294901760, %v6324_v46  ;;  %v757_v41 = vand.u32 4294901760, %v756_v27  ;;  %836 = vmatprep.subr.mxu0 %v5573_v18 }
  0x68   :  { %11267 = vst [vmem:[#allocation97_spill] sm:$0xff] %v6341_v26  ;;  %11268 = vst [vmem:[#allocation98_spill] sm:$0xff] %v6347_v20  ;;  %v6349_v28 = vand.u32 4294901760, %v38_v49  ;;  %v6355_v21 = vsub.f32 %v39_v30, %v6341_v26  ;;  %v6360_v27 = vsub.f32 %v6216_v53, %v6247_v37  ;;  %v774_v1 = vsub.f32 %v6335_v47, %v10504_v13 }
  0x69   :  { %746 = vmatprep.subr.mxu1 %v745_v51  ;;  %v763_v33 = vand.u32 4294901760, %v762_v52  ;;  %v768_v19 = vsub.f32 %v6324_v46, %v10505_v39  ;;  %v10508_v51 = vand.u32 4294901760, %v6347_v20  ;;  %v6371_v30 = vsub.f32 %v6229_v7, %v6260_v34  ;;  %826 = vmatprep.mubr.f32.mxu1 %v6341_v26 }
  0x6a   :  { %11269 = vst [vmem:[#allocation99_spill] sm:$0xff] %v6349_v28  ;;  %752 = vmatpush2.msra.mxu1 %v751_v32  ;;  %11270 = vst [vmem:[#allocation100_spill] sm:$0xff] %v6355_v21  ;;  %v6367_v32 = vsub.f32 %v38_v49, %v6349_v28  ;;  %v6375_v53 = vand.u32 4294901760, %v6355_v21  ;;  %v6380_v13 = vsub.f32 %v6238_v44, %v6272_v56  ;;  %v775_v39 = vand.u32 4294901760, %v774_v1 }
  0x6b   :  { %11271 = vst [vmem:[#allocation101_spill] sm:$0xff] %v6360_v27  ;;  %758 = vmatprep.subr.mxu1 %v757_v41  ;;  %11273 = vst [vmem:[#allocation103_spill] sm:$0xff] %v6371_v30  ;;  %v769_v52 = vand.u32 4294901760, %v768_v19  ;;  %v10513_v41 = vand.u32 4294901760, %v6360_v27  ;;  %v780_v49 = vsub.f32 %v6347_v20, %v10508_v51  ;;  %v6397_v1 = vsub.f32 %v6249_v24, %v6283_v29 }
  0x6c   :  { %11272 = vst [vmem:[#allocation102_spill] sm:$0xff] %v6367_v32  ;;  %764 = vmatpush2.msra.mxu1 %v763_v33  ;;  %11274 = vst [vmem:[#allocation104_spill] sm:$0xff] %v6375_v53  ;;  %v6386_v7 = vand.u32 4294901760, %v6367_v32  ;;  %v10520_v33 = vand.u32 4294901760, %v6371_v30  ;;  %v427_v19 = vsub.f32 %v6355_v21, %v6375_v53  ;;  %v6406_v53 = vsub.f32 %v6274_v62, %v6302_v14 }
  0x6d   :  { %770 = vmatprep.subr.mxu1 %v769_v52  ;;  %v786_v26 = vsub.f32 %v6360_v27, %v10513_v41  ;;  %11276 = vst [vmem:[#allocation106_spill] sm:$0xff] %v6397_v1  ;;  %v781_v51 = vand.u32 4294901760, %v780_v49  ;;  %v11279_v34 = vand.u32 4294901760, %v6380_v13  ;;  %v6427_v62 = vsub.f32 %v6308_v61, %v6331_v38 }
  0x6e   :  { %11275 = vst [vmem:[#allocation105_spill] sm:$0xff] %v6386_v7  ;;  %776 = vmatpush2.msra.mxu1 %v775_v39  ;;  %v433_v56 = vsub.f32 %v6367_v32, %v6386_v7  ;;  %v792_v52 = vsub.f32 %v6371_v30, %v10520_v33  ;;  %11277 = vst [vmem:[#allocation107_spill] sm:$0xff] %v6406_v53  ;;  %v6408_v41 = vand.u32 4294901760, %v427_v19  ;;  %v10524_v39 = vand.u32 4294901760, %v6397_v1 }
  0x6f   :  { %v787_v44 = vand.u32 4294901760, %v786_v26  ;;  %v798_v24 = vsub.f32 %v6380_v13, %v11279_v34  ;;  %782 = vmatprep.subr.mxu1 %v781_v51  ;;  %v10523_v29 = vand.u32 4294901760, %v6406_v53  ;;  %v6419_v33 = vsub.f32 %v6285_v12, %v6315_v2  ;;  %11281 = vst [vmem:[#allocation110_spill] sm:$0xff] %v6427_v62 }
  0x70   :  { %11278 = vst [vmem:[#allocation108_spill] sm:$0xff] %v6408_v41  ;;  %v6414_v49 = vand.u32 4294901760, %v433_v56  ;;  %v793_v7 = vand.u32 4294901760, %v792_v52  ;;  %429 = vmatprep.mubr.f32.mxu0 %v6408_v41  ;;  %v804_v34 = vsub.f32 %v6397_v1, %v10524_v39  ;;  %v10521_v19 = vand.u32 4294901760, %v6427_v62  ;;  %v11294_v39 = vld [vmem:[#allocation17_spill] sm:$0xff]  ;;  %v11297_v41 = vld [vmem:[#allocation43_spill] sm:$0xff] }
  0x71   :  { %788 = vmatpush2.msra.mxu1 %v787_v44  ;;  %v799_v26 = vand.u32 4294901760, %v798_v24  ;;  %v810_v56 = vsub.f32 %v6406_v53, %v10523_v29  ;;  %v10522_v12 = vand.u32 4294901760, %v6419_v33  ;;  %v11293_v29 = vld [vmem:[#allocation39_spill] sm:$0xff] }
  0x72   :  { %11280 = vst [vmem:[#allocation109_spill] sm:$0xff] %v6414_v49  ;;  %435 = vmatmul.mubr.f32.vlgmr.msra.gmra.mxu0 %v6414_v49  ;;  %794 = vmatprep.subr.mxu1 %v793_v7  ;;  %v805_v51 = vand.u32 4294901760, %v804_v34  ;;  %v822_v7 = vsub.f32 %v6427_v62, %v10521_v19  ;;  %v11283_v34 = vld [vmem:[#allocation29_spill] sm:$0xff]  ;;  %v11296_v49 = vld [vmem:[#allocation18_spill] sm:$0xff] }
  0x73   :  { %839 = vmatpush1.msra.mxu0 %v5586_v23  ;;  %800 = vmatpush2.msra.mxu1 %v799_v26  ;;  %v811_v44 = vand.u32 4294901760, %v810_v56  ;;  %v816_v61 = vsub.f32 %v6419_v33, %v10522_v12  ;;  %v11282_v26 = vld [vmem:[#allocation11_spill] sm:$0xff]  ;;  %v11284_v56 = vld [vmem:[#allocation12_spill] sm:$0xff]  ;;  %v11291_v19 = vld [vmem:[#allocation37_spill] sm:$0xff] }
  0x74   :  { %842 = vmatprep.subr.mxu0 %v5592_v25  ;;  %1028 = vmatprep.mubr.f32.mxu0 %v6355_v21  ;;  %v823_v24 = vand.u32 4294901760, %v822_v7  ;;  %v11288_v7 = vld [vmem:[#allocation14_spill] sm:$0xff]  ;;  %v11292_v12 = vld [vmem:[#allocation16_spill] sm:$0xff]  ;;  %v11295_v21 = vld [vmem:[#allocation41_spill] sm:$0xff] }
  0x75   :  { %845 = vmatpush1.msra.mxu0 %v5606_v31  ;;  %806 = vmatprep.subr.mxu1 %v805_v51  ;;  %v817_v52 = vand.u32 4294901760, %v816_v61  ;;  %v11285_v51 = vld [vmem:[#allocation31_spill] sm:$0xff]  ;;  %v11287_v61 = vld [vmem:[#allocation33_spill] sm:$0xff] }
  0x76   :  { %848 = vmatprep.subr.mxu0 %v5615_v35  ;;  %812 = vmatpush2.msra.mxu1 %v811_v44  ;;  %v11286_v44 = vld [vmem:[#allocation13_spill] sm:$0xff] }
  0x77   :  { %851 = vmatpush1.msra.mxu0 %v5628_v40  ;;  %818 = vmatprep.subr.mxu1 %v817_v52  ;;  %v11289_v52 = vld [vmem:[#allocation35_spill] sm:$0xff] }
  0x78   :  { %854 = vmatprep.subr.mxu0 %v5642_v45  ;;  %824 = vmatpush2.msra.mxu1 %v823_v24  ;;  %v11290_v24 = vld [vmem:[#allocation15_spill] sm:$0xff] }
  0x79   :  { %857 = vmatpush1.msra.mxu0 %v5668_v59  ;;  %828 = vmatmul.mubr.f32.vlgmr.msra.gmra.mxu1 %v6349_v28  ;;  %v11298_v28 = vld [vmem:[#allocation19_spill] sm:$0xff] }
  0x7a   :  { %860 = vmatprep.subr.mxu0 %v5680_v0  ;;  %1038 = vmatprep.subr.mxu1 %v5553_v3 }
  0x7b   :  { %863 = vmatpush1.msra.mxu0 %v5691_v8  ;;  %1040 = vmatpush1.msra.mxu1 %v5555_v4 }
  0x7c   :  { %866 = vmatprep.subr.mxu0 %v5702_v42  ;;  %1042 = vmatprep.subr.mxu1 %v5557_v5 }
  0x7d   :  { %869 = vmatpush1.msra.mxu0 %v5714_v48  ;;  %1044 = vmatpush1.msra.mxu1 %v5559_v9 }
  0x7e   :  { %872 = vmatprep.subr.mxu0 %v5728_v57  ;;  %1046 = vmatprep.subr.mxu1 %v5561_v10 }
  0x7f   :  { %875 = vmatpush1.msra.mxu0 %v5740_v6  ;;  %1048 = vmatpush1.msra.mxu1 %v5563_v11 }
  0x80   :  { %878 = vmatprep.subr.mxu0 %v5761_v54  ;;  %1050 = vmatprep.subr.mxu1 %v5566_v15 }
  0x81   :  { %881 = vmatpush1.msra.mxu0 %v5774_v63  ;;  %1052 = vmatpush1.msra.mxu1 %v5568_v16 }
  0x82   :  { %884 = vmatprep.subr.mxu0 %v5792_v55  ;;  %1054 = vmatprep.subr.mxu1 %v5570_v17 }
  0x83   :  { %887 = vmatpush1.msra.mxu0 %v5805_v58  ;;  %1056 = vmatpush1.msra.mxu1 %v5583_v22 }
  0x84   :  { %890 = vmatprep.subr.mxu0 %v5817_v60  ;;  %1058 = vmatprep.subr.mxu1 %v11282_v26 }
  0x85   :  { %893 = vmatpush1.msra.mxu0 %v11283_v34  ;;  %1060 = vmatpush1.msra.mxu1 %v11284_v56 }
  0x86   :  { %896 = vmatprep.subr.mxu0 %v11285_v51  ;;  %1062 = vmatprep.subr.mxu1 %v11286_v44 }
  0x87   :  { %899 = vmatpush1.msra.mxu0 %v11287_v61  ;;  %1064 = vmatpush1.msra.mxu1 %v11288_v7  ;;  %v11299_v7 = vld [vmem:[#allocation45_spill] sm:$0xff] }
  0x88   :  { %902 = vmatprep.subr.mxu0 %v11289_v52  ;;  %1066 = vmatprep.subr.mxu1 %v11290_v24  ;;  %v11300_v52 = vld [vmem:[#allocation20_spill] sm:$0xff]  ;;  %v11301_v24 = vld [vmem:[#allocation47_spill] sm:$0xff] }
  0x89   :  { %905 = vmatpush1.msra.mxu0 %v11291_v19  ;;  %1068 = vmatpush1.msra.mxu1 %v11292_v12  ;;  %v11302_v19 = vld [vmem:[#allocation21_spill] sm:$0xff] }
  0x8a   :  { %908 = vmatprep.subr.mxu0 %v11293_v29  ;;  %1070 = vmatprep.subr.mxu1 %v11294_v39  ;;  %v11303_v12 = vld [vmem:[#allocation49_spill] sm:$0xff]  ;;  %v11304_v29 = vld [vmem:[#allocation22_spill] sm:$0xff]  ;;  %v11305_v39 = vld [vmem:[#allocation51_spill] sm:$0xff] }
  0x8b   :  { %911 = vmatpush1.msra.mxu0 %v11295_v21  ;;  %1072 = vmatpush1.msra.mxu1 %v11296_v49  ;;  %v11306_v21 = vld [vmem:[#allocation23_spill] sm:$0xff]  ;;  %v11307_v49 = vld [vmem:[#allocation53_spill] sm:$0xff] }
  0x8c   :  { %914 = vmatprep.subr.mxu0 %v11297_v41  ;;  %1074 = vmatprep.subr.mxu1 %v11298_v28  ;;  %v11308_v41 = vld [vmem:[#allocation24_spill] sm:$0xff]  ;;  %v11309_v28 = vld [vmem:[#allocation55_spill] sm:$0xff] }
  0x8d   :  { %917 = vmatpush1.msra.mxu0 %v11299_v7  ;;  %1076 = vmatpush1.msra.mxu1 %v11300_v52  ;;  %v11310_v7 = vld [vmem:[#allocation25_spill] sm:$0xff] }
  0x8e   :  { %920 = vmatprep.subr.mxu0 %v11301_v24  ;;  %1078 = vmatprep.subr.mxu1 %v11302_v19  ;;  %v11311_v52 = vld [vmem:[#allocation57_spill] sm:$0xff]  ;;  %v11312_v24 = vld [vmem:[#allocation26_spill] sm:$0xff]  ;;  %v11313_v19 = vld [vmem:[#allocation59_spill] sm:$0xff] }
  0x8f   :  { %923 = vmatpush1.msra.mxu0 %v11303_v12  ;;  %1080 = vmatpush1.msra.mxu1 %v11304_v29  ;;  %v11314_v12 = vld [vmem:[#allocation27_spill] sm:$0xff]  ;;  %v11315_v29 = vld [vmem:[#allocation61_spill] sm:$0xff] }
  0x90   :  { %926 = vmatprep.subr.mxu0 %v11305_v39  ;;  %1082 = vmatprep.subr.mxu1 %v11306_v21  ;;  %v11316_v39 = vld [vmem:[#allocation28_spill] sm:$0xff]  ;;  %v11317_v21 = vld [vmem:[#allocation63_spill] sm:$0xff] }
  0x91   :  { %929 = vmatpush1.msra.mxu0 %v11307_v49  ;;  %1084 = vmatpush1.msra.mxu1 %v11308_v41  ;;  %v11318_v49 = vld [vmem:[#allocation30_spill] sm:$0xff]  ;;  %v11319_v41 = vld [vmem:[#allocation65_spill] sm:$0xff] }
  0x92   :  { %932 = vmatprep.subr.mxu0 %v11309_v28  ;;  %1086 = vmatprep.subr.mxu1 %v11310_v7  ;;  %v11320_v28 = vld [vmem:[#allocation32_spill] sm:$0xff]  ;;  %v11321_v7 = vld [vmem:[#allocation67_spill] sm:$0xff] }
  0x93   :  { %935 = vmatpush2.msra.mxu0 %v11311_v52  ;;  %1088 = vmatpush1.msra.mxu1 %v11312_v24  ;;  %v11322_v52 = vld [vmem:[#allocation34_spill] sm:$0xff]  ;;  %v11323_v24 = vld [vmem:[#allocation69_spill] sm:$0xff] }
  0x94   :  { %938 = vmatprep.subr.mxu0 %v11313_v19  ;;  %1090 = vmatprep.subr.mxu1 %v11314_v12  ;;  %v11324_v19 = vld [vmem:[#allocation36_spill] sm:$0xff]  ;;  %v11325_v12 = vld [vmem:[#allocation71_spill] sm:$0xff] }
  0x95   :  { %941 = vmatpush2.msra.mxu0 %v11315_v29  ;;  %1092 = vmatpush1.msra.mxu1 %v11316_v39  ;;  %v11326_v29 = vld [vmem:[#allocation38_spill] sm:$0xff]  ;;  %v11327_v39 = vld [vmem:[#allocation73_spill] sm:$0xff] }
  0x96   :  { %944 = vmatprep.subr.mxu0 %v11317_v21  ;;  %1094 = vmatprep.subr.mxu1 %v11318_v49  ;;  %v11328_v21 = vld [vmem:[#allocation40_spill] sm:$0xff]  ;;  %v11329_v49 = vld [vmem:[#allocation75_spill] sm:$0xff] }
  0x97   :  { %947 = vmatpush2.msra.mxu0 %v11319_v41  ;;  %1096 = vmatpush1.msra.mxu1 %v11320_v28  ;;  %v11330_v41 = vld [vmem:[#allocation42_spill] sm:$0xff]  ;;  %v11331_v28 = vld [vmem:[#allocation77_spill] sm:$0xff] }
  0x98   :  { %950 = vmatprep.subr.mxu0 %v11321_v7  ;;  %1098 = vmatprep.subr.mxu1 %v11322_v52  ;;  %v11332_v7 = vld [vmem:[#allocation44_spill] sm:$0xff]  ;;  %v11333_v52 = vld [vmem:[#allocation79_spill] sm:$0xff] }
  0x99   :  { %953 = vmatpush2.msra.mxu0 %v11323_v24  ;;  %1100 = vmatpush1.msra.mxu1 %v11324_v19  ;;  %v11334_v24 = vld [vmem:[#allocation46_spill] sm:$0xff]  ;;  %v11335_v19 = vld [vmem:[#allocation81_spill] sm:$0xff] }
  0x9a   :  { %956 = vmatprep.subr.mxu0 %v11325_v12  ;;  %1102 = vmatprep.subr.mxu1 %v11326_v29  ;;  %v11336_v12 = vld [vmem:[#allocation48_spill] sm:$0xff]  ;;  %v11337_v29 = vld [vmem:[#allocation83_spill] sm:$0xff] }
  0x9b   :  { %959 = vmatpush2.msra.mxu0 %v11327_v39  ;;  %1104 = vmatpush2.msra.mxu1 %v11328_v21  ;;  %v11338_v39 = vld [vmem:[#allocation50_spill] sm:$0xff]  ;;  %v11339_v21 = vld [vmem:[#allocation85_spill] sm:$0xff] }
  0x9c   :  { %962 = vmatprep.subr.mxu0 %v11329_v49  ;;  %1106 = vmatprep.subr.mxu1 %v11330_v41  ;;  %v11340_v49 = vld [vmem:[#allocation52_spill] sm:$0xff]  ;;  %v11341_v41 = vld [vmem:[#allocation86_spill] sm:$0xff] }
  0x9d   :  { %965 = vmatpush2.msra.mxu0 %v11331_v28  ;;  %1108 = vmatpush2.msra.mxu1 %v11332_v7  ;;  %v11342_v28 = vld [vmem:[#allocation54_spill] sm:$0xff]  ;;  %v11343_v7 = vld [vmem:[#allocation87_spill] sm:$0xff] }
  0x9e   :  { %968 = vmatprep.subr.mxu0 %v11333_v52  ;;  %1110 = vmatprep.subr.mxu1 %v11334_v24  ;;  %v11344_v52 = vld [vmem:[#allocation56_spill] sm:$0xff]  ;;  %v11345_v24 = vld [vmem:[#allocation89_spill] sm:$0xff] }
  0x9f   :  { %971 = vmatpush2.msra.mxu0 %v11335_v19  ;;  %1112 = vmatpush2.msra.mxu1 %v11336_v12  ;;  %v11346_v19 = vld [vmem:[#allocation58_spill] sm:$0xff] }
  0xa0   :  { %974 = vmatprep.subr.mxu0 %v11337_v29  ;;  %1114 = vmatprep.subr.mxu1 %v11338_v39  ;;  %v11347_v29 = vld [vmem:[#allocation60_spill] sm:$0xff]  ;;  %v11348_v39 = vld [vmem:[#allocation93_spill] sm:$0xff] }
  0xa1   :  { %977 = vmatpush2.msra.mxu0 %v11339_v21  ;;  %1116 = vmatpush2.msra.mxu1 %v11340_v49  ;;  %v11349_v21 = vld [vmem:[#allocation62_spill] sm:$0xff] }
  0xa2   :  { %980 = vmatprep.subr.mxu0 %v11341_v41  ;;  %1118 = vmatprep.subr.mxu1 %v11342_v28  ;;  %v11350_v41 = vld [vmem:[#allocation64_spill] sm:$0xff] }
  0xa3   :  { %983 = vmatpush2.msra.mxu0 %v11343_v7  ;;  %1120 = vmatpush2.msra.mxu1 %v11344_v52  ;;  %v11351_v7 = vld [vmem:[#allocation66_spill] sm:$0xff] }
  0xa4   :  { %986 = vmatprep.subr.mxu0 %v11345_v24  ;;  %1122 = vmatprep.subr.mxu1 %v11346_v19  ;;  %v11352_v24 = vld [vmem:[#allocation68_spill] sm:$0xff] }
  0xa5   :  { %989 = vmatpush2.msra.mxu0 %v6280_v50  ;;  %1124 = vmatpush2.msra.mxu1 %v11347_v29  ;;  %v11353_v50 = vld [vmem:[#allocation70_spill] sm:$0xff] }
  0xa6   :  { %992 = vmatprep.subr.mxu0 %v11348_v39  ;;  %1126 = vmatprep.subr.mxu1 %v11349_v21  ;;  %v11354_v39 = vld [vmem:[#allocation72_spill] sm:$0xff] }
  0xa7   :  { %995 = vmatpush2.msra.mxu0 %v6306_v36  ;;  %1128 = vmatpush2.msra.mxu1 %v11350_v41  ;;  %v11355_v36 = vld [vmem:[#allocation74_spill] sm:$0xff] }
  0xa8   :  { %998 = vmatprep.subr.mxu0 %v6324_v46  ;;  %1130 = vmatprep.subr.mxu1 %v11351_v7  ;;  %v11356_v46 = vld [vmem:[#allocation76_spill] sm:$0xff] }
  0xa9   :  { %1001 = vmatpush2.msra.mxu0 %v6335_v47  ;;  %1132 = vmatpush2.msra.mxu1 %v11352_v24  ;;  %v11357_v47 = vld [vmem:[#allocation78_spill] sm:$0xff] }
  0xaa   :  { %1004 = vmatprep.subr.mxu0 %v6347_v20  ;;  %1134 = vmatprep.subr.mxu1 %v11353_v50  ;;  %v11358_v20 = vld [vmem:[#allocation80_spill] sm:$0xff] }
  0xab   :  { %1007 = vmatpush2.msra.mxu0 %v6360_v27  ;;  %1136 = vmatpush2.msra.mxu1 %v11354_v39  ;;  %v11359_v27 = vld [vmem:[#allocation82_spill] sm:$0xff] }
  0xac   :  { %1010 = vmatprep.subr.mxu0 %v6371_v30  ;;  %1138 = vmatprep.subr.mxu1 %v11355_v36  ;;  %v11360_v30 = vld [vmem:[#allocation84_spill] sm:$0xff] }
  0xad   :  { %1013 = vmatpush2.msra.mxu0 %v6380_v13  ;;  %1140 = vmatpush2.msra.mxu1 %v11356_v46 }
  0xae   :  { %1016 = vmatprep.subr.mxu0 %v6397_v1  ;;  %1142 = vmatprep.subr.mxu1 %v11357_v47  ;;  %v11361_v1 = vand.u32 4294901760, %v5573_v18  ;;  %v11368_v18 = vand.u32 4294901760, %v5615_v35  ;;  %v11374_v35 = vand.u32 4294901760, %v5680_v0  ;;  %v11378_v0 = vand.u32 4294901760, %v5728_v57  ;;  %v11394_v57 = vld [vmem:[#allocation16_spill] sm:$0xff] }
  0xaf   :  { %1019 = vmatpush2.msra.mxu0 %v6406_v53  ;;  %1144 = vmatpush2.msra.mxu1 %v11358_v20  ;;  %v11362_v53 = vand.u32 4294901760, %v5586_v23  ;;  %v11363_v20 = vld [vmem:[#allocation88_spill] sm:$0xff]  ;;  %v11369_v23 = vand.u32 4294901760, %v5628_v40  ;;  %v11375_v40 = vand.u32 4294901760, %v5691_v8  ;;  %v11388_v8 = vld [vmem:[#allocation14_spill] sm:$0xff] }
  0xb0   :  { %1022 = vmatprep.subr.mxu0 %v6419_v33  ;;  %1146 = vmatprep.subr.mxu1 %v11359_v27  ;;  %v11364_v27 = vand.u32 4294901760, %v5592_v25  ;;  %v11370_v25 = vand.u32 4294901760, %v5642_v45  ;;  %v11376_v45 = vand.u32 4294901760, %v5702_v42  ;;  %v11391_v42 = vld [vmem:[#allocation15_spill] sm:$0xff] }
  0xb1   :  { %1025 = vmatpush2.msra.mxu0 %v6427_v62  ;;  %1148 = vmatpush2.msra.mxu1 %v11360_v30  ;;  %v11365_v62 = vld [vmem:[#allocation90_spill] sm:$0xff]  ;;  %v11366_v30 = vand.u32 4294901760, %v5606_v31  ;;  %v11372_v31 = vand.u32 4294901760, %v5668_v59  ;;  %v11377_v59 = vand.u32 4294901760, %v5714_v48  ;;  %v11392_v48 = vld [vmem:[#allocation37_spill] sm:$0xff] }
  0xb2   :  { %1031 = vmatmul.mubr.f32.vlgmr.msra.gmra.mxu0 %v6367_v32  ;;  %1150 = vmatprep.subr.mxu1 %v6236_v43  ;;  %v11367_v32 = vld [vmem:[#allocation92_spill] sm:$0xff] }
  0xb3   :  { %1181 = vmatprep.subr.mxu0 %v11361_v1  ;;  %1152 = vmatpush2.msra.mxu1 %v6247_v37  ;;  %v11400_v1 = vld [vmem:[#allocation18_spill] sm:$0xff] }
  0xb4   :  { %1185 = vmatpush1.msra.mxu0 %v11362_v53  ;;  %1154 = vmatprep.subr.mxu1 %v11363_v20 }
  0xb5   :  { %1189 = vmatprep.subr.mxu0 %v11364_v27  ;;  %1156 = vmatpush2.msra.mxu1 %v11365_v62  ;;  %v11371_v27 = vld [vmem:[#allocation104_spill] sm:$0xff] }
  0xb6   :  { %1193 = vmatpush1.msra.mxu0 %v11366_v30  ;;  %1158 = vmatprep.subr.mxu1 %v11367_v32  ;;  %v11373_v30 = vld [vmem:[#allocation105_spill] sm:$0xff] }
  0xb7   :  { %1197 = vmatprep.subr.mxu0 %v11368_v18  ;;  %1160 = vmatpush2.msra.mxu1 %v6302_v14  ;;  %v11407_v18 = vld [vmem:[#allocation47_spill] sm:$0xff] }
  0xb8   :  { %1201 = vmatpush1.msra.mxu0 %v11369_v23  ;;  %1162 = vmatprep.subr.mxu1 %v6315_v2  ;;  %v11408_v23 = vand.u32 4294901760, %v11407_v18  ;;  %v11442_v18 = vld [vmem:[#allocation36_spill] sm:$0xff] }
  0xb9   :  { %1205 = vmatprep.subr.mxu0 %v11370_v25  ;;  %1164 = vmatpush2.msra.mxu1 %v6331_v38  ;;  %v11409_v25 = vld [vmem:[#allocation21_spill] sm:$0xff] }
  0xba   :  { %1168 = vmatprep.mubr.f32.mxu1 %v11371_v27  ;;  %1209 = vmatpush1.msra.mxu0 %v11372_v31  ;;  %v11410_v31 = vld [vmem:[#allocation49_spill] sm:$0xff] }
  0xbb   :  { %1172 = vmatmul.mubr.f32.vlgmr.msra.gmra.mxu1 %v11373_v30  ;;  %1213 = vmatprep.subr.mxu0 %v11374_v35  ;;  %v11411_v35 = vand.u32 4294901760, %v11410_v31  ;;  %v11445_v31 = vld [vmem:[#allocation38_spill] sm:$0xff] }
  0xbc   :  { %1444 = vmatprep.subr.mxu1 %v5553_v3  ;;  %1217 = vmatpush1.msra.mxu0 %v11375_v40  ;;  %v11379_v3 = vand.u32 4294901760, %v5740_v6  ;;  %v11412_v40 = vld [vmem:[#allocation22_spill] sm:$0xff] }
  0xbd   :  { %1446 = vmatpush1.msra.mxu1 %v5555_v4  ;;  %1221 = vmatprep.subr.mxu0 %v11376_v45  ;;  %v11380_v4 = vand.u32 4294901760, %v5761_v54  ;;  %v11393_v54 = vand.u32 4294901760, %v11392_v48  ;;  %v11413_v45 = vld [vmem:[#allocation51_spill] sm:$0xff]  ;;  %v11521_v30 = vld [vmem:[#allocation110_spill] sm:$0xff] }
  0xbe   :  { %1448 = vmatprep.subr.mxu1 %v5557_v5  ;;  %1225 = vmatpush1.msra.mxu0 %v11377_v59  ;;  %v11381_v5 = vand.u32 4294901760, %v5774_v63  ;;  %v11395_v63 = vld [vmem:[#allocation39_spill] sm:$0xff]  ;;  %v11414_v59 = vand.u32 4294901760, %v11413_v45  ;;  %v11522_v27 = vand.u32 4294901760, %v11521_v30 }
  0xbf   :  { %1450 = vmatpush1.msra.mxu1 %v5559_v9  ;;  %1229 = vmatprep.subr.mxu0 %v11378_v0  ;;  %v11382_v9 = vand.u32 4294901760, %v5792_v55  ;;  %v11396_v6 = vand.u32 4294901760, %v11395_v63  ;;  %v11397_v55 = vld [vmem:[#allocation17_spill] sm:$0xff]  ;;  %v11415_v0 = vld [vmem:[#allocation23_spill] sm:$0xff] }
  0xc0   :  { %1452 = vmatprep.subr.mxu1 %v5561_v10  ;;  %1233 = vmatpush1.msra.mxu0 %v11379_v3  ;;  %v11383_v10 = vand.u32 4294901760, %v5805_v58  ;;  %v11398_v58 = vld [vmem:[#allocation41_spill] sm:$0xff]  ;;  %v11529_v30 = vld [vmem:[#allocation99_spill] sm:$0xff] }
  0xc1   :  { %1454 = vmatpush1.msra.mxu1 %v5563_v11  ;;  %1237 = vmatprep.subr.mxu0 %v11380_v4  ;;  %v11384_v11 = vand.u32 4294901760, %v5817_v60  ;;  %v11399_v53 = vand.u32 4294901760, %v11398_v58  ;;  %v11416_v3 = vld [vmem:[#allocation53_spill] sm:$0xff] }
  0xc2   :  { %1456 = vmatprep.subr.mxu1 %v5566_v15  ;;  %1241 = vmatpush1.msra.mxu0 %v11381_v5  ;;  %v11385_v15 = vand.u32 4294901760, %v11283_v34  ;;  %v11417_v4 = vand.u32 4294901760, %v11416_v3  ;;  %v11418_v5 = vld [vmem:[#allocation24_spill] sm:$0xff] }
  0xc3   :  { %1458 = vmatpush1.msra.mxu1 %v5568_v16  ;;  %1245 = vmatprep.subr.mxu0 %v11382_v9  ;;  %v11386_v16 = vand.u32 4294901760, %v11285_v51  ;;  %v11404_v51 = vld [vmem:[#allocation45_spill] sm:$0xff]  ;;  %v11419_v9 = vld [vmem:[#allocation55_spill] sm:$0xff] }
  0xc4   :  { %1460 = vmatprep.subr.mxu1 %v5570_v17  ;;  %1249 = vmatpush1.msra.mxu0 %v11383_v10  ;;  %v11387_v17 = vand.u32 4294901760, %v11287_v61  ;;  %v11406_v61 = vld [vmem:[#allocation20_spill] sm:$0xff]  ;;  %v11420_v10 = vand.u32 4294901760, %v11419_v9 }
  0xc5   :  { %1462 = vmatpush1.msra.mxu1 %v5583_v22  ;;  %1253 = vmatprep.subr.mxu0 %v11384_v11  ;;  %v11389_v22 = vld [vmem:[#allocation35_spill] sm:$0xff]  ;;  %v11421_v11 = vld [vmem:[#allocation25_spill] sm:$0xff] }
  0xc6   :  { %1464 = vmatprep.subr.mxu1 %v11282_v26  ;;  %1257 = vmatpush1.msra.mxu0 %v11385_v15  ;;  %v11390_v60 = vand.u32 4294901760, %v11389_v22  ;;  %v11401_v26 = vld [vmem:[#allocation43_spill] sm:$0xff]  ;;  %v11422_v15 = vld [vmem:[#allocation57_spill] sm:$0xff] }
  0xc7   :  { %1466 = vmatpush1.msra.mxu1 %v11284_v56  ;;  %1261 = vmatprep.subr.mxu0 %v11386_v16  ;;  %v11402_v34 = vand.u32 4294901760, %v11401_v26  ;;  %v11403_v56 = vld [vmem:[#allocation19_spill] sm:$0xff]  ;;  %v11423_v16 = vand.u32 4294901760, %v11422_v15 }
  0xc8   :  { %1468 = vmatprep.subr.mxu1 %v11286_v44  ;;  %1265 = vmatpush1.msra.mxu0 %v11387_v17  ;;  %v11405_v44 = vand.u32 4294901760, %v11404_v51  ;;  %v11424_v17 = vld [vmem:[#allocation26_spill] sm:$0xff]  ;;  %v162_v51 = vld [vmem:[#allocation5 + $0x3d0] sm:$0xff] }
  0xc9   :  { %1470 = vmatpush1.msra.mxu1 %v11388_v8  ;;  %1269 = vmatprep.subr.mxu0 %v11390_v60  ;;  %v11425_v8 = vld [vmem:[#allocation59_spill] sm:$0xff]  ;;  %v6693_v3 = vand.u32 4294901760, %v162_v51 }
  0xca   :  { %1472 = vmatprep.subr.mxu1 %v11391_v42  ;;  %1273 = vmatpush1.msra.mxu0 %v11393_v54  ;;  %v11426_v22 = vand.u32 4294901760, %v11425_v8  ;;  %v11427_v60 = vld [vmem:[#allocation27_spill] sm:$0xff]  ;;  %v11428_v42 = vld [vmem:[#allocation61_spill] sm:$0xff]  ;;  %v11430_v54 = vld [vmem:[#allocation28_spill] sm:$0xff] }
  0xcb   :  { %1474 = vmatpush1.msra.mxu1 %v11394_v57  ;;  %1277 = vmatprep.subr.mxu0 %v11396_v6  ;;  %v11429_v48 = vand.u32 4294901760, %v11428_v42  ;;  %v11431_v57 = vld [vmem:[#allocation63_spill] sm:$0xff]  ;;  %v11433_v6 = vld [vmem:[#allocation30_spill] sm:$0xff] }
  0xcc   :  { %1476 = vmatprep.subr.mxu1 %v11397_v55  ;;  %1281 = vmatpush1.msra.mxu0 %v11399_v53  ;;  %v11432_v63 = vand.u32 4294901760, %v11431_v57  ;;  %v11434_v55 = vld [vmem:[#allocation65_spill] sm:$0xff]  ;;  %v11436_v53 = vld [vmem:[#allocation32_spill] sm:$0xff]  ;;  %v147_v8 = vld [vmem:[#allocation5 + $0x358] sm:$0xff] }
  0xcd   :  { %1478 = vmatpush1.msra.mxu1 %v11400_v1  ;;  %1285 = vmatprep.subr.mxu0 %v11402_v34  ;;  %v11435_v58 = vand.u32 4294901760, %v11434_v55  ;;  %v11437_v1 = vld [vmem:[#allocation67_spill] sm:$0xff]  ;;  %v11439_v34 = vld [vmem:[#allocation34_spill] sm:$0xff]  ;;  %v11460_v57 = vld [vmem:[#allocation81_spill] sm:$0xff] }
  0xce   :  { %1480 = vmatprep.subr.mxu1 %v11403_v56  ;;  %1289 = vmatpush1.msra.mxu0 %v11405_v44  ;;  %v11438_v26 = vand.u32 4294901760, %v11437_v1  ;;  %v163_v56 = vld [vmem:[#allocation5 + $0x3d8] sm:$0xff]  ;;  %v11440_v44 = vld [vmem:[#allocation69_spill] sm:$0xff] }
  0xcf   :  { %1482 = vmatpush1.msra.mxu1 %v11406_v61  ;;  %1293 = vmatprep.subr.mxu0 %v11408_v23  ;;  %v11441_v61 = vand.u32 4294901760, %v11440_v44  ;;  %v11443_v23 = vld [vmem:[#allocation71_spill] sm:$0xff]  ;;  %v139_v55 = vld [vmem:[#allocation5 + $0x318] sm:$0xff] }
  0xd0   :  { %1484 = vmatprep.subr.mxu1 %v11409_v25  ;;  %1297 = vmatpush1.msra.mxu0 %v11411_v35  ;;  %v11444_v25 = vand.u32 4294901760, %v11443_v23  ;;  %v155_v35 = vld [vmem:[#allocation5 + $0x398] sm:$0xff] }
  0xd1   :  { %1486 = vmatpush1.msra.mxu1 %v11412_v40  ;;  %1301 = vmatprep.subr.mxu0 %v11414_v59  ;;  %v11446_v40 = vld [vmem:[#allocation73_spill] sm:$0xff]  ;;  %v11448_v59 = vld [vmem:[#allocation40_spill] sm:$0xff] }
  0xd2   :  { %1488 = vmatprep.subr.mxu1 %v11415_v0  ;;  %1305 = vmatpush1.msra.mxu0 %v11417_v4  ;;  %v11447_v45 = vand.u32 4294901760, %v11446_v40  ;;  %v6691_v0 = vand.u32 4294901760, %v163_v56  ;;  %v154_v4 = vld [vmem:[#allocation5 + $0x390] sm:$0xff]  ;;  %v131_v40 = vld [vmem:[#allocation5 + $0x2d8] sm:$0xff] }
  0xd3   :  { %1490 = vmatpush1.msra.mxu1 %v11418_v5  ;;  %1309 = vmatprep.subr.mxu0 %v11420_v10  ;;  %v11449_v5 = vld [vmem:[#allocation75_spill] sm:$0xff]  ;;  %v11451_v10 = vld [vmem:[#allocation42_spill] sm:$0xff] }
  0xd4   :  { %1492 = vmatprep.subr.mxu1 %v11421_v11  ;;  %1313 = vmatpush2.msra.mxu0 %v11423_v16  ;;  %v11450_v9 = vand.u32 4294901760, %v11449_v5  ;;  %v11452_v11 = vld [vmem:[#allocation77_spill] sm:$0xff]  ;;  %v11454_v16 = vld [vmem:[#allocation44_spill] sm:$0xff] }
  0xd5   :  { %1494 = vmatpush1.msra.mxu1 %v11424_v17  ;;  %1317 = vmatprep.subr.mxu0 %v11426_v22  ;;  %v11453_v15 = vand.u32 4294901760, %v11452_v11  ;;  %v6701_v17 = vand.u32 4294901760, %v155_v35  ;;  %v146_v22 = vld [vmem:[#allocation5 + $0x350] sm:$0xff] }
  0xd6   :  { %1496 = vmatprep.subr.mxu1 %v11427_v60  ;;  %1321 = vmatpush2.msra.mxu0 %v11429_v48  ;;  %v11456_v60 = vld [vmem:[#allocation79_spill] sm:$0xff]  ;;  %v11458_v48 = vld [vmem:[#allocation46_spill] sm:$0xff]  ;;  %v6722_v44 = vand.u32 4294901760, %v146_v22  ;;  %v122_v11 = vld [vmem:[#allocation5 + $0x290] sm:$0xff] }
  0xd7   :  { %1498 = vmatpush1.msra.mxu1 %v11430_v54  ;;  %1325 = vmatprep.subr.mxu0 %v11432_v63  ;;  %11455 = vst [vmem:[#allocation11_spill] sm:$0xff] %v6701_v17  ;;  %v11457_v42 = vand.u32 4294901760, %v11456_v60  ;;  %v6706_v54 = vand.u32 4294901760, %v154_v4  ;;  %v11461_v63 = vand.u32 4294901760, %v11460_v57  ;;  %v6757_v60 = vand.u32 4294901760, %v131_v40 }
  0xd8   :  { %1500 = vmatprep.subr.mxu1 %v11433_v6  ;;  %1329 = vmatpush2.msra.mxu0 %v11435_v58  ;;  %v6712_v6 = vsub.f32 %v162_v51, %v6693_v3  ;;  %v6715_v58 = vsub.f32 %v163_v56, %v6691_v0  ;;  %11466 = vst [vmem:[#allocation31_spill] sm:$0xff] %v6722_v44  ;;  %v11469_v56 = vld [vmem:[#allocation86_spill] sm:$0xff] }
  0xd9   :  { %1502 = vmatpush1.msra.mxu1 %v11436_v53  ;;  %1333 = vmatprep.subr.mxu0 %v11438_v26  ;;  %11459 = vst [vmem:[#allocation29_spill] sm:$0xff] %v6706_v54  ;;  %v11462_v53 = vld [vmem:[#allocation83_spill] sm:$0xff]  ;;  %v11464_v26 = vld [vmem:[#allocation50_spill] sm:$0xff]  ;;  %v11470_v51 = vand.u32 4294901760, %v11469_v56  ;;  %11481 = vst [vmem:[#allocation54_spill] sm:$0xff] %v6757_v60 }
  0xda   :  { %1504 = vmatprep.subr.mxu1 %v11439_v34  ;;  %1337 = vmatpush2.msra.mxu0 %v11441_v61  ;;  %v11463_v1 = vand.u32 4294901760, %v11462_v53  ;;  %v6720_v34 = vand.u32 4294901760, %v147_v8  ;;  %v138_v61 = vld [vmem:[#allocation5 + $0x310] sm:$0xff]  ;;  %v11486_v53 = vld [vmem:[#allocation94_spill] sm:$0xff]  ;;  %v11490_v56 = vld [vmem:[#allocation95_spill] sm:$0xff] }
  0xdb   :  { %1506 = vmatpush1.msra.mxu1 %v11442_v18  ;;  %1341 = vmatprep.subr.mxu0 %v11444_v25  ;;  %v11467_v18 = vld [vmem:[#allocation85_spill] sm:$0xff]  ;;  %v6734_v25 = vsub.f32 %v154_v4, %v6706_v54  ;;  %v6749_v4 = vsub.f32 %v146_v22, %v6722_v44 }
  0xdc   :  { %1508 = vmatprep.subr.mxu1 %v11445_v31  ;;  %1345 = vmatpush2.msra.mxu0 %v11447_v45  ;;  %11465 = vst [vmem:[#allocation12_spill] sm:$0xff] %v6720_v34  ;;  %v11468_v23 = vand.u32 4294901760, %v11467_v18  ;;  %v6736_v31 = vand.u32 4294901760, %v139_v55  ;;  %v130_v45 = vld [vmem:[#allocation5 + $0x2d0] sm:$0xff]  ;;  %v115_v18 = vld [vmem:[#allocation5 + $0x258] sm:$0xff] }
  0xdd   :  { %1510 = vmatpush2.msra.mxu1 %v11448_v59  ;;  %1349 = vmatprep.subr.mxu0 %v11450_v9  ;;  %v11472_v59 = vld [vmem:[#allocation87_spill] sm:$0xff]  ;;  %v10547_v9 = vand.u32 4294901760, %v6712_v6  ;;  %11477 = vst [vmem:[#allocation48_spill] sm:$0xff] %v6749_v4 }
  0xde   :  { %1512 = vmatprep.subr.mxu1 %v11451_v10  ;;  %1353 = vmatpush2.msra.mxu0 %v11453_v15  ;;  %11471 = vst [vmem:[#allocation13_spill] sm:$0xff] %v6736_v31  ;;  %v11473_v5 = vand.u32 4294901760, %v11472_v59  ;;  %v11475_v10 = vld [vmem:[#allocation89_spill] sm:$0xff]  ;;  %v6752_v15 = vsub.f32 %v147_v8, %v6720_v34  ;;  %v10545_v8 = vand.u32 4294901760, %v6734_v25  ;;  %v6767_v22 = vsub.f32 %v139_v55, %v6736_v31 }
  0xdf   :  { %1514 = vmatpush2.msra.mxu1 %v11454_v16  ;;  %1357 = vmatprep.subr.mxu0 %v11457_v42  ;;  %v11479_v16 = vld [vmem:[#allocation91_spill] sm:$0xff]  ;;  %v6759_v42 = vand.u32 4294901760, %v130_v45  ;;  %v6785_v55 = vand.u32 4294901760, %v122_v11  ;;  %v10549_v59 = vand.u32 4294901760, %v6749_v4 }
  0xe0   :  { %1516 = vmatprep.subr.mxu1 %v11458_v48  ;;  %1361 = vmatpush2.msra.mxu0 %v11461_v63  ;;  %11478 = vst [vmem:[#allocation52_spill] sm:$0xff] %v6752_v15  ;;  %v123_v48 = vld [vmem:[#allocation5 + $0x298] sm:$0xff]  ;;  %11485 = vst [vmem:[#allocation58_spill] sm:$0xff] %v6767_v22 }
  0xe1   :  { %1518 = vmatpush2.msra.mxu1 %v11336_v12  ;;  %1365 = vmatprep.subr.mxu0 %v11463_v1  ;;  %v6728_v12 = vsub.f32 %v155_v35, %v6701_v17  ;;  %v10550_v35 = vand.u32 4294901760, %v6715_v58  ;;  %11482 = vst [vmem:[#allocation56_spill] sm:$0xff] %v6759_v42  ;;  %v11487_v1 = vand.u32 4294901760, %v11486_v53  ;;  %11489 = vst [vmem:[#allocation62_spill] sm:$0xff] %v6785_v55 }
  0xe2   :  { %1520 = vmatprep.subr.mxu1 %v11464_v26  ;;  %1369 = vmatpush2.msra.mxu0 %v11468_v23  ;;  %v114_v23 = vld [vmem:[#allocation5 + $0x250] sm:$0xff] }
  0xe3   :  { %1522 = vmatpush2.msra.mxu1 %v11340_v49  ;;  %1373 = vmatprep.subr.mxu0 %v11470_v51  ;;  %v6741_v49 = vand.u32 4294901760, %v138_v61  ;;  %v10546_v57 = vand.u32 4294901760, %v6728_v12  ;;  %v6778_v26 = vsub.f32 %v6715_v58, %v10550_v35  ;;  %v11491_v51 = vand.u32 4294901760, %v11490_v56  ;;  %v11509_v35 = vld [vmem:[#allocation106_spill] sm:$0xff] }
  0xe4   :  { %1524 = vmatprep.subr.mxu1 %v11342_v28  ;;  %1377 = vmatpush2.msra.mxu0 %v11473_v5  ;;  %v11476_v28 = vand.u32 4294901760, %v11475_v10  ;;  %v11493_v5 = vld [vmem:[#allocation96_spill] sm:$0xff]  ;;  %v6818_v53 = vand.u32 4294901760, %v114_v23  ;;  %v10551_v56 = vand.u32 4294901760, %v6767_v22 }
  0xe5   :  { %1526 = vmatpush2.msra.mxu1 %v11344_v52  ;;  %11474 = vst [vmem:[#allocation33_spill] sm:$0xff] %v6741_v49  ;;  %v11480_v52 = vand.u32 4294901760, %v11479_v16  ;;  %v11494_v10 = vand.u32 4294901760, %v11493_v5  ;;  %v6803_v16 = vsub.f32 %v6728_v12, %v10546_v57  ;;  %v98_v57 = vld [vmem:[#allocation5 + $0x1d0] sm:$0xff]  ;;  %v11513_v5 = vld [vmem:[#allocation107_spill] sm:$0xff] }
  0xe6   :  { %1381 = vmatprep.subr.mxu0 %v11476_v28  ;;  %1528 = vmatprep.subr.mxu1 %v11346_v19  ;;  %v11483_v19 = vld [vmem:[#allocation93_spill] sm:$0xff]  ;;  %v6798_v28 = vsub.f32 %v130_v45, %v6759_v42  ;;  %v6816_v45 = vand.u32 4294901760, %v115_v18  ;;  %11500 = vst [vmem:[#allocation72_spill] sm:$0xff] %v6818_v53 }
  0xe7   :  { %1385 = vmatpush2.msra.mxu0 %v11480_v52  ;;  %1530 = vmatpush2.msra.mxu1 %v11347_v29  ;;  %v11484_v63 = vand.u32 4294901760, %v11483_v19  ;;  %v6773_v29 = vsub.f32 %v138_v61, %v6741_v49  ;;  %v10548_v61 = vand.u32 4294901760, %v6752_v15  ;;  %v6806_v52 = vsub.f32 %v131_v40, %v6757_v60  ;;  %v11497_v19 = vld [vmem:[#allocation98_spill] sm:$0xff] }
  0xe8   :  { %1532 = vmatprep.subr.mxu1 %v11349_v21  ;;  %v6783_v21 = vsub.f32 %v6712_v6, %v10547_v9  ;;  %11495 = vst [vmem:[#allocation66_spill] sm:$0xff] %v6798_v28  ;;  %11499 = vst [vmem:[#allocation70_spill] sm:$0xff] %v6816_v45 }
  0xe9   :  { %1389 = vmatprep.subr.mxu0 %v11484_v63  ;;  %1534 = vmatpush2.msra.mxu1 %v11350_v41  ;;  %11488 = vst [vmem:[#allocation60_spill] sm:$0xff] %v6773_v29  ;;  %v6790_v41 = vand.u32 4294901760, %v123_v48  ;;  %11496 = vst [vmem:[#allocation68_spill] sm:$0xff] %v6806_v52  ;;  %v11498_v63 = vand.u32 4294901760, %v11497_v19  ;;  %v10552_v19 = vand.u32 4294901760, %v6773_v29 }
  0xea   :  { %1393 = vmatpush2.msra.mxu0 %v11487_v1  ;;  %1536 = vmatprep.subr.mxu1 %v11351_v7  ;;  %v106_v7 = vld [vmem:[#allocation5 + $0x210] sm:$0xff]  ;;  %v107_v1 = vld [vmem:[#allocation5 + $0x218] sm:$0xff] }
  0xeb   :  { %1397 = vmatprep.subr.mxu0 %v11491_v51  ;;  %11492 = vst [vmem:[#allocation64_spill] sm:$0xff] %v6790_v41  ;;  %1538 = vmatpush2.msra.mxu1 %v11352_v24  ;;  %v6814_v24 = vsub.f32 %v6734_v25, %v10545_v8  ;;  %v11501_v51 = vld [vmem:[#allocation101_spill] sm:$0xff]  ;;  %v6846_v9 = vsub.f32 %v123_v48, %v6790_v41  ;;  %v11524_v48 = vand.u32 4294901760, %v6806_v52 }
  0xec   :  { %1401 = vmatpush2.msra.mxu0 %v11494_v10  ;;  %1540 = vmatprep.subr.mxu1 %v11353_v50  ;;  %v11502_v40 = vand.u32 4294901760, %v11501_v51  ;;  %v6827_v10 = vsub.f32 %v122_v11, %v6785_v55  ;;  %v6836_v51 = vsub.f32 %v6752_v15, %v10548_v61  ;;  %v99_v11 = vld [vmem:[#allocation5 + $0x1d8] sm:$0xff]  ;;  %v11510_v50 = vand.u32 4294901760, %v11509_v35  ;;  %v11515_v35 = vld [vmem:[#allocation80_spill] sm:$0xff] }
  0xed   :  { %1405 = vmatprep.subr.mxu0 %v11498_v63  ;;  %1542 = vmatpush2.msra.mxu1 %v11354_v39  ;;  %v11504_v63 = vld [vmem:[#allocation103_spill] sm:$0xff]  ;;  %v6841_v39 = vsub.f32 %v6749_v4, %v10549_v59  ;;  %11507 = vst [vmem:[#allocation78_spill] sm:$0xff] %v6846_v9  ;;  %v11514_v59 = vand.u32 4294901760, %v11513_v5  ;;  %v11519_v61 = vld [vmem:[#allocation82_spill] sm:$0xff] }
  0xee   :  { %1409 = vmatpush2.msra.mxu0 %v11502_v40  ;;  %11503 = vst [vmem:[#allocation74_spill] sm:$0xff] %v6827_v10  ;;  %v11505_v8 = vand.u32 4294901760, %v11504_v63  ;;  %1544 = vmatprep.subr.mxu1 %v11355_v36  ;;  %v6843_v40 = vand.u32 4294901760, %v106_v7  ;;  %v6852_v63 = vand.u32 4294901760, %v107_v1  ;;  %v6869_v36 = vsub.f32 %v115_v18, %v6816_v45 }
  0xef   :  { %1546 = vmatpush2.msra.mxu1 %v11356_v46  ;;  %v6866_v46 = vsub.f32 %v6767_v22, %v10551_v56  ;;  %v91_v56 = vld [vmem:[#allocation5 + $0x198] sm:$0xff]  ;;  %v11518_v18 = vand.u32 4294901760, %v6419_v33  ;;  %v6899_v33 = vsub.f32 %v6806_v52, %v11524_v48  ;;  %v74_v22 = vld [vmem:[#allocation5 + $0x110] sm:$0xff] }
  0xf0   :  { %1413 = vmatprep.subr.mxu0 %v11505_v8  ;;  %11506 = vst [vmem:[#allocation76_spill] sm:$0xff] %v6843_v40  ;;  %v11508_v8 = vand.u32 4294901760, %v6380_v13  ;;  %1548 = vmatprep.subr.mxu1 %v11357_v47  ;;  %v6861_v13 = vsub.f32 %v114_v23, %v6818_v53  ;;  %11512 = vst [vmem:[#allocation90_spill] sm:$0xff] %v6869_v36  ;;  %v6877_v47 = vsub.f32 %v6773_v29, %v10552_v19  ;;  %v11523_v29 = vld [vmem:[#allocation97_spill] sm:$0xff]  ;;  %v75_v52 = vld [vmem:[#allocation5 + $0x118] sm:$0xff] }
  0xf1   :  { %1550 = vmatpush2.msra.mxu1 %v11515_v35  ;;  %v6879_v23 = vand.u32 4294901760, %v99_v11  ;;  %v6890_v35 = vsub.f32 %v106_v7, %v6843_v40  ;;  %1435 = vmatprep.mubr.f32.mxu0 %v11523_v29  ;;  %v83_v7 = vld [vmem:[#allocation5 + $0x158] sm:$0xff]  ;;  %v6909_v19 = vsub.f32 %v107_v1, %v6852_v63  ;;  %v6914_v48 = vand.u32 4294901760, %v91_v56 }
  0xf2   :  { %1417 = vmatpush2.msra.mxu0 %v11508_v8  ;;  %11511 = vst [vmem:[#allocation88_spill] sm:$0xff] %v6861_v13  ;;  %v90_v8 = vld [vmem:[#allocation5 + $0x190] sm:$0xff]  ;;  %1552 = vmatprep.subr.mxu1 %v11519_v61  ;;  %v11525_v61 = vand.u32 4294901760, %v6798_v28 }
  0xf3   :  { %1421 = vmatprep.subr.mxu0 %v11510_v50  ;;  %11516 = vst [vmem:[#allocation92_spill] sm:$0xff] %v6879_v23  ;;  %v6881_v50 = vand.u32 4294901760, %v98_v57  ;;  %11520 = vst [vmem:[#allocation35_spill] sm:$0xff] %v6890_v35  ;;  %v6906_v5 = vand.u32 4294901760, %v90_v8  ;;  %v6930_v15 = vsub.f32 %v99_v11, %v6879_v23  ;;  %v6964_v11 = vand.u32 4294901760, %v74_v22  ;;  %1572 = vmatprep.mubr.f32.mxu1 %v11523_v29 }
  0xf4   :  { %1425 = vmatpush2.msra.mxu0 %v11514_v59  ;;  %v82_v59 = vld [vmem:[#allocation5 + $0x150] sm:$0xff]  ;;  %11527 = vst [vmem:[#allocation37_spill] sm:$0xff] %v6909_v19  ;;  %11530 = vst [vmem:[#allocation16_spill] sm:$0xff] %v6914_v48 }
  0xf5   :  { %11517 = vst [vmem:[#allocation14_spill] sm:$0xff] %v6881_v50  ;;  %1429 = vmatprep.subr.mxu0 %v11518_v18  ;;  %v6904_v18 = vsub.f32 %v6798_v28, %v11525_v61  ;;  %11526 = vst [vmem:[#allocation15_spill] sm:$0xff] %v6906_v5  ;;  %v6922_v1 = vsub.f32 %v98_v57, %v6881_v50  ;;  %v6939_v57 = vand.u32 4294901760, %v83_v7  ;;  %v6941_v61 = vand.u32 4294901760, %v82_v59 }
  0xf6   :  { %1433 = vmatpush2.msra.mxu0 %v11522_v27  ;;  %v11528_v27 = vld [vmem:[#allocation84_spill] sm:$0xff]  ;;  %11533 = vst [vmem:[#allocation17_spill] sm:$0xff] %v6930_v15  ;;  %11540 = vst [vmem:[#allocation19_spill] sm:$0xff] %v6964_v11 }
  0xf7   :  { %1554 = vmatpush2.msra.mxu1 %v11528_v27  ;;  %1437 = vmatmul.mubr.f32.vlgmr.msra.gmra.mxu0 %v11529_v30  ;;  %11531 = vst [vmem:[#allocation39_spill] sm:$0xff] %v6922_v1  ;;  %v11532_v27 = vand.u32 4294901760, %v6827_v10  ;;  %11535 = vst [vmem:[#allocation41_spill] sm:$0xff] %v6939_v57 }
  0xf8   :  { %1556 = vmatprep.subr.mxu1 %v6236_v43  ;;  %1581 = vmatprep.subr.mxu0 %v6691_v0  ;;  %v11534_v43 = vand.u32 4294901760, %v6846_v9  ;;  %11536 = vst [vmem:[#allocation18_spill] sm:$0xff] %v6941_v61 }
  0xf9   :  { %v6927_v4 = vsub.f32 %v6827_v10, %v11532_v27  ;;  %1558 = vmatpush2.msra.mxu1 %v6247_v37  ;;  %1583 = vmatpush1.msra.mxu0 %v6693_v3  ;;  %v6949_v10 = vsub.f32 %v90_v8, %v6906_v5  ;;  %v67_v8 = vld [vmem:[#allocation5 + $0xd8] sm:$0xff] }
  0xfa   :  { %v6937_v28 = vsub.f32 %v6846_v9, %v11534_v43  ;;  %1560 = vmatprep.subr.mxu1 %v11363_v20  ;;  %1585 = vmatprep.subr.mxu0 %v6701_v17  ;;  %v11538_v9 = vand.u32 4294901760, %v6869_v36  ;;  %v11539_v20 = vand.u32 4294901760, %v6861_v13  ;;  %v66_v17 = vld [vmem:[#allocation5 + $0xd0] sm:$0xff]  ;;  %v6967_v43 = vsub.f32 %v91_v56, %v6914_v48 }
  0xfb   :  { %11537 = vst [vmem:[#allocation43_spill] sm:$0xff] %v6949_v10  ;;  %1562 = vmatpush2.msra.mxu1 %v11365_v62  ;;  %1587 = vmatpush1.msra.mxu0 %v6706_v54  ;;  %v6980_v56 = vsub.f32 %v82_v59, %v6941_v61  ;;  %v58_v62 = vld [vmem:[#allocation5 + $0x90] sm:$0xff]  ;;  %v6988_v54 = vsub.f32 %v83_v7, %v6939_v57  ;;  %v6997_v59 = vand.u32 4294901760, %v67_v8 }
  0xfc   :  { %v6957_v27 = vsub.f32 %v6869_v36, %v11538_v9  ;;  %v6962_v37 = vsub.f32 %v6861_v13, %v11539_v20  ;;  %11541 = vst [vmem:[#allocation45_spill] sm:$0xff] %v6967_v43  ;;  %1564 = vmatprep.subr.mxu1 %v11367_v32  ;;  %1589 = vmatprep.subr.mxu0 %v6720_v34  ;;  %v6972_v9 = vand.u32 4294901760, %v75_v52  ;;  %v11544_v32 = vand.u32 4294901760, %v6890_v35  ;;  %v59_v36 = vld [vmem:[#allocation5 + $0x98] sm:$0xff] }
  0xfd   :  { %1566 = vmatpush2.msra.mxu1 %v6302_v14  ;;  %1591 = vmatpush1.msra.mxu0 %v6722_v44  ;;  %11543 = vst [vmem:[#allocation47_spill] sm:$0xff] %v6980_v56  ;;  %11545 = vst [vmem:[#allocation21_spill] sm:$0xff] %v6988_v54  ;;  %v11546_v14 = vand.u32 4294901760, %v6909_v19  ;;  %v6999_v20 = vand.u32 4294901760, %v66_v17  ;;  %v7022_v7 = vand.u32 4294901760, %v58_v62  ;;  %v7048_v44 = vsub.f32 %v67_v8, %v6997_v59 }
  0xfe   :  { %11542 = vst [vmem:[#allocation20_spill] sm:$0xff] %v6972_v9  ;;  %v6985_v34 = vsub.f32 %v6890_v35, %v11544_v32  ;;  %1568 = vmatprep.subr.mxu1 %v6315_v2  ;;  %1593 = vmatprep.subr.mxu0 %v6736_v31  ;;  %11547 = vst [vmem:[#allocation49_spill] sm:$0xff] %v6997_v59  ;;  %v7007_v35 = vsub.f32 %v74_v22, %v6964_v11  ;;  %v11550_v31 = vand.u32 4294901760, %v6930_v15  ;;  %v51_v22 = vld [vmem:[#allocation5 + $0x58] sm:$0xff] }
  0xff   :  { %v6995_v13 = vsub.f32 %v6909_v19, %v11546_v14  ;;  %11548 = vst [vmem:[#allocation22_spill] sm:$0xff] %v6999_v20  ;;  %1570 = vmatpush2.msra.mxu1 %v6331_v38  ;;  %1595 = vmatpush1.msra.mxu0 %v6741_v49  ;;  %v11551_v38 = vand.u32 4294901760, %v6922_v1  ;;  %11552 = vst [vmem:[#allocation23_spill] sm:$0xff] %v7022_v7  ;;  %v50_v19 = vld [vmem:[#allocation5 + $0x50] sm:$0xff]  ;;  %v7025_v14 = vsub.f32 %v75_v52, %v6972_v9 }
 0x100   :  { %11549 = vst [vmem:[#allocation51_spill] sm:$0xff] %v7007_v35  ;;  %1574 = vmatmul.mubr.f32.vlgmr.msra.gmra.mxu1 %v11529_v30  ;;  %v7015_v32 = vsub.f32 %v6930_v15, %v11550_v31  ;;  %1597 = vmatprep.subr.mxu0 %v6757_v60  ;;  %v11554_v49 = vand.u32 4294901760, %v6778_v26  ;;  %v7031_v15 = vand.u32 4294901760, %v59_v36  ;;  %v7040_v60 = vsub.f32 %v66_v17, %v6999_v20  ;;  %v42_v31 = vld [vmem:[#allocation5 + $0x10] sm:$0xff] }
 0x101   :  { %v7020_v2 = vsub.f32 %v6922_v1, %v11551_v38  ;;  %11553 = vst [vmem:[#allocation53_spill] sm:$0xff] %v7025_v14  ;;  %1599 = vmatpush1.msra.mxu0 %v6759_v42  ;;  %v11556_v1 = vand.u32 4294901760, %v6783_v21  ;;  %11559 = vst [vmem:[#allocation25_spill] sm:$0xff] %v7048_v44  ;;  %v11560_v38 = vand.u32 4294901760, %v6803_v16  ;;  %v11561_v21 = vand.u32 4294901760, %v6967_v43  ;;  %v290_v16 = vld [vmem:[#allocation5 + $0x7d0] sm:$0xff]  ;;  %2110 = vmatprep.mubr.f32.mxu1 %v11523_v29 }
 0x102   :  { %1730 = vmatprep.subr.mxu1 %v11554_v49  ;;  %11555 = vst [vmem:[#allocation24_spill] sm:$0xff] %v7031_v15  ;;  %11557 = vst [vmem:[#allocation55_spill] sm:$0xff] %v7040_v60  ;;  %v11558_v49 = vand.u32 4294901760, %v6949_v10  ;;  %1601 = vmatprep.subr.mxu0 %v6790_v41  ;;  %v7058_v17 = vand.u32 4294901760, %v51_v22  ;;  %v7060_v52 = vand.u32 4294901760, %v50_v19  ;;  %v11564_v8 = vand.u32 4294901760, %v6814_v24 }
 0x103   :  { %1736 = vmatpush1.msra.mxu1 %v11556_v1  ;;  %v7056_v1 = vsub.f32 %v6967_v43, %v11561_v21  ;;  %1603 = vmatpush1.msra.mxu0 %v6785_v55  ;;  %v7069_v41 = vsub.f32 %v58_v62, %v7022_v7  ;;  %v11566_v43 = vand.u32 4294901760, %v6836_v51  ;;  %v11568_v24 = vand.u32 4294901760, %v6980_v56  ;;  %v291_v62 = vld [vmem:[#allocation5 + $0x7d8] sm:$0xff]  ;;  %v11711_v29 = vld [vmem:[#allocation33_spill] sm:$0xff] }
 0x104   :  { %v7045_v26 = vsub.f32 %v6949_v10, %v11558_v49  ;;  %1742 = vmatprep.subr.mxu1 %v11560_v38  ;;  %11562 = vst [vmem:[#allocation57_spill] sm:$0xff] %v7058_v17  ;;  %11563 = vst [vmem:[#allocation26_spill] sm:$0xff] %v7060_v52  ;;  %v43_v49 = vld [vmem:[#allocation5 + $0x18] sm:$0xff]  ;;  %1605 = vmatprep.subr.mxu0 %v6816_v45  ;;  %v11567_v10 = vand.u32 4294901760, %v6988_v54  ;;  %v7085_v38 = vand.u32 4294901760, %v42_v31  ;;  %v11571_v51 = vand.u32 4294901760, %v6841_v39 }
 0x105   :  { %1748 = vmatpush1.msra.mxu1 %v11564_v8  ;;  %11565 = vst [vmem:[#allocation59_spill] sm:$0xff] %v7069_v41  ;;  %v7083_v8 = vsub.f32 %v6980_v56, %v11568_v24  ;;  %v7088_v21 = vsub.f32 %v59_v36, %v7031_v15  ;;  %1607 = vmatpush1.msra.mxu0 %v6818_v53  ;;  %v11573_v56 = vand.u32 4294901760, %v6866_v46  ;;  %v11575_v39 = vand.u32 4294901760, %v7007_v35 }
 0x106   :  { %1754 = vmatprep.subr.mxu1 %v11566_v43  ;;  %v7078_v55 = vsub.f32 %v6988_v54, %v11567_v10  ;;  %11569 = vst [vmem:[#allocation27_spill] sm:$0xff] %v7085_v38  ;;  %v7094_v43 = vand.u32 4294901760, %v43_v49  ;;  %1609 = vmatprep.subr.mxu0 %v6852_v63  ;;  %v7103_v53 = vsub.f32 %v50_v19, %v7060_v52  ;;  %v283_v10 = vld [vmem:[#allocation5 + $0x798] sm:$0xff]  ;;  %v282_v54 = vld [vmem:[#allocation5 + $0x790] sm:$0xff]  ;;  %v11577_v46 = vand.u32 4294901760, %v6877_v47 }
 0x107   :  { %11570 = vst [vmem:[#allocation61_spill] sm:$0xff] %v7088_v21  ;;  %1760 = vmatpush1.msra.mxu1 %v11571_v51  ;;  %v7108_v51 = vsub.f32 %v7007_v35, %v11575_v39  ;;  %v7111_v45 = vsub.f32 %v51_v22, %v7058_v17  ;;  %1611 = vmatpush1.msra.mxu0 %v6843_v40  ;;  %v7121_v36 = vand.u32 4294901760, %v291_v62  ;;  %v7123_v24 = vand.u32 4294901760, %v290_v16  ;;  %v275_v40 = vld [vmem:[#allocation5 + $0x758] sm:$0xff] }
 0x108   :  { %11572 = vst [vmem:[#allocation28_spill] sm:$0xff] %v7094_v43  ;;  %1766 = vmatprep.subr.mxu1 %v11573_v56  ;;  %11574 = vst [vmem:[#allocation63_spill] sm:$0xff] %v7103_v53  ;;  %v11578_v56 = vand.u32 4294901760, %v7025_v14  ;;  %1613 = vmatprep.subr.mxu0 %v6879_v23  ;;  %v11581_v22 = vand.u32 4294901760, %v6899_v33  ;;  %v11583_v35 = vand.u32 4294901760, %v6904_v18  ;;  %v11584_v39 = vand.u32 4294901760, %v7048_v44 }
 0x109   :  { %11576 = vst [vmem:[#allocation30_spill] sm:$0xff] %v7111_v45  ;;  %1772 = vmatpush1.msra.mxu1 %v11577_v46  ;;  %11579 = vst [vmem:[#allocation65_spill] sm:$0xff] %v7121_v36  ;;  %v7132_v46 = vsub.f32 %v42_v31, %v7085_v38  ;;  %1615 = vmatpush1.msra.mxu0 %v6881_v50  ;;  %v11585_v33 = vand.u32 4294901760, %v7040_v60  ;;  %v7148_v47 = vand.u32 4294901760, %v283_v10  ;;  %v7150_v31 = vand.u32 4294901760, %v282_v54  ;;  %v267_v50 = vld [vmem:[#allocation5 + $0x718] sm:$0xff] }
 0x10a   :  { %v7119_v19 = vsub.f32 %v7025_v14, %v11578_v56  ;;  %11580 = vst [vmem:[#allocation32_spill] sm:$0xff] %v7123_v24  ;;  %1778 = vmatprep.subr.mxu1 %v11581_v22  ;;  %v7141_v23 = vsub.f32 %v7048_v44, %v11584_v39  ;;  %v274_v56 = vld [vmem:[#allocation5 + $0x750] sm:$0xff]  ;;  %1617 = vmatprep.subr.mxu0 %v6914_v48  ;;  %v11590_v44 = vand.u32 4294901760, %v6927_v4  ;;  %v11594_v39 = vand.u32 4294901760, %v6957_v27 }
 0x10b   :  { %11582 = vst [vmem:[#allocation67_spill] sm:$0xff] %v7132_v46  ;;  %1784 = vmatpush1.msra.mxu1 %v11583_v35  ;;  %v7146_v22 = vsub.f32 %v7040_v60, %v11585_v33  ;;  %11586 = vst [vmem:[#allocation34_spill] sm:$0xff] %v7148_v47  ;;  %v11588_v35 = vand.u32 4294901760, %v6937_v28  ;;  %v7159_v33 = vsub.f32 %v43_v49, %v7094_v43  ;;  %v266_v60 = vld [vmem:[#allocation5 + $0x710] sm:$0xff]  ;;  %1619 = vmatpush1.msra.mxu0 %v6906_v5 }
 0x10c   :  { %11587 = vst [vmem:[#allocation69_spill] sm:$0xff] %v7150_v31  ;;  %v7166_v28 = vsub.f32 %v290_v16, %v7123_v24  ;;  %v7174_v49 = vsub.f32 %v291_v62, %v7121_v36  ;;  %1621 = vmatprep.subr.mxu0 %v6939_v57  ;;  %v7184_v16 = vand.u32 4294901760, %v275_v40  ;;  %v7186_v48 = vand.u32 4294901760, %v274_v56  ;;  %v259_v57 = vld [vmem:[#allocation5 + $0x6d8] sm:$0xff] }
 0x10d   :  { %1790 = vmatprep.subr.mxu1 %v11588_v35  ;;  %11589 = vst [vmem:[#allocation36_spill] sm:$0xff] %v7159_v33  ;;  %v11592_v35 = vand.u32 4294901760, %v7069_v41  ;;  %1623 = vmatpush1.msra.mxu0 %v6941_v61  ;;  %v11598_v62 = vand.u32 4294901760, %v6962_v37  ;;  %v11601_v5 = vand.u32 4294901760, %v6995_v13  ;;  %v11603_v37 = vand.u32 4294901760, %v7103_v53 }
 0x10e   :  { %1796 = vmatpush1.msra.mxu1 %v11590_v44  ;;  %11591 = vst [vmem:[#allocation71_spill] sm:$0xff] %v7166_v28  ;;  %11593 = vst [vmem:[#allocation38_spill] sm:$0xff] %v7174_v49  ;;  %v11595_v44 = vand.u32 4294901760, %v7088_v21  ;;  %1625 = vmatprep.subr.mxu0 %v6972_v9  ;;  %v7212_v27 = vand.u32 4294901760, %v267_v50  ;;  %v11605_v13 = vand.u32 4294901760, %v6985_v34  ;;  %v7229_v34 = vsub.f32 %v274_v56, %v7186_v48  ;;  %v251_v9 = vld [vmem:[#allocation5 + $0x698] sm:$0xff] }
 0x10f   :  { %v7171_v18 = vsub.f32 %v7069_v41, %v11592_v35  ;;  %1802 = vmatprep.subr.mxu1 %v11594_v39  ;;  %11596 = vst [vmem:[#allocation73_spill] sm:$0xff] %v7184_v16  ;;  %11597 = vst [vmem:[#allocation40_spill] sm:$0xff] %v7186_v48  ;;  %v7195_v39 = vsub.f32 %v282_v54, %v7150_v31  ;;  %v11602_v35 = vand.u32 4294901760, %v7111_v45  ;;  %v258_v41 = vld [vmem:[#allocation5 + $0x6d0] sm:$0xff]  ;;  %1627 = vmatpush1.msra.mxu0 %v6964_v11 }
 0x110   :  { %v7182_v4 = vsub.f32 %v7088_v21, %v11595_v44  ;;  %1808 = vmatpush1.msra.mxu1 %v11598_v62  ;;  %v7197_v44 = vand.u32 4294901760, %v266_v60  ;;  %v7210_v62 = vsub.f32 %v7103_v53, %v11603_v37  ;;  %11604 = vst [vmem:[#allocation77_spill] sm:$0xff] %v7212_v27  ;;  %v7222_v37 = vsub.f32 %v283_v10, %v7148_v47  ;;  %v250_v53 = vld [vmem:[#allocation5 + $0x690] sm:$0xff] }
 0x111   :  { %11599 = vst [vmem:[#allocation75_spill] sm:$0xff] %v7195_v39  ;;  %1814 = vmatprep.subr.mxu1 %v11601_v5  ;;  %v7205_v61 = vsub.f32 %v7111_v45, %v11602_v35  ;;  %1629 = vmatprep.subr.mxu0 %v6997_v59  ;;  %v11607_v54 = vand.u32 4294901760, %v7015_v32  ;;  %11608 = vst [vmem:[#allocation79_spill] sm:$0xff] %v7229_v34  ;;  %v7237_v10 = vsub.f32 %v275_v40, %v7184_v16  ;;  %v242_v59 = vld [vmem:[#allocation5 + $0x650] sm:$0xff] }
 0x112   :  { %11600 = vst [vmem:[#allocation42_spill] sm:$0xff] %v7197_v44  ;;  %1820 = vmatpush1.msra.mxu1 %v11605_v13  ;;  %11606 = vst [vmem:[#allocation44_spill] sm:$0xff] %v7222_v37  ;;  %v11609_v13 = vand.u32 4294901760, %v7132_v46  ;;  %1631 = vmatpush1.msra.mxu0 %v6999_v20  ;;  %v11611_v35 = vand.u32 4294901760, %v7020_v2  ;;  %v7243_v32 = vsub.f32 %v266_v60, %v7197_v44  ;;  %v7247_v56 = vand.u32 4294901760, %v258_v41 }
 0x113   :  { %1826 = vmatprep.subr.mxu1 %v11607_v54  ;;  %11610 = vst [vmem:[#allocation46_spill] sm:$0xff] %v7237_v10  ;;  %v7245_v54 = vand.u32 4294901760, %v259_v57  ;;  %1633 = vmatprep.subr.mxu0 %v7031_v15  ;;  %v11616_v2 = vand.u32 4294901760, %v7159_v33  ;;  %v11618_v11 = vand.u32 4294901760, %v7045_v26  ;;  %v11620_v20 = vand.u32 4294901760, %v7166_v28 }
 0x114   :  { %v7234_v5 = vsub.f32 %v7132_v46, %v11609_v13  ;;  %1832 = vmatpush1.msra.mxu1 %v11611_v35  ;;  %11612 = vst [vmem:[#allocation81_spill] sm:$0xff] %v7243_v32  ;;  %11614 = vst [vmem:[#allocation50_spill] sm:$0xff] %v7247_v56  ;;  %v11615_v13 = vand.u32 4294901760, %v7056_v1  ;;  %v7260_v35 = vand.u32 4294901760, %v250_v53  ;;  %1635 = vmatpush1.msra.mxu0 %v7022_v7  ;;  %v11619_v1 = vand.u32 4294901760, %v7174_v49  ;;  %v243_v46 = vld [vmem:[#allocation5 + $0x658] sm:$0xff] }
 0x115   :  { %11613 = vst [vmem:[#allocation83_spill] sm:$0xff] %v7245_v54  ;;  %v7258_v60 = vsub.f32 %v7159_v33, %v11616_v2  ;;  %v7273_v40 = vsub.f32 %v7166_v28, %v11620_v20  ;;  %v7275_v2 = vand.u32 4294901760, %v251_v9  ;;  %1637 = vmatprep.subr.mxu0 %v7058_v17  ;;  %v11622_v26 = vand.u32 4294901760, %v7078_v55  ;;  %v234_v20 = vld [vmem:[#allocation5 + $0x610] sm:$0xff]  ;;  %v235_v7 = vld [vmem:[#allocation5 + $0x618] sm:$0xff] }
 0x116   :  { %1838 = vmatprep.subr.mxu1 %v11615_v13  ;;  %11617 = vst [vmem:[#allocation85_spill] sm:$0xff] %v7260_v35  ;;  %v7268_v13 = vsub.f32 %v7174_v49, %v11619_v1  ;;  %v7285_v49 = vsub.f32 %v267_v50, %v7212_v27  ;;  %1639 = vmatpush1.msra.mxu0 %v7060_v52  ;;  %v11624_v15 = vand.u32 4294901760, %v7083_v8  ;;  %v11626_v55 = vand.u32 4294901760, %v7195_v39 }
 0x117   :  { %1844 = vmatpush1.msra.mxu1 %v11618_v11  ;;  %11621 = vst [vmem:[#allocation86_spill] sm:$0xff] %v7275_v2  ;;  %v7291_v17 = vsub.f32 %v258_v41, %v7247_v56  ;;  %v7298_v11 = vand.u32 4294901760, %v242_v59  ;;  %v7301_v50 = vsub.f32 %v259_v57, %v7245_v54  ;;  %1641 = vmatprep.subr.mxu0 %v7094_v43  ;;  %v11629_v1 = vand.u32 4294901760, %v7119_v19 }
 0x118   :  { %1850 = vmatprep.subr.mxu1 %v11622_v26  ;;  %11623 = vst [vmem:[#allocation87_spill] sm:$0xff] %v7285_v49  ;;  %v7296_v26 = vsub.f32 %v7195_v39, %v11626_v55  ;;  %v7308_v41 = vsub.f32 %v250_v53, %v7260_v35  ;;  %v7310_v8 = vand.u32 4294901760, %v243_v46  ;;  %1643 = vmatpush1.msra.mxu0 %v7085_v38  ;;  %v11632_v52 = vand.u32 4294901760, %v7108_v51  ;;  %v227_v39 = vld [vmem:[#allocation5 + $0x5d8] sm:$0xff] }
 0x119   :  { %1856 = vmatpush1.msra.mxu1 %v11624_v15  ;;  %11625 = vst [vmem:[#allocation89_spill] sm:$0xff] %v7291_v17  ;;  %11627 = vst [vmem:[#allocation91_spill] sm:$0xff] %v7298_v11  ;;  %v1909_v15 = vand.u32 4294901760, %v7258_v60  ;;  %v1921_v57 = vand.u32 4294901760, %v7268_v13  ;;  %v11633_v19 = vand.u32 4294901760, %v7222_v37  ;;  %v7323_v53 = vand.u32 4294901760, %v234_v20  ;;  %1645 = vmatprep.subr.mxu0 %v7121_v36 }
 0x11a   :  { %11628 = vst [vmem:[#allocation93_spill] sm:$0xff] %v7301_v50  ;;  %1862 = vmatprep.subr.mxu1 %v11629_v1  ;;  %11630 = vst [vmem:[#allocation94_spill] sm:$0xff] %v7308_v41  ;;  %v226_v1 = vld [vmem:[#allocation5 + $0x5d0] sm:$0xff]  ;;  %v11635_v55 = vand.u32 4294901760, %v7141_v23  ;;  %v11636_v51 = vand.u32 4294901760, %v7237_v10  ;;  %v11637_v13 = vand.u32 4294901760, %v7229_v34  ;;  %1647 = vmatpush2.msra.mxu0 %v7123_v24  ;;  %v7364_v36 = vsub.f32 %v243_v46, %v7310_v8 }
 0x11b   :  { %11631 = vst [vmem:[#allocation95_spill] sm:$0xff] %v7310_v8  ;;  %1868 = vmatpush1.msra.mxu1 %v11632_v52  ;;  %v7321_v60 = vsub.f32 %v7222_v37, %v11633_v19  ;;  %11634 = vst [vmem:[#allocation96_spill] sm:$0xff] %v7323_v53  ;;  %v7338_v19 = vand.u32 4294901760, %v235_v7  ;;  %v11639_v23 = vand.u32 4294901760, %v7146_v22  ;;  %1649 = vmatprep.subr.mxu0 %v7148_v47  ;;  %v11642_v38 = vand.u32 4294901760, %v7182_v4 }
 0x11c   :  { %1874 = vmatprep.subr.mxu1 %v11635_v55  ;;  %v7331_v52 = vsub.f32 %v7237_v10, %v11636_v51  ;;  %v7336_v43 = vsub.f32 %v7229_v34, %v11637_v13  ;;  %v7346_v51 = vsub.f32 %v242_v59, %v7298_v11  ;;  %v7350_v13 = vsub.f32 %v251_v9, %v7275_v2  ;;  %v218_v34 = vld [vmem:[#allocation5 + $0x590] sm:$0xff]  ;;  %v219_v55 = vld [vmem:[#allocation5 + $0x598] sm:$0xff] }
 0x11d   :  { %11638 = vst [vmem:[#allocation98_spill] sm:$0xff] %v7338_v19  ;;  %1880 = vmatpush1.msra.mxu1 %v11639_v23  ;;  %v11643_v24 = vand.u32 4294901760, %v7243_v32  ;;  %v7360_v23 = vand.u32 4294901760, %v226_v1  ;;  %11645 = vst [vmem:[#allocation107_spill] sm:$0xff] %v7364_v36  ;;  %1651 = vmatpush2.msra.mxu0 %v7150_v31  ;;  %v11646_v9 = vand.u32 4294901760, %v7171_v18  ;;  %v7371_v4 = vsub.f32 %v234_v20, %v7323_v53 }
 0x11e   :  { %11640 = vst [vmem:[#allocation101_spill] sm:$0xff] %v7346_v51  ;;  %11641 = vst [vmem:[#allocation103_spill] sm:$0xff] %v7350_v13  ;;  %1886 = vmatprep.subr.mxu1 %v11642_v38  ;;  %v1933_v38 = vand.u32 4294901760, %v7321_v60  ;;  %1653 = vmatprep.subr.mxu0 %v7184_v16  ;;  %v11649_v59 = vand.u32 4294901760, %v7205_v61  ;;  %v1945_v46 = vand.u32 4294901760, %v7331_v52  ;;  %v1951_v31 = vand.u32 4294901760, %v7336_v43 }
 0x11f   :  { %v7358_v22 = vsub.f32 %v7243_v32, %v11643_v24  ;;  %11644 = vst [vmem:[#allocation106_spill] sm:$0xff] %v7360_v23  ;;  %1892 = vmatpush1.msra.mxu1 %v11646_v9  ;;  %11647 = vst [vmem:[#allocation80_spill] sm:$0xff] %v7371_v4  ;;  %v7373_v24 = vand.u32 4294901760, %v227_v39  ;;  %v11650_v18 = vand.u32 4294901760, %v7285_v49  ;;  %v7386_v20 = vand.u32 4294901760, %v218_v34  ;;  %v210_v9 = vld [vmem:[#allocation5 + $0x550] sm:$0xff]  ;;  %1655 = vmatpush2.msra.mxu0 %v7186_v48 }
 0x120   :  { %1898 = vmatprep.subr.mxu1 %v11649_v59  ;;  %v11652_v47 = vand.u32 4294901760, %v7210_v62  ;;  %v11653_v61 = vand.u32 4294901760, %v7301_v50  ;;  %v7396_v52 = vand.u32 4294901760, %v219_v55  ;;  %v211_v16 = vld [vmem:[#allocation5 + $0x558] sm:$0xff]  ;;  %1657 = vmatprep.subr.mxu0 %v7212_v27  ;;  %v11657_v62 = vand.u32 4294901760, %v7291_v17  ;;  %v202_v43 = vld [vmem:[#allocation5 + $0x510] sm:$0xff] }
 0x121   :  { %11648 = vst [vmem:[#allocation82_spill] sm:$0xff] %v7373_v24  ;;  %v7384_v60 = vsub.f32 %v7285_v49, %v11650_v18  ;;  %11651 = vst [vmem:[#allocation110_spill] sm:$0xff] %v7386_v20  ;;  %v7400_v18 = vsub.f32 %v235_v7, %v7338_v19  ;;  %v1963_v48 = vand.u32 4294901760, %v7358_v22  ;;  %1659 = vmatpush2.msra.mxu0 %v7197_v44  ;;  %v11658_v7 = vand.u32 4294901760, %v7234_v5  ;;  %v203_v32 = vld [vmem:[#allocation5 + $0x518] sm:$0xff] }
 0x122   :  { %1904 = vmatpush1.msra.mxu1 %v11652_v47  ;;  %v7394_v59 = vsub.f32 %v7301_v50, %v11653_v61  ;;  %11654 = vst [vmem:[#allocation84_spill] sm:$0xff] %v7396_v52  ;;  %v7405_v47 = vsub.f32 %v226_v1, %v7360_v23  ;;  %v7410_v61 = vsub.f32 %v7291_v17, %v11657_v62  ;;  %v7421_v1 = vand.u32 4294901760, %v210_v9  ;;  %v195_v44 = vld [vmem:[#allocation5 + $0x4d8] sm:$0xff] }
 0x123   :  { %11655 = vst [vmem:[#allocation111_spill] sm:$0xff] %v7400_v18  ;;  %1910 = vmatprep.subr.mxu1 %v1909_v15  ;;  %v11659_v15 = vand.u32 4294901760, %v7308_v41  ;;  %1661 = vmatprep.subr.mxu0 %v7245_v54  ;;  %v1957_v50 = vand.u32 4294901760, %v7384_v60  ;;  %v7428_v5 = vsub.f32 %v218_v34, %v7386_v20  ;;  %v11664_v27 = vand.u32 4294901760, %v7273_v40 }
 0x124   :  { %11656 = vst [vmem:[#allocation112_spill] sm:$0xff] %v7405_v47  ;;  %1916 = vmatpush1.msra.mxu1 %v11658_v7  ;;  %11660 = vst [vmem:[#allocation113_spill] sm:$0xff] %v7421_v1  ;;  %v7430_v7 = vand.u32 4294901760, %v211_v16  ;;  %1663 = vmatpush2.msra.mxu0 %v7247_v56  ;;  %v1969_v62 = vand.u32 4294901760, %v7394_v59  ;;  %v11665_v54 = vand.u32 4294901760, %v7350_v13  ;;  %v7443_v34 = vand.u32 4294901760, %v202_v43 }
 0x125   :  { %v7419_v22 = vsub.f32 %v7308_v41, %v11659_v15  ;;  %1922 = vmatprep.subr.mxu1 %v1921_v57  ;;  %11661 = vst [vmem:[#allocation114_spill] sm:$0xff] %v7428_v5  ;;  %v7433_v15 = vsub.f32 %v227_v39, %v7373_v24  ;;  %v194_v41 = vld [vmem:[#allocation5 + $0x4d0] sm:$0xff]  ;;  %1665 = vmatprep.subr.mxu0 %v7275_v2  ;;  %v1975_v39 = vand.u32 4294901760, %v7410_v61  ;;  %v11666_v40 = vand.u32 4294901760, %v7364_v36 }
 0x126   :  { %11662 = vst [vmem:[#allocation115_spill] sm:$0xff] %v7430_v7  ;;  %1928 = vmatpush2.msra.mxu1 %v11664_v27  ;;  %v1980_v57 = vsub.f32 %v7350_v13, %v11665_v54  ;;  %v7452_v59 = vand.u32 4294901760, %v203_v32  ;;  %v7455_v54 = vsub.f32 %v219_v55, %v7396_v52  ;;  %1667 = vmatpush2.msra.mxu0 %v7260_v35  ;;  %v11668_v60 = vand.u32 4294901760, %v7296_v26 }
 0x127   :  { %11663 = vst [vmem:[#allocation116_spill] sm:$0xff] %v7433_v15  ;;  %1934 = vmatprep.subr.mxu1 %v1933_v38  ;;  %v7450_v27 = vsub.f32 %v7364_v36, %v11666_v40  ;;  %v1987_v2 = vand.u32 4294901760, %v7419_v22  ;;  %v7462_v38 = vsub.f32 %v210_v9, %v7421_v1  ;;  %v11670_v61 = vand.u32 4294901760, %v7346_v51  ;;  %v186_v36 = vld [vmem:[#allocation5 + $0x490] sm:$0xff]  ;;  %1669 = vmatprep.subr.mxu0 %v7310_v8 }
 0x128   :  { %11667 = vst [vmem:[#allocation117_spill] sm:$0xff] %v7455_v54  ;;  %1940 = vmatpush2.msra.mxu1 %v11668_v60  ;;  %v11671_v56 = vand.u32 4294901760, %v7371_v4  ;;  %v7475_v26 = vand.u32 4294901760, %v195_v44  ;;  %v7478_v9 = vand.u32 4294901760, %v194_v41  ;;  %v187_v60 = vld [vmem:[#allocation5 + $0x498] sm:$0xff]  ;;  %v7481_v35 = vsub.f32 %v211_v16, %v7430_v7  ;;  %1671 = vmatpush2.msra.mxu0 %v7298_v11 }
 0x129   :  { %11669 = vst [vmem:[#allocation118_spill] sm:$0xff] %v7462_v38  ;;  %v7467_v40 = vsub.f32 %v7346_v51, %v11670_v61  ;;  %1946 = vmatprep.subr.mxu1 %v1945_v46  ;;  %v1981_v61 = vand.u32 4294901760, %v1980_v57  ;;  %v7488_v46 = vsub.f32 %v202_v43, %v7443_v34  ;;  %1673 = vmatprep.subr.mxu0 %v7338_v19  ;;  %v1993_v22 = vand.u32 4294901760, %v7450_v27  ;;  %v178_v27 = vld [vmem:[#allocation5 + $0x450] sm:$0xff] }
 0x12a   :  { %v7472_v55 = vsub.f32 %v7371_v4, %v11671_v56  ;;  %11672 = vst [vmem:[#allocation119_spill] sm:$0xff] %v7481_v35  ;;  %1952 = vmatpush2.msra.mxu1 %v1951_v31  ;;  %v11673_v56 = vand.u32 4294901760, %v7400_v18  ;;  %v7494_v51 = vand.u32 4294901760, %v186_v36  ;;  %v179_v31 = vld [vmem:[#allocation5 + $0x458] sm:$0xff]  ;;  %v7497_v57 = vsub.f32 %v203_v32, %v7452_v59  ;;  %1675 = vmatpush2.msra.mxu0 %v7323_v53 }
 0x12b   :  { %11674 = vst [vmem:[#allocation120_spill] sm:$0xff] %v7488_v46  ;;  %1958 = vmatprep.subr.mxu1 %v1957_v50  ;;  %v1999_v43 = vand.u32 4294901760, %v7467_v40  ;;  %v7502_v8 = vand.u32 4294901760, %v187_v60  ;;  %1677 = vmatprep.subr.mxu0 %v7373_v24  ;;  %v11676_v16 = vand.u32 4294901760, %v7433_v15  ;;  %v7510_v19 = vsub.f32 %v194_v41, %v7478_v9  ;;  %v171_v40 = vld [vmem:[#allocation5 + $0x418] sm:$0xff]  ;;  %v170_v41 = vld [vmem:[#allocation5 + $0x410] sm:$0xff] }
 0x12c   :  { %v2004_v4 = vsub.f32 %v7400_v18, %v11673_v56  ;;  %11675 = vst [vmem:[#allocation121_spill] sm:$0xff] %v7497_v57  ;;  %1964 = vmatpush2.msra.mxu1 %v1963_v48  ;;  %v2011_v56 = vand.u32 4294901760, %v7472_v55  ;;  %v7514_v55 = vsub.f32 %v195_v44, %v7475_v26  ;;  %1679 = vmatpush2.msra.mxu0 %v7360_v23  ;;  %v11677_v24 = vand.u32 4294901760, %v7405_v47 }
 0x12d   :  { %1970 = vmatprep.subr.mxu1 %v1969_v62  ;;  %v2016_v32 = vsub.f32 %v7433_v15, %v11676_v16  ;;  %v7520_v53 = vand.u32 4294901760, %v179_v31  ;;  %1681 = vmatprep.subr.mxu0 %v7396_v52  ;;  %v11678_v48 = vand.u32 4294901760, %v7455_v54  ;;  %v7528_v23 = vsub.f32 %v186_v36, %v7494_v51 }
 0x12e   :  { %1976 = vmatpush2.msra.mxu1 %v1975_v39  ;;  %v2005_v50 = vand.u32 4294901760, %v2004_v4  ;;  %v2022_v62 = vsub.f32 %v7405_v47, %v11677_v24  ;;  %v7530_v4 = vand.u32 4294901760, %v178_v27  ;;  %1683 = vmatpush2.msra.mxu0 %v7386_v20  ;;  %v11680_v24 = vand.u32 4294901760, %v7428_v5 }
 0x12f   :  { %1982 = vmatprep.subr.mxu1 %v1981_v61  ;;  %v2028_v44 = vsub.f32 %v7455_v54, %v11678_v48  ;;  %11679 = vst [vmem:[#allocation122_spill] sm:$0xff] %v7528_v23  ;;  %v7537_v52 = vand.u32 4294901760, %v171_v40  ;;  %v7541_v48 = vsub.f32 %v187_v60, %v7502_v8  ;;  %1685 = vmatprep.subr.mxu0 %v7430_v7  ;;  %v2017_v36 = vand.u32 4294901760, %v2016_v32 }
 0x130   :  { %1988 = vmatpush2.msra.mxu1 %v1987_v2  ;;  %v2034_v16 = vsub.f32 %v7428_v5, %v11680_v24  ;;  %v11682_v39 = vand.u32 4294901760, %v7481_v35  ;;  %v7547_v2 = vand.u32 4294901760, %v170_v41  ;;  %1687 = vmatpush2.msra.mxu0 %v7421_v1  ;;  %v2023_v24 = vand.u32 4294901760, %v2022_v62 }
 0x131   :  { %11681 = vst [vmem:[#allocation123_spill] sm:$0xff] %v7541_v48  ;;  %1994 = vmatprep.subr.mxu1 %v1993_v22  ;;  %v11683_v61 = vand.u32 4294901760, %v7462_v38  ;;  %v7555_v7 = vsub.f32 %v179_v31, %v7520_v53  ;;  %1689 = vmatprep.subr.mxu0 %v7452_v59  ;;  %v2029_v22 = vand.u32 4294901760, %v2028_v44  ;;  %v7559_v32 = vsub.f32 %v178_v27, %v7530_v4 }
 0x132   :  { %v2040_v20 = vsub.f32 %v7481_v35, %v11682_v39  ;;  %2000 = vmatpush2.msra.mxu1 %v1999_v43  ;;  %v11684_v39 = vand.u32 4294901760, %v7497_v57  ;;  %1691 = vmatpush2.msra.mxu0 %v7443_v34  ;;  %v2035_v62 = vand.u32 4294901760, %v2034_v16  ;;  %v11685_v31 = vand.u32 4294901760, %v7488_v46 }
 0x133   :  { %v2046_v60 = vsub.f32 %v7462_v38, %v11683_v61  ;;  %2006 = vmatprep.subr.mxu1 %v2005_v50  ;;  %v7571_v44 = vsub.f32 %v171_v40, %v7537_v52  ;;  %1693 = vmatprep.subr.mxu0 %v7475_v26  ;;  %v11687_v43 = vand.u32 4294901760, %v7514_v55  ;;  %v10717_v40 = vand.u32 4294901760, %v7555_v7 }
 0x134   :  { %v2052_v11 = vsub.f32 %v7497_v57, %v11684_v39  ;;  %2012 = vmatpush2.msra.mxu1 %v2011_v56  ;;  %v2058_v61 = vsub.f32 %v7488_v46, %v11685_v31  ;;  %v2041_v27 = vand.u32 4294901760, %v2040_v20  ;;  %v7575_v39 = vsub.f32 %v170_v41, %v7547_v2  ;;  %1695 = vmatpush2.msra.mxu0 %v7478_v9 }
 0x135   :  { %2018 = vmatprep.subr.mxu1 %v2017_v36  ;;  %v2064_v56 = vsub.f32 %v7514_v55, %v11687_v43  ;;  %v2047_v31 = vand.u32 4294901760, %v2046_v60  ;;  %1697 = vmatprep.subr.mxu0 %v7502_v8  ;;  %v11688_v20 = vand.u32 4294901760, %v7510_v19  ;;  %v11689_v16 = vand.u32 4294901760, %v7541_v48 }
 0x136   :  { %11686 = vst [vmem:[#allocation124_spill] sm:$0xff] %v7575_v39  ;;  %2024 = vmatpush2.msra.mxu1 %v2023_v24  ;;  %v2053_v36 = vand.u32 4294901760, %v2052_v11  ;;  %1699 = vmatpush2.msra.mxu0 %v7494_v51  ;;  %v2059_v43 = vand.u32 4294901760, %v2058_v61  ;;  %v10719_v60 = vand.u32 4294901760, %v7571_v44  ;;  %v10718_v50 = vand.u32 4294901760, %v7575_v39 }
 0x137   :  { %2030 = vmatprep.subr.mxu1 %v2029_v22  ;;  %v2070_v41 = vsub.f32 %v7510_v19, %v11688_v20  ;;  %v2076_v24 = vsub.f32 %v7541_v48, %v11689_v16  ;;  %1701 = vmatprep.subr.mxu0 %v7520_v53  ;;  %v2065_v11 = vand.u32 4294901760, %v2064_v56  ;;  %v11690_v22 = vand.u32 4294901760, %v7528_v23 }
 0x138   :  { %2036 = vmatpush2.msra.mxu1 %v2035_v62  ;;  %1703 = vmatpush2.msra.mxu0 %v7530_v4  ;;  %v2088_v62 = vsub.f32 %v7555_v7, %v10717_v40 }
 0x139   :  { %2042 = vmatprep.subr.mxu1 %v2041_v27  ;;  %v2082_v20 = vsub.f32 %v7528_v23, %v11690_v22  ;;  %1705 = vmatprep.subr.mxu0 %v7537_v52  ;;  %v2071_v61 = vand.u32 4294901760, %v2070_v41  ;;  %v11691_v27 = vand.u32 4294901760, %v7559_v32  ;;  %v2077_v16 = vand.u32 4294901760, %v2076_v24  ;;  %v11692_v22 = vld [vmem:[#allocation108_spill] sm:$0xff]  ;;  %v11693_v41 = vld [vmem:[#allocation109_spill] sm:$0xff] }
 0x13a   :  { %2048 = vmatpush2.msra.mxu1 %v2047_v31  ;;  %1707 = vmatpush2.msra.mxu0 %v7547_v2  ;;  %v2100_v31 = vsub.f32 %v7571_v44, %v10719_v60  ;;  %v11707_v60 = vld [vmem:[#allocation31_spill] sm:$0xff] }
 0x13b   :  { %2054 = vmatprep.subr.mxu1 %v2053_v36  ;;  %v2094_v56 = vsub.f32 %v7559_v32, %v11691_v27  ;;  %1713 = vmatprep.mubr.f32.mxu0 %v11692_v22  ;;  %v2083_v40 = vand.u32 4294901760, %v2082_v20  ;;  %v2106_v36 = vsub.f32 %v7575_v39, %v10718_v50  ;;  %v2089_v27 = vand.u32 4294901760, %v2088_v62  ;;  %v11694_v20 = vld [vmem:[#allocation52_spill] sm:$0xff]  ;;  %v11696_v62 = vld [vmem:[#allocation58_spill] sm:$0xff]  ;;  %v11709_v22 = vld [vmem:[#allocation13_spill] sm:$0xff] }
 0x13c   :  { %2060 = vmatpush2.msra.mxu1 %v2059_v43  ;;  %2120 = vmatprep.subr.mxu0 %v6715_v58  ;;  %v2101_v24 = vand.u32 4294901760, %v2100_v31  ;;  %v11695_v50 = vld [vmem:[#allocation48_spill] sm:$0xff]  ;;  %v11701_v31 = vld [vmem:[#allocation11_spill] sm:$0xff] }
 0x13d   :  { %2066 = vmatprep.subr.mxu1 %v2065_v11  ;;  %1719 = vmatmul.mubr.f32.vlgmr.msra.gmra.mxu0 %v11693_v41  ;;  %v2095_v43 = vand.u32 4294901760, %v2094_v56  ;;  %v2107_v11 = vand.u32 4294901760, %v2106_v36  ;;  %v11699_v56 = vld [vmem:[#allocation66_spill] sm:$0xff]  ;;  %v11708_v41 = vld [vmem:[#allocation37_spill] sm:$0xff] }
 0x13e   :  { %2072 = vmatpush2.msra.mxu1 %v2071_v61  ;;  %2123 = vmatpush1.msra.mxu0 %v6712_v6  ;;  %v11697_v61 = vld [vmem:[#allocation60_spill] sm:$0xff]  ;;  %v11702_v36 = vld [vmem:[#allocation74_spill] sm:$0xff] }
 0x13f   :  { %2078 = vmatprep.subr.mxu1 %v2077_v16  ;;  %2126 = vmatprep.subr.mxu0 %v6728_v12  ;;  %v11700_v16 = vld [vmem:[#allocation78_spill] sm:$0xff] }
 0x140   :  { %2084 = vmatpush2.msra.mxu1 %v2083_v40  ;;  %2129 = vmatpush1.msra.mxu0 %v6734_v25  ;;  %v11698_v40 = vld [vmem:[#allocation68_spill] sm:$0xff] }
 0x141   :  { %2090 = vmatprep.subr.mxu1 %v2089_v27  ;;  %2132 = vmatprep.subr.mxu0 %v11694_v20  ;;  %v11703_v27 = vld [vmem:[#allocation29_spill] sm:$0xff] }
 0x142   :  { %2096 = vmatpush2.msra.mxu1 %v2095_v43  ;;  %2135 = vmatpush1.msra.mxu0 %v11695_v50  ;;  %v11704_v43 = vld [vmem:[#allocation90_spill] sm:$0xff] }
 0x143   :  { %2102 = vmatprep.subr.mxu1 %v2101_v24  ;;  %2138 = vmatprep.subr.mxu0 %v11696_v62  ;;  %v11705_v24 = vld [vmem:[#allocation12_spill] sm:$0xff] }
 0x144   :  { %2108 = vmatpush2.msra.mxu1 %v2107_v11  ;;  %2141 = vmatpush1.msra.mxu0 %v11697_v61  ;;  %v11706_v11 = vld [vmem:[#allocation88_spill] sm:$0xff] }
 0x145   :  { %2112 = vmatmul.mubr.f32.vlgmr.msra.gmra.mxu1 %v11529_v30  ;;  %2144 = vmatprep.subr.mxu0 %v11698_v40  ;;  %v11710_v30 = vld [vmem:[#allocation35_spill] sm:$0xff] }
 0x146   :  { %2322 = vmatprep.subr.mxu1 %v6691_v0  ;;  %2147 = vmatpush1.msra.mxu0 %v11699_v56 }
 0x147   :  { %2324 = vmatpush1.msra.mxu1 %v6693_v3  ;;  %2150 = vmatprep.subr.mxu0 %v11700_v16 }
 0x148   :  { %2326 = vmatprep.subr.mxu1 %v11701_v31  ;;  %2153 = vmatpush1.msra.mxu0 %v11702_v36  ;;  %v11712_v31 = vld [vmem:[#allocation17_spill] sm:$0xff]  ;;  %v11713_v36 = vld [vmem:[#allocation54_spill] sm:$0xff] }
 0x149   :  { %2328 = vmatpush1.msra.mxu1 %v11703_v27  ;;  %2156 = vmatprep.subr.mxu0 %v11704_v43  ;;  %v11714_v27 = vld [vmem:[#allocation39_spill] sm:$0xff] }
 0x14a   :  { %2330 = vmatprep.subr.mxu1 %v11705_v24  ;;  %2159 = vmatpush1.msra.mxu0 %v11706_v11  ;;  %v11715_v24 = vld [vmem:[#allocation45_spill] sm:$0xff]  ;;  %v11716_v11 = vld [vmem:[#allocation64_spill] sm:$0xff] }
 0x14b   :  { %2332 = vmatpush1.msra.mxu1 %v11707_v60  ;;  %2162 = vmatprep.subr.mxu0 %v11708_v41  ;;  %v11717_v60 = vld [vmem:[#allocation43_spill] sm:$0xff]  ;;  %v11718_v41 = vld [vmem:[#allocation62_spill] sm:$0xff] }
 0x14c   :  { %2334 = vmatprep.subr.mxu1 %v11709_v22  ;;  %2165 = vmatpush1.msra.mxu0 %v11710_v30  ;;  %v11719_v22 = vld [vmem:[#allocation21_spill] sm:$0xff]  ;;  %v11720_v30 = vld [vmem:[#allocation70_spill] sm:$0xff] }
 0x14d   :  { %2336 = vmatpush1.msra.mxu1 %v11711_v29  ;;  %2168 = vmatprep.subr.mxu0 %v11712_v31  ;;  %v11721_v29 = vld [vmem:[#allocation47_spill] sm:$0xff]  ;;  %v11722_v31 = vld [vmem:[#allocation72_spill] sm:$0xff] }
 0x14e   :  { %2338 = vmatprep.subr.mxu1 %v11713_v36  ;;  %2171 = vmatpush1.msra.mxu0 %v11714_v27 }
 0x14f   :  { %2340 = vmatpush1.msra.mxu1 %v6759_v42  ;;  %2174 = vmatprep.subr.mxu0 %v11715_v24  ;;  %v11723_v42 = vld [vmem:[#allocation51_spill] sm:$0xff]  ;;  %v11724_v24 = vld [vmem:[#allocation76_spill] sm:$0xff] }
 0x150   :  { %2342 = vmatprep.subr.mxu1 %v11716_v11  ;;  %2177 = vmatpush1.msra.mxu0 %v11717_v60  ;;  %v11725_v11 = vld [vmem:[#allocation25_spill] sm:$0xff]  ;;  %v11726_v60 = vld [vmem:[#allocation92_spill] sm:$0xff] }
 0x151   :  { %2344 = vmatpush1.msra.mxu1 %v11718_v41  ;;  %2180 = vmatprep.subr.mxu0 %v11719_v22  ;;  %v11727_v41 = vld [vmem:[#allocation55_spill] sm:$0xff]  ;;  %v11728_v22 = vld [vmem:[#allocation14_spill] sm:$0xff] }
 0x152   :  { %2346 = vmatprep.subr.mxu1 %v11720_v30  ;;  %2183 = vmatpush1.msra.mxu0 %v11721_v29  ;;  %v11729_v29 = vld [vmem:[#allocation16_spill] sm:$0xff] }
 0x153   :  { %2348 = vmatpush1.msra.mxu1 %v11722_v31  ;;  %2186 = vmatprep.subr.mxu0 %v7025_v14  ;;  %v11730_v31 = vld [vmem:[#allocation59_spill] sm:$0xff] }
 0x154   :  { %2350 = vmatprep.subr.mxu1 %v6852_v63  ;;  %2189 = vmatpush1.msra.mxu0 %v11723_v42  ;;  %v11731_v14 = vld [vmem:[#allocation15_spill] sm:$0xff]  ;;  %v11732_v42 = vld [vmem:[#allocation41_spill] sm:$0xff] }
 0x155   :  { %2352 = vmatpush1.msra.mxu1 %v11724_v24  ;;  %2192 = vmatprep.subr.mxu0 %v11725_v11  ;;  %v11733_v24 = vld [vmem:[#allocation63_spill] sm:$0xff]  ;;  %v11734_v11 = vld [vmem:[#allocation18_spill] sm:$0xff] }
 0x156   :  { %2354 = vmatprep.subr.mxu1 %v11726_v60  ;;  %2195 = vmatpush1.msra.mxu0 %v11727_v41  ;;  %v11735_v41 = vld [vmem:[#allocation20_spill] sm:$0xff] }
 0x157   :  { %2356 = vmatpush1.msra.mxu1 %v11728_v22  ;;  %2198 = vmatprep.subr.mxu0 %v7088_v21  ;;  %v11736_v22 = vld [vmem:[#allocation67_spill] sm:$0xff] }
 0x158   :  { %2358 = vmatprep.subr.mxu1 %v11729_v29  ;;  %2201 = vmatpush1.msra.mxu0 %v11730_v31  ;;  %v11737_v21 = vld [vmem:[#allocation19_spill] sm:$0xff]  ;;  %v11738_v29 = vld [vmem:[#allocation38_spill] sm:$0xff]  ;;  %v11739_v31 = vld [vmem:[#allocation49_spill] sm:$0xff] }
 0x159   :  { %2360 = vmatpush1.msra.mxu1 %v11731_v14  ;;  %2204 = vmatprep.subr.mxu0 %v7111_v45  ;;  %v11740_v45 = vld [vmem:[#allocation22_spill] sm:$0xff] }
 0x15a   :  { %2362 = vmatprep.subr.mxu1 %v11732_v42  ;;  %2207 = vmatpush1.msra.mxu0 %v11733_v24  ;;  %v11741_v24 = vld [vmem:[#allocation24_spill] sm:$0xff] }
 0x15b   :  { %2364 = vmatpush1.msra.mxu1 %v11734_v11  ;;  %2210 = vmatprep.subr.mxu0 %v7159_v33  ;;  %v11742_v11 = vld [vmem:[#allocation75_spill] sm:$0xff] }
 0x15c   :  { %2366 = vmatprep.subr.mxu1 %v11735_v41  ;;  %2213 = vmatpush1.msra.mxu0 %v11736_v22  ;;  %v11743_v33 = vld [vmem:[#allocation23_spill] sm:$0xff]  ;;  %v11744_v22 = vld [vmem:[#allocation57_spill] sm:$0xff] }
 0x15d   :  { %2368 = vmatpush1.msra.mxu1 %v11737_v21  ;;  %2216 = vmatprep.subr.mxu0 %v11738_v29  ;;  %v11745_v21 = vld [vmem:[#allocation79_spill] sm:$0xff]  ;;  %v11746_v29 = vld [vmem:[#allocation26_spill] sm:$0xff] }
 0x15e   :  { %2370 = vmatprep.subr.mxu1 %v11739_v31  ;;  %2219 = vmatpush2.msra.mxu0 %v7166_v28  ;;  %v11747_v28 = vld [vmem:[#allocation28_spill] sm:$0xff] }
 0x15f   :  { %2372 = vmatpush1.msra.mxu1 %v11740_v45  ;;  %2222 = vmatprep.subr.mxu0 %v7222_v37  ;;  %v11748_v45 = vld [vmem:[#allocation81_spill] sm:$0xff]  ;;  %v11749_v37 = vld [vmem:[#allocation27_spill] sm:$0xff] }
 0x160   :  { %2374 = vmatprep.subr.mxu1 %v11741_v24  ;;  %2225 = vmatpush2.msra.mxu0 %v11742_v11  ;;  %v11750_v24 = vld [vmem:[#allocation93_spill] sm:$0xff] }
 0x161   :  { %2376 = vmatpush1.msra.mxu1 %v11743_v33  ;;  %2228 = vmatprep.subr.mxu0 %v7237_v10  ;;  %v11751_v11 = vld [vmem:[#allocation65_spill] sm:$0xff]  ;;  %v11752_v10 = vld [vmem:[#allocation32_spill] sm:$0xff] }
 0x162   :  { %2378 = vmatprep.subr.mxu1 %v11744_v22  ;;  %2231 = vmatpush2.msra.mxu0 %v11745_v21  ;;  %v11753_v21 = vld [vmem:[#allocation34_spill] sm:$0xff] }
 0x163   :  { %2380 = vmatpush1.msra.mxu1 %v11746_v29  ;;  %2234 = vmatprep.subr.mxu0 %v7285_v49  ;;  %v11754_v29 = vld [vmem:[#allocation94_spill] sm:$0xff]  ;;  %v11755_v49 = vld [vmem:[#allocation69_spill] sm:$0xff] }
 0x164   :  { %2382 = vmatprep.subr.mxu1 %v11747_v28  ;;  %2237 = vmatpush2.msra.mxu0 %v11748_v45  ;;  %v11756_v28 = vld [vmem:[#allocation107_spill] sm:$0xff]  ;;  %v11757_v45 = vld [vmem:[#allocation73_spill] sm:$0xff] }
 0x165   :  { %2384 = vmatpush1.msra.mxu1 %v11749_v37  ;;  %2240 = vmatprep.subr.mxu0 %v11750_v24  ;;  %v11758_v37 = vld [vmem:[#allocation101_spill] sm:$0xff]  ;;  %v11759_v24 = vld [vmem:[#allocation40_spill] sm:$0xff] }
 0x166   :  { %2386 = vmatprep.subr.mxu1 %v11751_v11  ;;  %2243 = vmatpush2.msra.mxu0 %v7291_v17  ;;  %v11760_v17 = vld [vmem:[#allocation77_spill] sm:$0xff] }
 0x167   :  { %2388 = vmatpush2.msra.mxu1 %v11752_v10  ;;  %2246 = vmatprep.subr.mxu0 %v7350_v13  ;;  %v11761_v10 = vld [vmem:[#allocation80_spill] sm:$0xff]  ;;  %v11762_v13 = vld [vmem:[#allocation42_spill] sm:$0xff] }
 0x168   :  { %2390 = vmatprep.subr.mxu1 %v11753_v21  ;;  %2249 = vmatpush2.msra.mxu0 %v11754_v29  ;;  %v11763_v29 = vld [vmem:[#allocation83_spill] sm:$0xff] }
 0x169   :  { %2392 = vmatpush2.msra.mxu1 %v11755_v49  ;;  %2252 = vmatprep.subr.mxu0 %v11756_v28  ;;  %v11764_v28 = vld [vmem:[#allocation50_spill] sm:$0xff] }
 0x16a   :  { %2394 = vmatprep.subr.mxu1 %v11757_v45  ;;  %2255 = vmatpush2.msra.mxu0 %v11758_v37  ;;  %v11765_v37 = vld [vmem:[#allocation86_spill] sm:$0xff] }
 0x16b   :  { %2396 = vmatpush2.msra.mxu1 %v11759_v24  ;;  %2258 = vmatprep.subr.mxu0 %v7400_v18  ;;  %v11766_v18 = vld [vmem:[#allocation85_spill] sm:$0xff] }
 0x16c   :  { %2398 = vmatprep.subr.mxu1 %v11760_v17  ;;  %2261 = vmatpush2.msra.mxu0 %v11761_v10  ;;  %v11767_v10 = vld [vmem:[#allocation95_spill] sm:$0xff] }
 0x16d   :  { %2400 = vmatpush2.msra.mxu1 %v11762_v13  ;;  %2264 = vmatprep.subr.mxu0 %v7433_v15  ;;  %v11768_v15 = vld [vmem:[#allocation91_spill] sm:$0xff] }
 0x16e   :  { %2402 = vmatprep.subr.mxu1 %v11763_v29  ;;  %2267 = vmatpush2.msra.mxu0 %v7405_v47  ;;  %v11769_v47 = vld [vmem:[#allocation98_spill] sm:$0xff] }
 0x16f   :  { %2404 = vmatpush2.msra.mxu1 %v11764_v28  ;;  %2270 = vmatprep.subr.mxu0 %v7455_v54  ;;  %v11770_v54 = vld [vmem:[#allocation96_spill] sm:$0xff] }
 0x170   :  { %2406 = vmatprep.subr.mxu1 %v11765_v37  ;;  %2273 = vmatpush2.msra.mxu0 %v7428_v5  ;;  %v11771_v5 = vld [vmem:[#allocation82_spill] sm:$0xff] }
 0x171   :  { %2408 = vmatpush2.msra.mxu1 %v11766_v18  ;;  %2276 = vmatprep.subr.mxu0 %v7481_v35  ;;  %v11772_v35 = vld [vmem:[#allocation106_spill] sm:$0xff] }
 0x172   :  { %2410 = vmatprep.subr.mxu1 %v11767_v10  ;;  %2279 = vmatpush2.msra.mxu0 %v7462_v38  ;;  %v11773_v38 = vld [vmem:[#allocation84_spill] sm:$0xff] }
 0x173   :  { %2412 = vmatpush2.msra.mxu1 %v11768_v15  ;;  %2282 = vmatprep.subr.mxu0 %v7497_v57  ;;  %v11774_v57 = vld [vmem:[#allocation110_spill] sm:$0xff] }
 0x174   :  { %2414 = vmatprep.subr.mxu1 %v11769_v47  ;;  %2285 = vmatpush2.msra.mxu0 %v7488_v46  ;;  %v11775_v46 = vld [vmem:[#allocation115_spill] sm:$0xff] }
 0x175   :  { %2416 = vmatpush2.msra.mxu1 %v11770_v54  ;;  %2288 = vmatprep.subr.mxu0 %v7514_v55 }
 0x176   :  { %2418 = vmatprep.subr.mxu1 %v11771_v5  ;;  %2291 = vmatpush2.msra.mxu0 %v7510_v19 }
 0x177   :  { %2420 = vmatpush2.msra.mxu1 %v11772_v35  ;;  %2294 = vmatprep.subr.mxu0 %v7541_v48  ;;  %v11776_v48 = vld [vmem:[#allocation100_spill] sm:$0xff] }
 0x178   :  { %2422 = vmatprep.subr.mxu1 %v11773_v38  ;;  %2297 = vmatpush2.msra.mxu0 %v7528_v23  ;;  %v11777_v23 = vld [vmem:[#allocation102_spill] sm:$0xff] }
 0x179   :  { %2424 = vmatpush2.msra.mxu1 %v11774_v57  ;;  %2300 = vmatprep.subr.mxu0 %v7555_v7 }
 0x17a   :  { %2426 = vmatprep.subr.mxu1 %v11775_v46  ;;  %2303 = vmatpush2.msra.mxu0 %v7559_v32  ;;  %v11778_v46 = vand.u32 4294901760, %v6715_v58  ;;  %v11782_v58 = vand.u32 4294901760, %v11694_v20  ;;  %v11791_v20 = vld [vmem:[#allocation11_spill] sm:$0xff] }
 0x17b   :  { %2428 = vmatpush2.msra.mxu1 %v7421_v1  ;;  %2306 = vmatprep.subr.mxu0 %v7571_v44  ;;  %v11779_v1 = vand.u32 4294901760, %v6712_v6  ;;  %v11783_v6 = vand.u32 4294901760, %v11695_v50  ;;  %v11789_v50 = vand.u32 4294901760, %v11699_v56 }
 0x17c   :  { %2430 = vmatprep.subr.mxu1 %v7452_v59  ;;  %2309 = vmatpush2.msra.mxu0 %v7575_v39  ;;  %v11780_v39 = vand.u32 4294901760, %v6728_v12  ;;  %v11784_v12 = vand.u32 4294901760, %v11696_v62  ;;  %v11792_v62 = vld [vmem:[#allocation74_spill] sm:$0xff] }
 0x17d   :  { %2312 = vmatprep.mubr.f32.mxu0 %v11776_v48  ;;  %2432 = vmatpush2.msra.mxu1 %v7443_v34  ;;  %v11781_v48 = vand.u32 4294901760, %v6734_v25  ;;  %v11786_v25 = vand.u32 4294901760, %v11697_v61  ;;  %v11793_v61 = vand.u32 4294901760, %v11792_v62  ;;  %v11808_v62 = vand.u32 4294901760, %v11714_v27 }
 0x17e   :  { %2315 = vmatmul.mubr.f32.vlgmr.msra.gmra.mxu0 %v11777_v23  ;;  %2434 = vmatprep.subr.mxu1 %v7475_v26 }
 0x17f   :  { %2465 = vmatprep.subr.mxu0 %v11778_v46  ;;  %2436 = vmatpush2.msra.mxu1 %v7478_v9  ;;  %v11787_v46 = vld [vmem:[#allocation105_spill] sm:$0xff] }
 0x180   :  { %2469 = vmatpush1.msra.mxu0 %v11779_v1  ;;  %2438 = vmatprep.subr.mxu1 %v7502_v8  ;;  %v11785_v1 = vld [vmem:[#allocation104_spill] sm:$0xff] }
 0x181   :  { %2473 = vmatprep.subr.mxu0 %v11780_v39  ;;  %2440 = vmatpush2.msra.mxu1 %v7494_v51  ;;  %v11790_v39 = vand.u32 4294901760, %v11700_v16 }
 0x182   :  { %2477 = vmatpush1.msra.mxu0 %v11781_v48  ;;  %2442 = vmatprep.subr.mxu1 %v7520_v53  ;;  %v11788_v48 = vand.u32 4294901760, %v11698_v40  ;;  %v11795_v40 = vand.u32 4294901760, %v11704_v43 }
 0x183   :  { %2481 = vmatprep.subr.mxu0 %v11782_v58  ;;  %2444 = vmatpush2.msra.mxu1 %v7530_v4  ;;  %v11794_v58 = vld [vmem:[#allocation29_spill] sm:$0xff] }
 0x184   :  { %2485 = vmatpush1.msra.mxu0 %v11783_v6  ;;  %2446 = vmatprep.subr.mxu1 %v7537_v52  ;;  %v11796_v6 = vld [vmem:[#allocation12_spill] sm:$0xff] }
 0x185   :  { %2489 = vmatprep.subr.mxu0 %v11784_v12  ;;  %2448 = vmatpush2.msra.mxu1 %v7547_v2  ;;  %v11799_v12 = vld [vmem:[#allocation31_spill] sm:$0xff] }
 0x186   :  { %2452 = vmatprep.mubr.f32.mxu1 %v11785_v1  ;;  %2493 = vmatpush1.msra.mxu0 %v11786_v25  ;;  %v11802_v25 = vld [vmem:[#allocation13_spill] sm:$0xff] }
 0x187   :  { %2456 = vmatmul.mubr.f32.vlgmr.msra.gmra.mxu1 %v11787_v46  ;;  %2497 = vmatprep.subr.mxu0 %v11788_v48  ;;  %v11803_v48 = vld [vmem:[#allocation35_spill] sm:$0xff] }
 0x188   :  { %2728 = vmatprep.subr.mxu1 %v6691_v0  ;;  %2501 = vmatpush1.msra.mxu0 %v11789_v50  ;;  %v11797_v0 = vld [vmem:[#allocation88_spill] sm:$0xff]  ;;  %v11804_v50 = vand.u32 4294901760, %v11803_v48  ;;  %v11821_v48 = vld [vmem:[#allocation53_spill] sm:$0xff] }
 0x189   :  { %2730 = vmatpush1.msra.mxu1 %v6693_v3  ;;  %2505 = vmatprep.subr.mxu0 %v11790_v39  ;;  %v11798_v56 = vand.u32 4294901760, %v11797_v0  ;;  %v11800_v3 = vld [vmem:[#allocation37_spill] sm:$0xff]  ;;  %v11813_v0 = vld [vmem:[#allocation43_spill] sm:$0xff] }
 0x18a   :  { %2732 = vmatprep.subr.mxu1 %v11791_v20  ;;  %2509 = vmatpush1.msra.mxu0 %v11793_v61  ;;  %v11801_v16 = vand.u32 4294901760, %v11800_v3  ;;  %v11805_v39 = vld [vmem:[#allocation33_spill] sm:$0xff]  ;;  %v11809_v61 = vld [vmem:[#allocation56_spill] sm:$0xff] }
 0x18b   :  { %2734 = vmatpush1.msra.mxu1 %v11794_v58  ;;  %2513 = vmatprep.subr.mxu0 %v11795_v40  ;;  %v11806_v20 = vld [vmem:[#allocation17_spill] sm:$0xff] }
 0x18c   :  { %2736 = vmatprep.subr.mxu1 %v11796_v6  ;;  %2517 = vmatpush1.msra.mxu0 %v11798_v56  ;;  %v11807_v43 = vand.u32 4294901760, %v11806_v20  ;;  %v11810_v58 = vld [vmem:[#allocation45_spill] sm:$0xff]  ;;  %v11812_v6 = vld [vmem:[#allocation64_spill] sm:$0xff]  ;;  %v11814_v56 = vand.u32 4294901760, %v11813_v0 }
 0x18d   :  { %2738 = vmatpush1.msra.mxu1 %v11799_v12  ;;  %2521 = vmatprep.subr.mxu0 %v11801_v16  ;;  %v11811_v40 = vand.u32 4294901760, %v11810_v58  ;;  %v11815_v12 = vld [vmem:[#allocation62_spill] sm:$0xff]  ;;  %v11816_v3 = vld [vmem:[#allocation21_spill] sm:$0xff] }
 0x18e   :  { %2740 = vmatprep.subr.mxu1 %v11802_v25  ;;  %2525 = vmatpush1.msra.mxu0 %v11804_v50  ;;  %v11817_v16 = vand.u32 4294901760, %v11816_v3  ;;  %v11820_v25 = vld [vmem:[#allocation72_spill] sm:$0xff]  ;;  %v11822_v50 = vand.u32 4294901760, %v11821_v48  ;;  %v11836_v3 = vld [vmem:[#allocation30_spill] sm:$0xff] }
 0x18f   :  { %2742 = vmatpush1.msra.mxu1 %v11805_v39  ;;  %2529 = vmatprep.subr.mxu0 %v11807_v43  ;;  %v11823_v39 = vld [vmem:[#allocation51_spill] sm:$0xff]  ;;  %v11825_v43 = vld [vmem:[#allocation76_spill] sm:$0xff] }
 0x190   :  { %2744 = vmatprep.subr.mxu1 %v11713_v36  ;;  %2533 = vmatpush1.msra.mxu0 %v11808_v62  ;;  %v11818_v36 = vld [vmem:[#allocation47_spill] sm:$0xff]  ;;  %v11824_v20 = vand.u32 4294901760, %v11823_v39  ;;  %v11826_v62 = vld [vmem:[#allocation25_spill] sm:$0xff] }
 0x191   :  { %2746 = vmatpush1.msra.mxu1 %v11809_v61  ;;  %2537 = vmatprep.subr.mxu0 %v11811_v40  ;;  %v11819_v27 = vand.u32 4294901760, %v11818_v36  ;;  %v11827_v61 = vand.u32 4294901760, %v11826_v62  ;;  %v11830_v40 = vld [vmem:[#allocation14_spill] sm:$0xff] }
 0x192   :  { %2748 = vmatprep.subr.mxu1 %v11812_v6  ;;  %2541 = vmatpush1.msra.mxu0 %v11814_v56  ;;  %v11831_v6 = vld [vmem:[#allocation61_spill] sm:$0xff]  ;;  %v11833_v56 = vld [vmem:[#allocation16_spill] sm:$0xff] }
 0x193   :  { %2750 = vmatpush1.msra.mxu1 %v11815_v12  ;;  %2545 = vmatprep.subr.mxu0 %v11817_v16  ;;  %v11832_v0 = vand.u32 4294901760, %v11831_v6  ;;  %v11837_v16 = vand.u32 4294901760, %v11836_v3  ;;  %v165_v3 = vld [vmem:[#allocation5 + $0x3e8] sm:$0xff] }
 0x194   :  { %2752 = vmatprep.subr.mxu1 %v11720_v30  ;;  %2549 = vmatpush1.msra.mxu0 %v11819_v27  ;;  %v11828_v30 = vld [vmem:[#allocation55_spill] sm:$0xff]  ;;  %v11840_v27 = vld [vmem:[#allocation18_spill] sm:$0xff] }
 0x195   :  { %2754 = vmatpush1.msra.mxu1 %v11820_v25  ;;  %2553 = vmatprep.subr.mxu0 %v11822_v50  ;;  %v11829_v58 = vand.u32 4294901760, %v11828_v30  ;;  %v11841_v25 = vld [vmem:[#allocation36_spill] sm:$0xff]  ;;  %v11843_v50 = vld [vmem:[#allocation67_spill] sm:$0xff] }
 0x196   :  { %2756 = vmatprep.subr.mxu1 %v6852_v63  ;;  %2557 = vmatpush1.msra.mxu0 %v11824_v20  ;;  %v11834_v63 = vld [vmem:[#allocation59_spill] sm:$0xff]  ;;  %v11842_v48 = vand.u32 4294901760, %v11841_v25  ;;  %v11844_v39 = vand.u32 4294901760, %v11843_v50  ;;  %v11851_v30 = vld [vmem:[#allocation44_spill] sm:$0xff]  ;;  %v11864_v25 = vld [vmem:[#allocation81_spill] sm:$0xff] }
 0x197   :  { %2758 = vmatpush1.msra.mxu1 %v11825_v43  ;;  %2561 = vmatprep.subr.mxu0 %v11827_v61  ;;  %v11835_v12 = vand.u32 4294901760, %v11834_v63  ;;  %v11845_v20 = vld [vmem:[#allocation19_spill] sm:$0xff]  ;;  %v11850_v61 = vld [vmem:[#allocation22_spill] sm:$0xff]  ;;  %v157_v50 = vld [vmem:[#allocation5 + $0x3a8] sm:$0xff] }
 0x198   :  { %2760 = vmatprep.subr.mxu1 %v11726_v60  ;;  %2565 = vmatpush1.msra.mxu0 %v11829_v58  ;;  %v11838_v60 = vld [vmem:[#allocation63_spill] sm:$0xff]  ;;  %v11852_v58 = vand.u32 4294901760, %v11851_v30 }
 0x199   :  { %2762 = vmatpush1.msra.mxu1 %v11830_v40  ;;  %2569 = vmatprep.subr.mxu0 %v11832_v0  ;;  %v11839_v36 = vand.u32 4294901760, %v11838_v60  ;;  %v11853_v40 = vld [vmem:[#allocation24_spill] sm:$0xff]  ;;  %v11856_v0 = vld [vmem:[#allocation46_spill] sm:$0xff] }
 0x19a   :  { %2764 = vmatprep.subr.mxu1 %v11833_v56  ;;  %2573 = vmatpush1.msra.mxu0 %v11835_v12  ;;  %v11857_v56 = vand.u32 4294901760, %v11856_v0  ;;  %v11860_v12 = vld [vmem:[#allocation26_spill] sm:$0xff]  ;;  %v7874_v0 = vand.u32 4294901760, %v157_v50 }
 0x19b   :  { %2766 = vmatpush1.msra.mxu1 %v11731_v14  ;;  %2577 = vmatprep.subr.mxu0 %v11837_v16  ;;  %v11846_v14 = vld [vmem:[#allocation38_spill] sm:$0xff]  ;;  %v11861_v16 = vld [vmem:[#allocation87_spill] sm:$0xff] }
 0x19c   :  { %2768 = vmatprep.subr.mxu1 %v11732_v42  ;;  %2581 = vmatpush1.msra.mxu0 %v11839_v36  ;;  %v11847_v43 = vand.u32 4294901760, %v11846_v14  ;;  %v11848_v42 = vld [vmem:[#allocation71_spill] sm:$0xff]  ;;  %v11862_v60 = vand.u32 4294901760, %v11861_v16  ;;  %v11863_v36 = vld [vmem:[#allocation28_spill] sm:$0xff]  ;;  %11874 = vst [vmem:[#allocation52_spill] sm:$0xff] %v7874_v0 }
 0x19d   :  { %2770 = vmatpush1.msra.mxu1 %v11840_v27  ;;  %2585 = vmatprep.subr.mxu0 %v11842_v48  ;;  %v11849_v62 = vand.u32 4294901760, %v11848_v42  ;;  %v164_v27 = vld [vmem:[#allocation5 + $0x3e0] sm:$0xff]  ;;  %v11865_v48 = vand.u32 4294901760, %v11864_v25  ;;  %v11869_v42 = vld [vmem:[#allocation89_spill] sm:$0xff]  ;;  %v133_v16 = vld [vmem:[#allocation5 + $0x2e8] sm:$0xff] }
 0x19e   :  { %2772 = vmatprep.subr.mxu1 %v11735_v41  ;;  %2589 = vmatpush1.msra.mxu0 %v11844_v39  ;;  %v11854_v41 = vld [vmem:[#allocation75_spill] sm:$0xff]  ;;  %v7869_v30 = vand.u32 4294901760, %v164_v27 }
 0x19f   :  { %2774 = vmatpush1.msra.mxu1 %v11845_v20  ;;  %2593 = vmatprep.subr.mxu0 %v11847_v43  ;;  %v11855_v6 = vand.u32 4294901760, %v11854_v41  ;;  %v156_v39 = vld [vmem:[#allocation5 + $0x3a0] sm:$0xff]  ;;  %v11867_v20 = vld [vmem:[#allocation93_spill] sm:$0xff]  ;;  %v7864_v43 = vand.u32 4294901760, %v165_v3 }
 0x1a0   :  { %2776 = vmatprep.subr.mxu1 %v11739_v31  ;;  %2597 = vmatpush2.msra.mxu0 %v11849_v62  ;;  %v11858_v31 = vld [vmem:[#allocation79_spill] sm:$0xff]  ;;  %v11868_v14 = vand.u32 4294901760, %v11867_v20  ;;  %v11870_v62 = vand.u32 4294901760, %v11869_v42 }
 0x1a1   :  { %2778 = vmatpush1.msra.mxu1 %v11850_v61  ;;  %2601 = vmatprep.subr.mxu0 %v11852_v58  ;;  %v11859_v63 = vand.u32 4294901760, %v11858_v31  ;;  %v11871_v61 = vld [vmem:[#allocation32_spill] sm:$0xff]  ;;  %v148_v58 = vld [vmem:[#allocation5 + $0x360] sm:$0xff] }
 0x1a2   :  { %2780 = vmatprep.subr.mxu1 %v11853_v40  ;;  %2605 = vmatpush2.msra.mxu0 %v11855_v6  ;;  %v141_v40 = vld [vmem:[#allocation5 + $0x328] sm:$0xff]  ;;  %v11872_v41 = vld [vmem:[#allocation103_spill] sm:$0xff]  ;;  %v7886_v25 = vand.u32 4294901760, %v148_v58 }
 0x1a3   :  { %2782 = vmatpush1.msra.mxu1 %v11743_v33  ;;  %2609 = vmatprep.subr.mxu0 %v11857_v56  ;;  %v11866_v33 = vld [vmem:[#allocation27_spill] sm:$0xff]  ;;  %v11873_v6 = vand.u32 4294901760, %v11872_v41  ;;  %v7876_v56 = vand.u32 4294901760, %v156_v39  ;;  %v7910_v41 = vsub.f32 %v157_v50, %v7874_v0 }
 0x1a4   :  { %2784 = vmatprep.subr.mxu1 %v11744_v22  ;;  %2613 = vmatpush2.msra.mxu0 %v11859_v63  ;;  %v149_v22 = vld [vmem:[#allocation5 + $0x368] sm:$0xff]  ;;  %v140_v31 = vld [vmem:[#allocation5 + $0x320] sm:$0xff]  ;;  %v11876_v63 = vld [vmem:[#allocation94_spill] sm:$0xff]  ;;  %11880 = vst [vmem:[#allocation58_spill] sm:$0xff] %v7886_v25 }
 0x1a5   :  { %2786 = vmatpush1.msra.mxu1 %v11860_v12  ;;  %2617 = vmatprep.subr.mxu0 %v11862_v60  ;;  %v11877_v12 = vand.u32 4294901760, %v11876_v63  ;;  %v11878_v60 = vld [vmem:[#allocation107_spill] sm:$0xff]  ;;  %11891 = vst [vmem:[#allocation39_spill] sm:$0xff] %v7910_v41  ;;  %v829_v63 = vpop.f32.mrf.mxu1 }
 0x1a6   :  { %2788 = vmatprep.subr.mxu1 %v11863_v36  ;;  %2621 = vmatpush2.msra.mxu0 %v11865_v48  ;;  %v11879_v36 = vand.u32 4294901760, %v11878_v60  ;;  %v7891_v48 = vsub.f32 %v165_v3, %v7864_v43  ;;  %v132_v42 = vld [vmem:[#allocation5 + $0x2e0] sm:$0xff]  ;;  %v7907_v3 = vand.u32 4294901760, %v133_v16 }
 0x1a7   :  { %2790 = vmatpush1.msra.mxu1 %v11866_v33  ;;  %2625 = vmatprep.subr.mxu0 %v11868_v14  ;;  %v11883_v33 = vld [vmem:[#allocation101_spill] sm:$0xff]  ;;  %v7899_v14 = vand.u32 4294901760, %v140_v31 }
 0x1a8   :  { %2792 = vmatprep.subr.mxu1 %v11751_v11  ;;  %2629 = vmatpush2.msra.mxu0 %v11870_v62  ;;  %v7878_v11 = vand.u32 4294901760, %v149_v22  ;;  %11882 = vst [vmem:[#allocation68_spill] sm:$0xff] %v7891_v48  ;;  %v11884_v20 = vand.u32 4294901760, %v11883_v33  ;;  %v11887_v62 = vld [vmem:[#allocation111_spill] sm:$0xff]  ;;  %11890 = vst [vmem:[#allocation54_spill] sm:$0xff] %v7907_v3  ;;  %v10746_v50 = vand.u32 4294901760, %v7891_v48  ;;  %v436_v33 = vpop.f32.mrf.mxu0 }
 0x1a9   :  { %2794 = vmatpush2.msra.mxu1 %v11871_v61  ;;  %2633 = vmatprep.subr.mxu0 %v11873_v6  ;;  %11886 = vst [vmem:[#allocation78_spill] sm:$0xff] %v7899_v14  ;;  %v7905_v61 = vsub.f32 %v156_v39, %v7876_v56  ;;  %v7925_v39 = vand.u32 4294901760, %v132_v42 }
 0x1aa   :  { %2796 = vmatprep.subr.mxu1 %v11753_v21  ;;  %11875 = vst [vmem:[#allocation48_spill] sm:$0xff] %v7878_v11  ;;  %2637 = vmatpush2.msra.mxu0 %v11877_v12  ;;  %v7888_v21 = vand.u32 4294901760, %v141_v40  ;;  %v11895_v12 = vld [vmem:[#allocation116_spill] sm:$0xff] }
 0x1ab   :  { %2798 = vmatpush2.msra.mxu1 %v11755_v49  ;;  %2641 = vmatprep.subr.mxu0 %v11879_v36  ;;  %v7897_v49 = vsub.f32 %v164_v27, %v7869_v30  ;;  %11889 = vst [vmem:[#allocation90_spill] sm:$0xff] %v7905_v61  ;;  %v11893_v27 = vld [vmem:[#allocation80_spill] sm:$0xff]  ;;  %v11896_v60 = vand.u32 4294901760, %v11895_v12  ;;  %11898 = vst [vmem:[#allocation15_spill] sm:$0xff] %v7925_v39 }
 0x1ac   :  { %2800 = vmatprep.subr.mxu1 %v11757_v45  ;;  %11881 = vst [vmem:[#allocation60_spill] sm:$0xff] %v7888_v21  ;;  %2645 = vmatpush2.msra.mxu0 %v11884_v20  ;;  %v11888_v45 = vand.u32 4294901760, %v11887_v62  ;;  %v11894_v6 = vand.u32 4294901760, %v11893_v27  ;;  %v7928_v36 = vsub.f32 %v141_v40, %v7888_v21  ;;  %v11900_v20 = vld [vmem:[#allocation112_spill] sm:$0xff]  ;;  %v7934_v62 = vsub.f32 %v140_v31, %v7899_v14 }
 0x1ad   :  { %2802 = vmatpush2.msra.mxu1 %v11759_v24  ;;  %11885 = vst [vmem:[#allocation66_spill] sm:$0xff] %v7897_v49  ;;  %v7913_v24 = vsub.f32 %v149_v22, %v7878_v11  ;;  %v124_v22 = vld [vmem:[#allocation5 + $0x2a0] sm:$0xff]  ;;  %v125_v27 = vld [vmem:[#allocation5 + $0x2a8] sm:$0xff]  ;;  %v7964_v40 = vadd.f32 %v829_v63, %v436_v33  ;;  %v11917_v63 = vand.u32 4294901760, %v7910_v41 }
 0x1ae   :  { %2649 = vmatprep.subr.mxu0 %v11888_v45  ;;  %2804 = vmatprep.subr.mxu1 %v11760_v17  ;;  %v7922_v17 = vsub.f32 %v148_v58, %v7886_v25  ;;  %11899 = vst [vmem:[#allocation41_spill] sm:$0xff] %v7928_v36  ;;  %11902 = vst [vmem:[#allocation20_spill] sm:$0xff] %v7934_v62  ;;  %v11903_v58 = vld [vmem:[#allocation117_spill] sm:$0xff]  ;;  %v11920_v12 = vld [vmem:[#allocation120_spill] sm:$0xff] }
 0x1af   :  { %11892 = vst [vmem:[#allocation70_spill] sm:$0xff] %v7913_v24  ;;  %2653 = vmatpush2.msra.mxu0 %v11894_v6  ;;  %2806 = vmatpush2.msra.mxu1 %v11762_v13  ;;  %v11901_v13 = vand.u32 4294901760, %v11900_v20  ;;  %v11904_v45 = vand.u32 4294901760, %v11903_v58  ;;  %v7949_v20 = vand.u32 4294901760, %v124_v22  ;;  %v11909_v58 = vld [vmem:[#allocation119_spill] sm:$0xff]  ;;  %v438_v6 = vpop.f32.mrf.mxu0  ;;  %v7983_v33 = vsub.f32 %v7910_v41, %v11917_v63 }
 0x1b0   :  { %2657 = vmatprep.subr.mxu0 %v11896_v60  ;;  %2808 = vmatprep.subr.mxu1 %v11763_v29  ;;  %11897 = vst [vmem:[#allocation92_spill] sm:$0xff] %v7922_v17  ;;  %v10747_v29 = vand.u32 4294901760, %v7897_v49  ;;  %v7944_v60 = vsub.f32 %v133_v16, %v7907_v3  ;;  %v7960_v16 = vsub.f32 %v132_v42, %v7925_v39  ;;  %v7974_v42 = vand.u32 4294901760, %v125_v27 }
 0x1b1   :  { %2661 = vmatpush2.msra.mxu0 %v11901_v13  ;;  %2810 = vmatpush2.msra.mxu1 %v11764_v28  ;;  %v11906_v28 = vld [vmem:[#allocation114_spill] sm:$0xff]  ;;  %11908 = vst [vmem:[#allocation23_spill] sm:$0xff] %v7949_v20  ;;  %v831_v13 = vpop.f32.mrf.mxu1  ;;  %v11921_v1 = vand.u32 4294901760, %v11920_v12  ;;  %v8002_v63 = vsub.f32 %v124_v22, %v7949_v20  ;;  %v11927_v22 = vand.u32 4294901760, %v7928_v36 }
 0x1b2   :  { %2665 = vmatprep.subr.mxu0 %v11904_v45  ;;  %2812 = vmatprep.subr.mxu1 %v11765_v37  ;;  %11905 = vst [vmem:[#allocation49_spill] sm:$0xff] %v7944_v60  ;;  %v11907_v31 = vand.u32 4294901760, %v11906_v28  ;;  %v11910_v37 = vand.u32 4294901760, %v11909_v58  ;;  %v7957_v45 = vsub.f32 %v7891_v48, %v10746_v50  ;;  %11911 = vst [vmem:[#allocation57_spill] sm:$0xff] %v7960_v16  ;;  %v117_v28 = vld [vmem:[#allocation5 + $0x268] sm:$0xff]  ;;  %v11912_v58 = vld [vmem:[#allocation118_spill] sm:$0xff] }
 0x1b3   :  { %2814 = vmatpush2.msra.mxu1 %v11766_v18  ;;  %11914 = vst [vmem:[#allocation65_spill] sm:$0xff] %v7974_v42  ;;  %v11915_v18 = vld [vmem:[#allocation121_spill] sm:$0xff]  ;;  %v108_v50 = vld [vmem:[#allocation5 + $0x220] sm:$0xff]  ;;  %11922 = vst [vmem:[#allocation34_spill] sm:$0xff] %v8002_v63  ;;  %v8020_v12 = vsub.f32 %v7928_v36, %v11927_v22  ;;  %v8035_v22 = vsub.f32 %v125_v27, %v7974_v42  ;;  %v1173_v27 = vpop.f32.mrf.mxu1 }
 0x1b4   :  { %2669 = vmatpush2.msra.mxu0 %v11907_v31  ;;  %2816 = vmatprep.subr.mxu1 %v11767_v10  ;;  %v116_v31 = vld [vmem:[#allocation5 + $0x260] sm:$0xff]  ;;  %v7972_v10 = vsub.f32 %v7897_v49, %v10747_v29  ;;  %v11916_v46 = vand.u32 4294901760, %v11915_v18  ;;  %v7996_v18 = vadd.f32 %v831_v13, %v438_v6  ;;  %v11926_v13 = vand.u32 4294901760, %v7922_v17 }
 0x1b5   :  { %2673 = vmatprep.subr.mxu0 %v11910_v37  ;;  %v11913_v37 = vand.u32 4294901760, %v11912_v58  ;;  %2818 = vmatpush2.msra.mxu1 %v11768_v15  ;;  %v11918_v15 = vand.u32 4294901760, %v7905_v61  ;;  %v8006_v23 = vand.u32 4294901760, %v116_v31  ;;  %v11932_v36 = vld [vmem:[#allocation123_spill] sm:$0xff] }
 0x1b6   :  { %2820 = vmatprep.subr.mxu1 %v11769_v47  ;;  %v1032_v47 = vpop.f32.mrf.mxu0 }
 0x1b7   :  { %2677 = vmatpush2.msra.mxu0 %v11913_v37  ;;  %v7988_v58 = vsub.f32 %v7905_v61, %v11918_v15  ;;  %v11919_v37 = vand.u32 4294901760, %v7913_v24  ;;  %2822 = vmatpush2.msra.mxu1 %v11770_v54  ;;  %v8004_v15 = vand.u32 4294901760, %v117_v28  ;;  %11924 = vst [vmem:[#allocation73_spill] sm:$0xff] %v8006_v23  ;;  %v109_v54 = vld [vmem:[#allocation5 + $0x228] sm:$0xff]  ;;  %v11936_v61 = vld [vmem:[#allocation122_spill] sm:$0xff]  ;;  %v1033_v48 = vadd.f32 %v1032_v47, %v7964_v40 }
 0x1b8   :  { %2681 = vmatprep.subr.mxu0 %v11916_v46  ;;  %2824 = vmatprep.subr.mxu1 %v11771_v5  ;;  %v11933_v46 = vand.u32 4294901760, %v11932_v36  ;;  %v101_v5 = vld [vmem:[#allocation5 + $0x1e8] sm:$0xff]  ;;  %v11937_v41 = vand.u32 4294901760, %v11936_v61  ;;  %v8054_v36 = vand.u32 4294901760, %v109_v54  ;;  %v11941_v61 = vld [vmem:[#allocation115_spill] sm:$0xff] }
 0x1b9   :  { %v7993_v29 = vsub.f32 %v7913_v24, %v11919_v37  ;;  %2685 = vmatpush2.msra.mxu0 %v11921_v1  ;;  %11923 = vst [vmem:[#allocation69_spill] sm:$0xff] %v8004_v15  ;;  %v11925_v37 = vand.u32 4294901760, %v7514_v55  ;;  %v8015_v1 = vsub.f32 %v7922_v17, %v11926_v13  ;;  %v11928_v55 = vand.u32 4294901760, %v7510_v19  ;;  %2826 = vmatpush2.msra.mxu1 %v11772_v35  ;;  %v100_v17 = vld [vmem:[#allocation5 + $0x1e0] sm:$0xff] }
 0x1ba   :  { %v11930_v13 = vand.u32 4294901760, %v7934_v62  ;;  %2828 = vmatprep.subr.mxu1 %v11773_v38  ;;  %v11934_v24 = vand.u32 4294901760, %v7944_v60  ;;  %v8052_v38 = vsub.f32 %v116_v31, %v8006_v23  ;;  %11939 = vst [vmem:[#allocation50_spill] sm:$0xff] %v8054_v36  ;;  %v11940_v35 = vand.u32 4294901760, %v7555_v7 }
 0x1bb   :  { %2689 = vmatprep.subr.mxu0 %v11925_v37  ;;  %v8027_v37 = vand.u32 4294901760, %v108_v50  ;;  %2830 = vmatpush2.msra.mxu1 %v11774_v57  ;;  %v8067_v31 = vand.u32 4294901760, %v100_v17  ;;  %v11944_v19 = vand.u32 4294901760, %v7559_v32  ;;  %v8081_v57 = vand.u32 4294901760, %v101_v5 }
 0x1bc   :  { %2693 = vmatpush2.msra.mxu0 %v11928_v55  ;;  %v8032_v6 = vsub.f32 %v7934_v62, %v11930_v13  ;;  %v8046_v13 = vsub.f32 %v7944_v60, %v11934_v24  ;;  %v1034_v62 = vpop.f32.mrf.mxu0  ;;  %11938 = vst [vmem:[#allocation83_spill] sm:$0xff] %v8052_v38  ;;  %v92_v55 = vld [vmem:[#allocation5 + $0x1a0] sm:$0xff]  ;;  %v8060_v24 = vsub.f32 %v117_v28, %v8004_v15  ;;  %v11943_v60 = vand.u32 4294901760, %v7960_v16  ;;  %v11945_v28 = vld [vmem:[#allocation113_spill] sm:$0xff] }
 0x1bd   :  { %11929 = vst [vmem:[#allocation40_spill] sm:$0xff] %v8027_v37  ;;  %2697 = vmatprep.subr.mxu0 %v11933_v46  ;;  %v8056_v46 = vld [vmem:[#allocation5 + $0x1a8] sm:$0xff]  ;;  %2832 = vmatprep.subr.mxu1 %v11941_v61  ;;  %11942 = vst [vmem:[#allocation86_spill] sm:$0xff] %v8067_v31  ;;  %v84_v61 = vld [vmem:[#allocation5 + $0x160] sm:$0xff]  ;;  %v1035_v32 = vadd.f32 %v1034_v62, %v7996_v18 }
 0x1be   :  { %11931 = vst [vmem:[#allocation77_spill] sm:$0xff] %v8032_v6  ;;  %11935 = vst [vmem:[#allocation42_spill] sm:$0xff] %v8046_v13  ;;  %2701 = vmatpush2.msra.mxu0 %v11937_v41  ;;  %v8072_v49 = vsub.f32 %v7960_v16, %v11943_v60  ;;  %2834 = vmatpush2.msra.mxu1 %v11945_v28  ;;  %v1438_v7 = vpop.f32.mrf.mxu0  ;;  %v11948_v60 = vand.u32 4294901760, %v7571_v44  ;;  %v85_v28 = vld [vmem:[#allocation5 + $0x168] sm:$0xff]  ;;  %v1175_v16 = vpop.f32.mrf.mxu1  ;;  %v11953_v41 = vld [vmem:[#allocation97_spill] sm:$0xff]  ;;  %v11954_v44 = vand.u32 4294901760, %v8002_v63 }
 0x1bf   :  { %2705 = vmatprep.subr.mxu0 %v11940_v35  ;;  %v8078_v35 = vsub.f32 %v108_v50, %v8027_v37  ;;  %11947 = vst [vmem:[#allocation95_spill] sm:$0xff] %v8081_v57  ;;  %2836 = vmatprep.subr.mxu1 %v7452_v59  ;;  %v8092_v50 = vand.u32 4294901760, %v92_v55  ;;  %v11951_v6 = vld [vmem:[#allocation124_spill] sm:$0xff]  ;;  %v1174_v13 = vadd.f32 %v1173_v27, %v1033_v48  ;;  %v8121_v48 = vand.u32 4294901760, %v85_v28  ;;  %v76_v62 = vld [vmem:[#allocation5 + $0x120] sm:$0xff] }
 0x1c0   :  { %2709 = vmatpush2.msra.mxu0 %v11944_v19  ;;  %v8090_v19 = vand.u32 4294901760, %v8056_v46  ;;  %v11952_v37 = vand.u32 4294901760, %v11951_v6  ;;  %2719 = vmatprep.mubr.f32.mxu0 %v11953_v41  ;;  %v8100_v40 = vsub.f32 %v8002_v63, %v11954_v44  ;;  %v11956_v6 = vld [vmem:[#allocation99_spill] sm:$0xff]  ;;  %v1440_v47 = vpop.f32.mrf.mxu0  ;;  %v1176_v18 = vadd.f32 %v1175_v16, %v1035_v32  ;;  %v1575_v44 = vpop.f32.mrf.mxu1 }
 0x1c1   :  { %11946 = vst [vmem:[#allocation85_spill] sm:$0xff] %v8078_v35  ;;  %2713 = vmatprep.subr.mxu0 %v11948_v60  ;;  %11950 = vst [vmem:[#allocation98_spill] sm:$0xff] %v8092_v50  ;;  %v8105_v60 = vsub.f32 %v109_v54, %v8054_v36  ;;  %2838 = vmatpush2.msra.mxu1 %v7443_v34  ;;  %v11958_v54 = vand.u32 4294901760, %v8035_v22  ;;  %v8123_v34 = vand.u32 4294901760, %v84_v61  ;;  %v8150_v63 = vand.u32 4294901760, %v76_v62 }
 0x1c2   :  { %11949 = vst [vmem:[#allocation91_spill] sm:$0xff] %v8090_v19  ;;  %2717 = vmatpush2.msra.mxu0 %v11952_v37  ;;  %v8111_v37 = vsub.f32 %v100_v17, %v8067_v31  ;;  %2840 = vmatprep.subr.mxu1 %v7475_v26  ;;  %11959 = vst [vmem:[#allocation106_spill] sm:$0xff] %v8121_v48  ;;  %v8126_v17 = vsub.f32 %v101_v5, %v8081_v57  ;;  %v11963_v5 = vand.u32 4294901760, %v8060_v24 }
 0x1c3   :  { %11955 = vst [vmem:[#allocation96_spill] sm:$0xff] %v8105_v60  ;;  %2721 = vmatmul.mubr.f32.vlgmr.msra.gmra.mxu0 %v11956_v6  ;;  %2865 = vmatprep.subr.mxu0 %v7864_v43  ;;  %v8119_v59 = vsub.f32 %v8035_v22, %v11958_v54  ;;  %11960 = vst [vmem:[#allocation84_spill] sm:$0xff] %v8123_v34  ;;  %v1439_v27 = vadd.f32 %v1438_v7, %v1174_v13  ;;  %v69_v54 = vld [vmem:[#allocation5 + $0xe8] sm:$0xff] }
 0x1c4   :  { %11957 = vst [vmem:[#allocation82_spill] sm:$0xff] %v8111_v37  ;;  %11961 = vst [vmem:[#allocation110_spill] sm:$0xff] %v8126_v17  ;;  %2842 = vmatpush2.msra.mxu1 %v7478_v9  ;;  %2867 = vmatpush1.msra.mxu0 %v7869_v30  ;;  %v8131_v26 = vsub.f32 %v92_v55, %v8092_v50  ;;  %v8140_v16 = vsub.f32 %v8060_v24, %v11963_v5  ;;  %v11964_v9 = vand.u32 4294901760, %v8052_v38  ;;  %v77_v55 = vld [vmem:[#allocation5 + $0x128] sm:$0xff] }
 0x1c5   :  { %2844 = vmatprep.subr.mxu1 %v7502_v8  ;;  %2869 = vmatprep.subr.mxu0 %v7874_v0  ;;  %v1441_v32 = vadd.f32 %v1440_v47, %v1176_v18  ;;  %v1576_v8 = vadd.f32 %v1575_v44, %v1439_v27  ;;  %11965 = vst [vmem:[#allocation74_spill] sm:$0xff] %v8150_v63  ;;  %v68_v0 = vld [vmem:[#allocation5 + $0xe0] sm:$0xff]  ;;  %v8166_v27 = vand.u32 4294901760, %v77_v55  ;;  %v8173_v47 = vld [vmem:[#allocation5 + $0xa8] sm:$0xff] }
 0x1c6   :  { %11962 = vst [vmem:[#allocation11_spill] sm:$0xff] %v8131_v26  ;;  %v8145_v13 = vsub.f32 %v8052_v38, %v11964_v9  ;;  %2846 = vmatpush2.msra.mxu1 %v7494_v51  ;;  %2871 = vmatpush1.msra.mxu0 %v7876_v56  ;;  %v8154_v5 = vsub.f32 %v8056_v46, %v8090_v19  ;;  %v1577_v9 = vpop.f32.mrf.mxu1 }
 0x1c7   :  { %2848 = vmatprep.subr.mxu1 %v7520_v53  ;;  %2873 = vmatprep.subr.mxu0 %v7878_v11  ;;  %v8160_v51 = vsub.f32 %v84_v61, %v8123_v34  ;;  %5432 = vst [vmem:[#allocation7] sm:$0xff] %v1576_v8  ;;  %v1578_v46 = vadd.f32 %v1577_v9, %v1441_v32  ;;  %11968 = vst [vmem:[#allocation88_spill] sm:$0xff] %v8166_v27  ;;  %v11969_v53 = vand.u32 4294901760, %v8078_v35  ;;  %v60_v61 = vld [vmem:[#allocation5 + $0xa0] sm:$0xff] }
 0x1c8   :  { %11966 = vst [vmem:[#allocation29_spill] sm:$0xff] %v8154_v5  ;;  %2850 = vmatpush2.msra.mxu1 %v7530_v4  ;;  %2875 = vmatpush1.msra.mxu0 %v7886_v25  ;;  %v8176_v44 = vsub.f32 %v85_v28, %v8121_v48  ;;  %v11971_v4 = vand.u32 4294901760, %v8105_v60  ;;  %v8185_v8 = vand.u32 4294901760, %v69_v54  ;;  %v8187_v9 = vand.u32 4294901760, %v68_v0 }
 0x1c9   :  { %11967 = vst [vmem:[#allocation12_spill] sm:$0xff] %v8160_v51  ;;  %v8171_v7 = vsub.f32 %v8078_v35, %v11969_v53  ;;  %2852 = vmatprep.subr.mxu1 %v7537_v52  ;;  %2877 = vmatprep.subr.mxu0 %v7888_v21  ;;  %5433 = vst [vmem:[#allocation7 + $0x8] sm:$0xff] %v1578_v46  ;;  %v8195_v18 = vsub.f32 %v76_v62, %v8150_v63  ;;  %v11975_v53 = vand.u32 4294901760, %v8126_v17  ;;  %v52_v35 = vld [vmem:[#allocation5 + $0x60] sm:$0xff]  ;;  %v45_v21 = vld [vmem:[#allocation5 + $0x28] sm:$0xff] }
 0x1ca   :  { %11970 = vst [vmem:[#allocation31_spill] sm:$0xff] %v8176_v44  ;;  %v8183_v32 = vsub.f32 %v8105_v60, %v11971_v4  ;;  %11972 = vst [vmem:[#allocation37_spill] sm:$0xff] %v8185_v8  ;;  %2854 = vmatpush2.msra.mxu1 %v7547_v2  ;;  %2856 = vmatprep.mubr.f32.mxu1 %v11953_v41  ;;  %v11976_v46 = vand.u32 4294901760, %v8111_v37  ;;  %v8211_v28 = vand.u32 4294901760, %v8173_v47  ;;  %v8213_v62 = vand.u32 4294901760, %v60_v61  ;;  %v53_v4 = vld [vmem:[#allocation5 + $0x68] sm:$0xff] }
 0x1cb   :  { %11973 = vst [vmem:[#allocation13_spill] sm:$0xff] %v8187_v9  ;;  %11974 = vst [vmem:[#allocation35_spill] sm:$0xff] %v8195_v18  ;;  %2879 = vmatpush1.msra.mxu0 %v7899_v14  ;;  %2858 = vmatmul.mubr.f32.vlgmr.msra.gmra.mxu1 %v11956_v6  ;;  %v8203_v2 = vsub.f32 %v8126_v17, %v11975_v53  ;;  %v11979_v14 = vand.u32 4294901760, %v7957_v45  ;;  %v11981_v60 = vand.u32 4294901760, %v7972_v10  ;;  %v11985_v17 = vand.u32 4294901760, %v7983_v33 }
 0x1cc   :  { %v8208_v52 = vsub.f32 %v8111_v37, %v11976_v46  ;;  %11977 = vst [vmem:[#allocation33_spill] sm:$0xff] %v8211_v28  ;;  %11978 = vst [vmem:[#allocation17_spill] sm:$0xff] %v8213_v62  ;;  %2881 = vmatprep.subr.mxu0 %v7907_v3  ;;  %v8222_v46 = vsub.f32 %v77_v55, %v8166_v27  ;;  %v44_v37 = vld [vmem:[#allocation5 + $0x20] sm:$0xff]  ;;  %v8229_v45 = vsub.f32 %v68_v0, %v8187_v9 }
 0x1cd   :  { %3014 = vmatprep.subr.mxu1 %v11979_v14  ;;  %2883 = vmatpush1.msra.mxu0 %v7925_v39  ;;  %v11983_v14 = vand.u32 4294901760, %v8131_v26  ;;  %v8237_v55 = vsub.f32 %v69_v54, %v8185_v8  ;;  %v11986_v10 = vand.u32 4294901760, %v8154_v5  ;;  %v8247_v0 = vand.u32 4294901760, %v53_v4  ;;  %v276_v39 = vld [vmem:[#allocation5 + $0x760] sm:$0xff] }
 0x1ce   :  { %11980 = vst [vmem:[#allocation56_spill] sm:$0xff] %v8222_v46  ;;  %3020 = vmatpush1.msra.mxu1 %v11981_v60  ;;  %11982 = vst [vmem:[#allocation45_spill] sm:$0xff] %v8229_v45  ;;  %2885 = vmatprep.subr.mxu0 %v7974_v42  ;;  %v8249_v3 = vand.u32 4294901760, %v52_v35  ;;  %v11989_v54 = vand.u32 4294901760, %v7988_v58  ;;  %v11992_v42 = vand.u32 4294901760, %v7993_v29  ;;  %v11994_v58 = vand.u32 4294901760, %v8160_v51 }
 0x1cf   :  { %v8234_v53 = vsub.f32 %v8131_v26, %v11983_v14  ;;  %11984 = vst [vmem:[#allocation64_spill] sm:$0xff] %v8237_v55  ;;  %3026 = vmatprep.subr.mxu1 %v11985_v17  ;;  %v8245_v60 = vsub.f32 %v8154_v5, %v11986_v10  ;;  %11987 = vst [vmem:[#allocation43_spill] sm:$0xff] %v8247_v0  ;;  %2887 = vmatpush1.msra.mxu0 %v7949_v20  ;;  %v8260_v10 = vand.u32 4294901760, %v44_v37  ;;  %v293_v26 = vld [vmem:[#allocation5 + $0x7e8] sm:$0xff]  ;;  %v292_v5 = vld [vmem:[#allocation5 + $0x7e0] sm:$0xff] }
 0x1d0   :  { %11988 = vst [vmem:[#allocation62_spill] sm:$0xff] %v8249_v3  ;;  %3032 = vmatpush1.msra.mxu1 %v11989_v54  ;;  %v8258_v17 = vsub.f32 %v60_v61, %v8213_v62  ;;  %2889 = vmatprep.subr.mxu0 %v8004_v15  ;;  %v11993_v14 = vand.u32 4294901760, %v8176_v44  ;;  %v8273_v54 = vsub.f32 %v8160_v51, %v11994_v58  ;;  %v8275_v33 = vand.u32 4294901760, %v45_v21  ;;  %v284_v51 = vld [vmem:[#allocation5 + $0x7a0] sm:$0xff] }
 0x1d1   :  { %11991 = vst [vmem:[#allocation47_spill] sm:$0xff] %v8260_v10  ;;  %3038 = vmatprep.subr.mxu1 %v11992_v42  ;;  %2891 = vmatpush1.msra.mxu0 %v8006_v23  ;;  %v11996_v29 = vand.u32 4294901760, %v8015_v1  ;;  %v8286_v58 = vsub.f32 %v8173_v47, %v8211_v28  ;;  %v11998_v61 = vand.u32 4294901760, %v8020_v12  ;;  %v8293_v1 = vsub.f32 %v52_v35, %v8249_v3  ;;  %v12002_v47 = vld [vmem:[#allocation40_spill] sm:$0xff] }
 0x1d2   :  { %11990 = vst [vmem:[#allocation21_spill] sm:$0xff] %v8258_v17  ;;  %v8268_v20 = vsub.f32 %v8176_v44, %v11993_v14  ;;  %11995 = vst [vmem:[#allocation72_spill] sm:$0xff] %v8275_v33  ;;  %2893 = vmatprep.subr.mxu0 %v8054_v36  ;;  %v8301_v15 = vsub.f32 %v53_v4, %v8247_v0  ;;  %v12003_v14 = vld [vmem:[#allocation77_spill] sm:$0xff]  ;;  %v8307_v12 = vsub.f32 %v44_v37, %v8260_v10  ;;  %v285_v23 = vld [vmem:[#allocation5 + $0x7a8] sm:$0xff] }
 0x1d3   :  { %3044 = vmatpush1.msra.mxu1 %v11996_v29  ;;  %11997 = vst [vmem:[#allocation53_spill] sm:$0xff] %v8286_v58  ;;  %11999 = vst [vmem:[#allocation51_spill] sm:$0xff] %v8293_v1  ;;  %v12000_v29 = vand.u32 4294901760, %v8195_v18  ;;  %2895 = vmatpush1.msra.mxu0 %v12002_v47  ;;  %v12004_v36 = vand.u32 4294901760, %v12003_v14  ;;  %v8311_v35 = vand.u32 4294901760, %v292_v5  ;;  %v12012_v44 = vand.u32 4294901760, %v8072_v49 }
 0x1d4   :  { %3050 = vmatprep.subr.mxu1 %v11998_v61  ;;  %12001 = vst [vmem:[#allocation76_spill] sm:$0xff] %v8301_v15  ;;  %12005 = vst [vmem:[#allocation25_spill] sm:$0xff] %v8307_v12  ;;  %v8309_v61 = vand.u32 4294901760, %v293_v26  ;;  %2897 = vmatprep.subr.mxu0 %v8081_v57  ;;  %v12014_v14 = vand.u32 4294901760, %v8229_v45  ;;  %v277_v57 = vld [vmem:[#allocation5 + $0x768] sm:$0xff]  ;;  %v12016_v49 = vand.u32 4294901760, %v8119_v59 }
 0x1d5   :  { %v8298_v42 = vsub.f32 %v8195_v18, %v12000_v29  ;;  %3056 = vmatpush1.msra.mxu1 %v12004_v36  ;;  %12007 = vst [vmem:[#allocation14_spill] sm:$0xff] %v8311_v35  ;;  %v12008_v29 = vld [vmem:[#allocation42_spill] sm:$0xff]  ;;  %v12010_v36 = vand.u32 4294901760, %v8222_v46  ;;  %v8324_v18 = vand.u32 4294901760, %v284_v51  ;;  %2899 = vmatpush1.msra.mxu0 %v8067_v31 }
 0x1d6   :  { %12006 = vst [vmem:[#allocation55_spill] sm:$0xff] %v8309_v61  ;;  %v12009_v4 = vand.u32 4294901760, %v12008_v29  ;;  %v12013_v29 = vand.u32 4294901760, %v8237_v55  ;;  %v8337_v47 = vsub.f32 %v8229_v45, %v12014_v14  ;;  %2901 = vmatprep.subr.mxu0 %v8090_v19  ;;  %v12020_v19 = vand.u32 4294901760, %v8258_v17  ;;  %v268_v45 = vld [vmem:[#allocation5 + $0x720] sm:$0xff]  ;;  %3394 = vmatprep.mubr.f32.mxu1 %v11953_v41 }
 0x1d7   :  { %v8322_v37 = vsub.f32 %v8222_v46, %v12010_v36  ;;  %12011 = vst [vmem:[#allocation61_spill] sm:$0xff] %v8324_v18  ;;  %v8341_v46 = vsub.f32 %v45_v21, %v8275_v33  ;;  %2903 = vmatpush1.msra.mxu0 %v8092_v50  ;;  %v12018_v36 = vand.u32 4294901760, %v8100_v40  ;;  %v8355_v21 = vsub.f32 %v292_v5, %v8311_v35  ;;  %v261_v5 = vld [vmem:[#allocation5 + $0x6e8] sm:$0xff]  ;;  %v12140_v41 = vld [vmem:[#allocation15_spill] sm:$0xff] }
 0x1d8   :  { %3062 = vmatprep.subr.mxu1 %v12009_v4  ;;  %v8332_v4 = vsub.f32 %v8237_v55, %v12013_v29  ;;  %v8347_v29 = vand.u32 4294901760, %v285_v23  ;;  %v8360_v59 = vsub.f32 %v8258_v17, %v12020_v19  ;;  %v8365_v31 = vsub.f32 %v293_v26, %v8309_v61  ;;  %2905 = vmatprep.subr.mxu0 %v8121_v48  ;;  %v260_v17 = vld [vmem:[#allocation5 + $0x6e0] sm:$0xff] }
 0x1d9   :  { %3068 = vmatpush1.msra.mxu1 %v12012_v44  ;;  %12015 = vst [vmem:[#allocation16_spill] sm:$0xff] %v8341_v46  ;;  %12019 = vst [vmem:[#allocation30_spill] sm:$0xff] %v8355_v21  ;;  %v269_v44 = vld [vmem:[#allocation5 + $0x728] sm:$0xff]  ;;  %v12023_v40 = vand.u32 4294901760, %v8140_v16  ;;  %v8374_v14 = vand.u32 4294901760, %v277_v57  ;;  %2907 = vmatpush1.msra.mxu0 %v8123_v34  ;;  %v12026_v50 = vand.u32 4294901760, %v8145_v13 }
 0x1da   :  { %3074 = vmatprep.subr.mxu1 %v12016_v49  ;;  %12017 = vst [vmem:[#allocation59_spill] sm:$0xff] %v8347_v29  ;;  %v8362_v49 = vand.u32 4294901760, %v276_v39  ;;  %12022 = vst [vmem:[#allocation18_spill] sm:$0xff] %v8365_v31  ;;  %v12027_v16 = vand.u32 4294901760, %v8286_v58  ;;  %2909 = vmatprep.subr.mxu0 %v8166_v27  ;;  %v12028_v19 = vand.u32 4294901760, %v8183_v32  ;;  %v12030_v48 = vand.u32 4294901760, %v8293_v1 }
 0x1db   :  { %3080 = vmatpush1.msra.mxu1 %v12018_v36  ;;  %v8372_v36 = vsub.f32 %v284_v51, %v8324_v18  ;;  %12025 = vst [vmem:[#allocation67_spill] sm:$0xff] %v8374_v14  ;;  %v8403_v51 = vand.u32 4294901760, %v268_v45  ;;  %2911 = vmatpush1.msra.mxu0 %v8150_v63  ;;  %v12033_v27 = vand.u32 4294901760, %v8171_v7  ;;  %v8414_v34 = vsub.f32 %v285_v23, %v8347_v29 }
 0x1dc   :  { %12021 = vst [vmem:[#allocation63_spill] sm:$0xff] %v8362_v49  ;;  %3086 = vmatprep.subr.mxu1 %v12023_v40  ;;  %v8385_v40 = vsub.f32 %v8286_v58, %v12027_v16  ;;  %v8399_v26 = vsub.f32 %v8293_v1, %v12030_v48  ;;  %v8401_v16 = vand.u32 4294901760, %v269_v44  ;;  %v252_v48 = vld [vmem:[#allocation5 + $0x6a0] sm:$0xff]  ;;  %2913 = vmatprep.subr.mxu0 %v8185_v8  ;;  %v12036_v1 = vand.u32 4294901760, %v8203_v2 }
 0x1dd   :  { %12024 = vst [vmem:[#allocation36_spill] sm:$0xff] %v8372_v36  ;;  %3092 = vmatpush1.msra.mxu1 %v12026_v50  ;;  %v12029_v50 = vand.u32 4294901760, %v8301_v15  ;;  %12032 = vst [vmem:[#allocation38_spill] sm:$0xff] %v8403_v51  ;;  %v12037_v63 = vand.u32 4294901760, %v8307_v12  ;;  %2915 = vmatpush1.msra.mxu0 %v8187_v9  ;;  %v12040_v23 = vand.u32 4294901760, %v8208_v52  ;;  %v12043_v32 = vand.u32 4294901760, %v8245_v60 }
 0x1de   :  { %3098 = vmatprep.subr.mxu1 %v12028_v19  ;;  %12031 = vst [vmem:[#allocation19_spill] sm:$0xff] %v8401_v16  ;;  %v8410_v19 = vsub.f32 %v276_v39, %v8362_v49  ;;  %12035 = vst [vmem:[#allocation22_spill] sm:$0xff] %v8414_v34  ;;  %v8426_v39 = vand.u32 4294901760, %v260_v17  ;;  %v3169_v2 = vand.u32 4294901760, %v8385_v40  ;;  %2917 = vmatprep.subr.mxu0 %v8211_v28  ;;  %v8450_v9 = vand.u32 4294901760, %v252_v48  ;;  %v244_v52 = vld [vmem:[#allocation5 + $0x660] sm:$0xff] }
 0x1df   :  { %v8394_v13 = vsub.f32 %v8301_v15, %v12029_v50  ;;  %3104 = vmatpush1.msra.mxu1 %v12033_v27  ;;  %v8422_v7 = vsub.f32 %v8307_v12, %v12037_v63  ;;  %v8424_v27 = vand.u32 4294901760, %v261_v5  ;;  %v253_v50 = vld [vmem:[#allocation5 + $0x6a8] sm:$0xff]  ;;  %v8440_v12 = vsub.f32 %v277_v57, %v8374_v14  ;;  %2919 = vmatpush1.msra.mxu0 %v8213_v62 }
 0x1e0   :  { %12034 = vst [vmem:[#allocation71_spill] sm:$0xff] %v8410_v19  ;;  %3110 = vmatprep.subr.mxu1 %v12036_v1  ;;  %12039 = vst [vmem:[#allocation24_spill] sm:$0xff] %v8426_v39  ;;  %v12041_v1 = vand.u32 4294901760, %v8341_v46  ;;  %v8448_v40 = vsub.f32 %v268_v45, %v8403_v51  ;;  %v12047_v57 = vand.u32 4294901760, %v8365_v31  ;;  %v8460_v60 = vand.u32 4294901760, %v253_v50  ;;  %2921 = vmatprep.subr.mxu0 %v8247_v0  ;;  %v237_v0 = vld [vmem:[#allocation5 + $0x628] sm:$0xff] }
 0x1e1   :  { %12038 = vst [vmem:[#allocation44_spill] sm:$0xff] %v8424_v27  ;;  %3116 = vmatpush1.msra.mxu1 %v12040_v23  ;;  %12042 = vst [vmem:[#allocation75_spill] sm:$0xff] %v8440_v12  ;;  %v245_v23 = vld [vmem:[#allocation5 + $0x668] sm:$0xff]  ;;  %v8464_v45 = vsub.f32 %v269_v44, %v8401_v16  ;;  %v12050_v62 = vand.u32 4294901760, %v8268_v20  ;;  %2923 = vmatpush1.msra.mxu0 %v8249_v3  ;;  %v12054_v44 = vand.u32 4294901760, %v8273_v54  ;;  %v228_v3 = vld [vmem:[#allocation5 + $0x5e0] sm:$0xff] }
 0x1e2   :  { %v8436_v8 = vsub.f32 %v8341_v46, %v12041_v1  ;;  %3122 = vmatprep.subr.mxu1 %v12043_v32  ;;  %12044 = vst [vmem:[#allocation46_spill] sm:$0xff] %v8448_v40  ;;  %12045 = vst [vmem:[#allocation79_spill] sm:$0xff] %v8450_v9  ;;  %v12046_v1 = vand.u32 4294901760, %v8234_v53  ;;  %v8458_v63 = vsub.f32 %v8365_v31, %v12047_v57  ;;  %v12052_v57 = vand.u32 4294901760, %v8355_v21 }
 0x1e3   :  { %12048 = vst [vmem:[#allocation26_spill] sm:$0xff] %v8460_v60  ;;  %12049 = vst [vmem:[#allocation87_spill] sm:$0xff] %v8464_v45  ;;  %v8479_v32 = vsub.f32 %v261_v5, %v8424_v27  ;;  %2925 = vmatprep.subr.mxu0 %v8275_v33  ;;  %v12056_v5 = vand.u32 4294901760, %v8322_v37  ;;  %v8496_v54 = vsub.f32 %v252_v48, %v8450_v9  ;;  %v12061_v33 = vand.u32 4294901760, %v8414_v34 }
 0x1e4   :  { %3128 = vmatpush1.msra.mxu1 %v12046_v1  ;;  %v8471_v1 = vsub.f32 %v260_v17, %v8426_v39  ;;  %v8476_v28 = vsub.f32 %v8355_v21, %v12052_v57  ;;  %v3193_v20 = vand.u32 4294901760, %v8436_v8  ;;  %v236_v21 = vld [vmem:[#allocation5 + $0x620] sm:$0xff]  ;;  %v8498_v8 = vand.u32 4294901760, %v245_v23  ;;  %2927 = vmatpush1.msra.mxu0 %v8260_v10 }
 0x1e5   :  { %3134 = vmatprep.subr.mxu1 %v12050_v62  ;;  %12053 = vst [vmem:[#allocation81_spill] sm:$0xff] %v8479_v32  ;;  %v12055_v62 = vand.u32 4294901760, %v8372_v36  ;;  %12057 = vst [vmem:[#allocation27_spill] sm:$0xff] %v8496_v54  ;;  %v12060_v57 = vand.u32 4294901760, %v8298_v42  ;;  %v3205_v53 = vand.u32 4294901760, %v8458_v63  ;;  %v8510_v37 = vsub.f32 %v8414_v34, %v12061_v33  ;;  %2929 = vmatprep.subr.mxu0 %v8309_v61 }
 0x1e6   :  { %12051 = vst [vmem:[#allocation28_spill] sm:$0xff] %v8471_v1  ;;  %3140 = vmatpush1.msra.mxu1 %v12054_v44  ;;  %12058 = vst [vmem:[#allocation93_spill] sm:$0xff] %v8498_v8  ;;  %v8500_v44 = vand.u32 4294901760, %v244_v52  ;;  %v3211_v42 = vand.u32 4294901760, %v8476_v28  ;;  %v8520_v63 = vand.u32 4294901760, %v237_v0  ;;  %2931 = vmatpush2.msra.mxu0 %v8311_v35  ;;  %v12066_v48 = vand.u32 4294901760, %v8337_v47 }
 0x1e7   :  { %v8488_v17 = vsub.f32 %v8372_v36, %v12055_v62  ;;  %3146 = vmatprep.subr.mxu1 %v12056_v5  ;;  %v229_v5 = vld [vmem:[#allocation5 + $0x5e8] sm:$0xff]  ;;  %v8514_v36 = vsub.f32 %v253_v50, %v8460_v60  ;;  %v12063_v62 = vand.u32 4294901760, %v8332_v4  ;;  %v12067_v61 = vand.u32 4294901760, %v8440_v12  ;;  %2933 = vmatprep.subr.mxu0 %v8347_v29 }
 0x1e8   :  { %12059 = vst [vmem:[#allocation89_spill] sm:$0xff] %v8500_v44  ;;  %3152 = vmatpush1.msra.mxu1 %v12060_v57  ;;  %12064 = vst [vmem:[#allocation103_spill] sm:$0xff] %v8520_v63  ;;  %v8522_v57 = vand.u32 4294901760, %v236_v21  ;;  %v12068_v28 = vand.u32 4294901760, %v8410_v19  ;;  %v8542_v47 = vsub.f32 %v244_v52, %v8500_v44  ;;  %v8551_v33 = vand.u32 4294901760, %v228_v3  ;;  %v221_v35 = vld [vmem:[#allocation5 + $0x5a8] sm:$0xff]  ;;  %2935 = vmatpush2.msra.mxu0 %v8324_v18 }
 0x1e9   :  { %12062 = vst [vmem:[#allocation32_spill] sm:$0xff] %v8514_v36  ;;  %3158 = vmatprep.subr.mxu1 %v12063_v62  ;;  %v8532_v4 = vsub.f32 %v8440_v12, %v12067_v61  ;;  %v8549_v61 = vand.u32 4294901760, %v229_v5  ;;  %v12074_v52 = vand.u32 4294901760, %v8464_v45  ;;  %v8564_v29 = vsub.f32 %v245_v23, %v8498_v8  ;;  %2937 = vmatprep.subr.mxu0 %v8374_v14  ;;  %v213_v18 = vld [vmem:[#allocation5 + $0x568] sm:$0xff] }
 0x1ea   :  { %12065 = vst [vmem:[#allocation94_spill] sm:$0xff] %v8522_v57  ;;  %3164 = vmatpush1.msra.mxu1 %v12066_v48  ;;  %v8537_v62 = vsub.f32 %v8410_v19, %v12068_v28  ;;  %12069 = vst [vmem:[#allocation107_spill] sm:$0xff] %v8542_v47  ;;  %v12070_v48 = vand.u32 4294901760, %v8448_v40  ;;  %v12073_v28 = vand.u32 4294901760, %v8360_v59  ;;  %v8570_v59 = vsub.f32 %v236_v21, %v8522_v57 }
 0x1eb   :  { %3170 = vmatprep.subr.mxu1 %v3169_v2  ;;  %12071 = vst [vmem:[#allocation101_spill] sm:$0xff] %v8549_v61  ;;  %12072 = vst [vmem:[#allocation111_spill] sm:$0xff] %v8551_v33  ;;  %v3217_v2 = vand.u32 4294901760, %v8510_v37  ;;  %v8560_v10 = vsub.f32 %v8464_v45, %v12074_v52  ;;  %v12078_v37 = vand.u32 4294901760, %v8479_v32  ;;  %v220_v52 = vld [vmem:[#allocation5 + $0x5a0] sm:$0xff]  ;;  %2939 = vmatpush2.msra.mxu0 %v8362_v49  ;;  %v12080_v23 = vand.u32 4294901760, %v8399_v26 }
 0x1ec   :  { %v8547_v50 = vsub.f32 %v8448_v40, %v12070_v48  ;;  %3176 = vmatpush1.msra.mxu1 %v12073_v28  ;;  %12075 = vst [vmem:[#allocation80_spill] sm:$0xff] %v8564_v29  ;;  %v12076_v40 = vand.u32 4294901760, %v8394_v13  ;;  %12077 = vst [vmem:[#allocation116_spill] sm:$0xff] %v8570_v59  ;;  %v8579_v48 = vsub.f32 %v237_v0, %v8520_v63  ;;  %v3229_v13 = vand.u32 4294901760, %v8532_v4 }
 0x1ed   :  { %v8575_v28 = vsub.f32 %v8479_v32, %v12078_v37  ;;  %v3235_v21 = vand.u32 4294901760, %v8537_v62  ;;  %v8591_v14 = vand.u32 4294901760, %v221_v35  ;;  %2941 = vmatprep.subr.mxu0 %v8401_v16  ;;  %v8596_v26 = vsub.f32 %v228_v3, %v8551_v33  ;;  %v204_v62 = vld [vmem:[#allocation5 + $0x520] sm:$0xff] }
 0x1ee   :  { %3182 = vmatprep.subr.mxu1 %v12076_v40  ;;  %12079 = vst [vmem:[#allocation112_spill] sm:$0xff] %v8579_v48  ;;  %v12081_v40 = vand.u32 4294901760, %v8471_v1  ;;  %v3247_v0 = vand.u32 4294901760, %v8547_v50  ;;  %v8600_v49 = vsub.f32 %v229_v5, %v8549_v61  ;;  %2943 = vmatpush2.msra.mxu0 %v8403_v51  ;;  %v3241_v16 = vand.u32 4294901760, %v8560_v10  ;;  %v196_v51 = vld [vmem:[#allocation5 + $0x4e0] sm:$0xff] }
 0x1ef   :  { %3188 = vmatpush1.msra.mxu1 %v12080_v23  ;;  %12082 = vst [vmem:[#allocation117_spill] sm:$0xff] %v8596_v26  ;;  %v212_v23 = vld [vmem:[#allocation5 + $0x560] sm:$0xff]  ;;  %v8611_v3 = vand.u32 4294901760, %v220_v52  ;;  %2945 = vmatprep.subr.mxu0 %v8424_v27  ;;  %v3253_v5 = vand.u32 4294901760, %v8575_v28  ;;  %v8621_v10 = vand.u32 4294901760, %v213_v18  ;;  %v197_v27 = vld [vmem:[#allocation5 + $0x4e8] sm:$0xff] }
 0x1f0   :  { %v8589_v37 = vsub.f32 %v8471_v1, %v12081_v40  ;;  %3194 = vmatprep.subr.mxu1 %v3193_v20  ;;  %12083 = vst [vmem:[#allocation114_spill] sm:$0xff] %v8600_v49  ;;  %v12084_v40 = vand.u32 4294901760, %v8422_v7  ;;  %v12085_v20 = vand.u32 4294901760, %v8514_v36  ;;  %v205_v1 = vld [vmem:[#allocation5 + $0x528] sm:$0xff]  ;;  %v12087_v7 = vand.u32 4294901760, %v8496_v54  ;;  %2947 = vmatpush2.msra.mxu0 %v8426_v39 }
 0x1f1   :  { %12086 = vst [vmem:[#allocation119_spill] sm:$0xff] %v8611_v3  ;;  %12088 = vst [vmem:[#allocation118_spill] sm:$0xff] %v8621_v10  ;;  %2949 = vmatprep.subr.mxu0 %v8460_v60  ;;  %v12092_v28 = vand.u32 4294901760, %v8488_v17 }
 0x1f2   :  { %3200 = vmatpush1.msra.mxu1 %v12084_v40  ;;  %v8609_v50 = vsub.f32 %v8514_v36, %v12085_v20  ;;  %v8619_v40 = vsub.f32 %v8496_v54, %v12087_v7  ;;  %v3259_v4 = vand.u32 4294901760, %v8589_v37  ;;  %v8626_v36 = vand.u32 4294901760, %v212_v23  ;;  %2951 = vmatpush2.msra.mxu0 %v8450_v9  ;;  %v188_v9 = vld [vmem:[#allocation5 + $0x4a0] sm:$0xff] }
 0x1f3   :  { %3206 = vmatprep.subr.mxu1 %v3205_v53  ;;  %v8628_v53 = vand.u32 4294901760, %v204_v62  ;;  %v12090_v7 = vand.u32 4294901760, %v8542_v47  ;;  %v8637_v54 = vand.u32 4294901760, %v205_v1  ;;  %v8641_v37 = vsub.f32 %v221_v35, %v8591_v14  ;;  %2953 = vmatprep.subr.mxu0 %v8498_v8 }
 0x1f4   :  { %3212 = vmatpush2.msra.mxu1 %v3211_v42  ;;  %12089 = vst [vmem:[#allocation121_spill] sm:$0xff] %v8626_v36  ;;  %v3265_v60 = vand.u32 4294901760, %v8609_v50  ;;  %v3271_v35 = vand.u32 4294901760, %v8619_v40  ;;  %v12095_v42 = vand.u32 4294901760, %v8579_v48  ;;  %v8662_v50 = vand.u32 4294901760, %v197_v27  ;;  %2955 = vmatpush2.msra.mxu0 %v8500_v44 }
 0x1f5   :  { %3218 = vmatprep.subr.mxu1 %v3217_v2  ;;  %v8635_v20 = vsub.f32 %v8542_v47, %v12090_v7  ;;  %12091 = vst [vmem:[#allocation120_spill] sm:$0xff] %v8641_v37  ;;  %v8648_v2 = vsub.f32 %v220_v52, %v8611_v3  ;;  %v12094_v7 = vand.u32 4294901760, %v8564_v29  ;;  %v8653_v47 = vand.u32 4294901760, %v196_v51  ;;  %v189_v52 = vld [vmem:[#allocation5 + $0x4a8] sm:$0xff]  ;;  %2957 = vmatprep.subr.mxu0 %v8520_v63  ;;  %v180_v63 = vld [vmem:[#allocation5 + $0x460] sm:$0xff] }
 0x1f6   :  { %3224 = vmatpush2.msra.mxu1 %v12092_v28  ;;  %v8660_v17 = vsub.f32 %v8579_v48, %v12095_v42  ;;  %v8665_v28 = vsub.f32 %v213_v18, %v8621_v10  ;;  %v12098_v40 = vand.u32 4294901760, %v8570_v59  ;;  %v8685_v48 = vsub.f32 %v205_v1, %v8637_v54  ;;  %2959 = vmatpush2.msra.mxu0 %v8522_v57  ;;  %v173_v57 = vld [vmem:[#allocation5 + $0x428] sm:$0xff] }
 0x1f7   :  { %12093 = vst [vmem:[#allocation123_spill] sm:$0xff] %v8648_v2  ;;  %v3276_v39 = vsub.f32 %v8564_v29, %v12094_v7  ;;  %3230 = vmatprep.subr.mxu1 %v3229_v13  ;;  %v8669_v7 = vsub.f32 %v212_v23, %v8626_v36  ;;  %v8672_v13 = vsub.f32 %v204_v62, %v8628_v53  ;;  %v3283_v18 = vand.u32 4294901760, %v8635_v20  ;;  %v181_v62 = vld [vmem:[#allocation5 + $0x468] sm:$0xff] }
 0x1f8   :  { %12096 = vst [vmem:[#allocation122_spill] sm:$0xff] %v8665_v28  ;;  %3236 = vmatpush2.msra.mxu1 %v3235_v21  ;;  %v3294_v42 = vsub.f32 %v8570_v59, %v12098_v40  ;;  %v12099_v21 = vand.u32 4294901760, %v8600_v49  ;;  %12100 = vst [vmem:[#allocation113_spill] sm:$0xff] %v8685_v48  ;;  %v8689_v8 = vsub.f32 %v196_v51, %v8653_v47  ;;  %2961 = vmatprep.subr.mxu0 %v8549_v61 }
 0x1f9   :  { %12097 = vst [vmem:[#allocation115_spill] sm:$0xff] %v8672_v13  ;;  %3242 = vmatprep.subr.mxu1 %v3241_v16  ;;  %v3277_v40 = vand.u32 4294901760, %v3276_v39  ;;  %v8691_v16 = vand.u32 4294901760, %v189_v52  ;;  %v8696_v44 = vand.u32 4294901760, %v188_v9  ;;  %v8700_v39 = vsub.f32 %v197_v27, %v8662_v50  ;;  %2963 = vmatpush2.msra.mxu0 %v8551_v33 }
 0x1fa   :  { %v3300_v23 = vsub.f32 %v8600_v49, %v12099_v21  ;;  %3248 = vmatpush2.msra.mxu1 %v3247_v0  ;;  %v3289_v21 = vand.u32 4294901760, %v8660_v17  ;;  %v3295_v51 = vand.u32 4294901760, %v3294_v42  ;;  %v12102_v0 = vand.u32 4294901760, %v8596_v26  ;;  %v172_v17 = vld [vmem:[#allocation5 + $0x420] sm:$0xff]  ;;  %2965 = vmatprep.subr.mxu0 %v8591_v14 }
 0x1fb   :  { %3254 = vmatprep.subr.mxu1 %v3253_v5  ;;  %12101 = vst [vmem:[#allocation124_spill] sm:$0xff] %v8700_v39  ;;  %v8706_v61 = vand.u32 4294901760, %v181_v62  ;;  %v12103_v27 = vand.u32 4294901760, %v8641_v37  ;;  %v8713_v33 = vand.u32 4294901760, %v180_v63  ;;  %2967 = vmatpush2.msra.mxu0 %v8611_v3  ;;  %v12104_v42 = vand.u32 4294901760, %v8648_v2 }
 0x1fc   :  { %3260 = vmatpush2.msra.mxu1 %v3259_v4  ;;  %v3306_v20 = vsub.f32 %v8596_v26, %v12102_v0  ;;  %v3301_v1 = vand.u32 4294901760, %v3300_v23  ;;  %v8720_v5 = vand.u32 4294901760, %v173_v57  ;;  %v8724_v23 = vsub.f32 %v189_v52, %v8691_v16  ;;  %2969 = vmatprep.subr.mxu0 %v8621_v10 }
 0x1fd   :  { %3266 = vmatprep.subr.mxu1 %v3265_v60  ;;  %v3312_v49 = vsub.f32 %v8641_v37, %v12103_v27  ;;  %v3318_v0 = vsub.f32 %v8648_v2, %v12104_v42  ;;  %v8728_v27 = vsub.f32 %v188_v9, %v8696_v44  ;;  %v12108_v4 = vand.u32 4294901760, %v8665_v28  ;;  %2971 = vmatpush2.msra.mxu0 %v8626_v36 }
 0x1fe   :  { %3272 = vmatpush2.msra.mxu1 %v3271_v35  ;;  %12105 = vst [vmem:[#allocation77_spill] sm:$0xff] %v8720_v5  ;;  %12106 = vst [vmem:[#allocation42_spill] sm:$0xff] %v8724_v23  ;;  %v8733_v3 = vand.u32 4294901760, %v172_v17  ;;  %v3307_v60 = vand.u32 4294901760, %v3306_v20  ;;  %v12110_v52 = vand.u32 4294901760, %v8669_v7  ;;  %2973 = vmatprep.subr.mxu0 %v8637_v54  ;;  %v12111_v42 = vand.u32 4294901760, %v8685_v48 }
 0x1ff   :  { %3278 = vmatprep.subr.mxu1 %v3277_v40  ;;  %12107 = vst [vmem:[#allocation125_spill] sm:$0xff] %v8728_v27  ;;  %v3324_v35 = vsub.f32 %v8665_v28, %v12108_v4  ;;  %v8741_v40 = vsub.f32 %v181_v62, %v8706_v61  ;;  %v3313_v9 = vand.u32 4294901760, %v3312_v49  ;;  %v8745_v4 = vsub.f32 %v180_v63, %v8713_v33 }
 0x200   :  { %12109 = vst [vmem:[#allocation126_spill] sm:$0xff] %v8733_v3  ;;  %3284 = vmatpush2.msra.mxu1 %v3283_v18  ;;  %v3330_v10 = vsub.f32 %v8669_v7, %v12110_v52  ;;  %v3336_v36 = vsub.f32 %v8685_v48, %v12111_v42  ;;  %2975 = vmatpush2.msra.mxu0 %v8628_v53  ;;  %v3319_v20 = vand.u32 4294901760, %v3318_v0  ;;  %v12112_v62 = vand.u32 4294901760, %v8672_v13 }
 0x201   :  { %3290 = vmatprep.subr.mxu1 %v3289_v21  ;;  %v8757_v49 = vsub.f32 %v173_v57, %v8720_v5  ;;  %2977 = vmatprep.subr.mxu0 %v8662_v50  ;;  %v3325_v63 = vand.u32 4294901760, %v3324_v35  ;;  %v8761_v42 = vsub.f32 %v172_v17, %v8733_v3  ;;  %v12114_v18 = vand.u32 4294901760, %v8700_v39 }
 0x202   :  { %3296 = vmatpush2.msra.mxu1 %v3295_v51  ;;  %v3342_v52 = vsub.f32 %v8672_v13, %v12112_v62  ;;  %2979 = vmatpush2.msra.mxu0 %v8653_v47  ;;  %v3331_v62 = vand.u32 4294901760, %v3330_v10  ;;  %v10914_v57 = vand.u32 4294901760, %v8741_v40  ;;  %v12115_v35 = vand.u32 4294901760, %v8689_v8 }
 0x203   :  { %3302 = vmatprep.subr.mxu1 %v3301_v1  ;;  %12113 = vst [vmem:[#allocation127_spill] sm:$0xff] %v8761_v42  ;;  %v3348_v51 = vsub.f32 %v8700_v39, %v12114_v18  ;;  %2981 = vmatprep.subr.mxu0 %v8691_v16  ;;  %v3337_v1 = vand.u32 4294901760, %v3336_v36  ;;  %v12116_v0 = vand.u32 4294901760, %v8724_v23  ;;  %v10920_v21 = vand.u32 4294901760, %v8761_v42 }
 0x204   :  { %3308 = vmatpush2.msra.mxu1 %v3307_v60  ;;  %v3354_v17 = vsub.f32 %v8689_v8, %v12115_v35  ;;  %2983 = vmatpush2.msra.mxu0 %v8696_v44  ;;  %v3343_v18 = vand.u32 4294901760, %v3342_v52  ;;  %v10919_v60 = vand.u32 4294901760, %v8757_v49 }
 0x205   :  { %3314 = vmatprep.subr.mxu1 %v3313_v9  ;;  %v3360_v10 = vsub.f32 %v8724_v23, %v12116_v0  ;;  %2985 = vmatprep.subr.mxu0 %v8706_v61  ;;  %v3349_v36 = vand.u32 4294901760, %v3348_v51  ;;  %v12117_v9 = vand.u32 4294901760, %v8728_v27 }
 0x206   :  { %3320 = vmatpush2.msra.mxu1 %v3319_v20  ;;  %2987 = vmatpush2.msra.mxu0 %v8713_v33  ;;  %v3372_v20 = vsub.f32 %v8741_v40, %v10914_v57  ;;  %v3355_v52 = vand.u32 4294901760, %v3354_v17  ;;  %v12120_v17 = vld [vmem:[#allocation68_spill] sm:$0xff] }
 0x207   :  { %3326 = vmatprep.subr.mxu1 %v3325_v63  ;;  %v3366_v35 = vsub.f32 %v8728_v27, %v12117_v9  ;;  %2989 = vmatprep.subr.mxu0 %v8720_v5  ;;  %v12118_v63 = vand.u32 4294901760, %v8745_v4  ;;  %v3361_v0 = vand.u32 4294901760, %v3360_v10  ;;  %v12119_v9 = vld [vmem:[#allocation108_spill] sm:$0xff]  ;;  %v12121_v5 = vld [vmem:[#allocation109_spill] sm:$0xff] }
 0x208   :  { %3332 = vmatpush2.msra.mxu1 %v3331_v62  ;;  %2991 = vmatpush2.msra.mxu0 %v8733_v3  ;;  %v3384_v62 = vsub.f32 %v8757_v49, %v10919_v60  ;;  %v12123_v3 = vld [vmem:[#allocation39_spill] sm:$0xff] }
 0x209   :  { %3338 = vmatprep.subr.mxu1 %v3337_v1  ;;  %v3378_v51 = vsub.f32 %v8745_v4, %v12118_v63  ;;  %2997 = vmatprep.mubr.f32.mxu0 %v12119_v9  ;;  %v3367_v57 = vand.u32 4294901760, %v3366_v35  ;;  %v3390_v1 = vsub.f32 %v8761_v42, %v10920_v21  ;;  %v3373_v63 = vand.u32 4294901760, %v3372_v20  ;;  %v12125_v9 = vld [vmem:[#allocation70_spill] sm:$0xff]  ;;  %v12126_v21 = vld [vmem:[#allocation92_spill] sm:$0xff]  ;;  %v12127_v20 = vld [vmem:[#allocation41_spill] sm:$0xff] }
 0x20a   :  { %3344 = vmatpush2.msra.mxu1 %v3343_v18  ;;  %3404 = vmatprep.subr.mxu0 %v12120_v17  ;;  %v12122_v18 = vld [vmem:[#allocation66_spill] sm:$0xff]  ;;  %v3385_v60 = vand.u32 4294901760, %v3384_v62  ;;  %v12133_v62 = vld [vmem:[#allocation96_spill] sm:$0xff] }
 0x20b   :  { %3350 = vmatprep.subr.mxu1 %v3349_v36  ;;  %3003 = vmatmul.mubr.f32.vlgmr.msra.gmra.mxu0 %v12121_v5  ;;  %v3379_v10 = vand.u32 4294901760, %v3378_v51  ;;  %v12124_v36 = vld [vmem:[#allocation90_spill] sm:$0xff]  ;;  %v3391_v35 = vand.u32 4294901760, %v3390_v1  ;;  %v12130_v51 = vld [vmem:[#allocation57_spill] sm:$0xff]  ;;  %v12134_v1 = vld [vmem:[#allocation60_spill] sm:$0xff] }
 0x20c   :  { %3356 = vmatpush2.msra.mxu1 %v3355_v52  ;;  %3407 = vmatpush1.msra.mxu0 %v12122_v18  ;;  %v12128_v52 = vld [vmem:[#allocation20_spill] sm:$0xff]  ;;  %v12138_v5 = vld [vmem:[#allocation54_spill] sm:$0xff] }
 0x20d   :  { %3362 = vmatprep.subr.mxu1 %v3361_v0  ;;  %3410 = vmatprep.subr.mxu0 %v12123_v3  ;;  %v12132_v0 = vld [vmem:[#allocation34_spill] sm:$0xff] }
 0x20e   :  { %3368 = vmatpush2.msra.mxu1 %v3367_v57  ;;  %3413 = vmatpush1.msra.mxu0 %v12124_v36  ;;  %v12129_v57 = vld [vmem:[#allocation49_spill] sm:$0xff] }
 0x20f   :  { %3374 = vmatprep.subr.mxu1 %v3373_v63  ;;  %3416 = vmatprep.subr.mxu0 %v12125_v9  ;;  %v12135_v63 = vld [vmem:[#allocation85_spill] sm:$0xff] }
 0x210   :  { %3380 = vmatpush2.msra.mxu1 %v3379_v10  ;;  %3419 = vmatpush1.msra.mxu0 %v12126_v21  ;;  %v12136_v10 = vld [vmem:[#allocation78_spill] sm:$0xff] }
 0x211   :  { %3386 = vmatprep.subr.mxu1 %v3385_v60  ;;  %3422 = vmatprep.subr.mxu0 %v12127_v20  ;;  %v12131_v60 = vld [vmem:[#allocation52_spill] sm:$0xff] }
 0x212   :  { %3392 = vmatpush2.msra.mxu1 %v3391_v35  ;;  %3425 = vmatpush1.msra.mxu0 %v12128_v52  ;;  %v12137_v35 = vld [vmem:[#allocation110_spill] sm:$0xff] }
 0x213   :  { %3396 = vmatmul.mubr.f32.vlgmr.msra.gmra.mxu1 %v11956_v6  ;;  %3428 = vmatprep.subr.mxu0 %v12129_v57  ;;  %v12139_v6 = vld [vmem:[#allocation82_spill] sm:$0xff] }
 0x214   :  { %3606 = vmatprep.subr.mxu1 %v7864_v43  ;;  %3431 = vmatpush1.msra.mxu0 %v12130_v51 }
 0x215   :  { %3608 = vmatpush1.msra.mxu1 %v7869_v30  ;;  %3434 = vmatprep.subr.mxu0 %v8035_v22 }
 0x216   :  { %3610 = vmatprep.subr.mxu1 %v12131_v60  ;;  %3437 = vmatpush1.msra.mxu0 %v12132_v0 }
 0x217   :  { %3612 = vmatpush1.msra.mxu1 %v7876_v56  ;;  %3440 = vmatprep.subr.mxu0 %v8060_v24 }
 0x218   :  { %3614 = vmatprep.subr.mxu1 %v7878_v11  ;;  %3443 = vmatpush1.msra.mxu0 %v8052_v38  ;;  %v12141_v11 = vld [vmem:[#allocation29_spill] sm:$0xff] }
 0x219   :  { %3616 = vmatpush1.msra.mxu1 %v7886_v25  ;;  %3446 = vmatprep.subr.mxu0 %v12133_v62  ;;  %v12142_v38 = vld [vmem:[#allocation65_spill] sm:$0xff]  ;;  %v12143_v25 = vld [vmem:[#allocation11_spill] sm:$0xff] }
 0x21a   :  { %3618 = vmatprep.subr.mxu1 %v12134_v1  ;;  %3449 = vmatpush1.msra.mxu0 %v12135_v63  ;;  %v12144_v62 = vld [vmem:[#allocation23_spill] sm:$0xff]  ;;  %v12146_v63 = vld [vmem:[#allocation69_spill] sm:$0xff] }
 0x21b   :  { %3620 = vmatpush1.msra.mxu1 %v12136_v10  ;;  %3452 = vmatprep.subr.mxu0 %v12137_v35  ;;  %v12145_v1 = vld [vmem:[#allocation31_spill] sm:$0xff]  ;;  %v12147_v10 = vld [vmem:[#allocation12_spill] sm:$0xff]  ;;  %v12148_v35 = vld [vmem:[#allocation73_spill] sm:$0xff] }
 0x21c   :  { %3622 = vmatprep.subr.mxu1 %v12138_v5  ;;  %3455 = vmatpush1.msra.mxu0 %v12139_v6  ;;  %v12149_v5 = vld [vmem:[#allocation56_spill] sm:$0xff]  ;;  %v12150_v6 = vld [vmem:[#allocation50_spill] sm:$0xff] }
 0x21d   :  { %3624 = vmatpush1.msra.mxu1 %v12140_v41  ;;  %3458 = vmatprep.subr.mxu0 %v12141_v11  ;;  %v12151_v41 = vld [vmem:[#allocation35_spill] sm:$0xff]  ;;  %v12152_v11 = vld [vmem:[#allocation40_spill] sm:$0xff] }
 0x21e   :  { %3626 = vmatprep.subr.mxu1 %v12142_v38  ;;  %3461 = vmatpush1.msra.mxu0 %v12143_v25  ;;  %v12153_v25 = vld [vmem:[#allocation95_spill] sm:$0xff] }
 0x21f   :  { %3628 = vmatpush1.msra.mxu1 %v12144_v62  ;;  %3464 = vmatprep.subr.mxu0 %v12145_v1  ;;  %v12154_v62 = vld [vmem:[#allocation45_spill] sm:$0xff]  ;;  %v12155_v1 = vld [vmem:[#allocation86_spill] sm:$0xff] }
 0x220   :  { %3630 = vmatprep.subr.mxu1 %v12146_v63  ;;  %3467 = vmatpush1.msra.mxu0 %v12147_v10  ;;  %v12156_v10 = vld [vmem:[#allocation91_spill] sm:$0xff] }
 0x221   :  { %3632 = vmatpush1.msra.mxu1 %v12148_v35  ;;  %3470 = vmatprep.subr.mxu0 %v12149_v5  ;;  %v12157_v35 = vld [vmem:[#allocation21_spill] sm:$0xff]  ;;  %v12158_v5 = vld [vmem:[#allocation98_spill] sm:$0xff] }
 0x222   :  { %3634 = vmatprep.subr.mxu1 %v12150_v6  ;;  %3473 = vmatpush1.msra.mxu0 %v12151_v41  ;;  %v12159_v41 = vld [vmem:[#allocation106_spill] sm:$0xff] }
 0x223   :  { %3636 = vmatpush1.msra.mxu1 %v12152_v11  ;;  %3476 = vmatprep.subr.mxu0 %v8237_v55  ;;  %v12160_v11 = vld [vmem:[#allocation51_spill] sm:$0xff]  ;;  %v12161_v55 = vld [vmem:[#allocation84_spill] sm:$0xff] }
 0x224   :  { %3638 = vmatprep.subr.mxu1 %v12153_v25  ;;  %3479 = vmatpush1.msra.mxu0 %v12154_v62  ;;  %v12162_v62 = vld [vmem:[#allocation88_spill] sm:$0xff] }
 0x225   :  { %3640 = vmatpush1.msra.mxu1 %v12155_v1  ;;  %3482 = vmatprep.subr.mxu0 %v8286_v58  ;;  %v12163_v1 = vld [vmem:[#allocation25_spill] sm:$0xff]  ;;  %v12164_v58 = vld [vmem:[#allocation74_spill] sm:$0xff] }
 0x226   :  { %3642 = vmatprep.subr.mxu1 %v12156_v10  ;;  %3485 = vmatpush1.msra.mxu0 %v12157_v35  ;;  %v12165_v35 = vld [vmem:[#allocation37_spill] sm:$0xff] }
 0x227   :  { %3644 = vmatpush1.msra.mxu1 %v12158_v5  ;;  %3488 = vmatprep.subr.mxu0 %v8301_v15  ;;  %v12166_v5 = vld [vmem:[#allocation30_spill] sm:$0xff]  ;;  %v12167_v15 = vld [vmem:[#allocation13_spill] sm:$0xff] }
 0x228   :  { %3646 = vmatprep.subr.mxu1 %v12159_v41  ;;  %3491 = vmatpush1.msra.mxu0 %v12160_v11  ;;  %v12168_v11 = vld [vmem:[#allocation33_spill] sm:$0xff] }
 0x229   :  { %3648 = vmatpush1.msra.mxu1 %v12161_v55  ;;  %3494 = vmatprep.subr.mxu0 %v8341_v46  ;;  %v12169_v55 = vld [vmem:[#allocation36_spill] sm:$0xff]  ;;  %v12170_v46 = vld [vmem:[#allocation17_spill] sm:$0xff] }
 0x22a   :  { %3650 = vmatprep.subr.mxu1 %v12162_v62  ;;  %3497 = vmatpush1.msra.mxu0 %v12163_v1  ;;  %v12171_v1 = vld [vmem:[#allocation43_spill] sm:$0xff] }
 0x22b   :  { %3652 = vmatpush1.msra.mxu1 %v12164_v58  ;;  %3500 = vmatprep.subr.mxu0 %v8365_v31  ;;  %v12172_v31 = vld [vmem:[#allocation62_spill] sm:$0xff] }
 0x22c   :  { %3654 = vmatprep.subr.mxu1 %v12165_v35  ;;  %3503 = vmatpush2.msra.mxu0 %v12166_v5  ;;  %v12173_v5 = vld [vmem:[#allocation72_spill] sm:$0xff] }
 0x22d   :  { %3656 = vmatpush1.msra.mxu1 %v12167_v15  ;;  %3506 = vmatprep.subr.mxu0 %v8414_v34  ;;  %v12174_v15 = vld [vmem:[#allocation46_spill] sm:$0xff]  ;;  %v12175_v34 = vld [vmem:[#allocation47_spill] sm:$0xff] }
 0x22e   :  { %3658 = vmatprep.subr.mxu1 %v12168_v11  ;;  %3509 = vmatpush2.msra.mxu0 %v12169_v55  ;;  %v12176_v55 = vld [vmem:[#allocation55_spill] sm:$0xff] }
 0x22f   :  { %3660 = vmatpush1.msra.mxu1 %v12170_v46  ;;  %3512 = vmatprep.subr.mxu0 %v8440_v12  ;;  %v12177_v46 = vld [vmem:[#allocation28_spill] sm:$0xff]  ;;  %v12178_v12 = vld [vmem:[#allocation14_spill] sm:$0xff] }
 0x230   :  { %3662 = vmatprep.subr.mxu1 %v12171_v1  ;;  %3515 = vmatpush2.msra.mxu0 %v8410_v19  ;;  %v12179_v1 = vld [vmem:[#allocation32_spill] sm:$0xff]  ;;  %v12180_v19 = vld [vmem:[#allocation59_spill] sm:$0xff] }
 0x231   :  { %3664 = vmatpush1.msra.mxu1 %v12172_v31  ;;  %3518 = vmatprep.subr.mxu0 %v8464_v45  ;;  %v12181_v31 = vld [vmem:[#allocation27_spill] sm:$0xff]  ;;  %v12182_v45 = vld [vmem:[#allocation61_spill] sm:$0xff] }
 0x232   :  { %3666 = vmatprep.subr.mxu1 %v12173_v5  ;;  %3521 = vmatpush2.msra.mxu0 %v12174_v15  ;;  %v12183_v15 = vld [vmem:[#allocation67_spill] sm:$0xff] }
 0x233   :  { %3668 = vmatpush1.msra.mxu1 %v12175_v34  ;;  %3524 = vmatprep.subr.mxu0 %v8479_v32  ;;  %v12184_v34 = vld [vmem:[#allocation107_spill] sm:$0xff] }
 0x234   :  { %3670 = vmatprep.subr.mxu1 %v12176_v55  ;;  %3527 = vmatpush2.msra.mxu0 %v12177_v46  ;;  %v12185_v32 = vld [vmem:[#allocation63_spill] sm:$0xff]  ;;  %v12186_v55 = vld [vmem:[#allocation112_spill] sm:$0xff] }
 0x235   :  { %3672 = vmatpush2.msra.mxu1 %v12178_v12  ;;  %3530 = vmatprep.subr.mxu0 %v12179_v1  ;;  %v12187_v46 = vld [vmem:[#allocation19_spill] sm:$0xff]  ;;  %v12188_v1 = vld [vmem:[#allocation38_spill] sm:$0xff] }
 0x236   :  { %3674 = vmatprep.subr.mxu1 %v12180_v19  ;;  %3533 = vmatpush2.msra.mxu0 %v12181_v31  ;;  %v12189_v19 = vld [vmem:[#allocation114_spill] sm:$0xff]  ;;  %v12190_v31 = vld [vmem:[#allocation44_spill] sm:$0xff] }
 0x237   :  { %3676 = vmatpush2.msra.mxu1 %v12182_v45  ;;  %3536 = vmatprep.subr.mxu0 %v8564_v29  ;;  %v12191_v29 = vld [vmem:[#allocation24_spill] sm:$0xff] }
 0x238   :  { %3678 = vmatprep.subr.mxu1 %v12183_v15  ;;  %3539 = vmatpush2.msra.mxu0 %v12184_v34  ;;  %v12192_v34 = vld [vmem:[#allocation26_spill] sm:$0xff] }
 0x239   :  { %3680 = vmatpush2.msra.mxu1 %v12185_v32  ;;  %3542 = vmatprep.subr.mxu0 %v12186_v55  ;;  %v12193_v55 = vld [vmem:[#allocation79_spill] sm:$0xff] }
 0x23a   :  { %3682 = vmatprep.subr.mxu1 %v12187_v46  ;;  %3545 = vmatpush2.msra.mxu0 %v8570_v59  ;;  %v12194_v59 = vld [vmem:[#allocation93_spill] sm:$0xff] }
 0x23b   :  { %3684 = vmatpush2.msra.mxu1 %v12188_v1  ;;  %3548 = vmatprep.subr.mxu0 %v12189_v19  ;;  %v12195_v19 = vld [vmem:[#allocation89_spill] sm:$0xff] }
 0x23c   :  { %3686 = vmatprep.subr.mxu1 %v12190_v31  ;;  %3551 = vmatpush2.msra.mxu0 %v8596_v26  ;;  %v12196_v26 = vld [vmem:[#allocation103_spill] sm:$0xff] }
 0x23d   :  { %3688 = vmatpush2.msra.mxu1 %v12191_v29  ;;  %3554 = vmatprep.subr.mxu0 %v8641_v37  ;;  %v12197_v37 = vld [vmem:[#allocation94_spill] sm:$0xff] }
 0x23e   :  { %3690 = vmatprep.subr.mxu1 %v12192_v34  ;;  %3557 = vmatpush2.msra.mxu0 %v8648_v2  ;;  %v12198_v2 = vld [vmem:[#allocation101_spill] sm:$0xff] }
 0x23f   :  { %3692 = vmatpush2.msra.mxu1 %v12193_v55  ;;  %3560 = vmatprep.subr.mxu0 %v8665_v28  ;;  %v12199_v28 = vld [vmem:[#allocation111_spill] sm:$0xff] }
 0x240   :  { %3694 = vmatprep.subr.mxu1 %v12194_v59  ;;  %3563 = vmatpush2.msra.mxu0 %v8669_v7 }
 0x241   :  { %3696 = vmatpush2.msra.mxu1 %v12195_v19  ;;  %3566 = vmatprep.subr.mxu0 %v8685_v48  ;;  %v12200_v48 = vld [vmem:[#allocation119_spill] sm:$0xff] }
 0x242   :  { %3698 = vmatprep.subr.mxu1 %v12196_v26  ;;  %3569 = vmatpush2.msra.mxu0 %v8672_v13  ;;  %v12201_v13 = vld [vmem:[#allocation118_spill] sm:$0xff] }
 0x243   :  { %3700 = vmatpush2.msra.mxu1 %v12197_v37  ;;  %3572 = vmatprep.subr.mxu0 %v8700_v39  ;;  %v12202_v39 = vld [vmem:[#allocation121_spill] sm:$0xff] }
 0x244   :  { %3702 = vmatprep.subr.mxu1 %v12198_v2  ;;  %3575 = vmatpush2.msra.mxu0 %v8689_v8 }
 0x245   :  { %3704 = vmatpush2.msra.mxu1 %v12199_v28  ;;  %3578 = vmatprep.subr.mxu0 %v8724_v23  ;;  %v12203_v23 = vld [vmem:[#allocation100_spill] sm:$0xff] }
 0x246   :  { %3706 = vmatprep.subr.mxu1 %v8591_v14  ;;  %3581 = vmatpush2.msra.mxu0 %v8728_v27  ;;  %v12204_v27 = vld [vmem:[#allocation102_spill] sm:$0xff] }
 0x247   :  { %3708 = vmatpush2.msra.mxu1 %v12200_v48  ;;  %3584 = vmatprep.subr.mxu0 %v8741_v40 }
 0x248   :  { %3710 = vmatprep.subr.mxu1 %v12201_v13  ;;  %3587 = vmatpush2.msra.mxu0 %v8745_v4  ;;  %v12205_v13 = vand.u32 4294901760, %v12120_v17  ;;  %v12209_v17 = vand.u32 4294901760, %v12125_v9  ;;  %v12217_v9 = vand.u32 4294901760, %v12129_v57  ;;  %v12221_v57 = vand.u32 4294901760, %v8060_v24 }
 0x249   :  { %3712 = vmatpush2.msra.mxu1 %v12202_v39  ;;  %3590 = vmatprep.subr.mxu0 %v8757_v49  ;;  %v12206_v39 = vand.u32 4294901760, %v12122_v18  ;;  %v12214_v18 = vld [vmem:[#allocation104_spill] sm:$0xff] }
 0x24a   :  { %3714 = vmatprep.subr.mxu1 %v8637_v54  ;;  %3593 = vmatpush2.msra.mxu0 %v8761_v42  ;;  %v12207_v42 = vand.u32 4294901760, %v12123_v3  ;;  %v12212_v3 = vand.u32 4294901760, %v12127_v20  ;;  %v12219_v20 = vand.u32 4294901760, %v8035_v22 }
 0x24b   :  { %3596 = vmatprep.mubr.f32.mxu0 %v12203_v23  ;;  %3716 = vmatpush2.msra.mxu1 %v8628_v53  ;;  %v12208_v23 = vand.u32 4294901760, %v12124_v36  ;;  %v12216_v36 = vld [vmem:[#allocation105_spill] sm:$0xff] }
 0x24c   :  { %3599 = vmatmul.mubr.f32.vlgmr.msra.gmra.mxu0 %v12204_v27  ;;  %3718 = vmatprep.subr.mxu1 %v8662_v50 }
 0x24d   :  { %3749 = vmatprep.subr.mxu0 %v12205_v13  ;;  %3720 = vmatpush2.msra.mxu1 %v8653_v47  ;;  %v12210_v13 = vand.u32 4294901760, %v12126_v21  ;;  %v12218_v21 = vand.u32 4294901760, %v12130_v51 }
 0x24e   :  { %3753 = vmatpush1.msra.mxu0 %v12206_v39  ;;  %3722 = vmatprep.subr.mxu1 %v8691_v16  ;;  %v12211_v39 = vld [vmem:[#allocation77_spill] sm:$0xff] }
 0x24f   :  { %3757 = vmatprep.subr.mxu0 %v12207_v42  ;;  %3724 = vmatpush2.msra.mxu1 %v8696_v44  ;;  %v12213_v42 = vld [vmem:[#allocation126_spill] sm:$0xff] }
 0x250   :  { %3761 = vmatpush1.msra.mxu0 %v12208_v23  ;;  %3726 = vmatprep.subr.mxu1 %v8706_v61  ;;  %v12215_v23 = vand.u32 4294901760, %v12128_v52  ;;  %v12220_v52 = vand.u32 4294901760, %v12132_v0 }
 0x251   :  { %3765 = vmatprep.subr.mxu0 %v12209_v17  ;;  %3728 = vmatpush2.msra.mxu1 %v8713_v33  ;;  %v12222_v17 = vld [vmem:[#allocation48_spill] sm:$0xff] }
 0x252   :  { %3769 = vmatpush1.msra.mxu0 %v12210_v13  ;;  %3730 = vmatprep.subr.mxu1 %v12211_v39  ;;  %v12225_v13 = vld [vmem:[#allocation58_spill] sm:$0xff] }
 0x253   :  { %3773 = vmatprep.subr.mxu0 %v12212_v3  ;;  %3732 = vmatpush2.msra.mxu1 %v12213_v42  ;;  %v12228_v3 = vld [vmem:[#allocation60_spill] sm:$0xff] }
 0x254   :  { %3736 = vmatprep.mubr.f32.mxu1 %v12214_v18  ;;  %3777 = vmatpush1.msra.mxu0 %v12215_v23  ;;  %v12231_v23 = vld [vmem:[#allocation78_spill] sm:$0xff] }
 0x255   :  { %3740 = vmatmul.mubr.f32.vlgmr.msra.gmra.mxu1 %v12216_v36  ;;  %3781 = vmatprep.subr.mxu0 %v12217_v9  ;;  %v12234_v9 = vld [vmem:[#allocation54_spill] sm:$0xff] }
 0x256   :  { %4012 = vmatprep.subr.mxu1 %v7864_v43  ;;  %3785 = vmatpush1.msra.mxu0 %v12218_v21  ;;  %v12223_v43 = vld [vmem:[#allocation83_spill] sm:$0xff]  ;;  %v12235_v21 = vld [vmem:[#allocation82_spill] sm:$0xff] }
 0x257   :  { %4014 = vmatpush1.msra.mxu1 %v7869_v30  ;;  %3789 = vmatprep.subr.mxu0 %v12219_v20  ;;  %v12224_v51 = vand.u32 4294901760, %v12223_v43  ;;  %v12226_v30 = vld [vmem:[#allocation96_spill] sm:$0xff]  ;;  %v12236_v20 = vand.u32 4294901760, %v12235_v21  ;;  %v12240_v43 = vld [vmem:[#allocation11_spill] sm:$0xff] }
 0x258   :  { %4016 = vmatprep.subr.mxu1 %v12131_v60  ;;  %3793 = vmatpush1.msra.mxu0 %v12220_v52  ;;  %v12227_v22 = vand.u32 4294901760, %v12226_v30  ;;  %v12229_v60 = vld [vmem:[#allocation85_spill] sm:$0xff]  ;;  %v12237_v52 = vld [vmem:[#allocation15_spill] sm:$0xff]  ;;  %v12253_v21 = vld [vmem:[#allocation64_spill] sm:$0xff] }
 0x259   :  { %4018 = vmatpush1.msra.mxu1 %v7876_v56  ;;  %3797 = vmatprep.subr.mxu0 %v12221_v57  ;;  %v12230_v0 = vand.u32 4294901760, %v12229_v60  ;;  %v12232_v56 = vld [vmem:[#allocation110_spill] sm:$0xff]  ;;  %v12238_v57 = vld [vmem:[#allocation29_spill] sm:$0xff]  ;;  %v12243_v30 = vld [vmem:[#allocation31_spill] sm:$0xff] }
 0x25a   :  { %4020 = vmatprep.subr.mxu1 %v12222_v17  ;;  %3801 = vmatpush1.msra.mxu0 %v12224_v51  ;;  %v12233_v24 = vand.u32 4294901760, %v12232_v56  ;;  %v12239_v17 = vand.u32 4294901760, %v12238_v57  ;;  %v12241_v51 = vand.u32 4294901760, %v12240_v43  ;;  %v12257_v57 = vld [vmem:[#allocation86_spill] sm:$0xff] }
 0x25b   :  { %4022 = vmatpush1.msra.mxu1 %v12225_v13  ;;  %3805 = vmatprep.subr.mxu0 %v12227_v22  ;;  %v12242_v13 = vld [vmem:[#allocation23_spill] sm:$0xff]  ;;  %v12244_v22 = vand.u32 4294901760, %v12243_v30  ;;  %v12263_v30 = vld [vmem:[#allocation76_spill] sm:$0xff] }
 0x25c   :  { %4024 = vmatprep.subr.mxu1 %v12228_v3  ;;  %3809 = vmatpush1.msra.mxu0 %v12230_v0  ;;  %v12245_v3 = vld [vmem:[#allocation12_spill] sm:$0xff]  ;;  %v12247_v0 = vld [vmem:[#allocation73_spill] sm:$0xff] }
 0x25d   :  { %4026 = vmatpush1.msra.mxu1 %v12231_v23  ;;  %3813 = vmatprep.subr.mxu0 %v12233_v24  ;;  %v12246_v60 = vand.u32 4294901760, %v12245_v3  ;;  %v12248_v23 = vld [vmem:[#allocation56_spill] sm:$0xff] }
 0x25e   :  { %4028 = vmatprep.subr.mxu1 %v12234_v9  ;;  %3817 = vmatpush1.msra.mxu0 %v12236_v20  ;;  %v12249_v56 = vand.u32 4294901760, %v12248_v23  ;;  %v12252_v9 = vld [vmem:[#allocation40_spill] sm:$0xff]  ;;  %v12254_v20 = vand.u32 4294901760, %v12253_v21  ;;  %v12276_v21 = vld [vmem:[#allocation13_spill] sm:$0xff] }
 0x25f   :  { %4030 = vmatpush1.msra.mxu1 %v12237_v52  ;;  %3821 = vmatprep.subr.mxu0 %v12239_v17  ;;  %v12258_v17 = vld [vmem:[#allocation53_spill] sm:$0xff] }
 0x260   :  { %4032 = vmatprep.subr.mxu1 %v12142_v38  ;;  %3825 = vmatpush1.msra.mxu0 %v12241_v51  ;;  %v12250_v38 = vld [vmem:[#allocation35_spill] sm:$0xff]  ;;  %v12259_v43 = vand.u32 4294901760, %v12258_v17 }
 0x261   :  { %4034 = vmatpush1.msra.mxu1 %v12242_v13  ;;  %3829 = vmatprep.subr.mxu0 %v12244_v22  ;;  %v12251_v24 = vand.u32 4294901760, %v12250_v38  ;;  %v12262_v13 = vld [vmem:[#allocation98_spill] sm:$0xff]  ;;  %v12264_v22 = vand.u32 4294901760, %v12263_v30  ;;  %v12288_v30 = vld [vmem:[#allocation87_spill] sm:$0xff] }
 0x262   :  { %4036 = vmatprep.subr.mxu1 %v12146_v63  ;;  %3833 = vmatpush1.msra.mxu0 %v12246_v60  ;;  %v12255_v63 = vld [vmem:[#allocation45_spill] sm:$0xff]  ;;  %v12267_v60 = vld [vmem:[#allocation84_spill] sm:$0xff]  ;;  %v12272_v38 = vld [vmem:[#allocation18_spill] sm:$0xff] }
 0x263   :  { %4038 = vmatpush1.msra.mxu1 %v12247_v0  ;;  %3837 = vmatprep.subr.mxu0 %v12249_v56  ;;  %v12256_v52 = vand.u32 4294901760, %v12255_v63  ;;  %v12268_v0 = vld [vmem:[#allocation16_spill] sm:$0xff] }
 0x264   :  { %4040 = vmatprep.subr.mxu1 %v12150_v6  ;;  %3841 = vmatpush1.msra.mxu0 %v12251_v24  ;;  %v12260_v6 = vld [vmem:[#allocation21_spill] sm:$0xff]  ;;  %v12269_v23 = vand.u32 4294901760, %v12268_v0  ;;  %v12273_v24 = vand.u32 4294901760, %v12272_v38  ;;  %v159_v0 = vld [vmem:[#allocation5 + $0x3b8] sm:$0xff] }
 0x265   :  { %4042 = vmatpush1.msra.mxu1 %v12252_v9  ;;  %3845 = vmatprep.subr.mxu0 %v12254_v20  ;;  %v12261_v51 = vand.u32 4294901760, %v12260_v6  ;;  %v12277_v20 = vld [vmem:[#allocation22_spill] sm:$0xff] }
 0x266   :  { %4044 = vmatprep.subr.mxu1 %v12153_v25  ;;  %3849 = vmatpush1.msra.mxu0 %v12256_v52  ;;  %v12265_v25 = vld [vmem:[#allocation51_spill] sm:$0xff]  ;;  %v12278_v63 = vand.u32 4294901760, %v12277_v20  ;;  %v150_v20 = vld [vmem:[#allocation5 + $0x370] sm:$0xff] }
 0x267   :  { %4046 = vmatpush1.msra.mxu1 %v12257_v57  ;;  %3853 = vmatprep.subr.mxu0 %v12259_v43  ;;  %v12266_v3 = vand.u32 4294901760, %v12265_v25  ;;  %v12281_v57 = vld [vmem:[#allocation17_spill] sm:$0xff]  ;;  %v12284_v43 = vld [vmem:[#allocation43_spill] sm:$0xff]  ;;  %v12290_v25 = vld [vmem:[#allocation46_spill] sm:$0xff] }
 0x268   :  { %4048 = vmatprep.subr.mxu1 %v12156_v10  ;;  %3857 = vmatpush1.msra.mxu0 %v12261_v51  ;;  %v12270_v10 = vld [vmem:[#allocation25_spill] sm:$0xff]  ;;  %v12287_v51 = vld [vmem:[#allocation62_spill] sm:$0xff] }
 0x269   :  { %4050 = vmatpush1.msra.mxu1 %v12262_v13  ;;  %3861 = vmatprep.subr.mxu0 %v12264_v22  ;;  %v12271_v56 = vand.u32 4294901760, %v12270_v10  ;;  %v167_v13 = vld [vmem:[#allocation5 + $0x3f8] sm:$0xff]  ;;  %v12289_v22 = vand.u32 4294901760, %v12288_v30  ;;  %v12305_v30 = vld [vmem:[#allocation80_spill] sm:$0xff] }
 0x26a   :  { %4052 = vmatprep.subr.mxu1 %v12159_v41  ;;  %3865 = vmatpush1.msra.mxu0 %v12266_v3  ;;  %v12274_v41 = vld [vmem:[#allocation30_spill] sm:$0xff]  ;;  %v12291_v3 = vand.u32 4294901760, %v12290_v25  ;;  %v9072_v25 = vand.u32 4294901760, %v150_v20 }
 0x26b   :  { %4054 = vmatpush1.msra.mxu1 %v12267_v60  ;;  %3869 = vmatprep.subr.mxu0 %v12269_v23  ;;  %v12275_v9 = vand.u32 4294901760, %v12274_v41  ;;  %v12292_v60 = vld [vmem:[#allocation47_spill] sm:$0xff]  ;;  %v158_v23 = vld [vmem:[#allocation5 + $0x3b0] sm:$0xff]  ;;  %v151_v10 = vld [vmem:[#allocation5 + $0x378] sm:$0xff]  ;;  %v9050_v41 = vand.u32 4294901760, %v167_v13 }
 0x26c   :  { %4056 = vmatprep.subr.mxu1 %v12162_v62  ;;  %3873 = vmatpush1.msra.mxu0 %v12271_v56  ;;  %v12279_v62 = vld [vmem:[#allocation36_spill] sm:$0xff]  ;;  %v12293_v56 = vld [vmem:[#allocation81_spill] sm:$0xff]  ;;  %12307 = vst [vmem:[#allocation39_spill] sm:$0xff] %v9072_v25 }
 0x26d   :  { %4058 = vmatpush1.msra.mxu1 %v12164_v58  ;;  %3877 = vmatprep.subr.mxu0 %v12273_v24  ;;  %v12280_v52 = vand.u32 4294901760, %v12279_v62  ;;  %v12282_v58 = vld [vmem:[#allocation75_spill] sm:$0xff]  ;;  %v12294_v38 = vand.u32 4294901760, %v12293_v56  ;;  %v12298_v62 = vld [vmem:[#allocation32_spill] sm:$0xff] }
 0x26e   :  { %4060 = vmatprep.subr.mxu1 %v12165_v35  ;;  %3881 = vmatpush2.msra.mxu0 %v12275_v9  ;;  %v12283_v17 = vand.u32 4294901760, %v12282_v58  ;;  %v12285_v35 = vld [vmem:[#allocation71_spill] sm:$0xff]  ;;  %v12296_v9 = vld [vmem:[#allocation28_spill] sm:$0xff]  ;;  %v9060_v58 = vand.u32 4294901760, %v159_v0 }
 0x26f   :  { %4062 = vmatpush1.msra.mxu1 %v12276_v21  ;;  %3885 = vmatprep.subr.mxu0 %v12278_v63  ;;  %v12286_v6 = vand.u32 4294901760, %v12285_v35  ;;  %v12295_v24 = vld [vmem:[#allocation55_spill] sm:$0xff]  ;;  %v12297_v21 = vand.u32 4294901760, %v12296_v9  ;;  %v143_v63 = vld [vmem:[#allocation5 + $0x338] sm:$0xff]  ;;  %v142_v35 = vld [vmem:[#allocation5 + $0x330] sm:$0xff] }
 0x270   :  { %4064 = vmatprep.subr.mxu1 %v12168_v11  ;;  %3889 = vmatpush2.msra.mxu0 %v12280_v52  ;;  %v166_v11 = vld [vmem:[#allocation5 + $0x3f0] sm:$0xff]  ;;  %v12299_v52 = vand.u32 4294901760, %v12298_v62  ;;  %12301 = vst [vmem:[#allocation68_spill] sm:$0xff] %v9060_v58  ;;  %v12310_v56 = vld [vmem:[#allocation107_spill] sm:$0xff] }
 0x271   :  { %4066 = vmatpush1.msra.mxu1 %v12281_v57  ;;  %3893 = vmatprep.subr.mxu0 %v12283_v17  ;;  %v12300_v57 = vld [vmem:[#allocation59_spill] sm:$0xff]  ;;  %v9062_v17 = vand.u32 4294901760, %v158_v23  ;;  %v134_v9 = vld [vmem:[#allocation5 + $0x2f0] sm:$0xff] }
 0x272   :  { %4068 = vmatprep.subr.mxu1 %v12284_v43  ;;  %3897 = vmatpush2.msra.mxu0 %v12286_v6  ;;  %v9064_v43 = vand.u32 4294901760, %v151_v10  ;;  %v12303_v6 = vld [vmem:[#allocation27_spill] sm:$0xff] }
 0x273   :  { %4070 = vmatpush1.msra.mxu1 %v12287_v51  ;;  %3901 = vmatprep.subr.mxu0 %v12289_v22  ;;  %v12304_v51 = vand.u32 4294901760, %v12303_v6  ;;  %v12306_v22 = vand.u32 4294901760, %v12305_v30  ;;  %v9091_v62 = vsub.f32 %v158_v23, %v9062_v17  ;;  %v2113_v6 = vpop.f32.mrf.mxu1  ;;  %v9111_v23 = vand.u32 4294901760, %v134_v9 }
 0x274   :  { %4072 = vmatprep.subr.mxu1 %v12173_v5  ;;  %3905 = vmatpush2.msra.mxu0 %v12291_v3  ;;  %v9055_v5 = vand.u32 4294901760, %v166_v11  ;;  %12302 = vst [vmem:[#allocation66_spill] sm:$0xff] %v9064_v43  ;;  %v9074_v3 = vand.u32 4294901760, %v143_v63 }
 0x275   :  { %4074 = vmatpush1.msra.mxu1 %v12292_v60  ;;  %3909 = vmatprep.subr.mxu0 %v12294_v38  ;;  %v9077_v60 = vsub.f32 %v167_v13, %v9050_v41  ;;  %v12311_v38 = vand.u32 4294901760, %v12310_v56  ;;  %12316 = vst [vmem:[#allocation20_spill] sm:$0xff] %v9091_v62  ;;  %12325 = vst [vmem:[#allocation65_spill] sm:$0xff] %v9111_v23  ;;  %v1720_v56 = vpop.f32.mrf.mxu0 }
 0x276   :  { %4076 = vmatprep.subr.mxu1 %v12295_v24  ;;  %3913 = vmatpush2.msra.mxu0 %v12297_v21  ;;  %12308 = vst [vmem:[#allocation90_spill] sm:$0xff] %v9074_v3  ;;  %v9085_v24 = vand.u32 4294901760, %v142_v35  ;;  %v12314_v21 = vld [vmem:[#allocation112_spill] sm:$0xff] }
 0x277   :  { %4078 = vmatpush2.msra.mxu1 %v12178_v12  ;;  %3917 = vmatprep.subr.mxu0 %v12299_v52  ;;  %v135_v12 = vld [vmem:[#allocation5 + $0x2f8] sm:$0xff]  ;;  %12309 = vst [vmem:[#allocation70_spill] sm:$0xff] %v9077_v60  ;;  %v9096_v52 = vsub.f32 %v159_v0, %v9060_v58  ;;  %v10948_v0 = vand.u32 4294901760, %v9077_v60 }
 0x278   :  { %4080 = vmatprep.subr.mxu1 %v12300_v57  ;;  %3921 = vmatpush2.msra.mxu0 %v12304_v51  ;;  %12313 = vst [vmem:[#allocation41_spill] sm:$0xff] %v9085_v24  ;;  %v9093_v13 = vand.u32 4294901760, %v135_v12  ;;  %v12322_v51 = vld [vmem:[#allocation114_spill] sm:$0xff] }
 0x279   :  { %4082 = vmatpush2.msra.mxu1 %v12182_v45  ;;  %3925 = vmatprep.subr.mxu0 %v12306_v22  ;;  %v9083_v45 = vsub.f32 %v166_v11, %v9055_v5  ;;  %12318 = vst [vmem:[#allocation57_spill] sm:$0xff] %v9096_v52  ;;  %v12320_v11 = vld [vmem:[#allocation116_spill] sm:$0xff]  ;;  %v12323_v30 = vand.u32 4294901760, %v12322_v51  ;;  %v9114_v22 = vsub.f32 %v143_v63, %v9074_v3  ;;  %v12346_v51 = vld [vmem:[#allocation115_spill] sm:$0xff] }
 0x27a   :  { %4084 = vmatprep.subr.mxu1 %v12183_v15  ;;  %3929 = vmatpush2.msra.mxu0 %v12311_v38  ;;  %v12315_v15 = vand.u32 4294901760, %v12314_v21  ;;  %12317 = vst [vmem:[#allocation49_spill] sm:$0xff] %v9093_v13  ;;  %v12321_v57 = vand.u32 4294901760, %v12320_v11  ;;  %v12327_v38 = vld [vmem:[#allocation117_spill] sm:$0xff]  ;;  %v9120_v21 = vsub.f32 %v142_v35, %v9085_v24  ;;  %v127_v11 = vld [vmem:[#allocation5 + $0x2b8] sm:$0xff]  ;;  %v9150_v63 = vadd.f32 %v2113_v6, %v1720_v56 }
 0x27b   :  { %4086 = vmatpush2.msra.mxu1 %v12185_v32  ;;  %12312 = vst [vmem:[#allocation92_spill] sm:$0xff] %v9083_v45  ;;  %v9099_v32 = vsub.f32 %v151_v10, %v9064_v43  ;;  %v126_v10 = vld [vmem:[#allocation5 + $0x2b0] sm:$0xff]  ;;  %12326 = vst [vmem:[#allocation69_spill] sm:$0xff] %v9114_v22  ;;  %v12343_v6 = vand.u32 4294901760, %v9096_v52  ;;  %v12347_v36 = vand.u32 4294901760, %v12346_v51 }
 0x27c   :  { %3933 = vmatprep.subr.mxu0 %v12315_v15  ;;  %4088 = vmatprep.subr.mxu1 %v12187_v46  ;;  %v9108_v46 = vsub.f32 %v150_v20, %v9072_v25  ;;  %12329 = vst [vmem:[#allocation50_spill] sm:$0xff] %v9120_v21  ;;  %v12330_v20 = vld [vmem:[#allocation120_spill] sm:$0xff] }
 0x27d   :  { %12319 = vst [vmem:[#allocation52_spill] sm:$0xff] %v9099_v32  ;;  %3937 = vmatpush2.msra.mxu0 %v12321_v57  ;;  %4090 = vmatpush2.msra.mxu1 %v12188_v1  ;;  %v12328_v1 = vand.u32 4294901760, %v12327_v38  ;;  %v12331_v15 = vand.u32 4294901760, %v12330_v20  ;;  %v9135_v38 = vand.u32 4294901760, %v126_v10  ;;  %v12336_v20 = vld [vmem:[#allocation122_spill] sm:$0xff]  ;;  %v1722_v57 = vpop.f32.mrf.mxu0 }
 0x27e   :  { %3941 = vmatprep.subr.mxu0 %v12323_v30  ;;  %4092 = vmatprep.subr.mxu1 %v12190_v31  ;;  %12324 = vst [vmem:[#allocation34_spill] sm:$0xff] %v9108_v46  ;;  %v10949_v31 = vand.u32 4294901760, %v9083_v45  ;;  %v9130_v30 = vsub.f32 %v135_v12, %v9093_v13  ;;  %v9146_v12 = vsub.f32 %v134_v9, %v9111_v23  ;;  %v9160_v9 = vand.u32 4294901760, %v127_v11 }
 0x27f   :  { %3945 = vmatpush2.msra.mxu0 %v12328_v1  ;;  %4094 = vmatpush2.msra.mxu1 %v12191_v29  ;;  %v12333_v29 = vld [vmem:[#allocation123_spill] sm:$0xff]  ;;  %12335 = vst [vmem:[#allocation91_spill] sm:$0xff] %v9135_v38  ;;  %v2115_v1 = vpop.f32.mrf.mxu1 }
 0x280   :  { %3949 = vmatprep.subr.mxu0 %v12331_v15  ;;  %4096 = vmatprep.subr.mxu1 %v12192_v34  ;;  %12332 = vst [vmem:[#allocation95_spill] sm:$0xff] %v9130_v30  ;;  %v12334_v35 = vand.u32 4294901760, %v12333_v29  ;;  %v12337_v34 = vand.u32 4294901760, %v12336_v20  ;;  %v9143_v15 = vsub.f32 %v9077_v60, %v10948_v0  ;;  %12338 = vst [vmem:[#allocation106_spill] sm:$0xff] %v9146_v12  ;;  %v119_v29 = vld [vmem:[#allocation5 + $0x278] sm:$0xff]  ;;  %v12339_v20 = vand.u32 4294901760, %v8669_v7 }
 0x281   :  { %4098 = vmatpush2.msra.mxu1 %v12193_v55  ;;  %12340 = vst [vmem:[#allocation88_spill] sm:$0xff] %v9160_v9  ;;  %v12341_v0 = vld [vmem:[#allocation113_spill] sm:$0xff]  ;;  %v9169_v7 = vsub.f32 %v9096_v52, %v12343_v6  ;;  %v9188_v6 = vsub.f32 %v126_v10, %v9135_v38  ;;  %v12354_v10 = vand.u32 4294901760, %v9114_v22 }
 0x282   :  { %3953 = vmatpush2.msra.mxu0 %v12334_v35  ;;  %4100 = vmatprep.subr.mxu1 %v12194_v59  ;;  %v118_v35 = vld [vmem:[#allocation5 + $0x270] sm:$0xff]  ;;  %v9158_v59 = vsub.f32 %v9083_v45, %v10949_v31  ;;  %v12342_v55 = vand.u32 4294901760, %v12341_v0 }
 0x283   :  { %3957 = vmatprep.subr.mxu0 %v12337_v34  ;;  %4102 = vmatpush2.msra.mxu1 %v12195_v19  ;;  %v12344_v19 = vand.u32 4294901760, %v9091_v62  ;;  %v110_v34 = vld [vmem:[#allocation5 + $0x230] sm:$0xff]  ;;  %12348 = vst [vmem:[#allocation74_spill] sm:$0xff] %v9188_v6  ;;  %v9192_v18 = vand.u32 4294901760, %v118_v35  ;;  %v9206_v51 = vsub.f32 %v9114_v22, %v12354_v10  ;;  %v9221_v10 = vsub.f32 %v127_v11, %v9160_v9  ;;  %v12359_v22 = vld [vmem:[#allocation42_spill] sm:$0xff]  ;;  %v2457_v11 = vpop.f32.mrf.mxu1 }
 0x284   :  { %3961 = vmatpush2.msra.mxu0 %v12339_v20  ;;  %4104 = vmatprep.subr.mxu1 %v12196_v26  ;;  %v12345_v20 = vand.u32 4294901760, %v9099_v32  ;;  %v2316_v26 = vpop.f32.mrf.mxu0  ;;  %v12360_v0 = vand.u32 4294901760, %v12359_v22 }
 0x285   :  { %3965 = vmatprep.subr.mxu0 %v12342_v55  ;;  %v9174_v56 = vsub.f32 %v9091_v62, %v12344_v19  ;;  %v9182_v55 = vadd.f32 %v2115_v1, %v1722_v57  ;;  %4106 = vmatpush2.msra.mxu1 %v12197_v37  ;;  %v9190_v19 = vand.u32 4294901760, %v119_v29  ;;  %12350 = vst [vmem:[#allocation33_spill] sm:$0xff] %v9192_v18  ;;  %v12353_v1 = vand.u32 4294901760, %v9108_v46  ;;  %v111_v37 = vld [vmem:[#allocation5 + $0x238] sm:$0xff]  ;;  %v12363_v62 = vld [vmem:[#allocation125_spill] sm:$0xff] }
 0x286   :  { %v9179_v31 = vsub.f32 %v9099_v32, %v12345_v20  ;;  %3969 = vmatpush2.msra.mxu0 %v12347_v36  ;;  %v12351_v20 = vld [vmem:[#allocation124_spill] sm:$0xff]  ;;  %4108 = vmatprep.subr.mxu1 %v12198_v2  ;;  %v103_v2 = vld [vmem:[#allocation5 + $0x1f8] sm:$0xff]  ;;  %v12361_v32 = vand.u32 4294901760, %v9130_v30  ;;  %v12364_v52 = vand.u32 4294901760, %v12363_v62  ;;  %v9240_v22 = vand.u32 4294901760, %v111_v37 }
 0x287   :  { %12349 = vst [vmem:[#allocation37_spill] sm:$0xff] %v9190_v19  ;;  %v12352_v27 = vand.u32 4294901760, %v12351_v20  ;;  %v9201_v36 = vsub.f32 %v9108_v46, %v12353_v1  ;;  %v12355_v20 = vand.u32 4294901760, %v8689_v8  ;;  %4110 = vmatpush2.msra.mxu1 %v12199_v28  ;;  %v12357_v1 = vand.u32 4294901760, %v9120_v21  ;;  %v102_v46 = vld [vmem:[#allocation5 + $0x1f0] sm:$0xff]  ;;  %v12368_v62 = vld [vmem:[#allocation118_spill] sm:$0xff] }
 0x288   :  { %4112 = vmatprep.subr.mxu1 %v8591_v14  ;;  %v9238_v14 = vsub.f32 %v118_v35, %v9192_v18  ;;  %12366 = vst [vmem:[#allocation63_spill] sm:$0xff] %v9240_v22  ;;  %v12367_v8 = vand.u32 4294901760, %v8741_v40  ;;  %v9253_v35 = vand.u32 4294901760, %v102_v46  ;;  %v12371_v28 = vand.u32 4294901760, %v8745_v4 }
 0x289   :  { %3973 = vmatprep.subr.mxu0 %v12352_v27  ;;  %v9213_v27 = vand.u32 4294901760, %v110_v34  ;;  %v9218_v57 = vsub.f32 %v9120_v21, %v12357_v1  ;;  %v9232_v1 = vsub.f32 %v9130_v30, %v12361_v32  ;;  %v2318_v21 = vpop.f32.mrf.mxu0  ;;  %4114 = vmatpush2.msra.mxu1 %v12200_v48  ;;  %v9246_v32 = vsub.f32 %v119_v29, %v9190_v19  ;;  %v12372_v29 = vld [vmem:[#allocation121_spill] sm:$0xff] }
 0x28a   :  { %3977 = vmatpush2.msra.mxu0 %v12355_v20  ;;  %12365 = vst [vmem:[#allocation67_spill] sm:$0xff] %v9238_v14  ;;  %v94_v20 = vld [vmem:[#allocation5 + $0x1b0] sm:$0xff]  ;;  %4116 = vmatprep.subr.mxu1 %v12368_v62  ;;  %12369 = vst [vmem:[#allocation19_spill] sm:$0xff] %v9253_v35  ;;  %v12370_v30 = vand.u32 4294901760, %v9146_v12  ;;  %v9267_v48 = vand.u32 4294901760, %v103_v2  ;;  %v2317_v60 = vadd.f32 %v2316_v26, %v9150_v63 }
 0x28b   :  { %12356 = vst [vmem:[#allocation72_spill] sm:$0xff] %v9213_v27  ;;  %12358 = vst [vmem:[#allocation14_spill] sm:$0xff] %v9218_v57  ;;  %3981 = vmatprep.subr.mxu0 %v12360_v0  ;;  %v9242_v0 = vld [vmem:[#allocation5 + $0x1b8] sm:$0xff]  ;;  %4118 = vmatpush2.msra.mxu1 %v12372_v29  ;;  %v2722_v40 = vpop.f32.mrf.mxu0  ;;  %v86_v62 = vld [vmem:[#allocation5 + $0x170] sm:$0xff]  ;;  %v2319_v4 = vadd.f32 %v2318_v21, %v9182_v55 }
 0x28c   :  { %12362 = vst [vmem:[#allocation61_spill] sm:$0xff] %v9232_v1  ;;  %3985 = vmatpush2.msra.mxu0 %v12364_v52  ;;  %v9258_v45 = vsub.f32 %v9146_v12, %v12370_v30  ;;  %12374 = vst [vmem:[#allocation44_spill] sm:$0xff] %v9267_v48  ;;  %v12375_v30 = vand.u32 4294901760, %v8757_v49  ;;  %4120 = vmatprep.subr.mxu1 %v8637_v54  ;;  %v87_v29 = vld [vmem:[#allocation5 + $0x178] sm:$0xff]  ;;  %v2459_v12 = vpop.f32.mrf.mxu1  ;;  %v12378_v57 = vld [vmem:[#allocation127_spill] sm:$0xff]  ;;  %v12381_v49 = vand.u32 4294901760, %v9188_v6 }
 0x28d   :  { %3989 = vmatprep.subr.mxu0 %v12367_v8  ;;  %v9264_v8 = vsub.f32 %v110_v34, %v9213_v27  ;;  %v9278_v34 = vand.u32 4294901760, %v94_v20  ;;  %v12379_v27 = vand.u32 4294901760, %v12378_v57  ;;  %v12380_v52 = vld [vmem:[#allocation97_spill] sm:$0xff]  ;;  %v2458_v1 = vadd.f32 %v2457_v11, %v2317_v60  ;;  %4122 = vmatpush2.msra.mxu1 %v8628_v53  ;;  %v12383_v57 = vld [vmem:[#allocation99_spill] sm:$0xff]  ;;  %v2724_v26 = vpop.f32.mrf.mxu0 }
 0x28e   :  { %3993 = vmatpush2.msra.mxu0 %v12371_v28  ;;  %v9276_v28 = vand.u32 4294901760, %v9242_v0  ;;  %4003 = vmatprep.mubr.f32.mxu0 %v12380_v52  ;;  %v9286_v63 = vsub.f32 %v9188_v6, %v12381_v49  ;;  %v9307_v60 = vand.u32 4294901760, %v87_v29  ;;  %v9309_v53 = vand.u32 4294901760, %v86_v62  ;;  %v78_v21 = vld [vmem:[#allocation5 + $0x130] sm:$0xff]  ;;  %v2859_v49 = vpop.f32.mrf.mxu1 }
 0x28f   :  { %12373 = vst [vmem:[#allocation38_spill] sm:$0xff] %v9264_v8  ;;  %3997 = vmatprep.subr.mxu0 %v12375_v30  ;;  %12377 = vst [vmem:[#allocation26_spill] sm:$0xff] %v9278_v34  ;;  %v9291_v30 = vsub.f32 %v111_v37, %v9240_v22  ;;  %4124 = vmatprep.subr.mxu1 %v8662_v50  ;;  %v12385_v37 = vand.u32 4294901760, %v9221_v10  ;;  %v2460_v55 = vadd.f32 %v2459_v12, %v2319_v4 }
 0x290   :  { %12376 = vst [vmem:[#allocation24_spill] sm:$0xff] %v9276_v28  ;;  %4001 = vmatpush2.msra.mxu0 %v12379_v27  ;;  %v9297_v27 = vsub.f32 %v102_v46, %v9253_v35  ;;  %12386 = vst [vmem:[#allocation89_spill] sm:$0xff] %v9307_v60  ;;  %v9312_v46 = vsub.f32 %v103_v2, %v9267_v48  ;;  %v2723_v11 = vadd.f32 %v2722_v40, %v2458_v1 }
 0x291   :  { %12382 = vst [vmem:[#allocation79_spill] sm:$0xff] %v9291_v30  ;;  %4005 = vmatmul.mubr.f32.vlgmr.msra.gmra.mxu0 %v12383_v57  ;;  %4149 = vmatprep.subr.mxu0 %v9050_v41  ;;  %v9305_v54 = vsub.f32 %v9221_v10, %v12385_v37  ;;  %12387 = vst [vmem:[#allocation103_spill] sm:$0xff] %v9309_v53  ;;  %v9317_v50 = vsub.f32 %v94_v20, %v9278_v34  ;;  %v12390_v2 = vand.u32 4294901760, %v9246_v32  ;;  %v79_v20 = vld [vmem:[#allocation5 + $0x138] sm:$0xff] }
 0x292   :  { %12384 = vst [vmem:[#allocation93_spill] sm:$0xff] %v9297_v27  ;;  %12388 = vst [vmem:[#allocation94_spill] sm:$0xff] %v9312_v46  ;;  %4126 = vmatpush2.msra.mxu1 %v8653_v47  ;;  %4151 = vmatpush1.msra.mxu0 %v9055_v5  ;;  %v12391_v47 = vand.u32 4294901760, %v9238_v14  ;;  %v2725_v4 = vadd.f32 %v2724_v26, %v2460_v55  ;;  %v9336_v6 = vand.u32 4294901760, %v78_v21  ;;  %v71_v37 = vld [vmem:[#allocation5 + $0xf8] sm:$0xff] }
 0x293   :  { %12389 = vst [vmem:[#allocation101_spill] sm:$0xff] %v9317_v50  ;;  %4128 = vmatprep.subr.mxu1 %v8691_v16  ;;  %4153 = vmatprep.subr.mxu0 %v9060_v58  ;;  %v9326_v12 = vsub.f32 %v9246_v32, %v12390_v2  ;;  %v2860_v16 = vadd.f32 %v2859_v49, %v2723_v11  ;;  %v70_v58 = vld [vmem:[#allocation5 + $0xf0] sm:$0xff]  ;;  %v9352_v11 = vand.u32 4294901760, %v79_v20  ;;  %v9359_v26 = vld [vmem:[#allocation5 + $0xb8] sm:$0xff] }
 0x294   :  { %v9331_v1 = vsub.f32 %v9238_v14, %v12391_v47  ;;  %4130 = vmatpush2.msra.mxu1 %v8696_v44  ;;  %4155 = vmatpush1.msra.mxu0 %v9062_v17  ;;  %12392 = vst [vmem:[#allocation111_spill] sm:$0xff] %v9336_v6  ;;  %v9340_v2 = vsub.f32 %v9242_v0, %v9276_v28  ;;  %v2861_v47 = vpop.f32.mrf.mxu1 }
 0x295   :  { %4132 = vmatprep.subr.mxu1 %v8706_v61  ;;  %4157 = vmatprep.subr.mxu0 %v9064_v43  ;;  %v9346_v44 = vsub.f32 %v86_v62, %v9309_v53  ;;  %5434 = vst [vmem:[#allocation7 + $0x10] sm:$0xff] %v2860_v16  ;;  %v2862_v0 = vadd.f32 %v2861_v47, %v2725_v4  ;;  %12395 = vst [vmem:[#allocation126_spill] sm:$0xff] %v9352_v11  ;;  %v12396_v61 = vand.u32 4294901760, %v9264_v8  ;;  %v62_v62 = vld [vmem:[#allocation5 + $0xb0] sm:$0xff] }
 0x296   :  { %12393 = vst [vmem:[#allocation119_spill] sm:$0xff] %v9340_v2  ;;  %4134 = vmatpush2.msra.mxu1 %v8713_v33  ;;  %4159 = vmatpush1.msra.mxu0 %v9072_v25  ;;  %v9362_v49 = vsub.f32 %v87_v29, %v9307_v60  ;;  %v12398_v33 = vand.u32 4294901760, %v9291_v30  ;;  %v9371_v16 = vand.u32 4294901760, %v71_v37  ;;  %v9373_v47 = vand.u32 4294901760, %v70_v58 }
 0x297   :  { %12394 = vst [vmem:[#allocation77_spill] sm:$0xff] %v9346_v44  ;;  %v9357_v40 = vsub.f32 %v9264_v8, %v12396_v61  ;;  %4136 = vmatprep.subr.mxu1 %v12211_v39  ;;  %4161 = vmatprep.subr.mxu0 %v9074_v3  ;;  %5435 = vst [vmem:[#allocation7 + $0x18] sm:$0xff] %v2862_v0  ;;  %v9381_v55 = vsub.f32 %v78_v21, %v9336_v6  ;;  %v12402_v61 = vand.u32 4294901760, %v9312_v46  ;;  %v54_v8 = vld [vmem:[#allocation5 + $0x70] sm:$0xff]  ;;  %v47_v3 = vld [vmem:[#allocation5 + $0x38] sm:$0xff] }
 0x298   :  { %12397 = vst [vmem:[#allocation48_spill] sm:$0xff] %v9362_v49  ;;  %v9369_v4 = vsub.f32 %v9291_v30, %v12398_v33  ;;  %12399 = vst [vmem:[#allocation83_spill] sm:$0xff] %v9371_v16  ;;  %4138 = vmatpush2.msra.mxu1 %v12213_v42  ;;  %4140 = vmatprep.mubr.f32.mxu1 %v12380_v52  ;;  %v12403_v0 = vand.u32 4294901760, %v9297_v27  ;;  %v9397_v29 = vand.u32 4294901760, %v9359_v26  ;;  %v9399_v21 = vand.u32 4294901760, %v62_v62  ;;  %v55_v33 = vld [vmem:[#allocation5 + $0x78] sm:$0xff] }
 0x299   :  { %12400 = vst [vmem:[#allocation58_spill] sm:$0xff] %v9373_v47  ;;  %12401 = vst [vmem:[#allocation96_spill] sm:$0xff] %v9381_v55  ;;  %4163 = vmatpush1.msra.mxu0 %v9085_v24  ;;  %4142 = vmatmul.mubr.f32.vlgmr.msra.gmra.mxu1 %v12383_v57  ;;  %v9389_v42 = vsub.f32 %v9312_v46, %v12402_v61  ;;  %v12406_v24 = vand.u32 4294901760, %v9143_v15  ;;  %v12408_v30 = vand.u32 4294901760, %v9158_v59  ;;  %v12412_v46 = vand.u32 4294901760, %v9169_v7 }
 0x29a   :  { %v9394_v39 = vsub.f32 %v9297_v27, %v12403_v0  ;;  %12404 = vst [vmem:[#allocation60_spill] sm:$0xff] %v9397_v29  ;;  %12405 = vst [vmem:[#allocation85_spill] sm:$0xff] %v9399_v21  ;;  %4165 = vmatprep.subr.mxu0 %v9093_v13  ;;  %v9408_v0 = vsub.f32 %v79_v20, %v9352_v11  ;;  %v46_v27 = vld [vmem:[#allocation5 + $0x30] sm:$0xff]  ;;  %v9415_v15 = vsub.f32 %v70_v58, %v9373_v47 }
 0x29b   :  { %4298 = vmatprep.subr.mxu1 %v12406_v24  ;;  %4167 = vmatpush1.msra.mxu0 %v9111_v23  ;;  %v12410_v24 = vand.u32 4294901760, %v9317_v50  ;;  %v9423_v20 = vsub.f32 %v71_v37, %v9371_v16  ;;  %v12413_v59 = vand.u32 4294901760, %v9340_v2  ;;  %v9433_v58 = vand.u32 4294901760, %v55_v33  ;;  %v278_v23 = vld [vmem:[#allocation5 + $0x770] sm:$0xff] }
 0x29c   :  { %12407 = vst [vmem:[#allocation78_spill] sm:$0xff] %v9408_v0  ;;  %4304 = vmatpush1.msra.mxu1 %v12408_v30  ;;  %12409 = vst [vmem:[#allocation110_spill] sm:$0xff] %v9415_v15  ;;  %4169 = vmatprep.subr.mxu0 %v9160_v9  ;;  %v9435_v13 = vand.u32 4294901760, %v54_v8  ;;  %v12416_v37 = vand.u32 4294901760, %v9174_v56  ;;  %v12419_v9 = vand.u32 4294901760, %v9179_v31  ;;  %v12421_v56 = vand.u32 4294901760, %v9346_v44 }
 0x29d   :  { %v9420_v61 = vsub.f32 %v9317_v50, %v12410_v24  ;;  %12411 = vst [vmem:[#allocation54_spill] sm:$0xff] %v9423_v20  ;;  %4310 = vmatprep.subr.mxu1 %v12412_v46  ;;  %v9431_v30 = vsub.f32 %v9340_v2, %v12413_v59  ;;  %12414 = vst [vmem:[#allocation82_spill] sm:$0xff] %v9433_v58  ;;  %4171 = vmatpush1.msra.mxu0 %v9135_v38  ;;  %v9446_v59 = vand.u32 4294901760, %v46_v27  ;;  %v295_v50 = vld [vmem:[#allocation5 + $0x7f8] sm:$0xff]  ;;  %v294_v2 = vld [vmem:[#allocation5 + $0x7f0] sm:$0xff] }
 0x29e   :  { %12415 = vst [vmem:[#allocation15_spill] sm:$0xff] %v9435_v13  ;;  %4316 = vmatpush1.msra.mxu1 %v12416_v37  ;;  %v9444_v46 = vsub.f32 %v62_v62, %v9399_v21  ;;  %4173 = vmatprep.subr.mxu0 %v9190_v19  ;;  %v12420_v24 = vand.u32 4294901760, %v9362_v49  ;;  %v9459_v37 = vsub.f32 %v9346_v44, %v12421_v56  ;;  %v9461_v7 = vand.u32 4294901760, %v47_v3  ;;  %v286_v44 = vld [vmem:[#allocation5 + $0x7b0] sm:$0xff] }
 0x29f   :  { %12418 = vst [vmem:[#allocation11_spill] sm:$0xff] %v9446_v59  ;;  %4322 = vmatprep.subr.mxu1 %v12419_v9  ;;  %4175 = vmatpush1.msra.mxu0 %v9192_v18  ;;  %v12423_v31 = vand.u32 4294901760, %v9201_v36  ;;  %v9472_v56 = vsub.f32 %v9359_v26, %v9397_v29  ;;  %v12425_v62 = vand.u32 4294901760, %v9206_v51  ;;  %v9479_v36 = vsub.f32 %v54_v8, %v9435_v13  ;;  %v12429_v26 = vld [vmem:[#allocation72_spill] sm:$0xff]  ;;  %v287_v18 = vld [vmem:[#allocation5 + $0x7b8] sm:$0xff] }
 0x2a0   :  { %12417 = vst [vmem:[#allocation29_spill] sm:$0xff] %v9444_v46  ;;  %v9454_v38 = vsub.f32 %v9362_v49, %v12420_v24  ;;  %12422 = vst [vmem:[#allocation23_spill] sm:$0xff] %v9461_v7  ;;  %4177 = vmatprep.subr.mxu0 %v9240_v22  ;;  %v9487_v19 = vsub.f32 %v55_v33, %v9433_v58  ;;  %v12430_v24 = vld [vmem:[#allocation14_spill] sm:$0xff]  ;;  %v9493_v51 = vsub.f32 %v46_v27, %v9446_v59 }
 0x2a1   :  { %4328 = vmatpush1.msra.mxu1 %v12423_v31  ;;  %12424 = vst [vmem:[#allocation31_spill] sm:$0xff] %v9472_v56  ;;  %12426 = vst [vmem:[#allocation12_spill] sm:$0xff] %v9479_v36  ;;  %v12427_v31 = vand.u32 4294901760, %v9381_v55  ;;  %4179 = vmatpush1.msra.mxu0 %v12429_v26  ;;  %v12431_v22 = vand.u32 4294901760, %v12430_v24  ;;  %v9497_v8 = vand.u32 4294901760, %v294_v2  ;;  %v12439_v49 = vand.u32 4294901760, %v9258_v45 }
 0x2a2   :  { %4334 = vmatprep.subr.mxu1 %v12425_v62  ;;  %12428 = vst [vmem:[#allocation73_spill] sm:$0xff] %v9487_v19  ;;  %12432 = vst [vmem:[#allocation56_spill] sm:$0xff] %v9493_v51  ;;  %v9495_v62 = vand.u32 4294901760, %v295_v50  ;;  %4181 = vmatprep.subr.mxu0 %v9267_v48  ;;  %v12441_v24 = vand.u32 4294901760, %v9415_v15  ;;  %v279_v48 = vld [vmem:[#allocation5 + $0x778] sm:$0xff]  ;;  %v12443_v45 = vand.u32 4294901760, %v9305_v54 }
 0x2a3   :  { %v9484_v9 = vsub.f32 %v9381_v55, %v12427_v31  ;;  %4340 = vmatpush1.msra.mxu1 %v12431_v22  ;;  %12434 = vst [vmem:[#allocation40_spill] sm:$0xff] %v9497_v8  ;;  %v12435_v31 = vld [vmem:[#allocation61_spill] sm:$0xff]  ;;  %v12437_v22 = vand.u32 4294901760, %v9408_v0  ;;  %v9510_v55 = vand.u32 4294901760, %v286_v44  ;;  %4183 = vmatpush1.msra.mxu0 %v9253_v35 }
 0x2a4   :  { %12433 = vst [vmem:[#allocation35_spill] sm:$0xff] %v9495_v62  ;;  %v12436_v33 = vand.u32 4294901760, %v12435_v31  ;;  %v12440_v31 = vand.u32 4294901760, %v9423_v20  ;;  %v9523_v26 = vsub.f32 %v9415_v15, %v12441_v24  ;;  %4185 = vmatprep.subr.mxu0 %v9276_v28  ;;  %v12447_v28 = vand.u32 4294901760, %v9444_v46  ;;  %v270_v15 = vld [vmem:[#allocation5 + $0x730] sm:$0xff]  ;;  %4678 = vmatprep.mubr.f32.mxu1 %v12380_v52 }
 0x2a5   :  { %v9508_v27 = vsub.f32 %v9408_v0, %v12437_v22  ;;  %12438 = vst [vmem:[#allocation64_spill] sm:$0xff] %v9510_v55  ;;  %v9527_v0 = vsub.f32 %v47_v3, %v9461_v7  ;;  %4187 = vmatpush1.msra.mxu0 %v9278_v34  ;;  %v12445_v22 = vand.u32 4294901760, %v9286_v63  ;;  %v9541_v3 = vsub.f32 %v294_v2, %v9497_v8  ;;  %v263_v2 = vld [vmem:[#allocation5 + $0x6f8] sm:$0xff]  ;;  %v12567_v52 = vld [vmem:[#allocation65_spill] sm:$0xff] }
 0x2a6   :  { %4346 = vmatprep.subr.mxu1 %v12436_v33  ;;  %v9518_v33 = vsub.f32 %v9423_v20, %v12440_v31  ;;  %v9533_v31 = vand.u32 4294901760, %v287_v18  ;;  %v9546_v54 = vsub.f32 %v9444_v46, %v12447_v28  ;;  %v9551_v35 = vsub.f32 %v295_v50, %v9495_v62  ;;  %4189 = vmatprep.subr.mxu0 %v9307_v60  ;;  %v262_v46 = vld [vmem:[#allocation5 + $0x6f0] sm:$0xff] }
 0x2a7   :  { %4352 = vmatpush1.msra.mxu1 %v12439_v49  ;;  %12442 = vst [vmem:[#allocation45_spill] sm:$0xff] %v9527_v0  ;;  %12446 = vst [vmem:[#allocation53_spill] sm:$0xff] %v9541_v3  ;;  %v271_v49 = vld [vmem:[#allocation5 + $0x738] sm:$0xff]  ;;  %v12450_v63 = vand.u32 4294901760, %v9326_v12  ;;  %v9560_v24 = vand.u32 4294901760, %v279_v48  ;;  %4191 = vmatpush1.msra.mxu0 %v9309_v53  ;;  %v12453_v34 = vand.u32 4294901760, %v9331_v1 }
 0x2a8   :  { %4358 = vmatprep.subr.mxu1 %v12443_v45  ;;  %12444 = vst [vmem:[#allocation86_spill] sm:$0xff] %v9533_v31  ;;  %v9548_v45 = vand.u32 4294901760, %v278_v23  ;;  %12449 = vst [vmem:[#allocation98_spill] sm:$0xff] %v9551_v35  ;;  %v12454_v12 = vand.u32 4294901760, %v9472_v56  ;;  %4193 = vmatprep.subr.mxu0 %v9352_v11  ;;  %v12455_v28 = vand.u32 4294901760, %v9369_v4  ;;  %v12457_v60 = vand.u32 4294901760, %v9479_v36 }
 0x2a9   :  { %4364 = vmatpush1.msra.mxu1 %v12445_v22  ;;  %v9558_v22 = vsub.f32 %v286_v44, %v9510_v55  ;;  %12452 = vst [vmem:[#allocation51_spill] sm:$0xff] %v9560_v24  ;;  %v9589_v44 = vand.u32 4294901760, %v270_v15  ;;  %4195 = vmatpush1.msra.mxu0 %v9336_v6  ;;  %v12460_v11 = vand.u32 4294901760, %v9357_v40  ;;  %v9600_v53 = vsub.f32 %v287_v18, %v9533_v31 }
 0x2aa   :  { %12448 = vst [vmem:[#allocation21_spill] sm:$0xff] %v9548_v45  ;;  %4370 = vmatprep.subr.mxu1 %v12450_v63  ;;  %v9571_v63 = vsub.f32 %v9472_v56, %v12454_v12  ;;  %v9585_v50 = vsub.f32 %v9479_v36, %v12457_v60  ;;  %v9587_v12 = vand.u32 4294901760, %v271_v49  ;;  %v254_v60 = vld [vmem:[#allocation5 + $0x6b0] sm:$0xff]  ;;  %4197 = vmatprep.subr.mxu0 %v9371_v16  ;;  %v12463_v36 = vand.u32 4294901760, %v9389_v42 }
 0x2ab   :  { %12451 = vst [vmem:[#allocation76_spill] sm:$0xff] %v9558_v22  ;;  %4376 = vmatpush1.msra.mxu1 %v12453_v34  ;;  %v12456_v34 = vand.u32 4294901760, %v9487_v19  ;;  %12459 = vst [vmem:[#allocation16_spill] sm:$0xff] %v9589_v44  ;;  %v12464_v6 = vand.u32 4294901760, %v9493_v51  ;;  %4199 = vmatpush1.msra.mxu0 %v9373_v47  ;;  %v12467_v18 = vand.u32 4294901760, %v9394_v39  ;;  %v12470_v4 = vand.u32 4294901760, %v9431_v30 }
 0x2ac   :  { %4382 = vmatprep.subr.mxu1 %v12455_v28  ;;  %12458 = vst [vmem:[#allocation84_spill] sm:$0xff] %v9587_v12  ;;  %v9596_v28 = vsub.f32 %v278_v23, %v9548_v45  ;;  %12462 = vst [vmem:[#allocation18_spill] sm:$0xff] %v9600_v53  ;;  %v9612_v23 = vand.u32 4294901760, %v262_v46  ;;  %v4453_v42 = vand.u32 4294901760, %v9571_v63  ;;  %4201 = vmatprep.subr.mxu0 %v9397_v29  ;;  %v9636_v47 = vand.u32 4294901760, %v254_v60  ;;  %v246_v39 = vld [vmem:[#allocation5 + $0x670] sm:$0xff] }
 0x2ad   :  { %v9580_v1 = vsub.f32 %v9487_v19, %v12456_v34  ;;  %4388 = vmatpush1.msra.mxu1 %v12460_v11  ;;  %v9608_v40 = vsub.f32 %v9493_v51, %v12464_v6  ;;  %v9610_v11 = vand.u32 4294901760, %v263_v2  ;;  %v255_v34 = vld [vmem:[#allocation5 + $0x6b8] sm:$0xff]  ;;  %v9626_v51 = vsub.f32 %v279_v48, %v9560_v24  ;;  %4203 = vmatpush1.msra.mxu0 %v9399_v21 }
 0x2ae   :  { %12461 = vst [vmem:[#allocation25_spill] sm:$0xff] %v9596_v28  ;;  %4394 = vmatprep.subr.mxu1 %v12463_v36  ;;  %12466 = vst [vmem:[#allocation13_spill] sm:$0xff] %v9612_v23  ;;  %v12468_v36 = vand.u32 4294901760, %v9527_v0  ;;  %v9634_v63 = vsub.f32 %v270_v15, %v9589_v44  ;;  %v12474_v48 = vand.u32 4294901760, %v9551_v35  ;;  %v9646_v30 = vand.u32 4294901760, %v255_v34  ;;  %4205 = vmatprep.subr.mxu0 %v9433_v58  ;;  %v239_v58 = vld [vmem:[#allocation5 + $0x638] sm:$0xff] }
 0x2af   :  { %12465 = vst [vmem:[#allocation30_spill] sm:$0xff] %v9610_v11  ;;  %4400 = vmatpush1.msra.mxu1 %v12467_v18  ;;  %12469 = vst [vmem:[#allocation22_spill] sm:$0xff] %v9626_v51  ;;  %v247_v18 = vld [vmem:[#allocation5 + $0x678] sm:$0xff]  ;;  %v9650_v15 = vsub.f32 %v271_v49, %v9587_v12  ;;  %v12477_v21 = vand.u32 4294901760, %v9454_v38  ;;  %4207 = vmatpush1.msra.mxu0 %v9435_v13  ;;  %v12481_v49 = vand.u32 4294901760, %v9459_v37  ;;  %v230_v13 = vld [vmem:[#allocation5 + $0x5f0] sm:$0xff] }
 0x2b0   :  { %v9622_v16 = vsub.f32 %v9527_v0, %v12468_v36  ;;  %4406 = vmatprep.subr.mxu1 %v12470_v4  ;;  %12471 = vst [vmem:[#allocation36_spill] sm:$0xff] %v9634_v63  ;;  %12472 = vst [vmem:[#allocation17_spill] sm:$0xff] %v9636_v47  ;;  %v12473_v36 = vand.u32 4294901760, %v9420_v61  ;;  %v9644_v6 = vsub.f32 %v9551_v35, %v12474_v48  ;;  %v12479_v48 = vand.u32 4294901760, %v9541_v3 }
 0x2b1   :  { %12475 = vst [vmem:[#allocation75_spill] sm:$0xff] %v9646_v30  ;;  %12476 = vst [vmem:[#allocation43_spill] sm:$0xff] %v9650_v15  ;;  %v9665_v4 = vsub.f32 %v263_v2, %v9610_v11  ;;  %4209 = vmatprep.subr.mxu0 %v9461_v7  ;;  %v12483_v2 = vand.u32 4294901760, %v9508_v27  ;;  %v9682_v37 = vsub.f32 %v254_v60, %v9636_v47  ;;  %v12488_v7 = vand.u32 4294901760, %v9600_v53 }
 0x2b2   :  { %4412 = vmatpush1.msra.mxu1 %v12473_v36  ;;  %v9657_v36 = vsub.f32 %v262_v46, %v9612_v23  ;;  %v9662_v29 = vsub.f32 %v9541_v3, %v12479_v48  ;;  %v4477_v38 = vand.u32 4294901760, %v9622_v16  ;;  %v238_v3 = vld [vmem:[#allocation5 + $0x630] sm:$0xff]  ;;  %v9684_v16 = vand.u32 4294901760, %v247_v18  ;;  %4211 = vmatpush1.msra.mxu0 %v9446_v59 }
 0x2b3   :  { %4418 = vmatprep.subr.mxu1 %v12477_v21  ;;  %12480 = vst [vmem:[#allocation62_spill] sm:$0xff] %v9665_v4  ;;  %v12482_v21 = vand.u32 4294901760, %v9558_v22  ;;  %12484 = vst [vmem:[#allocation87_spill] sm:$0xff] %v9682_v37  ;;  %v12487_v48 = vand.u32 4294901760, %v9484_v9  ;;  %v4489_v61 = vand.u32 4294901760, %v9644_v6  ;;  %v9696_v27 = vsub.f32 %v9600_v53, %v12488_v7  ;;  %4213 = vmatprep.subr.mxu0 %v9495_v62 }
 0x2b4   :  { %12478 = vst [vmem:[#allocation71_spill] sm:$0xff] %v9657_v36  ;;  %4424 = vmatpush1.msra.mxu1 %v12481_v49  ;;  %12485 = vst [vmem:[#allocation46_spill] sm:$0xff] %v9684_v16  ;;  %v9686_v49 = vand.u32 4294901760, %v246_v39  ;;  %v4495_v9 = vand.u32 4294901760, %v9662_v29  ;;  %v9706_v6 = vand.u32 4294901760, %v239_v58  ;;  %4215 = vmatpush2.msra.mxu0 %v9497_v8  ;;  %v12493_v60 = vand.u32 4294901760, %v9523_v26 }
 0x2b5   :  { %v9674_v46 = vsub.f32 %v9558_v22, %v12482_v21  ;;  %4430 = vmatprep.subr.mxu1 %v12483_v2  ;;  %v231_v2 = vld [vmem:[#allocation5 + $0x5f8] sm:$0xff]  ;;  %v9700_v22 = vsub.f32 %v255_v34, %v9646_v30  ;;  %v12490_v21 = vand.u32 4294901760, %v9518_v33  ;;  %v12494_v62 = vand.u32 4294901760, %v9626_v51  ;;  %4217 = vmatprep.subr.mxu0 %v9533_v31 }
 0x2b6   :  { %12486 = vst [vmem:[#allocation47_spill] sm:$0xff] %v9686_v49  ;;  %4436 = vmatpush1.msra.mxu1 %v12487_v48  ;;  %12491 = vst [vmem:[#allocation55_spill] sm:$0xff] %v9706_v6  ;;  %v9708_v48 = vand.u32 4294901760, %v238_v3  ;;  %v12495_v29 = vand.u32 4294901760, %v9596_v28  ;;  %v9728_v26 = vsub.f32 %v246_v39, %v9686_v49  ;;  %v9737_v7 = vand.u32 4294901760, %v230_v13  ;;  %v223_v8 = vld [vmem:[#allocation5 + $0x5b8] sm:$0xff]  ;;  %4219 = vmatpush2.msra.mxu0 %v9510_v55 }
 0x2b7   :  { %12489 = vst [vmem:[#allocation81_spill] sm:$0xff] %v9700_v22  ;;  %4442 = vmatprep.subr.mxu1 %v12490_v21  ;;  %v9718_v33 = vsub.f32 %v9626_v51, %v12494_v62  ;;  %v9735_v62 = vand.u32 4294901760, %v231_v2  ;;  %v12501_v39 = vand.u32 4294901760, %v9650_v15  ;;  %v9750_v31 = vsub.f32 %v247_v18, %v9684_v16  ;;  %4221 = vmatprep.subr.mxu0 %v9560_v24  ;;  %v215_v55 = vld [vmem:[#allocation5 + $0x578] sm:$0xff] }
 0x2b8   :  { %12492 = vst [vmem:[#allocation28_spill] sm:$0xff] %v9708_v48  ;;  %4448 = vmatpush1.msra.mxu1 %v12493_v60  ;;  %v9723_v21 = vsub.f32 %v9596_v28, %v12495_v29  ;;  %12496 = vst [vmem:[#allocation32_spill] sm:$0xff] %v9728_v26  ;;  %v12497_v60 = vand.u32 4294901760, %v9634_v63  ;;  %v12500_v29 = vand.u32 4294901760, %v9546_v54  ;;  %v9756_v54 = vsub.f32 %v238_v3, %v9708_v48 }
 0x2b9   :  { %4454 = vmatprep.subr.mxu1 %v4453_v42  ;;  %12498 = vst [vmem:[#allocation59_spill] sm:$0xff] %v9735_v62  ;;  %12499 = vst [vmem:[#allocation27_spill] sm:$0xff] %v9737_v7  ;;  %v4501_v42 = vand.u32 4294901760, %v9696_v27  ;;  %v9746_v59 = vsub.f32 %v9650_v15, %v12501_v39  ;;  %v12505_v27 = vand.u32 4294901760, %v9665_v4  ;;  %v222_v39 = vld [vmem:[#allocation5 + $0x5b0] sm:$0xff]  ;;  %4223 = vmatpush2.msra.mxu0 %v9548_v45  ;;  %v12507_v18 = vand.u32 4294901760, %v9585_v50 }
 0x2ba   :  { %v9733_v34 = vsub.f32 %v9634_v63, %v12497_v60  ;;  %4460 = vmatpush1.msra.mxu1 %v12500_v29  ;;  %12502 = vst [vmem:[#allocation80_spill] sm:$0xff] %v9750_v31  ;;  %v12503_v63 = vand.u32 4294901760, %v9580_v1  ;;  %12504 = vst [vmem:[#allocation107_spill] sm:$0xff] %v9756_v54  ;;  %v9765_v60 = vsub.f32 %v239_v58, %v9706_v6  ;;  %v4513_v1 = vand.u32 4294901760, %v9718_v33 }
 0x2bb   :  { %v9761_v29 = vsub.f32 %v9665_v4, %v12505_v27  ;;  %v4519_v3 = vand.u32 4294901760, %v9723_v21  ;;  %v9777_v24 = vand.u32 4294901760, %v223_v8  ;;  %4225 = vmatprep.subr.mxu0 %v9587_v12  ;;  %v9782_v50 = vsub.f32 %v230_v13, %v9737_v7  ;;  %v206_v21 = vld [vmem:[#allocation5 + $0x530] sm:$0xff] }
 0x2bc   :  { %4466 = vmatprep.subr.mxu1 %v12503_v63  ;;  %12506 = vst [vmem:[#allocation112_spill] sm:$0xff] %v9765_v60  ;;  %v12508_v63 = vand.u32 4294901760, %v9657_v36  ;;  %v4531_v58 = vand.u32 4294901760, %v9733_v34  ;;  %v9786_v45 = vsub.f32 %v231_v2, %v9735_v62  ;;  %4227 = vmatpush2.msra.mxu0 %v9589_v44  ;;  %v4525_v12 = vand.u32 4294901760, %v9746_v59  ;;  %v198_v44 = vld [vmem:[#allocation5 + $0x4f0] sm:$0xff] }
 0x2bd   :  { %4472 = vmatpush1.msra.mxu1 %v12507_v18  ;;  %12509 = vst [vmem:[#allocation116_spill] sm:$0xff] %v9782_v50  ;;  %v214_v18 = vld [vmem:[#allocation5 + $0x570] sm:$0xff]  ;;  %v9797_v13 = vand.u32 4294901760, %v222_v39  ;;  %4229 = vmatprep.subr.mxu0 %v9610_v11  ;;  %v4537_v2 = vand.u32 4294901760, %v9761_v29  ;;  %v9807_v59 = vand.u32 4294901760, %v215_v55  ;;  %v199_v11 = vld [vmem:[#allocation5 + $0x4f8] sm:$0xff] }
 0x2be   :  { %v9775_v27 = vsub.f32 %v9657_v36, %v12508_v63  ;;  %4478 = vmatprep.subr.mxu1 %v4477_v38  ;;  %12510 = vst [vmem:[#allocation114_spill] sm:$0xff] %v9786_v45  ;;  %v12511_v63 = vand.u32 4294901760, %v9608_v40  ;;  %v12512_v38 = vand.u32 4294901760, %v9700_v22  ;;  %v207_v36 = vld [vmem:[#allocation5 + $0x538] sm:$0xff]  ;;  %v12514_v40 = vand.u32 4294901760, %v9682_v37  ;;  %4231 = vmatpush2.msra.mxu0 %v9612_v23 }
 0x2bf   :  { %12513 = vst [vmem:[#allocation117_spill] sm:$0xff] %v9797_v13  ;;  %12515 = vst [vmem:[#allocation120_spill] sm:$0xff] %v9807_v59  ;;  %4233 = vmatprep.subr.mxu0 %v9646_v30  ;;  %v12519_v29 = vand.u32 4294901760, %v9674_v46 }
 0x2c0   :  { %4484 = vmatpush1.msra.mxu1 %v12511_v63  ;;  %v9795_v34 = vsub.f32 %v9700_v22, %v12512_v38  ;;  %v9805_v63 = vsub.f32 %v9682_v37, %v12514_v40  ;;  %v4543_v33 = vand.u32 4294901760, %v9775_v27  ;;  %v9812_v22 = vand.u32 4294901760, %v214_v18  ;;  %4235 = vmatpush2.msra.mxu0 %v9636_v47  ;;  %v190_v47 = vld [vmem:[#allocation5 + $0x4b0] sm:$0xff] }
 0x2c1   :  { %4490 = vmatprep.subr.mxu1 %v4489_v61  ;;  %v9814_v61 = vand.u32 4294901760, %v206_v21  ;;  %v12517_v40 = vand.u32 4294901760, %v9728_v26  ;;  %v9823_v37 = vand.u32 4294901760, %v207_v36  ;;  %v9827_v27 = vsub.f32 %v223_v8, %v9777_v24  ;;  %4237 = vmatprep.subr.mxu0 %v9684_v16 }
 0x2c2   :  { %4496 = vmatpush2.msra.mxu1 %v4495_v9  ;;  %12516 = vst [vmem:[#allocation123_spill] sm:$0xff] %v9812_v22  ;;  %v4549_v30 = vand.u32 4294901760, %v9795_v34  ;;  %v4555_v8 = vand.u32 4294901760, %v9805_v63  ;;  %v12522_v9 = vand.u32 4294901760, %v9765_v60  ;;  %v9848_v34 = vand.u32 4294901760, %v199_v11  ;;  %4239 = vmatpush2.msra.mxu0 %v9686_v49 }
 0x2c3   :  { %4502 = vmatprep.subr.mxu1 %v4501_v42  ;;  %v9821_v38 = vsub.f32 %v9728_v26, %v12517_v40  ;;  %12518 = vst [vmem:[#allocation122_spill] sm:$0xff] %v9827_v27  ;;  %v9834_v42 = vsub.f32 %v222_v39, %v9797_v13  ;;  %v12521_v40 = vand.u32 4294901760, %v9750_v31  ;;  %v9839_v26 = vand.u32 4294901760, %v198_v44  ;;  %v191_v39 = vld [vmem:[#allocation5 + $0x4b8] sm:$0xff]  ;;  %4241 = vmatprep.subr.mxu0 %v9706_v6  ;;  %v182_v6 = vld [vmem:[#allocation5 + $0x470] sm:$0xff] }
 0x2c4   :  { %4508 = vmatpush2.msra.mxu1 %v12519_v29  ;;  %v9846_v46 = vsub.f32 %v9765_v60, %v12522_v9  ;;  %v9851_v29 = vsub.f32 %v215_v55, %v9807_v59  ;;  %v12525_v63 = vand.u32 4294901760, %v9756_v54  ;;  %v9871_v60 = vsub.f32 %v207_v36, %v9823_v37  ;;  %4243 = vmatpush2.msra.mxu0 %v9708_v48  ;;  %v175_v48 = vld [vmem:[#allocation5 + $0x438] sm:$0xff] }
 0x2c5   :  { %12520 = vst [vmem:[#allocation113_spill] sm:$0xff] %v9834_v42  ;;  %v4560_v23 = vsub.f32 %v9750_v31, %v12521_v40  ;;  %4514 = vmatprep.subr.mxu1 %v4513_v1  ;;  %v9855_v40 = vsub.f32 %v214_v18, %v9812_v22  ;;  %v9858_v1 = vsub.f32 %v206_v21, %v9814_v61  ;;  %v4567_v55 = vand.u32 4294901760, %v9821_v38  ;;  %v183_v21 = vld [vmem:[#allocation5 + $0x478] sm:$0xff] }
 0x2c6   :  { %12523 = vst [vmem:[#allocation115_spill] sm:$0xff] %v9851_v29  ;;  %4520 = vmatpush2.msra.mxu1 %v4519_v3  ;;  %v4578_v9 = vsub.f32 %v9756_v54, %v12525_v63  ;;  %v12526_v3 = vand.u32 4294901760, %v9786_v45  ;;  %12527 = vst [vmem:[#allocation42_spill] sm:$0xff] %v9871_v60  ;;  %v9875_v16 = vsub.f32 %v198_v44, %v9839_v26  ;;  %4245 = vmatprep.subr.mxu0 %v9735_v62 }
 0x2c7   :  { %12524 = vst [vmem:[#allocation124_spill] sm:$0xff] %v9858_v1  ;;  %4526 = vmatprep.subr.mxu1 %v4525_v12  ;;  %v4561_v63 = vand.u32 4294901760, %v4560_v23  ;;  %v9877_v12 = vand.u32 4294901760, %v191_v39  ;;  %v9882_v49 = vand.u32 4294901760, %v190_v47  ;;  %v9886_v23 = vsub.f32 %v199_v11, %v9848_v34  ;;  %4247 = vmatpush2.msra.mxu0 %v9737_v7 }
 0x2c8   :  { %v4584_v18 = vsub.f32 %v9786_v45, %v12526_v3  ;;  %4532 = vmatpush2.msra.mxu1 %v4531_v58  ;;  %v4573_v3 = vand.u32 4294901760, %v9846_v46  ;;  %v4579_v44 = vand.u32 4294901760, %v4578_v9  ;;  %v12529_v58 = vand.u32 4294901760, %v9782_v50  ;;  %v174_v46 = vld [vmem:[#allocation5 + $0x430] sm:$0xff]  ;;  %4249 = vmatprep.subr.mxu0 %v9777_v24 }
 0x2c9   :  { %4538 = vmatprep.subr.mxu1 %v4537_v2  ;;  %12528 = vst [vmem:[#allocation125_spill] sm:$0xff] %v9886_v23  ;;  %v9892_v62 = vand.u32 4294901760, %v183_v21  ;;  %v12530_v11 = vand.u32 4294901760, %v9827_v27  ;;  %v9899_v7 = vand.u32 4294901760, %v182_v6  ;;  %4251 = vmatpush2.msra.mxu0 %v9797_v13  ;;  %v12531_v9 = vand.u32 4294901760, %v9834_v42 }
 0x2ca   :  { %4544 = vmatpush2.msra.mxu1 %v4543_v33  ;;  %v4590_v38 = vsub.f32 %v9782_v50, %v12529_v58  ;;  %v4585_v36 = vand.u32 4294901760, %v4584_v18  ;;  %v9906_v2 = vand.u32 4294901760, %v175_v48  ;;  %v9910_v18 = vsub.f32 %v191_v39, %v9877_v12  ;;  %4253 = vmatprep.subr.mxu0 %v9807_v59 }
 0x2cb   :  { %4550 = vmatprep.subr.mxu1 %v4549_v30  ;;  %v4596_v45 = vsub.f32 %v9827_v27, %v12530_v11  ;;  %v4602_v58 = vsub.f32 %v9834_v42, %v12531_v9  ;;  %v9914_v11 = vsub.f32 %v190_v47, %v9882_v49  ;;  %v12535_v33 = vand.u32 4294901760, %v9851_v29  ;;  %4255 = vmatpush2.msra.mxu0 %v9812_v22 }
 0x2cc   :  { %4556 = vmatpush2.msra.mxu1 %v4555_v8  ;;  %12532 = vst [vmem:[#allocation118_spill] sm:$0xff] %v9906_v2  ;;  %12533 = vst [vmem:[#allocation121_spill] sm:$0xff] %v9910_v18  ;;  %v9919_v13 = vand.u32 4294901760, %v174_v46  ;;  %v4591_v30 = vand.u32 4294901760, %v4590_v38  ;;  %v12537_v39 = vand.u32 4294901760, %v9855_v40  ;;  %4257 = vmatprep.subr.mxu0 %v9823_v37  ;;  %v12538_v9 = vand.u32 4294901760, %v9871_v60 }
 0x2cd   :  { %4562 = vmatprep.subr.mxu1 %v4561_v63  ;;  %12534 = vst [vmem:[#allocation127_spill] sm:$0xff] %v9914_v11  ;;  %v4608_v8 = vsub.f32 %v9851_v29, %v12535_v33  ;;  %v9927_v63 = vsub.f32 %v183_v21, %v9892_v62  ;;  %v4597_v47 = vand.u32 4294901760, %v4596_v45  ;;  %v9931_v33 = vsub.f32 %v182_v6, %v9899_v7 }
 0x2ce   :  { %12536 = vst [vmem:[#allocation14_spill] sm:$0xff] %v9919_v13  ;;  %4568 = vmatpush2.msra.mxu1 %v4567_v55  ;;  %v4614_v59 = vsub.f32 %v9855_v40, %v12537_v39  ;;  %v4620_v22 = vsub.f32 %v9871_v60, %v12538_v9  ;;  %4259 = vmatpush2.msra.mxu0 %v9814_v61  ;;  %v4603_v38 = vand.u32 4294901760, %v4602_v58  ;;  %v12539_v21 = vand.u32 4294901760, %v9858_v1 }
 0x2cf   :  { %4574 = vmatprep.subr.mxu1 %v4573_v3  ;;  %v9943_v45 = vsub.f32 %v175_v48, %v9906_v2  ;;  %4261 = vmatprep.subr.mxu0 %v9848_v34  ;;  %v4609_v6 = vand.u32 4294901760, %v4608_v8  ;;  %v9947_v9 = vsub.f32 %v174_v46, %v9919_v13  ;;  %v12541_v55 = vand.u32 4294901760, %v9886_v23 }
 0x2d0   :  { %4580 = vmatpush2.msra.mxu1 %v4579_v44  ;;  %v4626_v39 = vsub.f32 %v9858_v1, %v12539_v21  ;;  %4263 = vmatpush2.msra.mxu0 %v9839_v26  ;;  %v4615_v21 = vand.u32 4294901760, %v4614_v59  ;;  %v11116_v48 = vand.u32 4294901760, %v9927_v63  ;;  %v12542_v8 = vand.u32 4294901760, %v9875_v16 }
 0x2d1   :  { %4586 = vmatprep.subr.mxu1 %v4585_v36  ;;  %12540 = vst [vmem:[#allocation61_spill] sm:$0xff] %v9947_v9  ;;  %v4632_v44 = vsub.f32 %v9886_v23, %v12541_v55  ;;  %4265 = vmatprep.subr.mxu0 %v9877_v12  ;;  %v4621_v36 = vand.u32 4294901760, %v4620_v22  ;;  %v12543_v58 = vand.u32 4294901760, %v9910_v18  ;;  %v11122_v3 = vand.u32 4294901760, %v9947_v9 }
 0x2d2   :  { %4592 = vmatpush2.msra.mxu1 %v4591_v30  ;;  %v4638_v46 = vsub.f32 %v9875_v16, %v12542_v8  ;;  %4267 = vmatpush2.msra.mxu0 %v9882_v49  ;;  %v4627_v55 = vand.u32 4294901760, %v4626_v39  ;;  %v11121_v30 = vand.u32 4294901760, %v9943_v45 }
 0x2d3   :  { %4598 = vmatprep.subr.mxu1 %v4597_v47  ;;  %v4644_v59 = vsub.f32 %v9910_v18, %v12543_v58  ;;  %4269 = vmatprep.subr.mxu0 %v9892_v62  ;;  %v4633_v22 = vand.u32 4294901760, %v4632_v44  ;;  %v12544_v47 = vand.u32 4294901760, %v9914_v11 }
 0x2d4   :  { %4604 = vmatpush2.msra.mxu1 %v4603_v38  ;;  %4271 = vmatpush2.msra.mxu0 %v9899_v7  ;;  %v4656_v38 = vsub.f32 %v9927_v63, %v11116_v48  ;;  %v4639_v39 = vand.u32 4294901760, %v4638_v46  ;;  %v12547_v46 = vld [vmem:[#allocation70_spill] sm:$0xff] }
 0x2d5   :  { %4610 = vmatprep.subr.mxu1 %v4609_v6  ;;  %v4650_v8 = vsub.f32 %v9914_v11, %v12544_v47  ;;  %4273 = vmatprep.subr.mxu0 %v9906_v2  ;;  %v12545_v6 = vand.u32 4294901760, %v9931_v33  ;;  %v4645_v58 = vand.u32 4294901760, %v4644_v59  ;;  %v12546_v47 = vld [vmem:[#allocation108_spill] sm:$0xff]  ;;  %v12548_v2 = vld [vmem:[#allocation109_spill] sm:$0xff] }
 0x2d6   :  { %4616 = vmatpush2.msra.mxu1 %v4615_v21  ;;  %4275 = vmatpush2.msra.mxu0 %v9919_v13  ;;  %v4668_v21 = vsub.f32 %v9943_v45, %v11121_v30  ;;  %v12550_v13 = vld [vmem:[#allocation57_spill] sm:$0xff] }
 0x2d7   :  { %4622 = vmatprep.subr.mxu1 %v4621_v36  ;;  %v4662_v44 = vsub.f32 %v9931_v33, %v12545_v6  ;;  %4281 = vmatprep.mubr.f32.mxu0 %v12546_v47  ;;  %v4651_v48 = vand.u32 4294901760, %v4650_v8  ;;  %v4674_v36 = vsub.f32 %v9947_v9, %v11122_v3  ;;  %v4657_v6 = vand.u32 4294901760, %v4656_v38  ;;  %v12552_v47 = vld [vmem:[#allocation52_spill] sm:$0xff]  ;;  %v12553_v3 = vld [vmem:[#allocation34_spill] sm:$0xff] }
 0x2d8   :  { %4628 = vmatpush2.msra.mxu1 %v4627_v55  ;;  %4688 = vmatprep.subr.mxu0 %v12547_v46  ;;  %v12549_v55 = vld [vmem:[#allocation92_spill] sm:$0xff]  ;;  %v4669_v30 = vand.u32 4294901760, %v4668_v21  ;;  %v12555_v38 = vld [vmem:[#allocation50_spill] sm:$0xff] }
 0x2d9   :  { %4634 = vmatprep.subr.mxu1 %v4633_v22  ;;  %4287 = vmatmul.mubr.f32.vlgmr.msra.gmra.mxu0 %v12548_v2  ;;  %v4663_v59 = vand.u32 4294901760, %v4662_v44  ;;  %v12551_v22 = vld [vmem:[#allocation20_spill] sm:$0xff]  ;;  %v4675_v8 = vand.u32 4294901760, %v4674_v36  ;;  %v12554_v2 = vld [vmem:[#allocation69_spill] sm:$0xff]  ;;  %v12559_v44 = vld [vmem:[#allocation74_spill] sm:$0xff] }
 0x2da   :  { %4640 = vmatpush2.msra.mxu1 %v4639_v39  ;;  %4691 = vmatpush1.msra.mxu0 %v12549_v55  ;;  %v12557_v39 = vld [vmem:[#allocation106_spill] sm:$0xff] }
 0x2db   :  { %4646 = vmatprep.subr.mxu1 %v4645_v58  ;;  %4694 = vmatprep.subr.mxu0 %v12550_v13  ;;  %v12560_v58 = vld [vmem:[#allocation79_spill] sm:$0xff]  ;;  %v12561_v21 = vld [vmem:[#allocation90_spill] sm:$0xff] }
 0x2dc   :  { %4652 = vmatpush2.msra.mxu1 %v4651_v48  ;;  %4697 = vmatpush1.msra.mxu0 %v12551_v22  ;;  %v12556_v48 = vld [vmem:[#allocation95_spill] sm:$0xff]  ;;  %v12562_v36 = vld [vmem:[#allocation38_spill] sm:$0xff] }
 0x2dd   :  { %4658 = vmatprep.subr.mxu1 %v4657_v6  ;;  %4700 = vmatprep.subr.mxu0 %v12552_v47  ;;  %v12563_v6 = vld [vmem:[#allocation41_spill] sm:$0xff] }
 0x2de   :  { %4664 = vmatpush2.msra.mxu1 %v4663_v59  ;;  %4703 = vmatpush1.msra.mxu0 %v12553_v3  ;;  %v12564_v59 = vld [vmem:[#allocation94_spill] sm:$0xff] }
 0x2df   :  { %4670 = vmatprep.subr.mxu1 %v4669_v30  ;;  %4706 = vmatprep.subr.mxu0 %v12554_v2  ;;  %v12558_v30 = vld [vmem:[#allocation68_spill] sm:$0xff] }
 0x2e0   :  { %4676 = vmatpush2.msra.mxu1 %v4675_v8  ;;  %4709 = vmatpush1.msra.mxu0 %v12555_v38  ;;  %v12565_v8 = vld [vmem:[#allocation49_spill] sm:$0xff] }
 0x2e1   :  { %4680 = vmatmul.mubr.f32.vlgmr.msra.gmra.mxu1 %v12383_v57  ;;  %4712 = vmatprep.subr.mxu0 %v12556_v48  ;;  %v12566_v57 = vld [vmem:[#allocation93_spill] sm:$0xff] }
 0x2e2   :  { %4890 = vmatprep.subr.mxu1 %v9050_v41  ;;  %4715 = vmatpush1.msra.mxu0 %v12557_v39 }
 0x2e3   :  { %4892 = vmatpush1.msra.mxu1 %v9055_v5  ;;  %4718 = vmatprep.subr.mxu0 %v9221_v10 }
 0x2e4   :  { %4894 = vmatprep.subr.mxu1 %v12558_v30  ;;  %4721 = vmatpush1.msra.mxu0 %v12559_v44 }
 0x2e5   :  { %4896 = vmatpush1.msra.mxu1 %v9062_v17  ;;  %4724 = vmatprep.subr.mxu0 %v9246_v32 }
 0x2e6   :  { %4898 = vmatprep.subr.mxu1 %v9064_v43  ;;  %4727 = vmatpush1.msra.mxu0 %v9238_v14  ;;  %v12568_v43 = vld [vmem:[#allocation119_spill] sm:$0xff]  ;;  %v12569_v14 = vld [vmem:[#allocation88_spill] sm:$0xff] }
 0x2e7   :  { %4900 = vmatpush1.msra.mxu1 %v9072_v25  ;;  %4730 = vmatprep.subr.mxu0 %v12560_v58  ;;  %v12570_v25 = vld [vmem:[#allocation101_spill] sm:$0xff]  ;;  %v12571_v58 = vld [vmem:[#allocation91_spill] sm:$0xff] }
 0x2e8   :  { %4902 = vmatprep.subr.mxu1 %v12561_v21  ;;  %4733 = vmatpush1.msra.mxu0 %v12562_v36  ;;  %v12572_v21 = vld [vmem:[#allocation48_spill] sm:$0xff]  ;;  %v12573_v36 = vld [vmem:[#allocation37_spill] sm:$0xff] }
 0x2e9   :  { %4904 = vmatpush1.msra.mxu1 %v12563_v6  ;;  %4736 = vmatprep.subr.mxu0 %v12564_v59  ;;  %v12574_v6 = vld [vmem:[#allocation77_spill] sm:$0xff] }
 0x2ea   :  { %4906 = vmatprep.subr.mxu1 %v12565_v8  ;;  %4739 = vmatpush1.msra.mxu0 %v12566_v57  ;;  %v12575_v59 = vld [vmem:[#allocation33_spill] sm:$0xff]  ;;  %v12576_v8 = vld [vmem:[#allocation78_spill] sm:$0xff]  ;;  %v12577_v57 = vld [vmem:[#allocation63_spill] sm:$0xff] }
 0x2eb   :  { %4908 = vmatpush1.msra.mxu1 %v12567_v52  ;;  %4742 = vmatprep.subr.mxu0 %v12568_v43  ;;  %v12578_v52 = vld [vmem:[#allocation96_spill] sm:$0xff] }
 0x2ec   :  { %4910 = vmatprep.subr.mxu1 %v12569_v14  ;;  %4745 = vmatpush1.msra.mxu0 %v12570_v25  ;;  %v12579_v43 = vld [vmem:[#allocation72_spill] sm:$0xff] }
 0x2ed   :  { %4912 = vmatpush1.msra.mxu1 %v12571_v58  ;;  %4748 = vmatprep.subr.mxu0 %v12572_v21  ;;  %v12580_v25 = vld [vmem:[#allocation44_spill] sm:$0xff]  ;;  %v12581_v58 = vld [vmem:[#allocation110_spill] sm:$0xff]  ;;  %v12582_v21 = vld [vmem:[#allocation19_spill] sm:$0xff] }
 0x2ee   :  { %4914 = vmatprep.subr.mxu1 %v12573_v36  ;;  %4751 = vmatpush1.msra.mxu0 %v12574_v6  ;;  %v12583_v6 = vld [vmem:[#allocation24_spill] sm:$0xff] }
 0x2ef   :  { %4916 = vmatpush1.msra.mxu1 %v12575_v59  ;;  %4754 = vmatprep.subr.mxu0 %v12576_v8  ;;  %v12584_v59 = vld [vmem:[#allocation29_spill] sm:$0xff]  ;;  %v12585_v8 = vld [vmem:[#allocation26_spill] sm:$0xff] }
 0x2f0   :  { %4918 = vmatprep.subr.mxu1 %v12577_v57  ;;  %4757 = vmatpush1.msra.mxu0 %v12578_v52  ;;  %v12586_v52 = vld [vmem:[#allocation89_spill] sm:$0xff] }
 0x2f1   :  { %4920 = vmatpush1.msra.mxu1 %v12579_v43  ;;  %4760 = vmatprep.subr.mxu0 %v9423_v20  ;;  %v12587_v43 = vld [vmem:[#allocation12_spill] sm:$0xff]  ;;  %v12588_v20 = vld [vmem:[#allocation103_spill] sm:$0xff] }
 0x2f2   :  { %4922 = vmatprep.subr.mxu1 %v12580_v25  ;;  %4763 = vmatpush1.msra.mxu0 %v12581_v58  ;;  %v12589_v58 = vld [vmem:[#allocation126_spill] sm:$0xff] }
 0x2f3   :  { %4924 = vmatpush1.msra.mxu1 %v12582_v21  ;;  %4766 = vmatprep.subr.mxu0 %v9472_v56  ;;  %v12590_v21 = vld [vmem:[#allocation56_spill] sm:$0xff]  ;;  %v12591_v56 = vld [vmem:[#allocation111_spill] sm:$0xff] }
 0x2f4   :  { %4926 = vmatprep.subr.mxu1 %v12583_v6  ;;  %4769 = vmatpush1.msra.mxu0 %v12584_v59  ;;  %v12592_v59 = vld [vmem:[#allocation83_spill] sm:$0xff] }
 0x2f5   :  { %4928 = vmatpush1.msra.mxu1 %v12585_v8  ;;  %4772 = vmatprep.subr.mxu0 %v9487_v19  ;;  %v12593_v8 = vld [vmem:[#allocation53_spill] sm:$0xff]  ;;  %v12594_v19 = vld [vmem:[#allocation58_spill] sm:$0xff] }
 0x2f6   :  { %4930 = vmatprep.subr.mxu1 %v12586_v52  ;;  %4775 = vmatpush1.msra.mxu0 %v12587_v43  ;;  %v12595_v43 = vld [vmem:[#allocation60_spill] sm:$0xff] }
 0x2f7   :  { %4932 = vmatpush1.msra.mxu1 %v12588_v20  ;;  %4778 = vmatprep.subr.mxu0 %v9527_v0  ;;  %v12596_v20 = vld [vmem:[#allocation76_spill] sm:$0xff]  ;;  %v12597_v0 = vld [vmem:[#allocation85_spill] sm:$0xff] }
 0x2f8   :  { %4934 = vmatprep.subr.mxu1 %v12589_v58  ;;  %4781 = vmatpush1.msra.mxu0 %v12590_v21  ;;  %v12598_v21 = vld [vmem:[#allocation82_spill] sm:$0xff] }
 0x2f9   :  { %4936 = vmatpush1.msra.mxu1 %v12591_v56  ;;  %4784 = vmatprep.subr.mxu0 %v9551_v35  ;;  %v12599_v35 = vld [vmem:[#allocation15_spill] sm:$0xff] }
 0x2fa   :  { %4938 = vmatprep.subr.mxu1 %v12592_v59  ;;  %4787 = vmatpush2.msra.mxu0 %v12593_v8  ;;  %v12600_v8 = vld [vmem:[#allocation23_spill] sm:$0xff] }
 0x2fb   :  { %4940 = vmatpush1.msra.mxu1 %v12594_v19  ;;  %4790 = vmatprep.subr.mxu0 %v9600_v53  ;;  %v12601_v19 = vld [vmem:[#allocation36_spill] sm:$0xff]  ;;  %v12602_v53 = vld [vmem:[#allocation11_spill] sm:$0xff] }
 0x2fc   :  { %4942 = vmatprep.subr.mxu1 %v12595_v43  ;;  %4793 = vmatpush2.msra.mxu0 %v12596_v20  ;;  %v12603_v20 = vld [vmem:[#allocation35_spill] sm:$0xff] }
 0x2fd   :  { %4944 = vmatpush1.msra.mxu1 %v12597_v0  ;;  %4796 = vmatprep.subr.mxu0 %v9626_v51  ;;  %v12604_v0 = vld [vmem:[#allocation71_spill] sm:$0xff]  ;;  %v12605_v51 = vld [vmem:[#allocation40_spill] sm:$0xff] }
 0x2fe   :  { %4946 = vmatprep.subr.mxu1 %v12598_v21  ;;  %4799 = vmatpush2.msra.mxu0 %v9596_v28  ;;  %v12606_v21 = vld [vmem:[#allocation81_spill] sm:$0xff]  ;;  %v12607_v28 = vld [vmem:[#allocation86_spill] sm:$0xff] }
 0x2ff   :  { %4948 = vmatpush1.msra.mxu1 %v12599_v35  ;;  %4802 = vmatprep.subr.mxu0 %v9650_v15  ;;  %v12608_v35 = vld [vmem:[#allocation87_spill] sm:$0xff]  ;;  %v12609_v15 = vld [vmem:[#allocation64_spill] sm:$0xff] }
 0x300   :  { %4950 = vmatprep.subr.mxu1 %v12600_v8  ;;  %4805 = vmatpush2.msra.mxu0 %v12601_v19  ;;  %v12610_v19 = vld [vmem:[#allocation51_spill] sm:$0xff] }
 0x301   :  { %4952 = vmatpush1.msra.mxu1 %v12602_v53  ;;  %4808 = vmatprep.subr.mxu0 %v9665_v4  ;;  %v12611_v53 = vld [vmem:[#allocation32_spill] sm:$0xff]  ;;  %v12612_v4 = vld [vmem:[#allocation21_spill] sm:$0xff] }
 0x302   :  { %4954 = vmatprep.subr.mxu1 %v12603_v20  ;;  %4811 = vmatpush2.msra.mxu0 %v12604_v0  ;;  %v12613_v20 = vld [vmem:[#allocation112_spill] sm:$0xff] }
 0x303   :  { %4956 = vmatpush2.msra.mxu1 %v12605_v51  ;;  %4814 = vmatprep.subr.mxu0 %v12606_v21  ;;  %v12614_v0 = vld [vmem:[#allocation84_spill] sm:$0xff] }
 0x304   :  { %4958 = vmatprep.subr.mxu1 %v12607_v28  ;;  %4817 = vmatpush2.msra.mxu0 %v12608_v35  ;;  %v12615_v21 = vld [vmem:[#allocation16_spill] sm:$0xff]  ;;  %v12616_v28 = vld [vmem:[#allocation114_spill] sm:$0xff] }
 0x305   :  { %4960 = vmatpush2.msra.mxu1 %v12609_v15  ;;  %4820 = vmatprep.subr.mxu0 %v9750_v31  ;;  %v12617_v35 = vld [vmem:[#allocation30_spill] sm:$0xff]  ;;  %v12618_v31 = vld [vmem:[#allocation13_spill] sm:$0xff] }
 0x306   :  { %4962 = vmatprep.subr.mxu1 %v12610_v19  ;;  %4823 = vmatpush2.msra.mxu0 %v12611_v53  ;;  %v12619_v53 = vld [vmem:[#allocation75_spill] sm:$0xff] }
 0x307   :  { %4964 = vmatpush2.msra.mxu1 %v12612_v4  ;;  %4826 = vmatprep.subr.mxu0 %v12613_v20  ;;  %v12620_v20 = vld [vmem:[#allocation17_spill] sm:$0xff] }
 0x308   :  { %4966 = vmatprep.subr.mxu1 %v12614_v0  ;;  %4829 = vmatpush2.msra.mxu0 %v9756_v54  ;;  %v12621_v54 = vld [vmem:[#allocation46_spill] sm:$0xff] }
 0x309   :  { %4968 = vmatpush2.msra.mxu1 %v12615_v21  ;;  %4832 = vmatprep.subr.mxu0 %v12616_v28  ;;  %v12622_v28 = vld [vmem:[#allocation47_spill] sm:$0xff] }
 0x30a   :  { %4970 = vmatprep.subr.mxu1 %v12617_v35  ;;  %4835 = vmatpush2.msra.mxu0 %v9782_v50  ;;  %v12623_v50 = vld [vmem:[#allocation55_spill] sm:$0xff] }
 0x30b   :  { %4972 = vmatpush2.msra.mxu1 %v12618_v31  ;;  %4838 = vmatprep.subr.mxu0 %v9827_v27  ;;  %v12624_v27 = vld [vmem:[#allocation28_spill] sm:$0xff] }
 0x30c   :  { %4974 = vmatprep.subr.mxu1 %v12619_v53  ;;  %4841 = vmatpush2.msra.mxu0 %v9834_v42  ;;  %v12625_v42 = vld [vmem:[#allocation59_spill] sm:$0xff] }
 0x30d   :  { %4976 = vmatpush2.msra.mxu1 %v12620_v20  ;;  %4844 = vmatprep.subr.mxu0 %v9851_v29  ;;  %v12626_v29 = vld [vmem:[#allocation27_spill] sm:$0xff] }
 0x30e   :  { %4978 = vmatprep.subr.mxu1 %v12621_v54  ;;  %4847 = vmatpush2.msra.mxu0 %v9855_v40 }
 0x30f   :  { %4980 = vmatpush2.msra.mxu1 %v12622_v28  ;;  %4850 = vmatprep.subr.mxu0 %v9871_v60  ;;  %v12627_v60 = vld [vmem:[#allocation117_spill] sm:$0xff] }
 0x310   :  { %4982 = vmatprep.subr.mxu1 %v12623_v50  ;;  %4853 = vmatpush2.msra.mxu0 %v9858_v1  ;;  %v12628_v1 = vld [vmem:[#allocation120_spill] sm:$0xff] }
 0x311   :  { %4984 = vmatpush2.msra.mxu1 %v12624_v27  ;;  %4856 = vmatprep.subr.mxu0 %v9886_v23  ;;  %v12629_v23 = vld [vmem:[#allocation123_spill] sm:$0xff] }
 0x312   :  { %4986 = vmatprep.subr.mxu1 %v12625_v42  ;;  %4859 = vmatpush2.msra.mxu0 %v9875_v16 }
 0x313   :  { %4988 = vmatpush2.msra.mxu1 %v12626_v29  ;;  %4862 = vmatprep.subr.mxu0 %v9910_v18  ;;  %v12630_v18 = vld [vmem:[#allocation100_spill] sm:$0xff] }
 0x314   :  { %4990 = vmatprep.subr.mxu1 %v9777_v24  ;;  %4865 = vmatpush2.msra.mxu0 %v9914_v11  ;;  %v12631_v11 = vld [vmem:[#allocation102_spill] sm:$0xff] }
 0x315   :  { %4992 = vmatpush2.msra.mxu1 %v12627_v60  ;;  %4868 = vmatprep.subr.mxu0 %v9927_v63 }
 0x316   :  { %4994 = vmatprep.subr.mxu1 %v12628_v1  ;;  %4871 = vmatpush2.msra.mxu0 %v9931_v33  ;;  %v12632_v1 = vand.u32 4294901760, %v12547_v46  ;;  %v12641_v46 = vld [vmem:[#allocation104_spill] sm:$0xff] }
 0x317   :  { %4996 = vmatpush2.msra.mxu1 %v12629_v23  ;;  %4874 = vmatprep.subr.mxu0 %v9943_v45  ;;  %v12633_v23 = vand.u32 4294901760, %v12549_v55  ;;  %v12642_v55 = vand.u32 4294901760, %v12555_v38  ;;  %v12647_v38 = vand.u32 4294901760, %v12559_v44 }
 0x318   :  { %4998 = vmatprep.subr.mxu1 %v9823_v37  ;;  %4877 = vmatpush2.msra.mxu0 %v9947_v9  ;;  %v12634_v9 = vand.u32 4294901760, %v12550_v13  ;;  %v12639_v13 = vand.u32 4294901760, %v12554_v2  ;;  %v12646_v2 = vand.u32 4294901760, %v9221_v10 }
 0x319   :  { %4880 = vmatprep.mubr.f32.mxu0 %v12630_v18  ;;  %5000 = vmatpush2.msra.mxu1 %v9814_v61  ;;  %v12635_v18 = vand.u32 4294901760, %v12551_v22  ;;  %v12643_v22 = vld [vmem:[#allocation105_spill] sm:$0xff] }
 0x31a   :  { %4883 = vmatmul.mubr.f32.vlgmr.msra.gmra.mxu0 %v12631_v11  ;;  %5002 = vmatprep.subr.mxu1 %v9848_v34  ;;  %v12636_v11 = vand.u32 4294901760, %v12552_v47  ;;  %v12644_v47 = vand.u32 4294901760, %v12556_v48  ;;  %v12648_v48 = vand.u32 4294901760, %v9246_v32 }
 0x31b   :  { %5033 = vmatprep.subr.mxu0 %v12632_v1  ;;  %5004 = vmatpush2.msra.mxu1 %v9839_v26  ;;  %v12637_v1 = vand.u32 4294901760, %v12553_v3  ;;  %v12645_v3 = vand.u32 4294901760, %v12557_v39 }
 0x31c   :  { %5037 = vmatpush1.msra.mxu0 %v12633_v23  ;;  %5006 = vmatprep.subr.mxu1 %v9877_v12  ;;  %v12638_v23 = vld [vmem:[#allocation118_spill] sm:$0xff] }
 0x31d   :  { %5041 = vmatprep.subr.mxu0 %v12634_v9  ;;  %5008 = vmatpush2.msra.mxu1 %v9882_v49  ;;  %v12640_v9 = vld [vmem:[#allocation14_spill] sm:$0xff] }
 0x31e   :  { %5045 = vmatpush1.msra.mxu0 %v12635_v18  ;;  %5010 = vmatprep.subr.mxu1 %v9892_v62  ;;  %v12649_v18 = vld [vmem:[#allocation66_spill] sm:$0xff] }
 0x31f   :  { %5049 = vmatprep.subr.mxu0 %v12636_v11  ;;  %5012 = vmatpush2.msra.mxu1 %v9899_v7  ;;  %v12652_v11 = vld [vmem:[#allocation39_spill] sm:$0xff] }
 0x320   :  { %5053 = vmatpush1.msra.mxu0 %v12637_v1  ;;  %5014 = vmatprep.subr.mxu1 %v12638_v23  ;;  %v12655_v1 = vld [vmem:[#allocation90_spill] sm:$0xff] }
 0x321   :  { %5057 = vmatprep.subr.mxu0 %v12639_v13  ;;  %5016 = vmatpush2.msra.mxu1 %v12640_v9  ;;  %v12658_v13 = vld [vmem:[#allocation41_spill] sm:$0xff] }
 0x322   :  { %5020 = vmatprep.mubr.f32.mxu1 %v12641_v46  ;;  %5061 = vmatpush1.msra.mxu0 %v12642_v55  ;;  %v12661_v46 = vld [vmem:[#allocation49_spill] sm:$0xff] }
 0x323   :  { %5024 = vmatmul.mubr.f32.vlgmr.msra.gmra.mxu1 %v12643_v22  ;;  %5065 = vmatprep.subr.mxu0 %v12644_v47  ;;  %v12662_v55 = vld [vmem:[#allocation93_spill] sm:$0xff] }
 0x324   :  { %5296 = vmatprep.subr.mxu1 %v9050_v41  ;;  %5069 = vmatpush1.msra.mxu0 %v12645_v3  ;;  %v12650_v41 = vld [vmem:[#allocation67_spill] sm:$0xff]  ;;  %v12663_v22 = vand.u32 4294901760, %v12662_v55  ;;  %v12664_v47 = vld [vmem:[#allocation65_spill] sm:$0xff] }
 0x325   :  { %5298 = vmatpush1.msra.mxu1 %v9055_v5  ;;  %5073 = vmatprep.subr.mxu0 %v12646_v2  ;;  %v12651_v39 = vand.u32 4294901760, %v12650_v41  ;;  %v12653_v5 = vld [vmem:[#allocation79_spill] sm:$0xff]  ;;  %v12670_v41 = vld [vmem:[#allocation48_spill] sm:$0xff] }
 0x326   :  { %5300 = vmatprep.subr.mxu1 %v12558_v30  ;;  %5077 = vmatpush1.msra.mxu0 %v12647_v38  ;;  %v12654_v10 = vand.u32 4294901760, %v12653_v5  ;;  %v12656_v30 = vld [vmem:[#allocation38_spill] sm:$0xff]  ;;  %v12665_v3 = vld [vmem:[#allocation119_spill] sm:$0xff]  ;;  %v12667_v38 = vld [vmem:[#allocation101_spill] sm:$0xff] }
 0x327   :  { %5302 = vmatpush1.msra.mxu1 %v9062_v17  ;;  %5081 = vmatprep.subr.mxu0 %v12648_v48  ;;  %v12657_v44 = vand.u32 4294901760, %v12656_v30  ;;  %v12659_v17 = vld [vmem:[#allocation94_spill] sm:$0xff]  ;;  %v12666_v2 = vand.u32 4294901760, %v12665_v3  ;;  %v12668_v48 = vand.u32 4294901760, %v12667_v38  ;;  %v12684_v55 = vld [vmem:[#allocation19_spill] sm:$0xff]  ;;  %v12690_v38 = vld [vmem:[#allocation73_spill] sm:$0xff] }
 0x328   :  { %5304 = vmatprep.subr.mxu1 %v12649_v18  ;;  %5085 = vmatpush1.msra.mxu0 %v12651_v39  ;;  %v12660_v32 = vand.u32 4294901760, %v12659_v17  ;;  %v12669_v18 = vld [vmem:[#allocation91_spill] sm:$0xff]  ;;  %v12671_v39 = vand.u32 4294901760, %v12670_v41  ;;  %v12680_v17 = vld [vmem:[#allocation54_spill] sm:$0xff] }
 0x329   :  { %5306 = vmatpush1.msra.mxu1 %v12652_v11  ;;  %5089 = vmatprep.subr.mxu0 %v12654_v10  ;;  %v12672_v11 = vld [vmem:[#allocation77_spill] sm:$0xff]  ;;  %v12694_v41 = vld [vmem:[#allocation103_spill] sm:$0xff] }
 0x32a   :  { %5308 = vmatprep.subr.mxu1 %v12655_v1  ;;  %5093 = vmatpush1.msra.mxu0 %v12657_v44  ;;  %v12673_v5 = vand.u32 4294901760, %v12672_v11  ;;  %v12674_v10 = vld [vmem:[#allocation33_spill] sm:$0xff]  ;;  %v12675_v1 = vld [vmem:[#allocation78_spill] sm:$0xff] }
 0x32b   :  { %5310 = vmatpush1.msra.mxu1 %v12658_v13  ;;  %5097 = vmatprep.subr.mxu0 %v12660_v32  ;;  %v12676_v30 = vand.u32 4294901760, %v12675_v1  ;;  %v12679_v13 = vld [vmem:[#allocation72_spill] sm:$0xff]  ;;  %v12681_v32 = vand.u32 4294901760, %v12680_v17 }
 0x32c   :  { %5312 = vmatprep.subr.mxu1 %v12661_v46  ;;  %5101 = vmatpush1.msra.mxu0 %v12663_v22  ;;  %v12685_v22 = vld [vmem:[#allocation31_spill] sm:$0xff] }
 0x32d   :  { %5314 = vmatpush1.msra.mxu1 %v12664_v47  ;;  %5105 = vmatprep.subr.mxu0 %v12666_v2  ;;  %v12686_v47 = vand.u32 4294901760, %v12685_v22  ;;  %v12689_v2 = vld [vmem:[#allocation26_spill] sm:$0xff]  ;;  %v12714_v22 = vld [vmem:[#allocation15_spill] sm:$0xff] }
 0x32e   :  { %5316 = vmatprep.subr.mxu1 %v12569_v14  ;;  %5109 = vmatpush1.msra.mxu0 %v12668_v48  ;;  %v12677_v14 = vld [vmem:[#allocation96_spill] sm:$0xff]  ;;  %v12691_v48 = vand.u32 4294901760, %v12690_v38  ;;  %v12720_v38 = vld [vmem:[#allocation62_spill] sm:$0xff] }
 0x32f   :  { %5318 = vmatpush1.msra.mxu1 %v12669_v18  ;;  %5113 = vmatprep.subr.mxu0 %v12671_v39  ;;  %v12678_v44 = vand.u32 4294901760, %v12677_v14  ;;  %v12695_v39 = vld [vmem:[#allocation45_spill] sm:$0xff]  ;;  %v12703_v14 = vld [vmem:[#allocation58_spill] sm:$0xff] }
 0x330   :  { %5320 = vmatprep.subr.mxu1 %v12573_v36  ;;  %5117 = vmatpush1.msra.mxu0 %v12673_v5  ;;  %v12682_v36 = vld [vmem:[#allocation110_spill] sm:$0xff]  ;;  %v12696_v11 = vand.u32 4294901760, %v12695_v39  ;;  %v12725_v39 = vld [vmem:[#allocation81_spill] sm:$0xff] }
 0x331   :  { %5322 = vmatpush1.msra.mxu1 %v12674_v10  ;;  %5121 = vmatprep.subr.mxu0 %v12676_v30  ;;  %v12683_v46 = vand.u32 4294901760, %v12682_v36  ;;  %v12699_v10 = vld [vmem:[#allocation98_spill] sm:$0xff] }
 0x332   :  { %5324 = vmatprep.subr.mxu1 %v12577_v57  ;;  %5125 = vmatpush1.msra.mxu0 %v12678_v44  ;;  %v12687_v57 = vld [vmem:[#allocation29_spill] sm:$0xff]  ;;  %v12700_v1 = vand.u32 4294901760, %v12699_v10  ;;  %v12704_v44 = vld [vmem:[#allocation18_spill] sm:$0xff]  ;;  %v12730_v10 = vld [vmem:[#allocation80_spill] sm:$0xff] }
 0x333   :  { %5326 = vmatpush1.msra.mxu1 %v12679_v13  ;;  %5129 = vmatprep.subr.mxu0 %v12681_v32  ;;  %v12688_v3 = vand.u32 4294901760, %v12687_v57  ;;  %v12705_v13 = vand.u32 4294901760, %v12704_v44  ;;  %v12708_v32 = vld [vmem:[#allocation85_spill] sm:$0xff]  ;;  %v12736_v44 = vld [vmem:[#allocation107_spill] sm:$0xff] }
 0x334   :  { %5328 = vmatprep.subr.mxu1 %v12580_v25  ;;  %5133 = vmatpush1.msra.mxu0 %v12683_v46  ;;  %v12692_v25 = vld [vmem:[#allocation12_spill] sm:$0xff]  ;;  %v12711_v46 = vld [vmem:[#allocation82_spill] sm:$0xff] }
 0x335   :  { %5330 = vmatpush1.msra.mxu1 %v12684_v55  ;;  %5137 = vmatprep.subr.mxu0 %v12686_v47  ;;  %v12693_v18 = vand.u32 4294901760, %v12692_v25  ;;  %v12715_v47 = vld [vmem:[#allocation43_spill] sm:$0xff] }
 0x336   :  { %5332 = vmatprep.subr.mxu1 %v12583_v6  ;;  %5141 = vmatpush1.msra.mxu0 %v12688_v3  ;;  %v12697_v6 = vld [vmem:[#allocation56_spill] sm:$0xff]  ;;  %v12716_v57 = vand.u32 4294901760, %v12715_v47  ;;  %v12722_v25 = vld [vmem:[#allocation35_spill] sm:$0xff] }
 0x337   :  { %5334 = vmatpush1.msra.mxu1 %v12689_v2  ;;  %5145 = vmatprep.subr.mxu0 %v12691_v48  ;;  %v12698_v5 = vand.u32 4294901760, %v12697_v6  ;;  %v12719_v2 = vld [vmem:[#allocation11_spill] sm:$0xff]  ;;  %v12721_v48 = vand.u32 4294901760, %v12720_v38  ;;  %v12727_v6 = vld [vmem:[#allocation86_spill] sm:$0xff]  ;;  %v12751_v47 = vld [vmem:[#allocation124_spill] sm:$0xff] }
 0x338   :  { %5336 = vmatprep.subr.mxu1 %v12586_v52  ;;  %5149 = vmatpush1.msra.mxu0 %v12693_v18  ;;  %v12701_v52 = vld [vmem:[#allocation53_spill] sm:$0xff]  ;;  %v12723_v18 = vld [vmem:[#allocation71_spill] sm:$0xff] }
 0x339   :  { %5338 = vmatpush1.msra.mxu1 %v12694_v41  ;;  %5153 = vmatprep.subr.mxu0 %v12696_v11  ;;  %v12702_v30 = vand.u32 4294901760, %v12701_v52  ;;  %v12724_v41 = vand.u32 4294901760, %v12723_v18  ;;  %v12726_v11 = vand.u32 4294901760, %v12725_v39  ;;  %v12732_v52 = vld [vmem:[#allocation32_spill] sm:$0xff]  ;;  %v12758_v38 = vld [vmem:[#allocation127_spill] sm:$0xff]  ;;  %v12764_v39 = vand.u32 4294901760, %v9943_v45 }
 0x33a   :  { %5340 = vmatprep.subr.mxu1 %v12589_v58  ;;  %5157 = vmatpush1.msra.mxu0 %v12698_v5  ;;  %v12706_v58 = vld [vmem:[#allocation76_spill] sm:$0xff] }
 0x33b   :  { %5342 = vmatpush1.msra.mxu1 %v12591_v56  ;;  %5161 = vmatprep.subr.mxu0 %v12700_v1  ;;  %v12707_v17 = vand.u32 4294901760, %v12706_v58  ;;  %v12709_v56 = vld [vmem:[#allocation22_spill] sm:$0xff]  ;;  %v12731_v1 = vand.u32 4294901760, %v12730_v10 }
 0x33c   :  { %5344 = vmatprep.subr.mxu1 %v12592_v59  ;;  %5165 = vmatpush2.msra.mxu0 %v12702_v30  ;;  %v12710_v36 = vand.u32 4294901760, %v12709_v56  ;;  %v12712_v59 = vld [vmem:[#allocation25_spill] sm:$0xff]  ;;  %v12733_v30 = vand.u32 4294901760, %v12732_v52 }
 0x33d   :  { %5346 = vmatpush1.msra.mxu1 %v12703_v14  ;;  %5169 = vmatprep.subr.mxu0 %v12705_v13  ;;  %v12713_v55 = vand.u32 4294901760, %v12712_v59  ;;  %v12737_v13 = vand.u32 4294901760, %v12736_v44  ;;  %v3397_v59 = vpop.f32.mrf.mxu1 }
 0x33e   :  { %5348 = vmatprep.subr.mxu1 %v12595_v43  ;;  %5173 = vmatpush2.msra.mxu0 %v12707_v17  ;;  %v12717_v43 = vld [vmem:[#allocation36_spill] sm:$0xff] }
 0x33f   :  { %5350 = vmatpush1.msra.mxu1 %v12708_v32  ;;  %5177 = vmatprep.subr.mxu0 %v12710_v36  ;;  %v12718_v3 = vand.u32 4294901760, %v12717_v43  ;;  %v12740_v17 = vld [vmem:[#allocation116_spill] sm:$0xff]  ;;  %v12755_v43 = vand.u32 4294901760, %v9875_v16 }
 0x340   :  { %5352 = vmatprep.subr.mxu1 %v12711_v46  ;;  %5181 = vmatpush2.msra.mxu0 %v12713_v55  ;;  %v12741_v32 = vand.u32 4294901760, %v12740_v17  ;;  %v12748_v55 = vand.u32 4294901760, %v9855_v40  ;;  %v3399_v40 = vpop.f32.mrf.mxu1  ;;  %v12761_v16 = vld [vmem:[#allocation120_spill] sm:$0xff] }
 0x341   :  { %5354 = vmatpush1.msra.mxu1 %v12714_v22  ;;  %5185 = vmatprep.subr.mxu0 %v12716_v57  ;;  %v12753_v57 = vld [vmem:[#allocation125_spill] sm:$0xff] }
 0x342   :  { %5356 = vmatprep.subr.mxu1 %v12600_v8  ;;  %5189 = vmatpush2.msra.mxu0 %v12718_v3  ;;  %v12728_v8 = vld [vmem:[#allocation87_spill] sm:$0xff] }
 0x343   :  { %5358 = vmatpush1.msra.mxu1 %v12719_v2  ;;  %5193 = vmatprep.subr.mxu0 %v12721_v48  ;;  %v12729_v5 = vand.u32 4294901760, %v12728_v8  ;;  %v3741_v2 = vpop.f32.mrf.mxu1 }
 0x344   :  { %5360 = vmatprep.subr.mxu1 %v12722_v25  ;;  %5197 = vmatpush2.msra.mxu0 %v12724_v41  ;;  %v12763_v25 = vld [vmem:[#allocation123_spill] sm:$0xff] }
 0x345   :  { %5362 = vmatpush2.msra.mxu1 %v12605_v51  ;;  %5201 = vmatprep.subr.mxu0 %v12726_v11  ;;  %v12734_v51 = vld [vmem:[#allocation112_spill] sm:$0xff]  ;;  %v12765_v11 = vld [vmem:[#allocation61_spill] sm:$0xff] }
 0x346   :  { %5364 = vmatprep.subr.mxu1 %v12727_v6  ;;  %5205 = vmatpush2.msra.mxu0 %v12729_v5  ;;  %v12735_v14 = vand.u32 4294901760, %v12734_v51  ;;  %v12766_v6 = vand.u32 4294901760, %v12765_v11 }
 0x347   :  { %5366 = vmatpush2.msra.mxu1 %v12609_v15  ;;  %5209 = vmatprep.subr.mxu0 %v12731_v1  ;;  %v12738_v15 = vld [vmem:[#allocation114_spill] sm:$0xff] }
 0x348   :  { %5368 = vmatprep.subr.mxu1 %v12610_v19  ;;  %5213 = vmatpush2.msra.mxu0 %v12733_v30  ;;  %v12739_v58 = vand.u32 4294901760, %v12738_v15  ;;  %v3004_v19 = vpop.f32.mrf.mxu0 }
 0x349   :  { %5370 = vmatpush2.msra.mxu1 %v12612_v4  ;;  %5217 = vmatprep.subr.mxu0 %v12735_v14  ;;  %v12742_v4 = vld [vmem:[#allocation122_spill] sm:$0xff]  ;;  %v3398_v48 = vadd.f32 %v3397_v59, %v3004_v19 }
 0x34a   :  { %5372 = vmatprep.subr.mxu1 %v12614_v0  ;;  %5221 = vmatpush2.msra.mxu0 %v12737_v13  ;;  %v12743_v56 = vand.u32 4294901760, %v12742_v4  ;;  %v12744_v0 = vld [vmem:[#allocation113_spill] sm:$0xff] }
 0x34b   :  { %5374 = vmatpush2.msra.mxu1 %v12615_v21  ;;  %5225 = vmatprep.subr.mxu0 %v12739_v58  ;;  %v12745_v36 = vand.u32 4294901760, %v12744_v0  ;;  %v12746_v21 = vld [vmem:[#allocation115_spill] sm:$0xff] }
 0x34c   :  { %5376 = vmatprep.subr.mxu1 %v12617_v35  ;;  %5229 = vmatpush2.msra.mxu0 %v12741_v32  ;;  %v12747_v46 = vand.u32 4294901760, %v12746_v21  ;;  %v3006_v35 = vpop.f32.mrf.mxu0 }
 0x34d   :  { %5378 = vmatpush2.msra.mxu1 %v12618_v31  ;;  %5233 = vmatprep.subr.mxu0 %v12743_v56  ;;  %v12749_v31 = vld [vmem:[#allocation42_spill] sm:$0xff] }
 0x34e   :  { %5380 = vmatprep.subr.mxu1 %v12619_v53  ;;  %5237 = vmatpush2.msra.mxu0 %v12745_v36  ;;  %v12750_v22 = vand.u32 4294901760, %v12749_v31  ;;  %v3600_v53 = vpop.f32.mrf.mxu0 }
 0x34f   :  { %5382 = vmatpush2.msra.mxu1 %v12620_v20  ;;  %5241 = vmatprep.subr.mxu0 %v12747_v46  ;;  %v12752_v20 = vand.u32 4294901760, %v12751_v47  ;;  %v3601_v41 = vadd.f32 %v3600_v53, %v3398_v48 }
 0x350   :  { %5384 = vmatprep.subr.mxu1 %v12621_v54  ;;  %5245 = vmatpush2.msra.mxu0 %v12748_v55  ;;  %v12754_v54 = vand.u32 4294901760, %v12753_v57 }
 0x351   :  { %5386 = vmatpush2.msra.mxu1 %v12622_v28  ;;  %5249 = vmatprep.subr.mxu0 %v12750_v22  ;;  %v12756_v28 = vld [vmem:[#allocation121_spill] sm:$0xff]  ;;  %v3742_v5 = vadd.f32 %v3741_v2, %v3601_v41 }
 0x352   :  { %5388 = vmatprep.subr.mxu1 %v12623_v50  ;;  %5253 = vmatpush2.msra.mxu0 %v12752_v20  ;;  %v12757_v3 = vand.u32 4294901760, %v12756_v28  ;;  %v3602_v50 = vpop.f32.mrf.mxu0 }
 0x353   :  { %5390 = vmatpush2.msra.mxu1 %v12624_v27  ;;  %5257 = vmatprep.subr.mxu0 %v12754_v54  ;;  %v12759_v27 = vand.u32 4294901760, %v12758_v38 }
 0x354   :  { %5392 = vmatprep.subr.mxu1 %v12625_v42  ;;  %5261 = vmatpush2.msra.mxu0 %v12755_v43  ;;  %v12760_v42 = vand.u32 4294901760, %v9927_v63  ;;  %v4006_v18 = vpop.f32.mrf.mxu0  ;;  %v12767_v63 = vld [vmem:[#allocation97_spill] sm:$0xff] }
 0x355   :  { %5394 = vmatpush2.msra.mxu1 %v12626_v29  ;;  %5265 = vmatprep.subr.mxu0 %v12757_v3  ;;  %v12762_v29 = vand.u32 4294901760, %v9931_v33  ;;  %v12768_v33 = vld [vmem:[#allocation99_spill] sm:$0xff]  ;;  %v4007_v1 = vadd.f32 %v4006_v18, %v3742_v5 }
 0x356   :  { %5396 = vmatprep.subr.mxu1 %v9777_v24  ;;  %5269 = vmatpush2.msra.mxu0 %v12759_v27  ;;  %v3400_v24 = vadd.f32 %v3399_v40, %v3006_v35  ;;  %v4008_v10 = vpop.f32.mrf.mxu0 }
 0x357   :  { %5398 = vmatpush2.msra.mxu1 %v12627_v60  ;;  %5273 = vmatprep.subr.mxu0 %v12760_v42  ;;  %v3743_v60 = vpop.f32.mrf.mxu1 }
 0x358   :  { %5400 = vmatprep.subr.mxu1 %v12761_v16  ;;  %5277 = vmatpush2.msra.mxu0 %v12762_v29  ;;  %v3603_v8 = vadd.f32 %v3602_v50, %v3400_v24 }
 0x359   :  { %5402 = vmatpush2.msra.mxu1 %v12763_v25  ;;  %5281 = vmatprep.subr.mxu0 %v12764_v39 }
 0x35a   :  { %5404 = vmatprep.subr.mxu1 %v9823_v37  ;;  %5285 = vmatpush2.msra.mxu0 %v12766_v6  ;;  %v3744_v45 = vadd.f32 %v3743_v60, %v3603_v8  ;;  %v4143_v37 = vpop.f32.mrf.mxu1 }
 0x35b   :  { %5287 = vmatprep.mubr.f32.mxu0 %v12767_v63  ;;  %5406 = vmatpush2.msra.mxu1 %v9814_v61  ;;  %v4144_v30 = vadd.f32 %v4143_v37, %v4007_v1 }
 0x35c   :  { %5289 = vmatmul.mubr.f32.vlgmr.msra.gmra.mxu0 %v12768_v33  ;;  %5408 = vmatprep.subr.mxu1 %v9848_v34  ;;  %v4009_v52 = vadd.f32 %v4008_v10, %v3744_v45  ;;  %v4145_v61 = vpop.f32.mrf.mxu1 }
 0x35d   :  { %5424 = vmatprep.mubr.f32.mxu1 %v12767_v63  ;;  %5410 = vmatpush2.msra.mxu1 %v9839_v26  ;;  %5436 = vst [vmem:[#allocation7 + $0x20] sm:$0xff] %v4144_v30 }
 0x35e   :  { %5412 = vmatprep.subr.mxu1 %v9877_v12  ;;  %v4146_v34 = vadd.f32 %v4145_v61, %v4009_v52 }
 0x35f   :  { %5414 = vmatpush2.msra.mxu1 %v9882_v49 }
 0x360   :  { %5416 = vmatprep.subr.mxu1 %v9892_v62  ;;  %5437 = vst [vmem:[#allocation7 + $0x28] sm:$0xff] %v4146_v34 }
 0x361   :  { %5418 = vmatpush2.msra.mxu1 %v9899_v7 }
 0x362   :  { %5420 = vmatprep.subr.mxu1 %v12638_v23 }
 0x363   :  { %5422 = vmatpush2.msra.mxu1 %v12640_v9 }
 0x364   :  { %5426 = vmatmul.mubr.f32.vlgmr.msra.gmra.mxu1 %v12768_v33 }
 0x399   :  { %v4288_v26 = vpop.f32.mrf.mxu0 }
 0x39b   :  { %v4290_v12 = vpop.f32.mrf.mxu0 }
 0x3a1   :  { %v4681_v51 = vpop.f32.mrf.mxu1 }
 0x3a2   :  { %v4682_v62 = vadd.f32 %v4681_v51, %v4288_v26 }
 0x3a3   :  { %v4683_v49 = vpop.f32.mrf.mxu1 }
 0x3a4   :  { %v4684_v58 = vadd.f32 %v4683_v49, %v4290_v12 }
 0x3da   :  { %v4884_v14 = vpop.f32.mrf.mxu0 }
 0x3db   :  { %v4885_v7 = vadd.f32 %v4884_v14, %v4682_v62 }
 0x3dc   :  { %v4886_v44 = vpop.f32.mrf.mxu0 }
 0x3dd   :  { %v4887_v17 = vadd.f32 %v4886_v44, %v4684_v58 }
 0x3e3   :  { %v5025_v13 = vpop.f32.mrf.mxu1 }
 0x3e4   :  { %v5026_v32 = vadd.f32 %v5025_v13, %v4885_v7 }
 0x3e5   :  { %v5027_v19 = vpop.f32.mrf.mxu1 }
 0x3e6   :  { %v5028_v4 = vadd.f32 %v5027_v19, %v4887_v17 }
 0x41c   :  { %v5290_v15 = vpop.f32.mrf.mxu0 }
 0x41d   :  { %v5291_v9 = vadd.f32 %v5290_v15, %v5026_v32 }
 0x41e   :  { %v5292_v23 = vpop.f32.mrf.mxu0 }
 0x41f   :  { %v5293_v0 = vadd.f32 %v5292_v23, %v5028_v4 }
 0x424   :  { %v5427_v56 = vpop.f32.mrf.mxu1 }
 0x425   :  { %v5428_v36 = vadd.f32 %v5427_v56, %v5291_v9 }
 0x426   :  { %v5429_v21 = vpop.f32.mrf.mxu1 }
 0x427   :  { %5438 = vst [vmem:[#allocation7 + $0x30] sm:$0xff] %v5428_v36  ;;  %v5430_v46 = vadd.f32 %v5429_v21, %v5293_v0 }
 0x429   :  { %5439 = vst [vmem:[#allocation7 + $0x38] sm:$0xff] %v5430_v46 }
 0x42a   :  { %5512 = shalt.err (!%p5509_p0)
}
 0x42b   :  { %5449 = dma.vmem_to_hbm [thread:$0]  %s5447_s1, 1024, %s10322_s2, [#allocation4]  }
 0x42c   :  { %5525 = dma.done.wait [#allocation4], 1024  }
 0x42d   :  { %5526 = vsyncadd [#allocation4], 4294966272 }
 0x42e   :  { %5453 = vsyncpa [#allocation3], 1 }
 0x42f   :  { %5454 = vsyncpa [#allocation6], 1 }
 0x430   :  { %5455 = vsyncpa [#allocation4], 1 }

</bundles_post_ra>
